<compile_context>
chip_gen: v7x
topology: tpu7x:2x2x1
jax: 0.10.0
libtpu: 0.0.40
codegen_flags: <defaults>
</compile_context>

<pallas_src>
import functools

import jax
import jax.numpy as jnp
from jax import lax
from jax.experimental import pallas as pl
from jax.experimental.pallas import tpu as pltpu


_VMEM = pl.BlockSpec(memory_space=pltpu.MemorySpace.VMEM)


def _leaky(v):
    # LeakyReLU(0.33): single vmax instead of compare+select.
    return jnp.maximum(v, 0.33 * v)


def _sce(x, y, alpha):
    # GraphMAE scaled cosine error: mean_i (1 - cos(x_i, y_i))**alpha  (F.normalize eps=1e-12)
    xn = x / jnp.maximum(jnp.sqrt(jnp.sum(x * x, axis=-1, keepdims=True)), 1e-12)
    yn = y / jnp.maximum(jnp.sqrt(jnp.sum(y * y, axis=-1, keepdims=True)), 1e-12)
    d = 1.0 - jnp.sum(xn * yn, axis=-1, keepdims=True)              # (N, 1)
    loss = d * d if alpha == 2.0 else d ** alpha
    return jnp.mean(loss, axis=0, keepdims=True)                    # (1, 1)


def _row_argmax(s, sentinel):
    # First index of the row maximum (softmax before argmax in the reference is monotone).
    m = jnp.max(s, axis=-1, keepdims=True)
    col = lax.broadcasted_iota(jnp.int32, s.shape, 1).astype(jnp.float32)
    cand = jnp.where(s == m, col, float(sentinel))
    return jnp.min(cand, axis=-1, keepdims=True).astype(jnp.int32)  # (rows, 1) int32


# ----------------------- kernel 1: dense chain + node alignment + partial losses -----------------------

def _premodel_main_kernel(x_t_ref, x_s_ref, adj_t_ref, adj_s_ref,
                          enc_w_ref, e2d_w_ref,
                          dec_t_w_ref, dec_t_b_ref, dec_s_w_ref, dec_s_b_ref,
                          cls_w_ref, cls_b_ref,
                          w11_ref, w21_ref, b1_ref,
                          w12_ref, w22_ref, b2_ref, we_ref, be_ref,
                          y_ref, mask_ref,
                          ploss_ref, rep_s_ref, featT_ref, idx_attr_ref,
                          *, n, cm, classes, alpha):
    f32 = jnp.float32

    # ---- dense chain, target+source fused along M so every shared weight is pushed once ----
    x = jnp.concatenate([x_t_ref[...], x_s_ref[...]], axis=0)                       # (2n, in)
    enc = jnp.dot(x, enc_w_ref[...], preferred_element_type=f32)                    # (2n, h)
    rep = jnp.dot(enc, e2d_w_ref[...], preferred_element_type=f32)                  # (2n, h)
    rep_t, rep_s = rep[:n], rep[n:]
    rep_s_ref[...] = rep_s
    recon_t = jnp.dot(rep_t, dec_t_w_ref[...], preferred_element_type=f32) + dec_t_b_ref[...]
    recon_s = jnp.dot(rep_s, dec_s_w_ref[...], preferred_element_type=f32) + dec_s_b_ref[...]
    logits = jnp.dot(rep, cls_w_ref[...], preferred_element_type=f32) + cls_b_ref[...]
    logits_t, logits_s = logits[:n], logits[n:]

    # ---- attribute-branch similarity: argmax only, no (n,n) HBM writeback ----
    s_attr = lax.dot_general(rep_t, rep_s, (((1,), (1,)), ((), ())),
                             preferred_element_type=f32)                            # (n, n)
    idx_attr_ref[...] = _row_argmax(s_attr, n)

    # ---- Node_Alignment_Choose: E2E(1,8) -> LReLU -> E2E(8,8) -> LReLU -> e2n(256) -> LReLU ----
    # Both graphs in one body; weights loaded once and reused.
    w11, w21, b1 = w11_ref[...], w21_ref[...], b1_ref[...]
    w12, w22, b2 = w12_ref[...], w22_ref[...], b2_ref[...]
    we, be = we_ref[...], be_ref[...]

    def node_branch(adj):                                            # adj: (n, n) f32
        # E2E(1 -> cm): conv(d,1) row term + conv(1,d) column term
        r1 = jnp.dot(w11, adj, preferred_element_type=f32)                           # (cm,n) [o,j]
        c1 = lax.dot_general(w21, adj, (((1,), (1,)), ((), ())),
                             preferred_element_type=f32)                             # (cm,n) [o,i]
        x1 = _leaky(r1[:, None, :] + c1[:, :, None] + b1[:, :, None])                # (cm,n,n) [c,i,j]
        # E2E(cm -> cm): single batched contractions over the channel axis (no unrolled loops)
        r2 = jnp.einsum('coi,cij->coj', w12, x1,
                        preferred_element_type=f32).sum(axis=0)                      # (cm,n) [o,j]
        c2 = jnp.einsum('coj,cij->coi', w22, x1,
                        preferred_element_type=f32).sum(axis=0)                      # (cm,n) [o,i]
        x2 = _leaky(r2[:, None, :] + c2[:, :, None] + b2[:, :, None])                # (cm,n,n)
        # e2n Conv2d(cm, 256, (1, n)) -> produced transposed (n, 256): lane-dense output
        outT = jnp.einsum('cij,ckj->cik', x2, we,
                          preferred_element_type=f32).sum(axis=0)                    # (n, 256) [i,k]
        return _leaky(outT + be)

    featT_ref[0] = node_branch(adj_t_ref[...])
    featT_ref[1] = node_branch(adj_s_ref[...])

    # ---- idx_e-independent loss terms ----
    loss_attr_t = _sce(recon_t, x_t_ref[...], alpha)                                 # (1,1)
    loss_attr_s = _sce(recon_s, x_s_ref[...], alpha)

    # masked cross-entropy over source logits (mean over train_mask nodes)
    yoh = (lax.broadcasted_iota(jnp.int32, (n, classes), 1) == y_ref[...]).astype(f32)
    z = logits_s - jnp.max(logits_s, axis=-1, keepdims=True)
    logp = z - jnp.log(jnp.sum(jnp.exp(z), axis=-1, keepdims=True))
    nll = -jnp.sum(yoh * logp, axis=-1, keepdims=True)                               # (n, 1)
    msk = mask_ref[...]
    loss_src = (jnp.sum(nll * msk, axis=0, keepdims=True)
                / jnp.maximum(jnp.sum(msk, axis=0, keepdims=True), 1.0))             # (1, 1)

    # "entropy" on raw, clamped target logits (faithful to the original clamp quirk)
    p = jnp.clip(logits_t, 1e-9, 1.0)
    loss_ent = jnp.mean(jnp.sum(-p * jnp.log(p), axis=-1, keepdims=True),
                        axis=0, keepdims=True)

    ploss_ref[...] = loss_attr_t + loss_attr_s + loss_src + loss_ent


def premodel_main(pp, x_t, x_s, adj_t, adj_s, y2d, mask2d, *, cm=8, alpha=2.0):
    n, in_dim = x_t.shape
    h = pp["e2d_w"].shape[0]
    classes = pp["cls_w"].shape[1]
    flops = (2 * 2 * n * (in_dim * h + h * h + h * in_dim + h * classes)   # dense chain
             + 2 * n * n * h                                               # attr similarity
             + 2 * (4 * cm * n * n + 4 * cm * cm * n * n + 2 * cm * 256 * n * n
                    + 8 * cm * n * n))                                     # E2E/E2E/e2n, 2 graphs
    bytes_accessed = 4 * (2 * n * in_dim + 2 * n * n
                          + in_dim * h + h * h + 2 * h * in_dim + h * classes
                          + 2 * cm * n + 2 * cm * cm * n + cm * 256 * n + 256
                          + 2 * n
                          + 1 + n * h + 2 * n * 256 + n)
    return pl.pallas_call(
        functools.partial(_premodel_main_kernel, n=n, cm=cm, classes=classes, alpha=alpha),
        out_shape=(jax.ShapeDtypeStruct((1, 1), jnp.float32),        # partial loss
                   jax.ShapeDtypeStruct((n, h), jnp.float32),        # rep_s (for idx_e gather)
                   jax.ShapeDtypeStruct((2, n, 256), jnp.float32),   # e2n features, transposed
                   jax.ShapeDtypeStruct((n, 1), jnp.int32)),         # idx_attr
        in_specs=[_VMEM] * 22,
        out_specs=(_VMEM,) * 4,
        cost_estimate=pl.CostEstimate(flops=int(flops),
                                      transcendentals=int(2 * n * classes + 8 * n),
                                      bytes_accessed=int(bytes_accessed)),
    )(x_t, x_s, adj_t, adj_s,
      pp["enc_w"], pp["e2d_w"],
      pp["dec_t_w"], pp["dec_t_b"], pp["dec_s_w"], pp["dec_s_b"],
      pp["cls_w"], pp["cls_b"],
      pp["w11"], pp["w21"], pp["b1"],
      pp["w12"], pp["w22"], pp["b2"], pp["we"], pp["be"],
      y2d, mask2d)


# ----------------------- kernel 2: structure similarity + remaining losses -----------------------

def _align_loss_kernel(feat_ref, rep_s_ref, idx_attr_ref, adj_ref, ploss_ref,
                       out_ref, *, n, alpha):
    f32 = jnp.float32
    # calculate_two_similary on the structure branch: x_t @ x_s.T, row argmax (in VMEM only).
    s_e = lax.dot_general(feat_ref[0], feat_ref[1], (((1,), (1,)), ((), ())),
                          preferred_element_type=f32)                               # (n, n)
    idx_e = _row_argmax(s_e, n)                                                     # (n, 1) int32

    # loss_node = MSE(one_hot_e, one_hot_attr) + MSE(one_hot_attr, one_hot_e)
    #           = 4 * (#rows where the indices differ) / n^2   (closed form)
    mismatch = jnp.sum((idx_e != idx_attr_ref[...]).astype(f32), axis=0, keepdims=True)
    loss_node = mismatch * (4.0 / float(n * n))

    # feature = rep_s[idx_e] as an exact one-hot matmul (no gather / HBM roundtrip)
    one_hot_e = (lax.broadcasted_iota(jnp.int32, (n, n), 1) == idx_e).astype(f32)
    feature = jnp.dot(one_hot_e, rep_s_ref[...], preferred_element_type=f32)        # (n, h)

    # create_node_to_edge: softmax(feature @ feature.T, dim=-1)  (exact reciprocal: loss-critical)
    s = lax.dot_general(feature, feature, (((1,), (1,)), ((), ())),
                        preferred_element_type=f32)
    e = jnp.exp(s - jnp.max(s, axis=-1, keepdims=True))
    rec_adj = e / jnp.sum(e, axis=-1, keepdims=True)

    adj = adj_ref[...]
    loss_edge = _sce(rec_adj * adj, adj, alpha)

    out_ref[...] = ploss_ref[...] + loss_edge + loss_node


def align_and_loss(feat_scr, rep_s, idx_attr, adj_t, ploss, *, alpha=2.0):
    n = adj_t.shape[0]
    h = rep_s.shape[1]
    flops = 2 * n * n * 256 + 4 * n * n * h + 14 * n * n
    bytes_accessed = 4 * (feat_scr.size + rep_s.size + idx_attr.size + adj_t.size + 2)
    out = pl.pallas_call(
        functools.partial(_align_loss_kernel, n=n, alpha=alpha),
        out_shape=jax.ShapeDtypeStruct((1, 1), jnp.float32),
        in_specs=[_VMEM] * 5,
        out_specs=_VMEM,
        cost_estimate=pl.CostEstimate(flops=int(flops), transcendentals=int(n * n + 4 * n),
                                      bytes_accessed=int(bytes_accessed)),
    )(feat_scr, rep_s, idx_attr, adj_t, ploss)
    return out[0, 0]


# ----------------------------- parameters -----------------------------

def init_params(key, in_dim, num_hidden, classes, nodes):
    ks = jax.random.split(key, 12)

    def w(k, shape, scale=0.1):
        return scale * jax.random.normal(k, shape, jnp.float32)

    return {
        # encoder placeholder (see TODO at top)
        "enc_w": w(ks[0], (in_dim, num_hidden)),
        # decoder placeholders
        "dec_s_w": w(ks[1], (num_hidden, in_dim)),
        "dec_s_b": jnp.zeros((1, in_dim), jnp.float32),
        "dec_t_w": w(ks[2], (num_hidden, in_dim)),
        "dec_t_b": jnp.zeros((1, in_dim), jnp.float32),
        # encoder_to_decoder: nn.Linear(num_hidden, num_hidden, bias=False)
        "e2d_w": w(ks[3], (num_hidden, num_hidden)),
        # cls_model: nn.Linear(num_hidden, classes)
        "cls_w": w(ks[4], (num_hidden, classes)),
        "cls_b": jnp.zeros((1, classes), jnp.float32),
        # E2EN = Node_Alignment_Choose(nodes)
        "e2e1_w_d1": w(ks[5], (8, nodes)),            # Conv2d(1,8,(d,1)) weight [o, i]
        "e2e1_b_d1": jnp.zeros((8,), jnp.float32),
        "e2e1_w_1d": w(ks[6], (8, nodes)),            # Conv2d(1,8,(1,d)) weight [o, j]
        "e2e1_b_1d": jnp.zeros((8,), jnp.float32),
        "e2e2_w_d1": w(ks[7], (8, 8, nodes)),         # Conv2d(8,8,(d,1)) weight [o, c, i]
        "e2e2_b_d1": jnp.zeros((8,), jnp.float32),
        "e2e2_w_1d": w(ks[8], (8, 8, nodes)),         # Conv2d(8,8,(1,d)) weight [o, c, j]
        "e2e2_b_1d": jnp.zeros((8,), jnp.float32),
        "e2n_w": w(ks[9], (256, 8, nodes)),           # Conv2d(8,256,(1,d)) weight [k, c, j]
        "e2n_b": jnp.zeros((256,), jnp.float32),
    }


def pack_params(p):
    """Host-side repacking: conv weights are transposed to channel-major (c, o/k, spatial)
    so the in-kernel contractions are single leading-batch einsums; biases of the two E2E
    convolutions are summed (they always appear added)."""
    return {
        "enc_w": p["enc_w"], "e2d_w": p["e2d_w"],
        "dec_t_w": p["dec_t_w"], "dec_t_b": p["dec_t_b"],
        "dec_s_w": p["dec_s_w"], "dec_s_b": p["dec_s_b"],
        "cls_w": p["cls_w"], "cls_b": p["cls_b"],
        "w11": p["e2e1_w_d1"],                                    # (8, n)  [o, i]
        "w21": p["e2e1_w_1d"],                                    # (8, n)  [o, j]
        "b1": (p["e2e1_b_d1"] + p["e2e1_b_1d"]).reshape(8, 1),
        "w12": jnp.transpose(p["e2e2_w_d1"], (1, 0, 2)),          # (c, o, i)
        "w22": jnp.transpose(p["e2e2_w_1d"], (1, 0, 2)),          # (c, o, j)
        "b2": (p["e2e2_b_d1"] + p["e2e2_b_1d"]).reshape(8, 1),
        "we": jnp.transpose(p["e2n_w"], (1, 0, 2)),               # (c, k, j) = (8, 256, n)
        "be": p["e2n_b"].reshape(1, 256),
    }


# ----------------------------- PreModel forward -----------------------------

def premodel_forward(params, adj_t, x_t, adj_s, x_s, y_s, train_mask):
    n = adj_t.shape[0]
    pp = pack_params(params)
    y2d = y_s.reshape(n, 1).astype(jnp.int32)
    mask2d = train_mask.reshape(n, 1).astype(jnp.float32)

    # kernel 1: dense chain + attr argmax + node alignment features + idx_e-independent losses
    ploss, rep_s, featT, idx_attr = premodel_main(pp, x_t, x_s, adj_t, adj_s, y2d, mask2d,
                                                  alpha=2.0)

    # PyTorch quirk: E2EN output (1, 256, nodes, 1).reshape(nodes, -1) flattens channel-major.
    # featT is (graph, node, channel); recover the channel-major flat view with a tiny
    # transpose + reshape (pure layout plumbing, ~100 KB).
    feat_scr = jnp.transpose(featT, (0, 2, 1)).reshape(2, n, 256)

    # kernel 2: structure argmax, loss_node, rep_s[idx_e] gather, edge sce, final scalar
    return align_and_loss(feat_scr, rep_s, idx_attr, adj_t, ploss, alpha=2.0)


# ----------------------------- main -----------------------------

if __name__ == "__main__":
    in_dim, num_hidden, classes, nodes = 16, 32, 5, 50

    key = jax.random.PRNGKey(0)
    k1, k2, k3, k4, k5, kp = jax.random.split(key, 6)

    x_t = jax.random.normal(k1, (nodes, in_dim), jnp.float32)
    x_s = jax.random.normal(k2, (nodes, in_dim), jnp.float32)
    adj_t = (jax.random.uniform(k3, (nodes, nodes)) < 0.15).astype(jnp.float32)
    adj_t = jnp.maximum(adj_t, adj_t.T)
    adj_s = (jax.random.uniform(k4, (nodes, nodes)) < 0.15).astype(jnp.float32)
    adj_s = jnp.maximum(adj_s, adj_s.T)
    y_s = jax.random.randint(k5, (nodes,), 0, classes)
    train_mask = jnp.arange(nodes) < (nodes // 2)

    params = init_params(kp, in_dim, num_hidden, classes, nodes)

    fwd = jax.jit(premodel_forward)
    loss = fwd(params, adj_t, x_t, adj_s, x_s, y_s, train_mask)
    jax.block_until_ready(loss)
    assert jnp.isfinite(loss)
    print("KERNEL_OK")
</pallas_src>

<mosaic_0001>
module attributes {stable_mosaic.version = 11 : i64} {
  func.func @_premodel_main_kernel(%arg0: memref<50x16xf32, #tpu.memory_space<vmem>>, %arg1: memref<50x16xf32, #tpu.memory_space<vmem>>, %arg2: memref<50x50xf32, #tpu.memory_space<vmem>>, %arg3: memref<50x50xf32, #tpu.memory_space<vmem>>, %arg4: memref<16x32xf32, #tpu.memory_space<vmem>>, %arg5: memref<32x32xf32, #tpu.memory_space<vmem>>, %arg6: memref<32x16xf32, #tpu.memory_space<vmem>>, %arg7: memref<1x16xf32, #tpu.memory_space<vmem>>, %arg8: memref<32x16xf32, #tpu.memory_space<vmem>>, %arg9: memref<1x16xf32, #tpu.memory_space<vmem>>, %arg10: memref<32x5xf32, #tpu.memory_space<vmem>>, %arg11: memref<1x5xf32, #tpu.memory_space<vmem>>, %arg12: memref<8x50xf32, #tpu.memory_space<vmem>>, %arg13: memref<8x50xf32, #tpu.memory_space<vmem>>, %arg14: memref<8x1xf32, #tpu.memory_space<vmem>>, %arg15: memref<8x8x50xf32, #tpu.memory_space<vmem>>, %arg16: memref<8x8x50xf32, #tpu.memory_space<vmem>>, %arg17: memref<8x1xf32, #tpu.memory_space<vmem>>, %arg18: memref<8x256x50xf32, #tpu.memory_space<vmem>>, %arg19: memref<1x256xf32, #tpu.memory_space<vmem>>, %arg20: memref<50x1xi32, #tpu.memory_space<vmem>>, %arg21: memref<50x1xf32, #tpu.memory_space<vmem>>, %arg22: memref<1x1xf32, #tpu.memory_space<vmem>>, %arg23: memref<50x32xf32, #tpu.memory_space<vmem>>, %arg24: memref<2x50x256xf32, #tpu.memory_space<vmem>>, %arg25: memref<50x1xi32, #tpu.memory_space<vmem>>) attributes {dimension_semantics = [], scalar_prefetch = 0 : i64, scratch_operands = 0 : i64, tpu.core_type = #tpu.core_type<tc>} {
    %c0 = arith.constant 0 : index
    %c0_0 = arith.constant 0 : index
    %0 = vector.load %arg0[%c0, %c0_0] : memref<50x16xf32, #tpu.memory_space<vmem>>, vector<50x16xf32>
    %c0_1 = arith.constant 0 : index
    %c0_2 = arith.constant 0 : index
    %1 = vector.load %arg1[%c0_1, %c0_2] : memref<50x16xf32, #tpu.memory_space<vmem>>, vector<50x16xf32>
    %2 = tpu.concatenate %0, %1 in 0 : vector<50x16xf32>, vector<50x16xf32> -> vector<100x16xf32>
    %c0_3 = arith.constant 0 : index
    %c0_4 = arith.constant 0 : index
    %3 = vector.load %arg4[%c0_3, %c0_4] : memref<16x32xf32, #tpu.memory_space<vmem>>, vector<16x32xf32>
    %cst = arith.constant dense<0.000000e+00> : vector<100x32xf32>
    %4 = tpu.matmul %2, %3, %cst {dimension_numbers = #tpu.dot_dimension_numbers<[1], [0], [0], [1], [0, 0, 1, 1], [], []>} : vector<100x16xf32>, vector<16x32xf32>, vector<100x32xf32> -> vector<100x32xf32>
    %c0_5 = arith.constant 0 : index
    %c0_6 = arith.constant 0 : index
    %5 = vector.load %arg5[%c0_5, %c0_6] : memref<32x32xf32, #tpu.memory_space<vmem>>, vector<32x32xf32>
    %cst_7 = arith.constant dense<0.000000e+00> : vector<100x32xf32>
    %6 = tpu.matmul %4, %5, %cst_7 {dimension_numbers = #tpu.dot_dimension_numbers<[1], [0], [0], [1], [0, 0, 1, 1], [], []>} : vector<100x32xf32>, vector<32x32xf32>, vector<100x32xf32> -> vector<100x32xf32>
    %7 = vector.extract_strided_slice %6 {offsets = [0, 0], sizes = [50, 32], strides = [1, 1]} : vector<100x32xf32> to vector<50x32xf32>
    %8 = vector.extract_strided_slice %6 {offsets = [50, 0], sizes = [50, 32], strides = [1, 1]} : vector<100x32xf32> to vector<50x32xf32>
    %c0_8 = arith.constant 0 : index
    %c0_9 = arith.constant 0 : index
    %9 = vector.load %arg23[%c0_8, %c0_9] : memref<50x32xf32, #tpu.memory_space<vmem>>, vector<50x32xf32>
    tpu.vector_store %arg23[%c0_8, %c0_9], %8 {strides = array<i32>} : memref<50x32xf32, #tpu.memory_space<vmem>>, vector<50x32xf32>,
    %c0_10 = arith.constant 0 : index
    %c0_11 = arith.constant 0 : index
    %10 = vector.load %arg6[%c0_10, %c0_11] : memref<32x16xf32, #tpu.memory_space<vmem>>, vector<32x16xf32>
    %cst_12 = arith.constant dense<0.000000e+00> : vector<50x16xf32>
    %11 = tpu.matmul %7, %10, %cst_12 {dimension_numbers = #tpu.dot_dimension_numbers<[1], [0], [0], [1], [0, 0, 1, 1], [], []>} : vector<50x32xf32>, vector<32x16xf32>, vector<50x16xf32> -> vector<50x16xf32>
    %c0_13 = arith.constant 0 : index
    %c0_14 = arith.constant 0 : index
    %12 = vector.load %arg7[%c0_13, %c0_14] : memref<1x16xf32, #tpu.memory_space<vmem>>, vector<1x16xf32>
    %13 = vector.broadcast %12 : vector<1x16xf32> to vector<50x16xf32>
    %14 = arith.addf %11, %13 : vector<50x16xf32>
    %c0_15 = arith.constant 0 : index
    %c0_16 = arith.constant 0 : index
    %15 = vector.load %arg8[%c0_15, %c0_16] : memref<32x16xf32, #tpu.memory_space<vmem>>, vector<32x16xf32>
    %cst_17 = arith.constant dense<0.000000e+00> : vector<50x16xf32>
    %16 = tpu.matmul %8, %15, %cst_17 {dimension_numbers = #tpu.dot_dimension_numbers<[1], [0], [0], [1], [0, 0, 1, 1], [], []>} : vector<50x32xf32>, vector<32x16xf32>, vector<50x16xf32> -> vector<50x16xf32>
    %c0_18 = arith.constant 0 : index
    %c0_19 = arith.constant 0 : index
    %17 = vector.load %arg9[%c0_18, %c0_19] : memref<1x16xf32, #tpu.memory_space<vmem>>, vector<1x16xf32>
    %18 = vector.broadcast %17 : vector<1x16xf32> to vector<50x16xf32>
    %19 = arith.addf %16, %18 : vector<50x16xf32>
    %c0_20 = arith.constant 0 : index
    %c0_21 = arith.constant 0 : index
    %20 = vector.load %arg10[%c0_20, %c0_21] : memref<32x5xf32, #tpu.memory_space<vmem>>, vector<32x5xf32>
    %cst_22 = arith.constant dense<0.000000e+00> : vector<100x5xf32>
    %21 = tpu.matmul %6, %20, %cst_22 {dimension_numbers = #tpu.dot_dimension_numbers<[1], [0], [0], [1], [0, 0, 1, 1], [], []>} : vector<100x32xf32>, vector<32x5xf32>, vector<100x5xf32> -> vector<100x5xf32>
    %c0_23 = arith.constant 0 : index
    %c0_24 = arith.constant 0 : index
    %22 = vector.load %arg11[%c0_23, %c0_24] : memref<1x5xf32, #tpu.memory_space<vmem>>, vector<1x5xf32>
    %23 = vector.broadcast %22 : vector<1x5xf32> to vector<100x5xf32>
    %24 = arith.addf %21, %23 : vector<100x5xf32>
    %25 = vector.extract_strided_slice %24 {offsets = [0, 0], sizes = [50, 5], strides = [1, 1]} : vector<100x5xf32> to vector<50x5xf32>
    %26 = vector.extract_strided_slice %24 {offsets = [50, 0], sizes = [50, 5], strides = [1, 1]} : vector<100x5xf32> to vector<50x5xf32>
    %cst_25 = arith.constant dense<0.000000e+00> : vector<50x50xf32>
    %27 = tpu.matmul %7, %8, %cst_25 {dimension_numbers = #tpu.dot_dimension_numbers<[1], [1], [0], [0], [0, 0, 1, 0], [], []>} : vector<50x32xf32>, vector<50x32xf32>, vector<50x50xf32> -> vector<50x50xf32>
    %cst_26 = arith.constant dense<0xFF800000> : vector<50xf32>
    %28 = vector.multi_reduction <maximumf>, %27, %cst_26 [1] : vector<50x50xf32> to vector<50xf32>
    %29 = vector.shape_cast %28 : vector<50xf32> to vector<50x1xf32>
    %30 = tpu.iota {dimensions = array<i32: 1>} : vector<50x50xi32>
    %31 = arith.sitofp %30 : vector<50x50xi32> to vector<50x50xf32>
    %32 = vector.broadcast %29 : vector<50x1xf32> to vector<50x50xf32>
    %33 = arith.cmpf oeq, %27, %32 : vector<50x50xf32>
    %cst_27 = arith.constant 5.000000e+01 : f32
    %34 = vector.broadcast %cst_27 : f32 to vector<50x50xf32>
    %35 = arith.select %33, %31, %34 : vector<50x50xi1>, vector<50x50xf32>
    %cst_28 = arith.constant dense<0x7F800000> : vector<50xf32>
    %36 = vector.multi_reduction <minimumf>, %35, %cst_28 [1] : vector<50x50xf32> to vector<50xf32>
    %37 = vector.shape_cast %36 : vector<50xf32> to vector<50x1xf32>
    %38 = arith.fptosi %37 : vector<50x1xf32> to vector<50x1xi32>
    %c0_29 = arith.constant 0 : index
    %c0_30 = arith.constant 0 : index
    %39 = vector.load %arg25[%c0_29, %c0_30] : memref<50x1xi32, #tpu.memory_space<vmem>>, vector<50x1xi32>
    tpu.vector_store %arg25[%c0_29, %c0_30], %38 {strides = array<i32>} : memref<50x1xi32, #tpu.memory_space<vmem>>, vector<50x1xi32>,
    %c0_31 = arith.constant 0 : index
    %c0_32 = arith.constant 0 : index
    %40 = vector.load %arg12[%c0_31, %c0_32] : memref<8x50xf32, #tpu.memory_space<vmem>>, vector<8x50xf32>
    %c0_33 = arith.constant 0 : index
    %c0_34 = arith.constant 0 : index
    %41 = vector.load %arg13[%c0_33, %c0_34] : memref<8x50xf32, #tpu.memory_space<vmem>>, vector<8x50xf32>
    %c0_35 = arith.constant 0 : index
    %c0_36 = arith.constant 0 : index
    %42 = vector.load %arg14[%c0_35, %c0_36] : memref<8x1xf32, #tpu.memory_space<vmem>>, vector<8x1xf32>
    %c0_37 = arith.constant 0 : index
    %c0_38 = arith.constant 0 : index
    %c0_39 = arith.constant 0 : index
    %43 = vector.load %arg15[%c0_37, %c0_38, %c0_39] : memref<8x8x50xf32, #tpu.memory_space<vmem>>, vector<8x8x50xf32>
    %c0_40 = arith.constant 0 : index
    %c0_41 = arith.constant 0 : index
    %c0_42 = arith.constant 0 : index
    %44 = vector.load %arg16[%c0_40, %c0_41, %c0_42] : memref<8x8x50xf32, #tpu.memory_space<vmem>>, vector<8x8x50xf32>
    %c0_43 = arith.constant 0 : index
    %c0_44 = arith.constant 0 : index
    %45 = vector.load %arg17[%c0_43, %c0_44] : memref<8x1xf32, #tpu.memory_space<vmem>>, vector<8x1xf32>
    %c0_45 = arith.constant 0 : index
    %c0_46 = arith.constant 0 : index
    %c0_47 = arith.constant 0 : index
    %46 = vector.load %arg18[%c0_45, %c0_46, %c0_47] : memref<8x256x50xf32, #tpu.memory_space<vmem>>, vector<8x256x50xf32>
    %c0_48 = arith.constant 0 : index
    %c0_49 = arith.constant 0 : index
    %47 = vector.load %arg19[%c0_48, %c0_49] : memref<1x256xf32, #tpu.memory_space<vmem>>, vector<1x256xf32>
    %c0_50 = arith.constant 0 : index
    %c0_51 = arith.constant 0 : index
    %48 = vector.load %arg2[%c0_50, %c0_51] : memref<50x50xf32, #tpu.memory_space<vmem>>, vector<50x50xf32>
    %cst_52 = arith.constant dense<0.000000e+00> : vector<8x50xf32>
    %49 = tpu.matmul %40, %48, %cst_52 {dimension_numbers = #tpu.dot_dimension_numbers<[1], [0], [0], [1], [0, 0, 1, 1], [], []>} : vector<8x50xf32>, vector<50x50xf32>, vector<8x50xf32> -> vector<8x50xf32>
    %cst_53 = arith.constant dense<0.000000e+00> : vector<8x50xf32>
    %50 = tpu.matmul %41, %48, %cst_53 {dimension_numbers = #tpu.dot_dimension_numbers<[1], [1], [0], [0], [0, 0, 1, 0], [], []>} : vector<8x50xf32>, vector<50x50xf32>, vector<8x50xf32> -> vector<8x50xf32>
    %51 = vector.shape_cast %49 : vector<8x50xf32> to vector<8x1x50xf32>
    %52 = vector.shape_cast %50 : vector<8x50xf32> to vector<8x50x1xf32>
    %53 = vector.broadcast %51 : vector<8x1x50xf32> to vector<8x50x50xf32>
    %54 = vector.broadcast %52 : vector<8x50x1xf32> to vector<8x50x50xf32>
    %55 = arith.addf %53, %54 : vector<8x50x50xf32>
    %56 = vector.shape_cast %42 : vector<8x1xf32> to vector<8x1x1xf32>
    %57 = vector.broadcast %56 : vector<8x1x1xf32> to vector<8x50x50xf32>
    %58 = arith.addf %55, %57 : vector<8x50x50xf32>
    %cst_54 = arith.constant 3.300000e-01 : f32
    %59 = vector.broadcast %cst_54 : f32 to vector<8x50x50xf32>
    %60 = arith.mulf %59, %58 : vector<8x50x50xf32>
    %61 = arith.maximumf %58, %60 : vector<8x50x50xf32>
    "tpu.trace_start"() <{level = 10 : i32, message = "coi,cij->coj"}> : () -> ()
    %cst_55 = arith.constant dense<0.000000e+00> : vector<8x8x50xf32>
    %62 = tpu.matmul %43, %61, %cst_55 {dimension_numbers = #tpu.dot_dimension_numbers<[2], [1], [1], [2], [0, 0, 0, 1, 1, 2], [0], [0]>} : vector<8x8x50xf32>, vector<8x50x50xf32>, vector<8x8x50xf32> -> vector<8x8x50xf32>
    "tpu.trace_stop"() : () -> ()
    %cst_56 = arith.constant dense<0.000000e+00> : vector<8x50xf32>
    %63 = vector.multi_reduction <add>, %62, %cst_56 [0] : vector<8x8x50xf32> to vector<8x50xf32>
    "tpu.trace_start"() <{level = 10 : i32, message = "coj,cij->coi"}> : () -> ()
    %cst_57 = arith.constant dense<0.000000e+00> : vector<8x8x50xf32>
    %64 = tpu.matmul %44, %61, %cst_57 {dimension_numbers = #tpu.dot_dimension_numbers<[2], [2], [1], [1], [0, 0, 0, 1, 1, 1], [0], [0]>} : vector<8x8x50xf32>, vector<8x50x50xf32>, vector<8x8x50xf32> -> vector<8x8x50xf32>
    "tpu.trace_stop"() : () -> ()
    %cst_58 = arith.constant dense<0.000000e+00> : vector<8x50xf32>
    %65 = vector.multi_reduction <add>, %64, %cst_58 [0] : vector<8x8x50xf32> to vector<8x50xf32>
    %66 = vector.shape_cast %63 : vector<8x50xf32> to vector<8x1x50xf32>
    %67 = vector.shape_cast %65 : vector<8x50xf32> to vector<8x50x1xf32>
    %68 = vector.broadcast %66 : vector<8x1x50xf32> to vector<8x50x50xf32>
    %69 = vector.broadcast %67 : vector<8x50x1xf32> to vector<8x50x50xf32>
    %70 = arith.addf %68, %69 : vector<8x50x50xf32>
    %71 = vector.shape_cast %45 : vector<8x1xf32> to vector<8x1x1xf32>
    %72 = vector.broadcast %71 : vector<8x1x1xf32> to vector<8x50x50xf32>
    %73 = arith.addf %70, %72 : vector<8x50x50xf32>
    %cst_59 = arith.constant 3.300000e-01 : f32
    %74 = vector.broadcast %cst_59 : f32 to vector<8x50x50xf32>
    %75 = arith.mulf %74, %73 : vector<8x50x50xf32>
    %76 = arith.maximumf %73, %75 : vector<8x50x50xf32>
    "tpu.trace_start"() <{level = 10 : i32, message = "cij,ckj->cik"}> : () -> ()
    %cst_60 = arith.constant dense<0.000000e+00> : vector<8x50x256xf32>
    %77 = tpu.matmul %76, %46, %cst_60 {dimension_numbers = #tpu.dot_dimension_numbers<[2], [2], [1], [1], [0, 0, 0, 1, 1, 1], [0], [0]>} : vector<8x50x50xf32>, vector<8x256x50xf32>, vector<8x50x256xf32> -> vector<8x50x256xf32>
    "tpu.trace_stop"() : () -> ()
    %cst_61 = arith.constant dense<0.000000e+00> : vector<50x256xf32>
    %78 = vector.multi_reduction <add>, %77, %cst_61 [0] : vector<8x50x256xf32> to vector<50x256xf32>
    %79 = vector.broadcast %47 : vector<1x256xf32> to vector<50x256xf32>
    %80 = arith.addf %78, %79 : vector<50x256xf32>
    %cst_62 = arith.constant 3.300000e-01 : f32
    %81 = vector.broadcast %cst_62 : f32 to vector<50x256xf32>
    %82 = arith.mulf %81, %80 : vector<50x256xf32>
    %83 = arith.maximumf %80, %82 : vector<50x256xf32>
    %c0_63 = arith.constant 0 : index
    %c0_64 = arith.constant 0 : index
    %c0_65 = arith.constant 0 : index
    %84 = vector.load %arg24[%c0_63, %c0_64, %c0_65] : memref<2x50x256xf32, #tpu.memory_space<vmem>>, vector<1x50x256xf32>
    %85 = vector.shape_cast %84 : vector<1x50x256xf32> to vector<50x256xf32>
    %86 = vector.shape_cast %83 : vector<50x256xf32> to vector<1x50x256xf32>
    tpu.vector_store %arg24[%c0_63, %c0_64, %c0_65], %86 {strides = array<i32>} : memref<2x50x256xf32, #tpu.memory_space<vmem>>, vector<1x50x256xf32>,
    %c0_66 = arith.constant 0 : index
    %c0_67 = arith.constant 0 : index
    %87 = vector.load %arg3[%c0_66, %c0_67] : memref<50x50xf32, #tpu.memory_space<vmem>>, vector<50x50xf32>
    %cst_68 = arith.constant dense<0.000000e+00> : vector<8x50xf32>
    %88 = tpu.matmul %40, %87, %cst_68 {dimension_numbers = #tpu.dot_dimension_numbers<[1], [0], [0], [1], [0, 0, 1, 1], [], []>} : vector<8x50xf32>, vector<50x50xf32>, vector<8x50xf32> -> vector<8x50xf32>
    %cst_69 = arith.constant dense<0.000000e+00> : vector<8x50xf32>
    %89 = tpu.matmul %41, %87, %cst_69 {dimension_numbers = #tpu.dot_dimension_numbers<[1], [1], [0], [0], [0, 0, 1, 0], [], []>} : vector<8x50xf32>, vector<50x50xf32>, vector<8x50xf32> -> vector<8x50xf32>
    %90 = vector.shape_cast %88 : vector<8x50xf32> to vector<8x1x50xf32>
    %91 = vector.shape_cast %89 : vector<8x50xf32> to vector<8x50x1xf32>
    %92 = vector.broadcast %90 : vector<8x1x50xf32> to vector<8x50x50xf32>
    %93 = vector.broadcast %91 : vector<8x50x1xf32> to vector<8x50x50xf32>
    %94 = arith.addf %92, %93 : vector<8x50x50xf32>
    %95 = vector.shape_cast %42 : vector<8x1xf32> to vector<8x1x1xf32>
    %96 = vector.broadcast %95 : vector<8x1x1xf32> to vector<8x50x50xf32>
    %97 = arith.addf %94, %96 : vector<8x50x50xf32>
    %cst_70 = arith.constant 3.300000e-01 : f32
    %98 = vector.broadcast %cst_70 : f32 to vector<8x50x50xf32>
    %99 = arith.mulf %98, %97 : vector<8x50x50xf32>
    %100 = arith.maximumf %97, %99 : vector<8x50x50xf32>
    "tpu.trace_start"() <{level = 10 : i32, message = "coi,cij->coj"}> : () -> ()
    %cst_71 = arith.constant dense<0.000000e+00> : vector<8x8x50xf32>
    %101 = tpu.matmul %43, %100, %cst_71 {dimension_numbers = #tpu.dot_dimension_numbers<[2], [1], [1], [2], [0, 0, 0, 1, 1, 2], [0], [0]>} : vector<8x8x50xf32>, vector<8x50x50xf32>, vector<8x8x50xf32> -> vector<8x8x50xf32>
    "tpu.trace_stop"() : () -> ()
    %cst_72 = arith.constant dense<0.000000e+00> : vector<8x50xf32>
    %102 = vector.multi_reduction <add>, %101, %cst_72 [0] : vector<8x8x50xf32> to vector<8x50xf32>
    "tpu.trace_start"() <{level = 10 : i32, message = "coj,cij->coi"}> : () -> ()
    %cst_73 = arith.constant dense<0.000000e+00> : vector<8x8x50xf32>
    %103 = tpu.matmul %44, %100, %cst_73 {dimension_numbers = #tpu.dot_dimension_numbers<[2], [2], [1], [1], [0, 0, 0, 1, 1, 1], [0], [0]>} : vector<8x8x50xf32>, vector<8x50x50xf32>, vector<8x8x50xf32> -> vector<8x8x50xf32>
    "tpu.trace_stop"() : () -> ()
    %cst_74 = arith.constant dense<0.000000e+00> : vector<8x50xf32>
    %104 = vector.multi_reduction <add>, %103, %cst_74 [0] : vector<8x8x50xf32> to vector<8x50xf32>
    %105 = vector.shape_cast %102 : vector<8x50xf32> to vector<8x1x50xf32>
    %106 = vector.shape_cast %104 : vector<8x50xf32> to vector<8x50x1xf32>
    %107 = vector.broadcast %105 : vector<8x1x50xf32> to vector<8x50x50xf32>
    %108 = vector.broadcast %106 : vector<8x50x1xf32> to vector<8x50x50xf32>
    %109 = arith.addf %107, %108 : vector<8x50x50xf32>
    %110 = vector.shape_cast %45 : vector<8x1xf32> to vector<8x1x1xf32>
    %111 = vector.broadcast %110 : vector<8x1x1xf32> to vector<8x50x50xf32>
    %112 = arith.addf %109, %111 : vector<8x50x50xf32>
    %cst_75 = arith.constant 3.300000e-01 : f32
    %113 = vector.broadcast %cst_75 : f32 to vector<8x50x50xf32>
    %114 = arith.mulf %113, %112 : vector<8x50x50xf32>
    %115 = arith.maximumf %112, %114 : vector<8x50x50xf32>
    "tpu.trace_start"() <{level = 10 : i32, message = "cij,ckj->cik"}> : () -> ()
    %cst_76 = arith.constant dense<0.000000e+00> : vector<8x50x256xf32>
    %116 = tpu.matmul %115, %46, %cst_76 {dimension_numbers = #tpu.dot_dimension_numbers<[2], [2], [1], [1], [0, 0, 0, 1, 1, 1], [0], [0]>} : vector<8x50x50xf32>, vector<8x256x50xf32>, vector<8x50x256xf32> -> vector<8x50x256xf32>
    "tpu.trace_stop"() : () -> ()
    %cst_77 = arith.constant dense<0.000000e+00> : vector<50x256xf32>
    %117 = vector.multi_reduction <add>, %116, %cst_77 [0] : vector<8x50x256xf32> to vector<50x256xf32>
    %118 = vector.broadcast %47 : vector<1x256xf32> to vector<50x256xf32>
    %119 = arith.addf %117, %118 : vector<50x256xf32>
    %cst_78 = arith.constant 3.300000e-01 : f32
    %120 = vector.broadcast %cst_78 : f32 to vector<50x256xf32>
    %121 = arith.mulf %120, %119 : vector<50x256xf32>
    %122 = arith.maximumf %119, %121 : vector<50x256xf32>
    %c1 = arith.constant 1 : index
    %c0_79 = arith.constant 0 : index
    %c0_80 = arith.constant 0 : index
    %123 = vector.load %arg24[%c1, %c0_79, %c0_80] : memref<2x50x256xf32, #tpu.memory_space<vmem>>, vector<1x50x256xf32>
    %124 = vector.shape_cast %123 : vector<1x50x256xf32> to vector<50x256xf32>
    %125 = vector.shape_cast %122 : vector<50x256xf32> to vector<1x50x256xf32>
    tpu.vector_store %arg24[%c1, %c0_79, %c0_80], %125 {strides = array<i32>} : memref<2x50x256xf32, #tpu.memory_space<vmem>>, vector<1x50x256xf32>,
    %c0_81 = arith.constant 0 : index
    %c0_82 = arith.constant 0 : index
    %126 = vector.load %arg0[%c0_81, %c0_82] : memref<50x16xf32, #tpu.memory_space<vmem>>, vector<50x16xf32>
    %127 = arith.mulf %14, %14 : vector<50x16xf32>
    %cst_83 = arith.constant dense<0.000000e+00> : vector<50xf32>
    %128 = vector.multi_reduction <add>, %127, %cst_83 [1] : vector<50x16xf32> to vector<50xf32>
    %129 = vector.shape_cast %128 : vector<50xf32> to vector<50x1xf32>
    %130 = math.sqrt %129 : vector<50x1xf32>
    %cst_84 = arith.constant 9.99999996E-13 : f32
    %131 = vector.broadcast %cst_84 : f32 to vector<50x1xf32>
    %132 = arith.maximumf %130, %131 : vector<50x1xf32>
    %133 = vector.broadcast %132 : vector<50x1xf32> to vector<50x16xf32>
    %134 = arith.divf %14, %133 : vector<50x16xf32>
    %135 = arith.mulf %126, %126 : vector<50x16xf32>
    %cst_85 = arith.constant dense<0.000000e+00> : vector<50xf32>
    %136 = vector.multi_reduction <add>, %135, %cst_85 [1] : vector<50x16xf32> to vector<50xf32>
    %137 = vector.shape_cast %136 : vector<50xf32> to vector<50x1xf32>
    %138 = math.sqrt %137 : vector<50x1xf32>
    %cst_86 = arith.constant 9.99999996E-13 : f32
    %139 = vector.broadcast %cst_86 : f32 to vector<50x1xf32>
    %140 = arith.maximumf %138, %139 : vector<50x1xf32>
    %141 = vector.broadcast %140 : vector<50x1xf32> to vector<50x16xf32>
    %142 = arith.divf %126, %141 : vector<50x16xf32>
    %143 = arith.mulf %134, %142 : vector<50x16xf32>
    %cst_87 = arith.constant dense<0.000000e+00> : vector<50xf32>
    %144 = vector.multi_reduction <add>, %143, %cst_87 [1] : vector<50x16xf32> to vector<50xf32>
    %145 = vector.shape_cast %144 : vector<50xf32> to vector<50x1xf32>
    %cst_88 = arith.constant 1.000000e+00 : f32
    %146 = vector.broadcast %cst_88 : f32 to vector<50x1xf32>
    %147 = arith.subf %146, %145 : vector<50x1xf32>
    %148 = arith.mulf %147, %147 : vector<50x1xf32>
    %cst_89 = arith.constant dense<0.000000e+00> : vector<1xf32>
    %149 = vector.multi_reduction <add>, %148, %cst_89 [0] : vector<50x1xf32> to vector<1xf32>
    %150 = vector.shape_cast %149 : vector<1xf32> to vector<1x1xf32>
    %cst_90 = arith.constant 5.000000e+01 : f32
    %151 = vector.broadcast %cst_90 : f32 to vector<1x1xf32>
    %152 = arith.divf %150, %151 : vector<1x1xf32>
    %c0_91 = arith.constant 0 : index
    %c0_92 = arith.constant 0 : index
    %153 = vector.load %arg1[%c0_91, %c0_92] : memref<50x16xf32, #tpu.memory_space<vmem>>, vector<50x16xf32>
    %154 = arith.mulf %19, %19 : vector<50x16xf32>
    %cst_93 = arith.constant dense<0.000000e+00> : vector<50xf32>
    %155 = vector.multi_reduction <add>, %154, %cst_93 [1] : vector<50x16xf32> to vector<50xf32>
    %156 = vector.shape_cast %155 : vector<50xf32> to vector<50x1xf32>
    %157 = math.sqrt %156 : vector<50x1xf32>
    %cst_94 = arith.constant 9.99999996E-13 : f32
    %158 = vector.broadcast %cst_94 : f32 to vector<50x1xf32>
    %159 = arith.maximumf %157, %158 : vector<50x1xf32>
    %160 = vector.broadcast %159 : vector<50x1xf32> to vector<50x16xf32>
    %161 = arith.divf %19, %160 : vector<50x16xf32>
    %162 = arith.mulf %153, %153 : vector<50x16xf32>
    %cst_95 = arith.constant dense<0.000000e+00> : vector<50xf32>
    %163 = vector.multi_reduction <add>, %162, %cst_95 [1] : vector<50x16xf32> to vector<50xf32>
    %164 = vector.shape_cast %163 : vector<50xf32> to vector<50x1xf32>
    %165 = math.sqrt %164 : vector<50x1xf32>
    %cst_96 = arith.constant 9.99999996E-13 : f32
    %166 = vector.broadcast %cst_96 : f32 to vector<50x1xf32>
    %167 = arith.maximumf %165, %166 : vector<50x1xf32>
    %168 = vector.broadcast %167 : vector<50x1xf32> to vector<50x16xf32>
    %169 = arith.divf %153, %168 : vector<50x16xf32>
    %170 = arith.mulf %161, %169 : vector<50x16xf32>
    %cst_97 = arith.constant dense<0.000000e+00> : vector<50xf32>
    %171 = vector.multi_reduction <add>, %170, %cst_97 [1] : vector<50x16xf32> to vector<50xf32>
    %172 = vector.shape_cast %171 : vector<50xf32> to vector<50x1xf32>
    %cst_98 = arith.constant 1.000000e+00 : f32
    %173 = vector.broadcast %cst_98 : f32 to vector<50x1xf32>
    %174 = arith.subf %173, %172 : vector<50x1xf32>
    %175 = arith.mulf %174, %174 : vector<50x1xf32>
    %cst_99 = arith.constant dense<0.000000e+00> : vector<1xf32>
    %176 = vector.multi_reduction <add>, %175, %cst_99 [0] : vector<50x1xf32> to vector<1xf32>
    %177 = vector.shape_cast %176 : vector<1xf32> to vector<1x1xf32>
    %cst_100 = arith.constant 5.000000e+01 : f32
    %178 = vector.broadcast %cst_100 : f32 to vector<1x1xf32>
    %179 = arith.divf %177, %178 : vector<1x1xf32>
    %180 = tpu.iota {dimensions = array<i32: 1>} : vector<50x5xi32>
    %c0_101 = arith.constant 0 : index
    %c0_102 = arith.constant 0 : index
    %181 = vector.load %arg20[%c0_101, %c0_102] : memref<50x1xi32, #tpu.memory_space<vmem>>, vector<50x1xi32>
    %182 = vector.broadcast %181 : vector<50x1xi32> to vector<50x5xi32>
    %183 = arith.cmpi eq, %180, %182 : vector<50x5xi32>
    %184 = arith.extui %183 : vector<50x5xi1> to vector<50x5xi32>
    %185 = arith.sitofp %184 : vector<50x5xi32> to vector<50x5xf32>
    %cst_103 = arith.constant dense<0xFF800000> : vector<50xf32>
    %186 = vector.multi_reduction <maximumf>, %26, %cst_103 [1] : vector<50x5xf32> to vector<50xf32>
    %187 = vector.shape_cast %186 : vector<50xf32> to vector<50x1xf32>
    %188 = vector.broadcast %187 : vector<50x1xf32> to vector<50x5xf32>
    %189 = arith.subf %26, %188 : vector<50x5xf32>
    %190 = math.exp %189 : vector<50x5xf32>
    %cst_104 = arith.constant dense<0.000000e+00> : vector<50xf32>
    %191 = vector.multi_reduction <add>, %190, %cst_104 [1] : vector<50x5xf32> to vector<50xf32>
    %192 = vector.shape_cast %191 : vector<50xf32> to vector<50x1xf32>
    %193 = math.log %192 : vector<50x1xf32>
    %194 = vector.broadcast %193 : vector<50x1xf32> to vector<50x5xf32>
    %195 = arith.subf %189, %194 : vector<50x5xf32>
    %196 = arith.mulf %185, %195 : vector<50x5xf32>
    %cst_105 = arith.constant dense<0.000000e+00> : vector<50xf32>
    %197 = vector.multi_reduction <add>, %196, %cst_105 [1] : vector<50x5xf32> to vector<50xf32>
    %198 = vector.shape_cast %197 : vector<50xf32> to vector<50x1xf32>
    %cst_106 = arith.constant 0.000000e+00 : f32
    %199 = vector.broadcast %cst_106 : f32 to vector<50x1xf32>
    %200 = arith.subf %199, %198 : vector<50x1xf32>
    %c0_107 = arith.constant 0 : index
    %c0_108 = arith.constant 0 : index
    %201 = vector.load %arg21[%c0_107, %c0_108] : memref<50x1xf32, #tpu.memory_space<vmem>>, vector<50x1xf32>
    %202 = arith.mulf %200, %201 : vector<50x1xf32>
    %cst_109 = arith.constant dense<0.000000e+00> : vector<1xf32>
    %203 = vector.multi_reduction <add>, %202, %cst_109 [0] : vector<50x1xf32> to vector<1xf32>
    %204 = vector.shape_cast %203 : vector<1xf32> to vector<1x1xf32>
    %cst_110 = arith.constant dense<0.000000e+00> : vector<1xf32>
    %205 = vector.multi_reduction <add>, %201, %cst_110 [0] : vector<50x1xf32> to vector<1xf32>
    %206 = vector.shape_cast %205 : vector<1xf32> to vector<1x1xf32>
    %cst_111 = arith.constant 1.000000e+00 : f32
    %207 = vector.broadcast %cst_111 : f32 to vector<1x1xf32>
    %208 = arith.maximumf %206, %207 : vector<1x1xf32>
    %209 = arith.divf %204, %208 : vector<1x1xf32>
    %cst_112 = arith.constant 9.99999971E-10 : f32
    %cst_113 = arith.constant 1.000000e+00 : f32
    %210 = vector.broadcast %cst_112 : f32 to vector<50x5xf32>
    %211 = arith.maximumf %210, %25 : vector<50x5xf32>
    %212 = vector.broadcast %cst_113 : f32 to vector<50x5xf32>
    %213 = arith.minimumf %212, %211 : vector<50x5xf32>
    %cst_114 = arith.constant 0.000000e+00 : f32
    %214 = vector.broadcast %cst_114 : f32 to vector<50x5xf32>
    %215 = arith.subf %214, %213 : vector<50x5xf32>
    %216 = math.log %213 : vector<50x5xf32>
    %217 = arith.mulf %215, %216 : vector<50x5xf32>
    %cst_115 = arith.constant dense<0.000000e+00> : vector<50xf32>
    %218 = vector.multi_reduction <add>, %217, %cst_115 [1] : vector<50x5xf32> to vector<50xf32>
    %219 = vector.shape_cast %218 : vector<50xf32> to vector<50x1xf32>
    %cst_116 = arith.constant dense<0.000000e+00> : vector<1xf32>
    %220 = vector.multi_reduction <add>, %219, %cst_116 [0] : vector<50x1xf32> to vector<1xf32>
    %221 = vector.shape_cast %220 : vector<1xf32> to vector<1x1xf32>
    %cst_117 = arith.constant 5.000000e+01 : f32
    %222 = vector.broadcast %cst_117 : f32 to vector<1x1xf32>
    %223 = arith.divf %221, %222 : vector<1x1xf32>
    %224 = arith.addf %152, %179 : vector<1x1xf32>
    %225 = arith.addf %224, %209 : vector<1x1xf32>
    %226 = arith.addf %225, %223 : vector<1x1xf32>
    %c0_118 = arith.constant 0 : index
    %c0_119 = arith.constant 0 : index
    %227 = vector.load %arg22[%c0_118, %c0_119] : memref<1x1xf32, #tpu.memory_space<vmem>>, vector<1x1xf32>
    tpu.vector_store %arg22[%c0_118, %c0_119], %226 {strides = array<i32>} : memref<1x1xf32, #tpu.memory_space<vmem>>, vector<1x1xf32>,
    return
  }
}

module attributes {stable_mosaic.version = 11 : i64} {
  func.func @_align_loss_kernel(%arg0: memref<2x50x256xf32, #tpu.memory_space<vmem>>, %arg1: memref<50x32xf32, #tpu.memory_space<vmem>>, %arg2: memref<50x1xi32, #tpu.memory_space<vmem>>, %arg3: memref<50x50xf32, #tpu.memory_space<vmem>>, %arg4: memref<1x1xf32, #tpu.memory_space<vmem>>, %arg5: memref<1x1xf32, #tpu.memory_space<vmem>>) attributes {dimension_semantics = [], scalar_prefetch = 0 : i64, scratch_operands = 0 : i64, tpu.core_type = #tpu.core_type<tc>} {
    %c0 = arith.constant 0 : index
    %c0_0 = arith.constant 0 : index
    %c0_1 = arith.constant 0 : index
    %0 = vector.load %arg0[%c0, %c0_0, %c0_1] : memref<2x50x256xf32, #tpu.memory_space<vmem>>, vector<1x50x256xf32>
    %1 = vector.shape_cast %0 : vector<1x50x256xf32> to vector<50x256xf32>
    %c1 = arith.constant 1 : index
    %c0_2 = arith.constant 0 : index
    %c0_3 = arith.constant 0 : index
    %2 = vector.load %arg0[%c1, %c0_2, %c0_3] : memref<2x50x256xf32, #tpu.memory_space<vmem>>, vector<1x50x256xf32>
    %3 = vector.shape_cast %2 : vector<1x50x256xf32> to vector<50x256xf32>
    %cst = arith.constant dense<0.000000e+00> : vector<50x50xf32>
    %4 = tpu.matmul %1, %3, %cst {dimension_numbers = #tpu.dot_dimension_numbers<[1], [1], [0], [0], [0, 0, 1, 0], [], []>} : vector<50x256xf32>, vector<50x256xf32>, vector<50x50xf32> -> vector<50x50xf32>
    %cst_4 = arith.constant dense<0xFF800000> : vector<50xf32>
    %5 = vector.multi_reduction <maximumf>, %4, %cst_4 [1] : vector<50x50xf32> to vector<50xf32>
    %6 = vector.shape_cast %5 : vector<50xf32> to vector<50x1xf32>
    %7 = tpu.iota {dimensions = array<i32: 1>} : vector<50x50xi32>
    %8 = arith.sitofp %7 : vector<50x50xi32> to vector<50x50xf32>
    %9 = vector.broadcast %6 : vector<50x1xf32> to vector<50x50xf32>
    %10 = arith.cmpf oeq, %4, %9 : vector<50x50xf32>
    %cst_5 = arith.constant 5.000000e+01 : f32
    %11 = vector.broadcast %cst_5 : f32 to vector<50x50xf32>
    %12 = arith.select %10, %8, %11 : vector<50x50xi1>, vector<50x50xf32>
    %cst_6 = arith.constant dense<0x7F800000> : vector<50xf32>
    %13 = vector.multi_reduction <minimumf>, %12, %cst_6 [1] : vector<50x50xf32> to vector<50xf32>
    %14 = vector.shape_cast %13 : vector<50xf32> to vector<50x1xf32>
    %15 = arith.fptosi %14 : vector<50x1xf32> to vector<50x1xi32>
    %c0_7 = arith.constant 0 : index
    %c0_8 = arith.constant 0 : index
    %16 = vector.load %arg2[%c0_7, %c0_8] : memref<50x1xi32, #tpu.memory_space<vmem>>, vector<50x1xi32>
    %17 = arith.cmpi ne, %15, %16 : vector<50x1xi32>
    %18 = arith.extui %17 : vector<50x1xi1> to vector<50x1xi32>
    %19 = arith.sitofp %18 : vector<50x1xi32> to vector<50x1xf32>
    %cst_9 = arith.constant dense<0.000000e+00> : vector<1xf32>
    %20 = vector.multi_reduction <add>, %19, %cst_9 [0] : vector<50x1xf32> to vector<1xf32>
    %21 = vector.shape_cast %20 : vector<1xf32> to vector<1x1xf32>
    %cst_10 = arith.constant 1.600000e-03 : f32
    %22 = vector.broadcast %cst_10 : f32 to vector<1x1xf32>
    %23 = arith.mulf %21, %22 : vector<1x1xf32>
    %24 = tpu.iota {dimensions = array<i32: 1>} : vector<50x50xi32>
    %25 = vector.broadcast %15 : vector<50x1xi32> to vector<50x50xi32>
    %26 = arith.cmpi eq, %24, %25 : vector<50x50xi32>
    %27 = arith.extui %26 : vector<50x50xi1> to vector<50x50xi32>
    %28 = arith.sitofp %27 : vector<50x50xi32> to vector<50x50xf32>
    %c0_11 = arith.constant 0 : index
    %c0_12 = arith.constant 0 : index
    %29 = vector.load %arg1[%c0_11, %c0_12] : memref<50x32xf32, #tpu.memory_space<vmem>>, vector<50x32xf32>
    %cst_13 = arith.constant dense<0.000000e+00> : vector<50x32xf32>
    %30 = tpu.matmul %28, %29, %cst_13 {dimension_numbers = #tpu.dot_dimension_numbers<[1], [0], [0], [1], [0, 0, 1, 1], [], []>} : vector<50x50xf32>, vector<50x32xf32>, vector<50x32xf32> -> vector<50x32xf32>
    %cst_14 = arith.constant dense<0.000000e+00> : vector<50x50xf32>
    %31 = tpu.matmul %30, %30, %cst_14 {dimension_numbers = #tpu.dot_dimension_numbers<[1], [1], [0], [0], [0, 0, 1, 0], [], []>} : vector<50x32xf32>, vector<50x32xf32>, vector<50x50xf32> -> vector<50x50xf32>
    %cst_15 = arith.constant dense<0xFF800000> : vector<50xf32>
    %32 = vector.multi_reduction <maximumf>, %31, %cst_15 [1] : vector<50x50xf32> to vector<50xf32>
    %33 = vector.shape_cast %32 : vector<50xf32> to vector<50x1xf32>
    %34 = vector.broadcast %33 : vector<50x1xf32> to vector<50x50xf32>
    %35 = arith.subf %31, %34 : vector<50x50xf32>
    %36 = math.exp %35 : vector<50x50xf32>
    %cst_16 = arith.constant dense<0.000000e+00> : vector<50xf32>
    %37 = vector.multi_reduction <add>, %36, %cst_16 [1] : vector<50x50xf32> to vector<50xf32>
    %38 = vector.shape_cast %37 : vector<50xf32> to vector<50x1xf32>
    %39 = vector.broadcast %38 : vector<50x1xf32> to vector<50x50xf32>
    %40 = arith.divf %36, %39 : vector<50x50xf32>
    %c0_17 = arith.constant 0 : index
    %c0_18 = arith.constant 0 : index
    %41 = vector.load %arg3[%c0_17, %c0_18] : memref<50x50xf32, #tpu.memory_space<vmem>>, vector<50x50xf32>
    %42 = arith.mulf %40, %41 : vector<50x50xf32>
    %43 = arith.mulf %42, %42 : vector<50x50xf32>
    %cst_19 = arith.constant dense<0.000000e+00> : vector<50xf32>
    %44 = vector.multi_reduction <add>, %43, %cst_19 [1] : vector<50x50xf32> to vector<50xf32>
    %45 = vector.shape_cast %44 : vector<50xf32> to vector<50x1xf32>
    %46 = math.sqrt %45 : vector<50x1xf32>
    %cst_20 = arith.constant 9.99999996E-13 : f32
    %47 = vector.broadcast %cst_20 : f32 to vector<50x1xf32>
    %48 = arith.maximumf %46, %47 : vector<50x1xf32>
    %49 = vector.broadcast %48 : vector<50x1xf32> to vector<50x50xf32>
    %50 = arith.divf %42, %49 : vector<50x50xf32>
    %51 = arith.mulf %41, %41 : vector<50x50xf32>
    %cst_21 = arith.constant dense<0.000000e+00> : vector<50xf32>
    %52 = vector.multi_reduction <add>, %51, %cst_21 [1] : vector<50x50xf32> to vector<50xf32>
    %53 = vector.shape_cast %52 : vector<50xf32> to vector<50x1xf32>
    %54 = math.sqrt %53 : vector<50x1xf32>
    %cst_22 = arith.constant 9.99999996E-13 : f32
    %55 = vector.broadcast %cst_22 : f32 to vector<50x1xf32>
    %56 = arith.maximumf %54, %55 : vector<50x1xf32>
    %57 = vector.broadcast %56 : vector<50x1xf32> to vector<50x50xf32>
    %58 = arith.divf %41, %57 : vector<50x50xf32>
    %59 = arith.mulf %50, %58 : vector<50x50xf32>
    %cst_23 = arith.constant dense<0.000000e+00> : vector<50xf32>
    %60 = vector.multi_reduction <add>, %59, %cst_23 [1] : vector<50x50xf32> to vector<50xf32>
    %61 = vector.shape_cast %60 : vector<50xf32> to vector<50x1xf32>
    %cst_24 = arith.constant 1.000000e+00 : f32
    %62 = vector.broadcast %cst_24 : f32 to vector<50x1xf32>
    %63 = arith.subf %62, %61 : vector<50x1xf32>
    %64 = arith.mulf %63, %63 : vector<50x1xf32>
    %cst_25 = arith.constant dense<0.000000e+00> : vector<1xf32>
    %65 = vector.multi_reduction <add>, %64, %cst_25 [0] : vector<50x1xf32> to vector<1xf32>
    %66 = vector.shape_cast %65 : vector<1xf32> to vector<1x1xf32>
    %cst_26 = arith.constant 5.000000e+01 : f32
    %67 = vector.broadcast %cst_26 : f32 to vector<1x1xf32>
    %68 = arith.divf %66, %67 : vector<1x1xf32>
    %c0_27 = arith.constant 0 : index
    %c0_28 = arith.constant 0 : index
    %69 = vector.load %arg4[%c0_27, %c0_28] : memref<1x1xf32, #tpu.memory_space<vmem>>, vector<1x1xf32>
    %70 = arith.addf %69, %68 : vector<1x1xf32>
    %71 = arith.addf %70, %23 : vector<1x1xf32>
    %c0_29 = arith.constant 0 : index
    %c0_30 = arith.constant 0 : index
    %72 = vector.load %arg5[%c0_29, %c0_30] : memref<1x1xf32, #tpu.memory_space<vmem>>, vector<1x1xf32>
    tpu.vector_store %arg5[%c0_29, %c0_30], %71 {strides = array<i32>} : memref<1x1xf32, #tpu.memory_space<vmem>>, vector<1x1xf32>,
    return
  }
}

</mosaic_0001>

<bundles_post_ra>
// kernel: premodel_forward.3
= control target key start
LH: loop header
LB: loop body
LE: loop exit
PB: predicated region body
PF: predicated region fallthrough
CT: control target
= control target key end

     0   :  { %s1731_s0 = inlined_call_operand.vmem [shape: f32[2,50,256], index: 0, kind: input, shape index: {}]   ;;  %s1732_s1 = inlined_call_operand.vmem [shape: f32[50,32], index: 1, kind: input, shape index: {}]   ;;  %s1733_s2 = inlined_call_operand.vmem [shape: s32[50,1], index: 2, kind: input, shape index: {}]   ;;  %s1734_s3 = inlined_call_operand.vmem [shape: f32[50,50], index: 3, kind: input, shape index: {}]   ;;  %s1735_s4 = inlined_call_operand.<no memory space> [shape: f32[1,1], index: 4, kind: input, shape index: {}]   ;;  %s1736_s5 = inlined_call_operand.hbm [shape: f32[1,1], index: 5, kind: output, shape index: {}]  }
   0x1   :  { %v10_v0 = vstv %s1735_s4 }
   0x2   :  { %11 = vst [vmem:[#allocation2] sm:$0x1] %v10_v0 }
   0x3   :  { %v909_v1 = vld [vmem:[%s1731_s0 + $0x78] sm:$0xff]  ;;  %v911_v2 = vld [vmem:[%s1731_s0 + $0x88] sm:$0xff]  ;;  %v908_v3 = vld [vmem:[%s1731_s0 + $0x70] sm:$0xff] }
   0x4   :  { %v1056_v4 = vpack.c.bf16 %v911_v2, %v909_v1  ;;  %v910_v5 = vld [vmem:[%s1731_s0 + $0x80] sm:$0xff]  ;;  %v913_v6 = vld [vmem:[%s1731_s0 + $0x98] sm:$0xff]  ;;  %v915_v7 = vld [vmem:[%s1731_s0 + $0xa8] sm:$0xff] }
   0x5   :  { %v1058_v8 = vpack.c.bf16 %v910_v5, %v908_v3  ;;  %v1060_v9 = vpack.c.bf16 %v915_v7, %v913_v6  ;;  %v24_v10 = vld [vmem:[%s1731_s0 + $0x8] sm:$0xff]  ;;  %v912_v11 = vld [vmem:[%s1731_s0 + $0x90] sm:$0xff]  ;;  %v914_v12 = vld [vmem:[%s1731_s0 + $0xa0] sm:$0xff] }
   0x6   :  { %1057 = vmatprep.subr.bf16.mxu0 %v1056_v4  ;;  %116 = vmatprep.mubr.f32.mxu0 %v24_v10  ;;  %v917_v13 = vld [vmem:[%s1731_s0 + $0xb8] sm:$0xff]  ;;  %v919_v14 = vld [vmem:[%s1731_s0 + $0xc8] sm:$0xff]  ;;  %v1062_v15 = vpack.c.bf16 %v914_v12, %v912_v11 }
   0x7   :  { %1059 = vmatpush1.bf16.xpose.msra.mxu0 %v1058_v8  ;;  %v1064_v16 = vpack.c.bf16 %v919_v14, %v917_v13 }
   0x8   :  { %1061 = vmatprep.subr.bf16.mxu0 %v1060_v9 }
   0x9   :  { %12 = vsyncpa [#allocation4], 0  ;;  %v916_v17 = vld [vmem:[%s1731_s0 + $0xb0] sm:$0xff]  ;;  %v918_v18 = vld [vmem:[%s1731_s0 + $0xc0] sm:$0xff]  ;;  %vm152_vm0 = vcmask 408576   ;;  %vm171_vm1 = vcmask 402432   ;;  %v175_v63 = vlaneseq }
   0xa   :  { %v1066_v19 = vpack.c.bf16 %v918_v18, %v916_v17  ;;  %v921_v20 = vld [vmem:[%s1731_s0 + $0xd8] sm:$0x3]  ;;  %v920_v21 = vld [vmem:[%s1731_s0 + $0xd0] sm:$0x3]  ;;  %v23_v22 = vld [vmem:[%s1731_s0] sm:$0xff]  ;;  %v1223_v59 = vmov 0.0|0.0  }
   0xb   :  { %v26_v23 = vld [vmem:[%s1731_s0 + $0x18] sm:$0xff]  ;;  %v25_v24 = vld [vmem:[%s1731_s0 + $0x10] sm:$0xff]  ;;  %v28_v25 = vld [vmem:[%s1731_s0 + $0x28] sm:$0xff]  ;;  %1068 = vmatprep.subr.bf16.mxu1 %v1223_v59  ;;  %v1370_v0 = vand.u32 127, %v175_v63  ;;  %vm319_vm8 = vcmask 1041408   ;;  %vm1225_vm9 = vmmov 0  }
   0xc   :  { %v27_v26 = vld [vmem:[%s1731_s0 + $0x20] sm:$0xff]  ;;  %v30_v27 = vld [vmem:[%s1731_s0 + $0x38] sm:$0xff]  ;;  %v29_v28 = vld [vmem:[%s1731_s0 + $0x30] sm:$0xff]  ;;  %vm248_vm13 = vcmask 7168  }
   0xd   :  { %v32_v29 = vld [vmem:[%s1731_s0 + $0x48] sm:$0xff]  ;;  %v31_v30 = vld [vmem:[%s1731_s0 + $0x40] sm:$0xff]  ;;  %v34_v31 = vld [vmem:[%s1731_s0 + $0x58] sm:$0xff]  ;;  %v177_v1 = vcvt.s32.f32 %v1370_v0 }
   0xe   :  { %v33_v32 = vld [vmem:[%s1731_s0 + $0x50] sm:$0xff]  ;;  %v36_v33 = vld [vmem:[%s1731_s0 + $0x68] sm:$0x3]  ;;  %v35_v34 = vld [vmem:[%s1731_s0 + $0x60] sm:$0x3] }
   0xf   :  { %1063 = vmatpush1.bf16.xpose.msra.mxu0 %v1062_v15  ;;  %v291_v56 = vld [vmem:[%s1732_s1] sm:$0xff]  ;;  %v292_v57 = vld [vmem:[%s1732_s1 + $0x8] sm:$0xff]  ;;  %v293_v58 = vld [vmem:[%s1732_s1 + $0x10] sm:$0xff] }
  0x10   :  { %1065 = vmatprep.subr.bf16.mxu0 %v1064_v16  ;;  %v1069_v60 = vpack.c.bf16 %v292_v57, %v291_v56  ;;  %v294_v61 = vld [vmem:[%s1732_s1 + $0x18] sm:$0xff]  ;;  %v295_v15 = vld [vmem:[%s1732_s1 + $0x20] sm:$0xff]  ;;  %v296_v16 = vld [vmem:[%s1732_s1 + $0x28] sm:$0xff] }
  0x11   :  { %v1072_v62 = vpack.c.bf16 %v294_v61, %v293_v58  ;;  %v1075_v17 = vpack.c.bf16 %v296_v16, %v295_v15  ;;  %v224_v58 = vld [vmem:[%s1733_s2 + $0x20] sm:$0xff] }
  0x12   :  { %1070 = vmatpush3.bf16.msra.mxu1 %v1069_v60 }
  0x13   :  { %1071 = vmatprep.subr.bf16.mxu1 %v1223_v59 }
  0x16   :  { %1073 = vmatpush3.bf16.msra.mxu1 %v1072_v62 }
  0x17   :  { %1067 = vmatpush1.bf16.xpose.msra.mxu0 %v1066_v19  ;;  %1074 = vmatprep.subr.bf16.mxu1 %v1223_v59 }
  0x18   :  { %64 = vmatprep.subr.mxu0 %v921_v20 }
  0x1a   :  { %1076 = vmatpush3.bf16.msra.mxu1 %v1075_v17 }
  0x1f   :  { %65 = vmatpush1.xpose.msra.mxu0 %v920_v21  ;;  %v1224_v21 = vmov 0.0  }
  0x20   :  { %1077 = vmatprep.subr.bf16.mxu0 %v1223_v59  ;;  %998 = vmatprep.subr.mxu1 %v1224_v21 }
  0x21   :  { %1000 = vmatprep.mubr.msk.f32.mxu1 %vm1225_vm9, %v1224_v21 }
  0x22   :  { %117 = vmatmul.mubr.f32.vlgmr.msra.gmra.mrb[0].mxu0 %v23_v22 }
  0x23   :  { %121 = vmatprep.mubr.f32.mxu0 %v26_v23  ;;  %v297_v23 = vld [vmem:[%s1732_s1 + $0x30] sm:$0x3] }
  0x24   :  { %999 = vmatpush3.msk.msra.mxu1 %vm319_vm8, %v297_v23 }
  0x25   :  { %1089 = vmatprep.subr.bf16.mxu1 %v1223_v59 }
  0x26   :  { %122 = vmatmul.mubr.f32.gmra.mrb[2].mxu0 %v25_v24 }
  0x27   :  { %126 = vmatprep.mubr.f32.mxu0 %v28_v25 }
  0x2a   :  { %127 = vmatmul.mubr.f32.gmra.mrb[4].mxu0 %v27_v26 }
  0x2b   :  { %131 = vmatprep.mubr.f32.mxu0 %v30_v27 }
  0x2e   :  { %132 = vmatmul.mubr.f32.gmra.mrb[6].mxu0 %v29_v28 }
  0x2f   :  { %136 = vmatprep.mubr.f32.mxu0 %v32_v29 }
  0x32   :  { %137 = vmatmul.mubr.f32.gmra.mrb[8].mxu0 %v31_v30  ;;  %v220_v30 = vld [vmem:[%s1733_s2] sm:$0xff] }
  0x33   :  { %141 = vmatprep.mubr.f32.mxu0 %v34_v31 }
  0x36   :  { %142 = vmatmul.mubr.f32.gmra.mrb[10].mxu0 %v33_v32 }
  0x37   :  { %146 = vmatprep.mubr.f32.mxu0 %v36_v33 }
  0x3a   :  { %147 = vmatmul.mubr.f32.gmra.mrb[12].mxu0 %v35_v34  ;;  %v221_v34 = vld [vmem:[%s1733_s2 + $0x8] sm:$0xff] }
  0x3b   :  { %1035 = vmatprep.mubr.msk.f32.mxu0 %vm1225_vm9, %v1224_v21 }
  0xf5   :  { %v118_v35 = vpop.f32.mrb[0].mxu0 }
  0xf6   :  { %v120_v36 = vpop.f32.mrb[1].mxu0  ;;  %v153_v37 = vsel %vm152_vm0, %v118_v35, -inf }
  0xf7   :  { %154 = vmax.xlane.f32.xlu0 %v153_v37 }
  0xf9   :  { %v123_v38 = vpop.f32.mrb[2].mxu0 }
  0xfa   :  { %v125_v39 = vpop.f32.mrb[3].mxu0  ;;  %v156_v40 = vsel %vm152_vm0, %v123_v38, -inf }
  0xfb   :  { %157 = vmax.xlane.f32.xlu0 %v156_v40 }
  0xfd   :  { %v128_v41 = vpop.f32.mrb[4].mxu0 }
  0xfe   :  { %v130_v42 = vpop.f32.mrb[5].mxu0  ;;  %v159_v43 = vsel %vm152_vm0, %v128_v41, -inf }
  0xff   :  { %160 = vmax.xlane.f32.xlu1 %v159_v43 }
 0x101   :  { %v133_v44 = vpop.f32.mrb[6].mxu0 }
 0x102   :  { %v135_v45 = vpop.f32.mrb[7].mxu0  ;;  %v162_v46 = vsel %vm152_vm0, %v133_v44, -inf }
 0x103   :  { %163 = vmax.xlane.f32.xlu1 %v162_v46 }
 0x105   :  { %v138_v47 = vpop.f32.mrb[8].mxu0 }
 0x106   :  { %v140_v48 = vpop.f32.mrb[9].mxu0  ;;  %v165_v49 = vsel %vm152_vm0, %v138_v47, -inf }
 0x107   :  { %166 = vmax.xlane.f32.xlu0 %v165_v49 }
 0x109   :  { %v143_v50 = vpop.f32.mrb[10].mxu0 }
 0x10a   :  { %v145_v51 = vpop.f32.mrb[11].mxu0  ;;  %v168_v52 = vsel %vm152_vm0, %v143_v50, -inf }
 0x10b   :  { %169 = vmax.xlane.f32.xlu1 %v168_v52 }
 0x10d   :  { %v1350_v53 = vpop.f32.mrb[12].mxu0 }
 0x10e   :  { %v172_v54 = vsel %vm171_vm1, %v1350_v53, -inf  ;;  %v150_v55 = vpop.f32.mrb[13].mxu0 }
 0x10f   :  { %173 = vmax.xlane.f32.xlu0 %v172_v54 }
 0x184   :  { %v155_v2 = vpop.xlane.xlu0 %154 }
 0x185   :  { %vm178_vm2 = vcmp.eq.f32.partialorder %v118_v35, %v155_v2 }
 0x186   :  { %v185_v3 = vsel %vm178_vm2, %v177_v1, 50.0 }
 0x187   :  { %v192_v4 = vsel %vm152_vm0, %v185_v3, inf }
 0x188   :  { %v158_v5 = vpop.xlane.xlu0 %157  ;;  %193 = vmin.xlane.f32.xlu1 %v192_v4  ;;  %v225_v4 = vld [vmem:[%s1733_s2 + $0x28] sm:$0xff] }
 0x189   :  { %vm179_vm3 = vcmp.eq.f32.partialorder %v123_v38, %v158_v5 }
 0x18a   :  { %v186_v6 = vsel %vm179_vm3, %v177_v1, 50.0 }
 0x18b   :  { %v195_v7 = vsel %vm152_vm0, %v186_v6, inf }
 0x18c   :  { %v161_v8 = vpop.xlane.xlu1 %160  ;;  %196 = vmin.xlane.f32.xlu0 %v195_v7 }
 0x18d   :  { %vm180_vm4 = vcmp.eq.f32.partialorder %v128_v41, %v161_v8  ;;  %v222_v41 = vld [vmem:[%s1733_s2 + $0x10] sm:$0xff] }
 0x18e   :  { %v187_v9 = vsel %vm180_vm4, %v177_v1, 50.0 }
 0x18f   :  { %v198_v10 = vsel %vm152_vm0, %v187_v9, inf }
 0x190   :  { %v164_v11 = vpop.xlane.xlu1 %163  ;;  %199 = vmin.xlane.f32.xlu1 %v198_v10 }
 0x191   :  { %vm181_vm5 = vcmp.eq.f32.partialorder %v133_v44, %v164_v11 }
 0x192   :  { %v188_v12 = vsel %vm181_vm5, %v177_v1, 50.0 }
 0x193   :  { %v201_v13 = vsel %vm152_vm0, %v188_v12, inf  ;;  %v226_v12 = vld [vmem:[%s1733_s2 + $0x30] sm:$0x3] }
 0x194   :  { %v167_v14 = vpop.xlane.xlu0 %166  ;;  %202 = vmin.xlane.f32.xlu0 %v201_v13 }
 0x195   :  { %vm182_vm6 = vcmp.eq.f32.partialorder %v138_v47, %v167_v14 }
 0x196   :  { %v189_v18 = vsel %vm182_vm6, %v177_v1, 50.0 }
 0x197   :  { %v204_v19 = vsel %vm152_vm0, %v189_v18, inf }
 0x198   :  { %205 = vmin.xlane.f32.xlu1 %v204_v19  ;;  %v170_v20 = vpop.xlane.xlu1 %169 }
 0x199   :  { %vm183_vm7 = vcmp.eq.f32.partialorder %v143_v50, %v170_v20  ;;  %v223_v50 = vld [vmem:[%s1733_s2 + $0x18] sm:$0xff] }
 0x19a   :  { %v190_v22 = vsel %vm183_vm7, %v177_v1, 50.0 }
 0x19b   :  { %v207_v24 = vsel %vm152_vm0, %v190_v22, inf }
 0x19c   :  { %208 = vmin.xlane.f32.xlu0 %v207_v24  ;;  %v174_v25 = vpop.xlane.xlu0 %173 }
 0x19d   :  { %vm184_vm10 = vcmp.eq.f32.partialorder %v1350_v53, %v174_v25 }
 0x19e   :  { %v191_v26 = vsel %vm184_vm10, %v177_v1, 50.0 }
 0x19f   :  { %v210_v27 = vsel %vm171_vm1, %v191_v26, inf }
 0x1a0   :  { %211 = vmin.xlane.f32.xlu1 %v210_v27 }
 0x215   :  { %v194_v28 = vpop.xlane.xlu1 %193 }
 0x216   :  { %v1097_v29 = vtrunc.f32 %v194_v28 }
 0x218   :  { %v1098_v31 = vcvt.f32.s32 %v1097_v29 }
 0x219   :  { %v197_v32 = vpop.xlane.xlu0 %196 }
 0x21a   :  { %vm227_vm11 = vcmp.ne.s32.totalorder %v1098_v31, %v220_v30  ;;  %vm270_vm12 = vcmp.eq.s32.totalorder %v1370_v0, %v1098_v31  ;;  %v1099_v33 = vtrunc.f32 %v197_v32 }
 0x21b   :  { %v929_v35 = vsel %vm270_vm12, 1.0, %v1224_v21  ;;  %v922_v37 = vsel %vm227_vm11, 1.0, %v1224_v21  ;;  %vm260_vm12 = vcmask 1024  }
 0x21c   :  { %v1100_v36 = vcvt.f32.s32 %v1099_v33  ;;  %1001 = vmatmul.mubr.msk.f32.vlgmr.msra.gmra.mrb[0].mxu1 %vm152_vm0, %v929_v35  ;;  %v249_v43 = vsel %vm248_vm13, %v922_v37, 0.0 }
 0x21d   :  { %v200_v38 = vpop.xlane.xlu1 %199  ;;  %1003 = vmatprep.mubr.msk.f32.mxu1 %vm1225_vm9, %v1224_v21 }
 0x21e   :  { %vm228_vm14 = vcmp.ne.s32.totalorder %v1100_v36, %v221_v34  ;;  %vm271_vm15 = vcmp.eq.s32.totalorder %v1370_v0, %v1100_v36  ;;  %v1101_v39 = vtrunc.f32 %v200_v38 }
 0x21f   :  { %v923_v40 = vsel %vm228_vm14, 1.0, %v1224_v21  ;;  %v930_v42 = vsel %vm271_vm15, 1.0, %v1224_v21 }
 0x220   :  { %v250_v44 = vsel %vm248_vm13, %v923_v40, 0.0  ;;  %v1102_v45 = vcvt.f32.s32 %v1101_v39  ;;  %1004 = vmatmul.mubr.msk.f32.gmra.mrb[2].mxu1 %vm152_vm0, %v930_v42 }
 0x221   :  { %v251_v46 = vadd.f32 %v250_v44, %v249_v43  ;;  %v203_v47 = vpop.xlane.xlu0 %202  ;;  %1006 = vmatprep.mubr.msk.f32.mxu1 %vm1225_vm9, %v1224_v21 }
 0x222   :  { %vm229_vm2 = vcmp.ne.s32.totalorder %v1102_v45, %v222_v41  ;;  %vm272_vm3 = vcmp.eq.s32.totalorder %v1370_v0, %v1102_v45  ;;  %v1103_v48 = vtrunc.f32 %v203_v47 }
 0x223   :  { %v924_v49 = vsel %vm229_vm2, 1.0, %v1224_v21  ;;  %v931_v51 = vsel %vm272_vm3, 1.0, %v1224_v21 }
 0x224   :  { %v252_v52 = vsel %vm248_vm13, %v924_v49, 0.0  ;;  %v1104_v53 = vcvt.f32.s32 %v1103_v48  ;;  %1007 = vmatmul.mubr.msk.f32.gmra.mrb[4].mxu1 %vm152_vm0, %v931_v51 }
 0x225   :  { %v253_v54 = vadd.f32 %v252_v52, %v251_v46  ;;  %v206_v55 = vpop.xlane.xlu1 %205  ;;  %1009 = vmatprep.mubr.msk.f32.mxu1 %vm1225_vm9, %v1224_v21 }
 0x226   :  { %vm230_vm4 = vcmp.ne.s32.totalorder %v1104_v53, %v223_v50  ;;  %vm273_vm5 = vcmp.eq.s32.totalorder %v1370_v0, %v1104_v53  ;;  %v1105_v56 = vtrunc.f32 %v206_v55 }
 0x227   :  { %v925_v57 = vsel %vm230_vm4, 1.0, %v1224_v21  ;;  %v932_v60 = vsel %vm273_vm5, 1.0, %v1224_v21 }
 0x228   :  { %v254_v61 = vsel %vm248_vm13, %v925_v57, 0.0  ;;  %v1106_v62 = vcvt.f32.s32 %v1105_v56  ;;  %1010 = vmatmul.mubr.msk.f32.gmra.mrb[6].mxu1 %vm152_vm0, %v932_v60 }
 0x229   :  { %v255_v63 = vadd.f32 %v254_v61, %v253_v54  ;;  %v209_v1 = vpop.xlane.xlu0 %208  ;;  %1012 = vmatprep.mubr.msk.f32.mxu1 %vm1225_vm9, %v1224_v21 }
 0x22a   :  { %vm231_vm6 = vcmp.ne.s32.totalorder %v1106_v62, %v224_v58  ;;  %vm274_vm7 = vcmp.eq.s32.totalorder %v1370_v0, %v1106_v62  ;;  %v1107_v2 = vtrunc.f32 %v209_v1 }
 0x22b   :  { %v926_v3 = vsel %vm231_vm6, 1.0, %v1224_v21  ;;  %v933_v5 = vsel %vm274_vm7, 1.0, %v1224_v21 }
 0x22c   :  { %v256_v6 = vsel %vm248_vm13, %v926_v3, 0.0  ;;  %v1108_v7 = vcvt.f32.s32 %v1107_v2  ;;  %1013 = vmatmul.mubr.msk.f32.gmra.mrb[8].mxu1 %vm152_vm0, %v933_v5 }
 0x22d   :  { %v257_v8 = vadd.f32 %v256_v6, %v255_v63  ;;  %v212_v9 = vpop.xlane.xlu1 %211  ;;  %1015 = vmatprep.mubr.msk.f32.mxu1 %vm1225_vm9, %v1224_v21 }
 0x22e   :  { %vm232_vm10 = vcmp.ne.s32.totalorder %v1108_v7, %v225_v4  ;;  %vm275_vm11 = vcmp.eq.s32.totalorder %v1370_v0, %v1108_v7  ;;  %v1109_v10 = vtrunc.f32 %v212_v9 }
 0x22f   :  { %v927_v11 = vsel %vm232_vm10, 1.0, %v1224_v21  ;;  %v934_v13 = vsel %vm275_vm11, 1.0, %v1224_v21 }
 0x230   :  { %v258_v14 = vsel %vm248_vm13, %v927_v11, 0.0  ;;  %v1110_v15 = vcvt.f32.s32 %v1109_v10  ;;  %1016 = vmatmul.mubr.msk.f32.gmra.mrb[10].mxu1 %vm152_vm0, %v934_v13  ;;  %vm423_vm13 = vcmask 261120  }
 0x231   :  { %v259_v16 = vadd.f32 %v258_v14, %v257_v8  ;;  %1018 = vmatprep.mubr.msk.f32.mxu1 %vm1225_vm9, %v1224_v21  ;;  %vm1470_vm2 = vmpackc.low %vm423_vm13, %vm423_vm13 }
 0x232   :  { %vm233_vm14 = vcmp.ne.s32.totalorder %v1110_v15, %v226_v12  ;;  %vm276_vm15 = vcmp.eq.s32.totalorder %v1370_v0, %v1110_v15 }
 0x233   :  { %v928_v17 = vsel %vm233_vm14, 1.0, %v1224_v21  ;;  %v935_v18 = vsel %vm276_vm15, 1.0, %v1224_v21 }
 0x234   :  { %v261_v19 = vsel %vm260_vm12, %v928_v17, 0.0  ;;  %1019 = vmatmul.mubr.msk.f32.gmra.mrb[12].mxu1 %vm152_vm0, %v935_v18 }
 0x235   :  { %v1464_v20 = vadd.f32 %v261_v19, %v259_v16  ;;  %1038 = vmatprep.mubr.msk.f32.mxu1 %vm1225_vm9, %v1224_v21 }
 0x2ef   :  { %v389_v22 = vpop.f32.mrb[0].mxu1 }
 0x2f0   :  { %v1002_v23 = vpop.f32.mrb[1].mxu1 }
 0x2f3   :  { %v394_v24 = vpop.f32.mrb[2].mxu1 }
 0x2f4   :  { %v1078_v25 = vpack.c.bf16 %v394_v24, %v389_v22  ;;  %v1005_v26 = vpop.f32.mrb[3].mxu1 }
 0x2f6   :  { %1080 = vmatpush3.bf16.xpose.msk.msra.mxu0 %vm1470_vm2, %v1078_v25  ;;  %1093 = vmatpush3.bf16.xpose.msk.msra.mxu1 %vm1470_vm2, %v1078_v25 }
 0x2f7   :  { %v399_v27 = vpop.f32.mrb[4].mxu1  ;;  %1081 = vmatprep.subr.bf16.mxu0 %v1223_v59  ;;  %1090 = vmatprep.subr.bf16.mxu1 %v1223_v59 }
 0x2f8   :  { %v1008_v28 = vpop.f32.mrb[5].mxu1 }
 0x2f9   :  { %v1532_v28 = vld [vmem:[%s1734_s3] sm:$0xff] }
 0x2fb   :  { %v404_v29 = vpop.f32.mrb[6].mxu1 }
 0x2fc   :  { %v1082_v30 = vpack.c.bf16 %v404_v29, %v399_v27  ;;  %v1011_v31 = vpop.f32.mrb[7].mxu1 }
 0x2fd   :  { %v1541_v31 = vld [vmem:[%s1734_s3 + $0x8] sm:$0xff] }
 0x2fe   :  { %1084 = vmatpush3.bf16.xpose.msk.msra.mxu0 %vm1470_vm2, %v1082_v30  ;;  %1094 = vmatpush3.bf16.xpose.msk.msra.mxu1 %vm1470_vm2, %v1082_v30 }
 0x2ff   :  { %v409_v32 = vpop.f32.mrb[8].mxu1  ;;  %1085 = vmatprep.subr.bf16.mxu0 %v1223_v59  ;;  %1091 = vmatprep.subr.bf16.mxu1 %v1223_v59 }
 0x300   :  { %v1014_v33 = vpop.f32.mrb[9].mxu1 }
 0x303   :  { %v414_v34 = vpop.f32.mrb[10].mxu1 }
 0x304   :  { %v1086_v35 = vpack.c.bf16 %v414_v34, %v409_v32  ;;  %v1017_v36 = vpop.f32.mrb[11].mxu1 }
 0x305   :  { %v1553_v36 = vld [vmem:[%s1734_s3 + $0x10] sm:$0xff] }
 0x306   :  { %1088 = vmatpush3.bf16.xpose.msk.msra.mxu0 %vm1470_vm2, %v1086_v35  ;;  %1095 = vmatpush3.bf16.xpose.msk.msra.mxu1 %vm1470_vm2, %v1086_v35 }
 0x307   :  { %v419_v37 = vpop.f32.mrb[12].mxu1  ;;  %1033 = vmatprep.subr.mxu0 %v1224_v21  ;;  %1092 = vmatprep.subr.mxu1 %v1224_v21 }
 0x308   :  { %v1020_v38 = vpop.f32.mrb[13].mxu1 }
 0x30e   :  { %1034 = vmatpush3.xpose.msk.msra.mxu0 %vm423_vm13, %v419_v37  ;;  %1096 = vmatpush3.xpose.msk.msra.mxu1 %vm423_vm13, %v419_v37 }
 0x311   :  { %1036 = vmatmul.mubr.msk.f32.vlgmr.msra.gmra.mrb[14].mxu0 %vm423_vm13, %v389_v22  ;;  %1039 = vmatmul.mubr.msk.f32.vlgmr.msra.gmra.mrb[14].mxu1 %vm423_vm13, %v394_v24 }
 0x312   :  { %1041 = vmatprep.mubr.msk.f32.mxu1 %vm1225_vm9, %v1224_v21 }
 0x315   :  { %1042 = vmatmul.mubr.msk.f32.gmra.mrb[16].mxu1 %vm423_vm13, %v399_v27 }
 0x316   :  { %1044 = vmatprep.mubr.msk.f32.mxu1 %vm1225_vm9, %v1224_v21 }
 0x319   :  { %1045 = vmatmul.mubr.msk.f32.gmra.mrb[18].mxu1 %vm423_vm13, %v404_v29  ;;  %v734_v29 = vmul.f32 %v1532_v28, %v1532_v28 }
 0x31a   :  { %1047 = vmatprep.mubr.msk.f32.mxu1 %vm1225_vm9, %v1224_v21 }
 0x31b   :  { %v741_v33 = vsel %vm152_vm0, %v734_v29, 0.0 }
 0x31d   :  { %1048 = vmatmul.mubr.msk.f32.gmra.mrb[20].mxu1 %vm423_vm13, %v409_v32 }
 0x31e   :  { %1050 = vmatprep.mubr.msk.f32.mxu1 %vm1225_vm9, %v1224_v21 }
 0x321   :  { %1051 = vmatmul.mubr.msk.f32.gmra.mrb[22].mxu1 %vm423_vm13, %v414_v34  ;;  %v735_v34 = vmul.f32 %v1541_v31, %v1541_v31 }
 0x322   :  { %1053 = vmatprep.mubr.msk.f32.mxu1 %vm1225_vm9, %v1224_v21 }
 0x323   :  { %v744_v38 = vsel %vm152_vm0, %v735_v34, 0.0 }
 0x325   :  { %1054 = vmatmul.mubr.msk.f32.gmra.mrb[24].mxu1 %vm423_vm13, %v419_v37 }
 0x3e4   :  { %v511_v59 = vpop.f32.mrb[14].mxu0  ;;  %v516_v39 = vpop.f32.mrb[14].mxu1 }
 0x3e5   :  { %v1037_v40 = vpop.f32.mrb[15].mxu0  ;;  %v1040_v41 = vpop.f32.mrb[15].mxu1  ;;  %v548_v42 = vsel %vm152_vm0, %v516_v39, -inf  ;;  %v545_v43 = vsel %vm152_vm0, %v511_v59, -inf }
 0x3e6   :  { %549 = vmax.xlane.f32.xlu1 %v548_v42  ;;  %546 = vmax.xlane.f32.xlu0 %v545_v43 }
 0x3e8   :  { %v521_v44 = vpop.f32.mrb[16].mxu1 }
 0x3e9   :  { %v1043_v45 = vpop.f32.mrb[17].mxu1  ;;  %v551_v46 = vsel %vm152_vm0, %v521_v44, -inf }
 0x3ea   :  { %552 = vmax.xlane.f32.xlu0 %v551_v46 }
 0x3ec   :  { %v526_v47 = vpop.f32.mrb[18].mxu1 }
 0x3ed   :  { %v1046_v48 = vpop.f32.mrb[19].mxu1  ;;  %v554_v21 = vsel %vm152_vm0, %v526_v47, -inf }
 0x3ee   :  { %555 = vmax.xlane.f32.xlu1 %v554_v21 }
 0x3f0   :  { %v531_v49 = vpop.f32.mrb[20].mxu1 }
 0x3f1   :  { %v1049_v50 = vpop.f32.mrb[21].mxu1  ;;  %v557_v51 = vsel %vm152_vm0, %v531_v49, -inf }
 0x3f2   :  { %558 = vmax.xlane.f32.xlu0 %v557_v51  ;;  %v1572_v51 = vld [vmem:[%s1734_s3 + $0x20] sm:$0xff] }
 0x3f4   :  { %v536_v52 = vpop.f32.mrb[22].mxu1 }
 0x3f5   :  { %v1052_v53 = vpop.f32.mrb[23].mxu1  ;;  %v560_v54 = vsel %vm152_vm0, %v536_v52, -inf }
 0x3f6   :  { %561 = vmax.xlane.f32.xlu1 %v560_v54 }
 0x3f8   :  { %v541_v55 = vpop.f32.mrb[24].mxu1 }
 0x3f9   :  { %v1055_v56 = vpop.f32.mrb[25].mxu1  ;;  %v563_v57 = vsel %vm171_vm1, %v541_v55, -inf }
 0x3fa   :  { %564 = vmax.xlane.f32.xlu0 %v563_v57  ;;  %v738_v57 = vmul.f32 %v1572_v51, %v1572_v51 }
 0x473   :  { %v550_v58 = vpop.xlane.xlu1 %549  ;;  %v547_v60 = vpop.xlane.xlu0 %546 }
 0x474   :  { %v567_v61 = vsub.f32 %v516_v39, %v550_v58  ;;  %v566_v62 = vsub.f32 %v511_v59, %v547_v60  ;;  %v736_v59 = vmul.f32 %v1553_v36, %v1553_v36  ;;  %v1563_v39 = vld [vmem:[%s1734_s3 + $0x18] sm:$0xff] }
 0x475   :  { %v737_v41 = vmul.f32 %v1563_v39, %v1563_v39 }
 0x476   :  { %v575_v63 = vmul.f32 1.442695, %v567_v61  ;;  %v573_v1 = vmul.f32 1.442695, %v566_v62  ;;  %v747_v40 = vsel %vm152_vm0, %v736_v59, 0.0  ;;  %v1589_v61 = vld [vmem:[%s1734_s3 + $0x28] sm:$0xff] }
 0x477   :  { %v553_v2 = vpop.xlane.xlu0 %552  ;;  %v750_v42 = vsel %vm152_vm0, %v737_v41, 0.0 }
 0x478   :  { %1115 = vpow2.f32 %v575_v63  ;;  %v568_v3 = vsub.f32 %v521_v44, %v553_v2 }
 0x479   :  { %1117 = vpow2.f32 %v573_v1 }
 0x47a   :  { %v577_v4 = vmul.f32 1.442695, %v568_v3 }
 0x47b   :  { %v556_v5 = vpop.xlane.xlu1 %555 }
 0x47c   :  { %1119 = vpow2.f32 %v577_v4  ;;  %v569_v6 = vsub.f32 %v526_v47, %v556_v5  ;;  %v753_v4 = vsel %vm152_vm0, %v738_v57, 0.0  ;;  %v739_v5 = vmul.f32 %v1589_v61, %v1589_v61 }
 0x47e   :  { %v579_v7 = vmul.f32 1.442695, %v569_v6 }
 0x47f   :  { %v559_v8 = vpop.xlane.xlu0 %558 }
 0x480   :  { %1121 = vpow2.f32 %v579_v7  ;;  %v570_v9 = vsub.f32 %v531_v49, %v559_v8  ;;  %v1605_v8 = vld [vmem:[%s1734_s3 + $0x30] sm:$0x3]  ;;  %s1226_s3 = smov [#allocation3]  }
 0x481   :  { %s900_s10 = sshll.u32 %s1226_s3, 4  ;;  %s901_s10 = int_to_ptr.vmem [resolvable:$true] %s900_s10 }
 0x482   :  { %v1116_v10 = vpop.eup %1115  ;;  %v581_v11 = vmul.f32 1.442695, %v570_v9  ;;  %s1199_s1 = scalar_lea.vmem %s901_s10, 16  ;;  %s1203_s11 = scalar_lea.vmem %s901_s10, 32 }
 0x483   :  { %v1118_v12 = vpop.eup %1117  ;;  %v562_v13 = vpop.xlane.xlu1 %561  ;;  %v590_v14 = vsel %vm152_vm0, %v1116_v10, 0.0  ;;  %p1200_p0 = scmp.ne.s32.totalorder %s901_s10, %s1199_s1  ;;  %p1204_p1 = scmp.lt.s32.totalorder %s901_s10, %s901_s10 }
 0x484   :  { %1123 = vpow2.f32 %v581_v11  ;;  %v571_v15 = vsub.f32 %v536_v52, %v562_v13  ;;  %591 = vadd.xlane.f32.xlu0 %v590_v14  ;;  %v587_v16 = vsel %vm152_vm0, %v1118_v12, 0.0  ;;  %v740_v14 = vmul.f32 %v1605_v8, %v1605_v8  ;;  %p1205_p2 = scmp.lt.s32.totalorder %s1203_s11, %s1199_s1 }
 0x485   :  { %588 = vadd.xlane.f32.xlu1 %v587_v16 }
 0x486   :  { %v1120_v17 = vpop.eup %1119  ;;  %v583_v18 = vmul.f32 1.442695, %v571_v15  ;;  %p1206_p3 = por %p1205_p2, %p1204_p1 }
 0x487   :  { %v565_v19 = vpop.xlane.xlu0 %564  ;;  %v593_v22 = vsel %vm152_vm0, %v1120_v17, 0.0 }
 0x488   :  { %1125 = vpow2.f32 %v583_v18  ;;  %v572_v23 = vsub.f32 %v541_v55, %v565_v19  ;;  %v759_v19 = vsel %vm171_vm1, %v740_v14, 0.0  ;;  %p1207_p4 = pnand %p1206_p3, %p1200_p0 }
 0x489   :  { %594 = vadd.xlane.f32.xlu1 %v593_v22 }
 0x48a   :  { %v1521_v24 = vpop.eup %1121  ;;  %v585_v0 = vmul.f32 1.442695, %v572_v23 }
 0x48b   :  { %v596_v25 = vsel %vm152_vm0, %v1521_v24, 0.0 }
 0x48c   :  { %1127 = vpow2.f32 %v585_v0  ;;  %597 = vadd.xlane.f32.xlu0 %v596_v25 }
 0x48e   :  { %v1525_v26 = vpop.eup %1123 }
 0x48f   :  { %v599_v27 = vsel %vm152_vm0, %v1525_v26, 0.0 }
 0x490   :  { %600 = vadd.xlane.f32.xlu1 %v599_v27 }
 0x492   :  { %v1536_v30 = vpop.eup %1125 }
 0x493   :  { %v602_v32 = vsel %vm152_vm0, %v1536_v30, 0.0 }
 0x494   :  { %603 = vadd.xlane.f32.xlu0 %v602_v32 }
 0x496   :  { %v1548_v35 = vpop.eup %1127 }
 0x497   :  { %v605_v37 = vsel %vm171_vm1, %v1548_v35, 0.0 }
 0x498   :  { %606 = vadd.xlane.f32.xlu1 %v605_v37  ;;  %742 = vadd.xlane.f32.xlu0 %v741_v33 }
 0x49c   :  { %745 = vadd.xlane.f32.xlu1 %v744_v38 }
 0x4a0   :  { %748 = vadd.xlane.f32.xlu1 %v747_v40 }
 0x4a4   :  { %751 = vadd.xlane.f32.xlu1 %v750_v42 }
 0x511   :  { %v592_v43 = vpop.xlane.xlu0 %591 }
 0x512   :  { %v589_v44 = vpop.xlane.xlu1 %588  ;;  %1129 = vrcp.f32 %v592_v43 }
 0x513   :  { %1131 = vrcp.f32 %v589_v44 }
 0x516   :  { %v595_v45 = vpop.xlane.xlu1 %594 }
 0x517   :  { %1133 = vrcp.f32 %v595_v45 }
 0x519   :  { %v598_v46 = vpop.xlane.xlu0 %597 }
 0x51a   :  { %1135 = vrcp.f32 %v598_v46 }
 0x51c   :  { %v1130_v47 = vpop.eup %1129 }
 0x51d   :  { %v1132_v48 = vpop.eup %1131  ;;  %v601_v21 = vpop.xlane.xlu1 %600  ;;  %v611_v49 = vmul.f32 %v1130_v47, %v1116_v10 }
 0x51e   :  { %1137 = vrcp.f32 %v601_v21  ;;  %v609_v50 = vmul.f32 %v1132_v48, %v1118_v12  ;;  %v756_v12 = vsel %vm152_vm0, %v739_v5, 0.0 }
 0x51f   :  { %v1575_v52 = vmul.f32 %v1541_v31, %v611_v49 }
 0x520   :  { %v1578_v53 = vmul.f32 %v1532_v28, %v609_v50 }
 0x521   :  { %v1134_v54 = vpop.eup %1133  ;;  %v604_v55 = vpop.xlane.xlu0 %603  ;;  %v637_v56 = vmul.f32 %v1575_v52, %v1575_v52 }
 0x522   :  { %1139 = vrcp.f32 %v604_v55  ;;  %v636_v58 = vmul.f32 %v1578_v53, %v1578_v53  ;;  %v613_v60 = vmul.f32 %v1134_v54, %v1120_v17 }
 0x523   :  { %v646_v62 = vsel %vm152_vm0, %v637_v56, 0.0 }
 0x524   :  { %v1136_v63 = vpop.eup %1135  ;;  %v643_v1 = vsel %vm152_vm0, %v636_v58, 0.0  ;;  %647 = vadd.xlane.f32.xlu1 %v646_v62  ;;  %v1594_v2 = vmul.f32 %v1553_v36, %v613_v60 }
 0x525   :  { %644 = vadd.xlane.f32.xlu0 %v643_v1  ;;  %v607_v3 = vpop.xlane.xlu1 %606  ;;  %v615_v6 = vmul.f32 %v1136_v63, %v1521_v24  ;;  %v743_v37 = vpop.xlane.xlu0 %742 }
 0x526   :  { %1141 = vrcp.f32 %v607_v3  ;;  %v638_v7 = vmul.f32 %v1594_v2, %v1594_v2  ;;  %vm764_vm9 = vcmp.eq.f32.partialorder %v743_v37, inf  ;;  %v767_v43 = vand.u32 2147483648, %v743_v37 }
 0x527   :  { %v1608_v9 = vmul.f32 %v1563_v39, %v615_v6  ;;  %1143 = vrsqrt.f32 %v743_v37  ;;  %vm766_vm3 = vcmp.eq.f32.partialorder %v743_v37, 0.0 }
 0x528   :  { %v1138_v10 = vpop.eup %1137  ;;  %v649_v11 = vsel %vm152_vm0, %v638_v7, 0.0  ;;  %754 = vadd.xlane.f32.xlu1 %v753_v4 }
 0x529   :  { %650 = vadd.xlane.f32.xlu0 %v649_v11  ;;  %v639_v13 = vmul.f32 %v1608_v9, %v1608_v9  ;;  %v617_v15 = vmul.f32 %v1138_v10, %v1525_v26  ;;  %v746_v34 = vpop.xlane.xlu1 %745 }
 0x52a   :  { %1145 = vrsqrt.f32 %v746_v34  ;;  %vm771_vm4 = vcmp.eq.f32.partialorder %v746_v34, inf  ;;  %vm773_vm6 = vcmp.eq.f32.partialorder %v746_v34, 0.0  ;;  %v774_v49 = vand.u32 2147483648, %v746_v34 }
 0x52b   :  { %v652_v16 = vsel %vm152_vm0, %v639_v13, 0.0  ;;  %v1619_v17 = vmul.f32 %v1572_v51, %v617_v15 }
 0x52c   :  { %v1140_v18 = vpop.eup %1139  ;;  %757 = vadd.xlane.f32.xlu1 %v756_v12 }
 0x52d   :  { %653 = vadd.xlane.f32.xlu0 %v652_v16  ;;  %v640_v22 = vmul.f32 %v1619_v17, %v1619_v17  ;;  %v619_v23 = vmul.f32 %v1140_v18, %v1536_v30  ;;  %v749_v38 = vpop.xlane.xlu1 %748 }
 0x52e   :  { %1147 = vrsqrt.f32 %v749_v38  ;;  %vm778_vm5 = vcmp.eq.f32.partialorder %v749_v38, inf  ;;  %v781_v56 = vand.u32 2147483648, %v749_v38  ;;  %vm780_vm7 = vcmp.eq.f32.partialorder %v749_v38, 0.0 }
 0x52f   :  { %v655_v24 = vsel %vm152_vm0, %v640_v22, 0.0  ;;  %v1627_v0 = vmul.f32 %v1589_v61, %v619_v23 }
 0x530   :  { %v1142_v25 = vpop.eup %1141  ;;  %760 = vadd.xlane.f32.xlu1 %v759_v19 }
 0x531   :  { %656 = vadd.xlane.f32.xlu0 %v655_v24  ;;  %v641_v26 = vmul.f32 %v1627_v0, %v1627_v0  ;;  %v621_v27 = vmul.f32 %v1142_v25, %v1548_v35  ;;  %v752_v59 = vpop.xlane.xlu1 %751  ;;  %v1144_v35 = vpop.eup %1143 }
 0x532   :  { %1149 = vrsqrt.f32 %v752_v59  ;;  %v763_v40 = vmul.f32 %v1144_v35, %v743_v37  ;;  %vm785_vm10 = vcmp.eq.f32.partialorder %v752_v59, inf  ;;  %v788_v1 = vand.u32 2147483648, %v752_v59 }
 0x533   :  { %v658_v29 = vsel %vm152_vm0, %v641_v26, 0.0  ;;  %v1634_v32 = vmul.f32 %v1605_v8, %v621_v27  ;;  %vm787_vm11 = vcmp.eq.f32.partialorder %v752_v59, 0.0 }
 0x534   :  { %v1146_v41 = vpop.eup %1145  ;;  %v765_v46 = vsel %vm764_vm9, %v743_v37, %v763_v40 }
 0x535   :  { %659 = vadd.xlane.f32.xlu0 %v658_v29  ;;  %v642_v30 = vmul.f32 %v1634_v32, %v1634_v32  ;;  %v770_v45 = vmul.f32 %v1146_v41, %v746_v34  ;;  %v768_v50 = vsel %vm766_vm3, %v767_v43, %v765_v46 }
 0x536   :  { %v811_v62 = vmax.f32 %v768_v50, 1e-12 }
 0x537   :  { %v661_v33 = vsel %vm171_vm1, %v642_v30, 0.0  ;;  %v772_v55 = vsel %vm771_vm4, %v746_v34, %v770_v45 }
 0x538   :  { %v1148_v42 = vpop.eup %1147  ;;  %v775_v63 = vsel %vm773_vm6, %v774_v49, %v772_v55 }
 0x539   :  { %662 = vadd.xlane.f32.xlu0 %v661_v33  ;;  %v777_v21 = vmul.f32 %v1148_v42, %v749_v38  ;;  %v812_v10 = vmax.f32 %v775_v63, 1e-12 }
 0x53b   :  { %v779_v60 = vsel %vm778_vm5, %v749_v38, %v777_v21 }
 0x53c   :  { %v1150_v48 = vpop.eup %1149  ;;  %v782_v4 = vsel %vm780_vm7, %v781_v56, %v779_v60 }
 0x53d   :  { %v784_v57 = vmul.f32 %v1150_v48, %v752_v59  ;;  %v813_v12 = vmax.f32 %v782_v4, 1e-12 }
 0x53f   :  { %v786_v5 = vsel %vm785_vm10, %v752_v59, %v784_v57 }
 0x540   :  { %v789_v13 = vsel %vm787_vm11, %v788_v1, %v786_v5 }
 0x541   :  { %v814_v34 = vmax.f32 %v789_v13, 1e-12 }
 0x5b1   :  { %v648_v44 = vpop.xlane.xlu1 %647 }
 0x5b2   :  { %1151 = vrsqrt.f32 %v648_v44  ;;  %v645_v47 = vpop.xlane.xlu0 %644  ;;  %vm673_vm12 = vcmp.eq.f32.partialorder %v648_v44, inf  ;;  %vm675_vm14 = vcmp.eq.f32.partialorder %v648_v44, 0.0  ;;  %v676_v16 = vand.u32 2147483648, %v648_v44 }
 0x5b3   :  { %1153 = vrsqrt.f32 %v645_v47  ;;  %vm666_vm15 = vcmp.eq.f32.partialorder %v645_v47, inf  ;;  %v669_v23 = vand.u32 2147483648, %v645_v47  ;;  %vm668_vm13 = vcmp.eq.f32.partialorder %v645_v47, 0.0 }
 0x5b5   :  { %v1639_v54 = vpop.xlane.xlu1 %754 }
 0x5b6   :  { %1155 = vrsqrt.f32 %v1639_v54  ;;  %v651_v58 = vpop.xlane.xlu0 %650  ;;  %vm792_vm2 = vcmp.eq.f32.partialorder %v1639_v54, inf  ;;  %v795_v42 = vand.u32 2147483648, %v1639_v54  ;;  %vm794_vm4 = vcmp.eq.f32.partialorder %v1639_v54, 0.0 }
 0x5b7   :  { %1157 = vrsqrt.f32 %v651_v58  ;;  %vm680_vm9 = vcmp.eq.f32.partialorder %v651_v58, inf  ;;  %v683_v40 = vand.u32 2147483648, %v651_v58  ;;  %vm682_vm3 = vcmp.eq.f32.partialorder %v651_v58, 0.0 }
 0x5b9   :  { %v1642_v3 = vpop.xlane.xlu1 %757 }
 0x5ba   :  { %1159 = vrsqrt.f32 %v1642_v3  ;;  %v1645_v6 = vpop.xlane.xlu0 %653  ;;  %vm799_vm7 = vcmp.eq.f32.partialorder %v1642_v3, inf  ;;  %vm801_vm11 = vcmp.eq.f32.partialorder %v1642_v3, 0.0 }
 0x5bb   :  { %1161 = vrsqrt.f32 %v1645_v6  ;;  %vm687_vm5 = vcmp.eq.f32.partialorder %v1645_v6, inf  ;;  %v690_v55 = vand.u32 2147483648, %v1645_v6  ;;  %vm689_vm6 = vcmp.eq.f32.partialorder %v1645_v6, 0.0 }
 0x5bc   :  { %v1152_v7 = vpop.eup %1151  ;;  %1163 = vrcp.f32 %v811_v62 }
 0x5bd   :  { %v1154_v11 = vpop.eup %1153  ;;  %v672_v14 = vmul.f32 %v1152_v7, %v648_v44  ;;  %v1648_v15 = vpop.xlane.xlu1 %760 }
 0x5be   :  { %v665_v18 = vmul.f32 %v1154_v11, %v645_v47  ;;  %1165 = vrsqrt.f32 %v1648_v15  ;;  %v1651_v19 = vpop.xlane.xlu0 %656 }
 0x5bf   :  { %v674_v22 = vsel %vm673_vm12, %v648_v44, %v672_v14  ;;  %1167 = vrsqrt.f32 %v1651_v19  ;;  %vm694_vm10 = vcmp.eq.f32.partialorder %v1651_v19, inf  ;;  %vm696_vm12 = vcmp.eq.f32.partialorder %v1651_v19, 0.0 }
 0x5c0   :  { %v1156_v24 = vpop.eup %1155  ;;  %1169 = vrcp.f32 %v812_v10  ;;  %v677_v25 = vsel %vm675_vm14, %v676_v16, %v674_v22  ;;  %v667_v26 = vsel %vm666_vm15, %v645_v47, %v665_v18  ;;  %v802_v10 = vand.u32 2147483648, %v1642_v3 }
 0x5c1   :  { %v1158_v27 = vpop.eup %1157  ;;  %1171 = vrcp.f32 %v813_v12  ;;  %v714_v29 = vmax.f32 %v677_v25, 1e-12  ;;  %v670_v30 = vsel %vm668_vm13, %v669_v23, %v667_v26  ;;  %v791_v33 = vmul.f32 %v1156_v24, %v1639_v54 }
 0x5c2   :  { %v713_v37 = vmax.f32 %v670_v30, 1e-12  ;;  %v679_v38 = vmul.f32 %v1158_v27, %v651_v58  ;;  %v1656_v59 = vpop.xlane.xlu0 %659  ;;  %vm806_vm14 = vcmp.eq.f32.partialorder %v1648_v15, inf  ;;  %vm808_vm15 = vcmp.eq.f32.partialorder %v1648_v15, 0.0 }
 0x5c3   :  { %1173 = vrcp.f32 %v714_v29  ;;  %v793_v35 = vsel %vm792_vm2, %v1639_v54, %v791_v33  ;;  %v809_v25 = vand.u32 2147483648, %v1648_v15  ;;  %vm701_vm13 = vcmp.eq.f32.partialorder %v1656_v59, inf }
 0x5c4   :  { %v1160_v41 = vpop.eup %1159  ;;  %1175 = vrcp.f32 %v713_v37  ;;  %v681_v43 = vsel %vm680_vm9, %v651_v58, %v679_v38  ;;  %v796_v47 = vsel %vm794_vm4, %v795_v42, %v793_v35  ;;  %vm703_vm2 = vcmp.eq.f32.partialorder %v1656_v59, 0.0 }
 0x5c5   :  { %v1162_v44 = vpop.eup %1161  ;;  %v684_v45 = vsel %vm682_vm3, %v683_v40, %v681_v43  ;;  %1177 = vrsqrt.f32 %v1656_v59  ;;  %v798_v21 = vmul.f32 %v1160_v41, %v1642_v3  ;;  %v815_v58 = vmax.f32 %v796_v47, 1e-12 }
 0x5c6   :  { %v1164_v46 = vpop.eup %1163  ;;  %v715_v48 = vmax.f32 %v684_v45, 1e-12  ;;  %v686_v49 = vmul.f32 %v1162_v44, %v1645_v6  ;;  %v1664_v50 = vpop.xlane.xlu0 %662  ;;  %1179 = vrcp.f32 %v814_v34 }
 0x5c7   :  { %v800_v63 = vsel %vm799_vm7, %v1642_v3, %v798_v21  ;;  %v819_v26 = vmul.f32 %v1164_v46, %v1532_v28  ;;  %vm708_vm9 = vcmp.eq.f32.partialorder %v1664_v50, inf  ;;  %vm710_vm3 = vcmp.eq.f32.partialorder %v1664_v50, 0.0 }
 0x5c8   :  { %v1166_v56 = vpop.eup %1165  ;;  %1181 = vrcp.f32 %v715_v48  ;;  %v688_v54 = vsel %vm687_vm5, %v1645_v6, %v686_v49  ;;  %v697_v6 = vand.u32 2147483648, %v1651_v19  ;;  %v803_v13 = vsel %vm801_vm11, %v802_v10, %v800_v63 }
 0x5c9   :  { %v1168_v57 = vpop.eup %1167  ;;  %v691_v60 = vsel %vm689_vm6, %v690_v55, %v688_v54  ;;  %1183 = vrsqrt.f32 %v1664_v50  ;;  %v805_v4 = vmul.f32 %v1166_v56, %v1648_v15  ;;  %v816_v27 = vmax.f32 %v803_v13, 1e-12 }
 0x5ca   :  { %v1170_v62 = vpop.eup %1169  ;;  %v716_v1 = vmax.f32 %v691_v60, 1e-12  ;;  %v693_v5 = vmul.f32 %v1168_v57, %v1651_v19 }
 0x5cb   :  { %v1172_v7 = vpop.eup %1171  ;;  %v821_v16 = vmul.f32 %v1170_v62, %v1541_v31  ;;  %v807_v22 = vsel %vm806_vm14, %v1648_v15, %v805_v4 }
 0x5cc   :  { %1185 = vrcp.f32 %v716_v1  ;;  %v695_v11 = vsel %vm694_vm10, %v1651_v19, %v693_v5  ;;  %v810_v33 = vsel %vm808_vm15, %v809_v25, %v807_v22  ;;  %v823_v41 = vmul.f32 %v1172_v7, %v1553_v36 }
 0x5cd   :  { %v1174_v12 = vpop.eup %1173  ;;  %v698_v14 = vsel %vm696_vm12, %v697_v6, %v695_v11  ;;  %1187 = vrcp.f32 %v815_v58  ;;  %v817_v42 = vmax.f32 %v810_v33, 1e-12 }
 0x5ce   :  { %v1176_v18 = vpop.eup %1175  ;;  %v717_v23 = vmax.f32 %v698_v14, 1e-12  ;;  %v723_v24 = vmul.f32 %v1174_v12, %v1575_v52  ;;  %v704_v52 = vand.u32 2147483648, %v1656_v59 }
 0x5cf   :  { %v1178_v3 = vpop.eup %1177  ;;  %v721_v19 = vmul.f32 %v1176_v18, %v1578_v53 }
 0x5d0   :  { %1189 = vrcp.f32 %v717_v23  ;;  %v700_v31 = vmul.f32 %v1178_v3, %v1656_v59  ;;  %v833_v29 = vmul.f32 %v821_v16, %v723_v24  ;;  %v1180_v30 = vpop.eup %1179 }
 0x5d1   :  { %v832_v34 = vmul.f32 %v819_v26, %v721_v19  ;;  %1191 = vrcp.f32 %v816_v27  ;;  %v825_v21 = vmul.f32 %v1180_v30, %v1563_v39 }
 0x5d2   :  { %v1182_v37 = vpop.eup %1181  ;;  %v702_v38 = vsel %vm701_vm13, %v1656_v59, %v700_v31  ;;  %v842_v53 = vsel %vm152_vm0, %v833_v29, 0.0  ;;  %v711_v59 = vand.u32 2147483648, %v1664_v50  ;;  %v263_v31 = vrot.slane %v1464_v20, 4 }
 0x5d3   :  { %v1184_v28 = vpop.eup %1183  ;;  %v705_v15 = vsel %vm703_vm2, %v704_v52, %v702_v38  ;;  %843 = vadd.xlane.f32.xlu1 %v842_v53  ;;  %v839_v35 = vsel %vm152_vm0, %v832_v34, 0.0  ;;  %v725_v40 = vmul.f32 %v1182_v37, %v1594_v2 }
 0x5d4   :  { %v718_v43 = vmax.f32 %v705_v15, 1e-12  ;;  %v707_v44 = vmul.f32 %v1184_v28, %v1664_v50  ;;  %840 = vadd.xlane.f32.xlu0 %v839_v35  ;;  %v264_v38 = vadd.f32 %v263_v31, %v1464_v20 }
 0x5d5   :  { %v834_v45 = vmul.f32 %v823_v41, %v725_v40 }
 0x5d6   :  { %v1186_v46 = vpop.eup %1185  ;;  %1193 = vrcp.f32 %v718_v43  ;;  %v709_v47 = vsel %vm708_vm9, %v1664_v50, %v707_v44  ;;  %v265_v40 = vrot.slane %v264_v38, 2 }
 0x5d7   :  { %v712_v2 = vsel %vm710_vm3, %v711_v59, %v709_v47  ;;  %v845_v36 = vsel %vm152_vm0, %v834_v45, 0.0  ;;  %v727_v48 = vmul.f32 %v1186_v46, %v1608_v9  ;;  %v1188_v49 = vpop.eup %1187  ;;  %1195 = vrcp.f32 %v817_v42 }
 0x5d8   :  { %v719_v55 = vmax.f32 %v712_v2, 1e-12  ;;  %846 = vadd.xlane.f32.xlu0 %v845_v36  ;;  %v827_v50 = vmul.f32 %v1188_v49, %v1572_v51  ;;  %v266_v44 = vadd.f32 %v265_v40, %v264_v38 }
 0x5d9   :  { %v835_v56 = vmul.f32 %v825_v21, %v727_v48  ;;  %v889_v48 = vld [vmem:[#allocation2] sm:$0x1] }
 0x5da   :  { %v1190_v54 = vpop.eup %1189  ;;  %1197 = vrcp.f32 %v719_v55  ;;  %v267_v46 = vrot.slane %v266_v44, 1 }
 0x5db   :  { %v848_v57 = vsel %vm152_vm0, %v835_v56, 0.0  ;;  %v729_v58 = vmul.f32 %v1190_v54, %v1619_v17  ;;  %v1192_v62 = vpop.eup %1191 }
 0x5dc   :  { %849 = vadd.xlane.f32.xlu1 %v848_v57  ;;  %v829_v1 = vmul.f32 %v1192_v62, %v1589_v61  ;;  %v268_v2 = vadd.f32 %v267_v46, %v266_v44 }
 0x5dd   :  { %v836_v60 = vmul.f32 %v827_v50, %v729_v58 }
 0x5de   :  { %v269_v20 = vmul.f32 0.0016, %v268_v2 }
 0x5df   :  { %v851_v9 = vsel %vm152_vm0, %v836_v60, 0.0 }
 0x5e0   :  { %v1194_v63 = vpop.eup %1193  ;;  %852 = vadd.xlane.f32.xlu0 %v851_v9 }
 0x5e1   :  { %v731_v39 = vmul.f32 %v1194_v63, %v1627_v0  ;;  %v1196_v4 = vpop.eup %1195 }
 0x5e2   :  { %v831_v51 = vmul.f32 %v1196_v4, %v1605_v8 }
 0x5e3   :  { %v837_v5 = vmul.f32 %v829_v1, %v731_v39 }
 0x5e4   :  { %v1198_v7 = vpop.eup %1197 }
 0x5e5   :  { %v854_v10 = vsel %vm152_vm0, %v837_v5, 0.0  ;;  %v733_v17 = vmul.f32 %v1198_v7, %v1634_v32  ;;  %vm892_vm0 = vcmask 0  }
 0x5e6   :  { %855 = vadd.xlane.f32.xlu1 %v854_v10 }
 0x5e7   :  { %v838_v6 = vmul.f32 %v831_v51, %v733_v17 }
 0x5e9   :  { %v857_v11 = vsel %vm171_vm1, %v838_v6, 0.0 }
 0x5ea   :  { %858 = vadd.xlane.f32.xlu0 %v857_v11 }
 0x660   :  { %v844_v13 = vpop.xlane.xlu1 %843 }
 0x661   :  { %v841_v12 = vpop.xlane.xlu0 %840  ;;  %v861_v0 = vsub.f32 1.0, %v844_v13 }
 0x662   :  { %v860_v16 = vsub.f32 1.0, %v841_v12 }
 0x663   :  { %v868_v23 = vmul.f32 %v861_v0, %v861_v0 }
 0x664   :  { %v867_v24 = vmul.f32 %v860_v16, %v860_v16 }
 0x665   :  { %v847_v14 = vpop.xlane.xlu0 %846 }
 0x666   :  { %v862_v18 = vsub.f32 1.0, %v847_v14  ;;  %v874_v19 = vadd.f32 %v868_v23, %v867_v24 }
 0x668   :  { %v869_v25 = vmul.f32 %v862_v18, %v862_v18 }
 0x669   :  { %v850_v61 = vpop.xlane.xlu1 %849 }
 0x66a   :  { %v863_v3 = vsub.f32 1.0, %v850_v61  ;;  %v875_v29 = vadd.f32 %v874_v19, %v869_v25 }
 0x66c   :  { %v870_v8 = vmul.f32 %v863_v3, %v863_v3 }
 0x66d   :  { %v853_v22 = vpop.xlane.xlu0 %852 }
 0x66e   :  { %v864_v32 = vsub.f32 1.0, %v853_v22  ;;  %v876_v33 = vadd.f32 %v875_v29, %v870_v8 }
 0x670   :  { %v871_v30 = vmul.f32 %v864_v32, %v864_v32 }
 0x672   :  { %v877_v53 = vadd.f32 %v876_v33, %v871_v30 }
 0x673   :  { %v856_v26 = vpop.xlane.xlu1 %855 }
 0x674   :  { %v865_v27 = vsub.f32 1.0, %v856_v26 }
 0x676   :  { %v872_v52 = vmul.f32 %v865_v27, %v865_v27 }
 0x677   :  { %v859_v34 = vpop.xlane.xlu0 %858 }
 0x678   :  { %v866_v37 = vsub.f32 1.0, %v859_v34  ;;  %v878_v15 = vadd.f32 %v877_v53, %v872_v52 }
 0x67a   :  { %v873_v28 = vmul.f32 %v866_v37, %v866_v37 }
 0x67c   :  { %v879_v35 = vsel %vm319_vm8, %v873_v28, 0.0 }
 0x67d   :  { %v880_v41 = vadd.f32 %v879_v35, %v878_v15 }
 0x67f   :  { %v881_v42 = vrot.slane %v880_v41, 4 }
 0x681   :  { %v882_v43 = vadd.f32 %v881_v42, %v880_v41 }
 0x683   :  { %v883_v59 = vrot.slane %v882_v43, 2 }
 0x685   :  { %v884_v45 = vadd.f32 %v883_v59, %v882_v43 }
 0x687   :  { %v885_v47 = vrot.slane %v884_v45, 1 }
 0x689   :  { %v886_v36 = vadd.f32 %v885_v47, %v884_v45 }
 0x68b   :  { %v888_v21 = vmul.f32 0.02, %v886_v36 }
 0x68d   :  { %v890_v49 = vadd.f32 %v889_v48, %v888_v21 }
 0x68f   :  { %v891_v55 = vadd.f32 %v890_v49, %v269_v20 }
 0x691   :  { %893 = vst.msk [vmem:[#allocation3] sm:$0x1] %vm892_vm0, %v891_v55 }
 0x692   :  { %1210 = shalt.err (!%p1207_p4)
}
 0x693   :  { %s1211_s14 = scalar_lea.hbm %s1736_s5, 16 }
 0x694   :  { %p1212_p5 = scmp.ne.s32.totalorder %s1736_s5, %s1211_s14  ;;  %p1215_p6 = scmp.lt.u32.totalorder %s1211_s14, %s1736_s5 }
 0x696   :  { %p1217_p7 = pnand %p1215_p6, %p1212_p5 }
 0x698   :  { %1220 = shalt.err (!%p1217_p7)
}
 0x699   :  { %903 = dma.vmem_to_hbm [thread:$0]  %s901_s10, 16, %s1736_s5, [#allocation4]  }
 0x69a   :  { %1221 = dma.done.wait [#allocation4], 16  }
 0x69b   :  { %1222 = vsyncadd [#allocation4], 4294967280 }
 0x69c   :  { %907 = vsyncpa [#allocation4], 1 }

// kernel: premodel_forward.2
= control target key start
LH: loop header
LB: loop body
LE: loop exit
PB: predicated region body
PF: predicated region fallthrough
CT: control target
= control target key end

     0   :  { %s20953_s0 = inlined_call_operand.vmem [shape: f32[50,16], index: 0, kind: input, shape index: {}]   ;;  %s20954_s1 = inlined_call_operand.vmem [shape: f32[50,16], index: 1, kind: input, shape index: {}]   ;;  %s20955_s2 = inlined_call_operand.vmem [shape: f32[50,50], index: 2, kind: input, shape index: {}]   ;;  %s20956_s3 = inlined_call_operand.vmem [shape: f32[50,50], index: 3, kind: input, shape index: {}]   ;;  %s20957_s4 = inlined_call_operand.vmem [shape: f32[16,32], index: 4, kind: input, shape index: {}]   ;;  %s20958_s5 = inlined_call_operand.vmem [shape: f32[32,32], index: 5, kind: input, shape index: {}]   ;;  %s20959_s6 = inlined_call_operand.vmem [shape: f32[32,16], index: 6, kind: input, shape index: {}]   ;;  %s20960_s7 = inlined_call_operand.vmem [shape: f32[1,16], index: 7, kind: input, shape index: {}]   ;;  %s20961_s8 = inlined_call_operand.vmem [shape: f32[32,16], index: 8, kind: input, shape index: {}]   ;;  %s20962_s9 = inlined_call_operand.vmem [shape: f32[1,16], index: 9, kind: input, shape index: {}]   ;;  %s20963_s10 = inlined_call_operand.vmem [shape: f32[32,5], index: 10, kind: input, shape index: {}]   ;;  %s20964_s11 = inlined_call_operand.vmem [shape: f32[1,5], index: 11, kind: input, shape index: {}]   ;;  %s20965_s12 = inlined_call_operand.vmem [shape: f32[8,50], index: 12, kind: input, shape index: {}]   ;;  %s20966_s13 = inlined_call_operand.vmem [shape: f32[8,50], index: 13, kind: input, shape index: {}]   ;;  %s20967_s14 = inlined_call_operand.vmem [shape: f32[8,1], index: 14, kind: input, shape index: {}]   ;;  %s20968_s15 = inlined_call_operand.vmem [shape: f32[8,8,50], index: 15, kind: input, shape index: {}]   ;;  %s20969_s16 = inlined_call_operand.vmem [shape: f32[8,8,50], index: 16, kind: input, shape index: {}]   ;;  %s20970_s17 = inlined_call_operand.vmem [shape: f32[8,1], index: 17, kind: input, shape index: {}]   ;;  %s20971_s18 = inlined_call_operand.vmem [shape: f32[8,256,50], index: 18, kind: input, shape index: {}]   ;;  %s20972_s19 = inlined_call_operand.vmem [shape: f32[1,256], index: 19, kind: input, shape index: {}]   ;;  %s20973_s20 = inlined_call_operand.vmem [shape: s32[50,1], index: 20, kind: input, shape index: {}]   ;;  %s20974_s21 = inlined_call_operand.vmem [shape: f32[50,1], index: 21, kind: input, shape index: {}]   ;;  %s20975_s22 = inlined_call_operand.hbm [shape: f32[1,1], index: 22, kind: output, shape index: {0}]   ;;  %s20976_s23 = inlined_call_operand.vmem [shape: f32[50,32], index: 23, kind: output, shape index: {1}]   ;;  %s20977_s24 = inlined_call_operand.vmem [shape: f32[2,50,256], index: 24, kind: output, shape index: {2}]   ;;  %s20978_s25 = inlined_call_operand.vmem [shape: s32[50,1], index: 25, kind: output, shape index: {3}]  }
   0x1   :  { %21116 = sst [smem:[#allocation132_spill]] %s20953_s0 }
   0x2   :  { %21117 = sst [smem:[#allocation133_spill]] %s20954_s1 }
   0x3   :  { %21118 = sst [smem:[#allocation134_spill]] %s20955_s2 }
   0x4   :  { %21119 = sst [smem:[#allocation135_spill]] %s20956_s3 }
   0x5   :  { %21120 = sst [smem:[#allocation136_spill]] %s20957_s4 }
   0x6   :  { %21121 = sst [smem:[#allocation137_spill]] %s20958_s5 }
   0x7   :  { %21122 = sst [smem:[#allocation138_spill]] %s20959_s6 }
   0x8   :  { %21123 = sst [smem:[#allocation139_spill]] %s20960_s7 }
   0x9   :  { %21124 = sst [smem:[#allocation140_spill]] %s20961_s8 }
   0xa   :  { %21125 = sst [smem:[#allocation141_spill]] %s20962_s9 }
   0xb   :  { %s21126_s6 = sld [smem:[#allocation136_spill]]  ;;  %v20992_v2 = vmov 0.0|0.0   ;;  %vm15373_vm0 = vmmov 0   ;;  %v20990_v4 = vmov 0.0   ;;  %s21127_s1 = sld [smem:[#allocation132_spill]]  ;;  %vm115_vm1 = vcmask 130048  }
   0xc   :  { %13780 = vmatprep.subr.bf16.mxu0 %v20992_v2  ;;  %12942 = vmatprep.mubr.msk.f32.mxu0 %vm15373_vm0, %v20990_v4  ;;  %s21128_s4 = sld [smem:[#allocation137_spill]] }
   0xd   :  { %13783 = vmatprep.subr.bf16.mxu1 %v20992_v2  ;;  %12989 = vmatprep.mubr.msk.f32.mxu1 %vm15373_vm0, %v20990_v4 }
  0x11   :  { %v113_v0 = vld [vmem:[%s21126_s6] sm:$0xff]  ;;  %v114_v1 = vld [vmem:[%s21126_s6 + $0x8] sm:$0xff] }
  0x12   :  { %v13781_v3 = vpack.c.bf16 %v114_v1, %v113_v0  ;;  %v76_v5 = vld [vmem:[%s21127_s1] sm:$0xff]  ;;  %v280_v7 = vld [vmem:[%s21128_s4 + $0x8] sm:$0xff]  ;;  %v281_v8 = vld [vmem:[%s21128_s4 + $0x10] sm:$0xff] }
  0x13   :  { %v279_v6 = vld [vmem:[%s21128_s4] sm:$0xff]  ;;  %v282_v9 = vld [vmem:[%s21128_s4 + $0x18] sm:$0xff]  ;;  %v77_v10 = vld [vmem:[%s21127_s1 + $0x8] sm:$0xff] }
  0x14   :  { %13782 = vmatpush3.bf16.msra.mxu0 %v13781_v3  ;;  %v13784_v11 = vpack.c.bf16 %v280_v7, %v279_v6 }
  0x15   :  { %13789 = vmatprep.subr.bf16.mxu0 %v20992_v2 }
  0x17   :  { %12943 = vmatmul.mubr.msk.f32.vlgmr.msra.gmra.mrb[0].mxu0 %vm115_vm1, %v76_v5 }
  0x18   :  { %12945 = vmatprep.mubr.msk.f32.mxu0 %vm15373_vm0, %v20990_v4 }
  0x19   :  { %31 = vsyncpa [#allocation3], 0  ;;  %13785 = vmatpush3.bf16.msra.mxu1 %v13784_v11  ;;  %v13787_v12 = vpack.c.bf16 %v282_v9, %v281_v8  ;;  %v78_v13 = vld [vmem:[%s21127_s1 + $0x10] sm:$0xff]  ;;  %v79_v14 = vld [vmem:[%s21127_s1 + $0x18] sm:$0xff]  ;;  %s21129_s5 = sld [smem:[#allocation133_spill]]  ;;  %vm97_vm2 = vcmask 1041408  }
  0x1a   :  { %13786 = vmatprep.subr.bf16.mxu1 %v20992_v2  ;;  %v80_v15 = vld [vmem:[%s21127_s1 + $0x20] sm:$0xff]  ;;  %v81_v17 = vld [vmem:[%s21127_s1 + $0x28] sm:$0xff]  ;;  %v82_v19 = vld [vmem:[%s21127_s1 + $0x30] sm:$0x3]  ;;  %s21130_s7 = sld [smem:[#allocation138_spill]]  ;;  %vm283_vm3 = vcmask 261120  }
  0x1b   :  { %12946 = vmatmul.mubr.msk.f32.gmra.mrb[2].mxu0 %vm115_vm1, %v77_v10  ;;  %s21131_s29 = sld [smem:[#allocation140_spill]]  ;;  %vm453_vm4 = vcmask 261122   ;;  %s21132_s30 = sld [smem:[#allocation134_spill]]  ;;  %vm992_vm5 = vcmask 408576   ;;  %vm611_vm7 = vcmask 1045504   ;;  %vm15806_vm8 = vmpackc.low %vm283_vm3, %vm283_vm3  ;;  %vm460_vm9 = vcmask 257024  }
  0x1c   :  { %12948 = vmatprep.mubr.msk.f32.mxu0 %vm15373_vm0, %v20990_v4  ;;  %vm15760_vm6 = vmpackc.low %vm992_vm5, %vm992_vm5  ;;  %s21139_s4 = sld [smem:[#allocation139_spill]]  ;;  %s21152_s6 = sld [smem:[#allocation141_spill]]  ;;  %vm10625_vm10 = vcmask 39936   ;;  %vm10621_vm11 = vcmask 39938   ;;  %vm10641_vm12 = vcmask 35840   ;;  %vm10084_vm13 = vcmask 123904  }
  0x1d   :  { %13788 = vmatpush3.bf16.msra.mxu1 %v13787_v12  ;;  %s21179_s0 = sld [smem:[#allocation135_spill]]  ;;  %vm1011_vm14 = vcmask 402432   ;;  %s15377_s27 = smov [#allocation2]  }
  0x1e   :  { %13795 = vmatprep.subr.bf16.mxu1 %v20992_v2 }
  0x1f   :  { %12949 = vmatmul.mubr.msk.f32.gmra.mrb[4].mxu0 %vm115_vm1, %v78_v13  ;;  %v83_v16 = vld [vmem:[%s21129_s5] sm:$0xff]  ;;  %v84_v20 = vld [vmem:[%s21129_s5 + $0x8] sm:$0xff]  ;;  %v85_v23 = vld [vmem:[%s21129_s5 + $0x10] sm:$0xff] }
  0x20   :  { %12951 = vmatprep.mubr.msk.f32.mxu0 %vm15373_vm0, %v20990_v4  ;;  %v98_v18 = vrot.slane %v83_v16, 6  ;;  %v99_v22 = vrot.slane %v84_v20, 6  ;;  %v101_v25 = vrot.slane %v85_v23, 6  ;;  %v86_v26 = vld [vmem:[%s21129_s5 + $0x18] sm:$0xff]  ;;  %v87_v29 = vld [vmem:[%s21129_s5 + $0x20] sm:$0xff]  ;;  %v88_v32 = vld [vmem:[%s21129_s5 + $0x28] sm:$0xff] }
  0x21   :  { %v103_v28 = vrot.slane %v86_v26, 6  ;;  %v105_v31 = vrot.slane %v87_v29, 6  ;;  %v107_v34 = vrot.slane %v88_v32, 6  ;;  %v89_v35 = vld [vmem:[%s21129_s5 + $0x30] sm:$0x3]  ;;  %v462_v39 = vld [vmem:[%s21130_s7] sm:$0xff] }
  0x22   :  { %v112_v21 = vsel %vm97_vm2, %v82_v19, %v98_v18  ;;  %v100_v24 = vsel %vm97_vm2, %v98_v18, %v99_v22  ;;  %v102_v27 = vsel %vm97_vm2, %v99_v22, %v101_v25  ;;  %v109_v37 = vrot.slane %v89_v35, 6  ;;  %v463_v40 = vld [vmem:[%s21130_s7 + $0x8] sm:$0xff]  ;;  %v464_v41 = vld [vmem:[%s21130_s7 + $0x10] sm:$0xff]  ;;  %v465_v43 = vld [vmem:[%s21130_s7 + $0x18] sm:$0xff] }
  0x23   :  { %12952 = vmatmul.mubr.msk.f32.gmra.mrb[6].mxu0 %vm115_vm1, %v79_v14  ;;  %v104_v30 = vsel %vm97_vm2, %v101_v25, %v103_v28  ;;  %v106_v33 = vsel %vm97_vm2, %v103_v28, %v105_v31  ;;  %v108_v36 = vsel %vm97_vm2, %v105_v31, %v107_v34  ;;  %v13790_v42 = vpack.c.bf16 %v463_v40, %v462_v39  ;;  %v594_v9 = vld [vmem:[%s21131_s29] sm:$0xff]  ;;  %v595_v10 = vld [vmem:[%s21131_s29 + $0x8] sm:$0xff]  ;;  %v596_v12 = vld [vmem:[%s21131_s29 + $0x10] sm:$0xff] }
  0x24   :  { %12954 = vmatprep.mubr.msk.f32.mxu0 %vm15373_vm0, %v20990_v4  ;;  %v110_v38 = vsel %vm97_vm2, %v107_v34, %v109_v37  ;;  %v13793_v44 = vpack.c.bf16 %v465_v43, %v464_v41  ;;  %v13796_v11 = vpack.c.bf16 %v595_v10, %v594_v9  ;;  %v597_v13 = vld [vmem:[%s21131_s29 + $0x18] sm:$0xff]  ;;  %v740_v16 = vld [vmem:[%s20963_s10 + $0x8] sm:$0xff]  ;;  %v741_v18 = vld [vmem:[%s20963_s10 + $0x10] sm:$0xff] }
  0x25   :  { %13791 = vmatpush3.bf16.msra.mxu0 %v13790_v42  ;;  %v13799_v14 = vpack.c.bf16 %v597_v13, %v596_v12  ;;  %v742_v19 = vld [vmem:[%s20963_s10 + $0x18] sm:$0xff]  ;;  %v1347_v34 = vld [vmem:[%s21132_s30 + $0x8] sm:$0xff]  ;;  %v1352_v12 = vld [vmem:[%s21132_s30 + $0x30] sm:$0x3] }
  0x26   :  { %13792 = vmatprep.subr.bf16.mxu0 %v20992_v2  ;;  %v13805_v22 = vpack.c.bf16 %v742_v19, %v741_v18  ;;  %v1070_v13 = vld [vmem:[%s20966_s13] sm:$0xff] }
  0x27   :  { %12955 = vmatmul.mubr.msk.f32.gmra.mrb[8].mxu0 %vm115_vm1, %v80_v15  ;;  %v739_v15 = vld [vmem:[%s20963_s10] sm:$0xff] }
  0x28   :  { %12957 = vmatprep.mubr.msk.f32.mxu0 %vm15373_vm0, %v20990_v4 }
  0x29   :  { %13794 = vmatpush3.bf16.msra.mxu0 %v13793_v44 }
  0x2a   :  { %13801 = vmatprep.subr.bf16.mxu0 %v20992_v2 }
  0x2b   :  { %12958 = vmatmul.mubr.msk.f32.gmra.mrb[10].mxu0 %vm115_vm1, %v81_v17  ;;  %v13802_v17 = vpack.c.bf16 %v740_v16, %v739_v15  ;;  %v20989_v15 = vlaneseq  ;;  %v15375_v16 = vmov 1966171168  }
  0x2c   :  { %12960 = vmatprep.mubr.msk.f32.mxu0 %vm15373_vm0, %v20990_v4 }
  0x2d   :  { %v15971_v19 = vshrl.u32 %v20989_v15, 7 }
  0x2f   :  { %12961 = vmatmul.mubr.msk.f32.gmra.mrb[12].mxu0 %vm115_vm1, %v112_v21 }
  0x30   :  { %12963 = vmatprep.mubr.msk.f32.mxu0 %vm15373_vm0, %v20990_v4 }
  0x33   :  { %12964 = vmatmul.mubr.msk.f32.gmra.mrb[14].mxu0 %vm115_vm1, %v100_v24 }
  0x34   :  { %12966 = vmatprep.mubr.msk.f32.mxu0 %vm15373_vm0, %v20990_v4 }
  0x37   :  { %12967 = vmatmul.mubr.msk.f32.gmra.mrb[16].mxu0 %vm115_vm1, %v102_v27 }
  0x38   :  { %12969 = vmatprep.mubr.msk.f32.mxu0 %vm15373_vm0, %v20990_v4 }
  0x3b   :  { %12970 = vmatmul.mubr.msk.f32.gmra.mrb[18].mxu0 %vm115_vm1, %v104_v30 }
  0x3c   :  { %12972 = vmatprep.mubr.msk.f32.mxu0 %vm15373_vm0, %v20990_v4 }
  0x3f   :  { %12973 = vmatmul.mubr.msk.f32.gmra.mrb[20].mxu0 %vm115_vm1, %v106_v33  ;;  %v1346_v33 = vld [vmem:[%s21132_s30] sm:$0xff] }
  0x40   :  { %12975 = vmatprep.mubr.msk.f32.mxu0 %vm15373_vm0, %v20990_v4  ;;  %v15756_v37 = vpack.c.bf16 %v1347_v34, %v1346_v33 }
  0x43   :  { %12976 = vmatmul.mubr.msk.f32.gmra.mrb[22].mxu0 %vm115_vm1, %v108_v36 }
  0x44   :  { %12978 = vmatprep.mubr.msk.f32.mxu0 %vm15373_vm0, %v20990_v4 }
  0x47   :  { %12979 = vmatmul.mubr.msk.f32.gmra.mrb[24].mxu0 %vm115_vm1, %v110_v38 }
  0x48   :  { %13036 = vmatprep.mubr.msk.f32.mxu0 %vm15373_vm0, %v20990_v4 }
  0xea   :  { %v215_v45 = vpop.f32.mrb[0].mxu0 }
  0xeb   :  { %v12944_v46 = vpop.f32.mrb[1].mxu0  ;;  %12990 = vmatmul.mubr.msk.f32.vlgmr.msra.gmra.mrb[0].mxu1 %vm283_vm3, %v215_v45  ;;  %v1348_v45 = vld [vmem:[%s21132_s30 + $0x10] sm:$0xff] }
  0xec   :  { %12992 = vmatprep.mubr.msk.f32.mxu1 %vm15373_vm0, %v20990_v4  ;;  %13797 = vmatpush3.bf16.msra.mxu1 %v13796_v11  ;;  %v1349_v46 = vld [vmem:[%s21132_s30 + $0x18] sm:$0xff] }
  0xed   :  { %13798 = vmatprep.subr.bf16.mxu1 %v20992_v2 }
  0xee   :  { %v220_v47 = vpop.f32.mrb[2].mxu0 }
  0xef   :  { %v12947_v48 = vpop.f32.mrb[3].mxu0  ;;  %12993 = vmatmul.mubr.msk.f32.gmra.mrb[2].mxu1 %vm283_vm3, %v220_v47 }
  0xf0   :  { %12995 = vmatprep.mubr.msk.f32.mxu1 %vm15373_vm0, %v20990_v4  ;;  %13800 = vmatpush3.bf16.msra.mxu1 %v13799_v14  ;;  %v1069_v14 = vld [vmem:[%s20965_s12] sm:$0xff] }
  0xf1   :  { %13807 = vmatprep.subr.bf16.mxu1 %v20992_v2 }
  0xf2   :  { %v225_v49 = vpop.f32.mrb[4].mxu0 }
  0xf3   :  { %v12950_v50 = vpop.f32.mrb[5].mxu0  ;;  %12996 = vmatmul.mubr.msk.f32.gmra.mrb[4].mxu1 %vm283_vm3, %v225_v49 }
  0xf4   :  { %12998 = vmatprep.mubr.msk.f32.mxu1 %vm15373_vm0, %v20990_v4 }
  0xf6   :  { %v230_v51 = vpop.f32.mrb[6].mxu0 }
  0xf7   :  { %v12953_v52 = vpop.f32.mrb[7].mxu0  ;;  %12999 = vmatmul.mubr.msk.f32.gmra.mrb[6].mxu1 %vm283_vm3, %v230_v51  ;;  %v15810_v51 = vpack.c.bf16 %v1349_v46, %v1348_v45 }
  0xf8   :  { %13001 = vmatprep.mubr.msk.f32.mxu1 %vm15373_vm0, %v20990_v4 }
  0xfa   :  { %v235_v53 = vpop.f32.mrb[8].mxu0 }
  0xfb   :  { %v12956_v54 = vpop.f32.mrb[9].mxu0  ;;  %13002 = vmatmul.mubr.msk.f32.gmra.mrb[8].mxu1 %vm283_vm3, %v235_v53 }
  0xfc   :  { %13004 = vmatprep.mubr.msk.f32.mxu1 %vm15373_vm0, %v20990_v4 }
  0xfe   :  { %v240_v55 = vpop.f32.mrb[10].mxu0 }
  0xff   :  { %v12959_v56 = vpop.f32.mrb[11].mxu0  ;;  %13005 = vmatmul.mubr.msk.f32.gmra.mrb[10].mxu1 %vm283_vm3, %v240_v55 }
 0x100   :  { %13007 = vmatprep.mubr.msk.f32.mxu1 %vm15373_vm0, %v20990_v4 }
 0x102   :  { %v245_v57 = vpop.f32.mrb[12].mxu0 }
 0x103   :  { %v12962_v58 = vpop.f32.mrb[13].mxu0  ;;  %13008 = vmatmul.mubr.msk.f32.gmra.mrb[12].mxu1 %vm283_vm3, %v245_v57 }
 0x104   :  { %13010 = vmatprep.mubr.msk.f32.mxu1 %vm15373_vm0, %v20990_v4  ;;  %v1350_v58 = vld [vmem:[%s21132_s30 + $0x20] sm:$0xff] }
 0x106   :  { %v250_v59 = vpop.f32.mrb[14].mxu0 }
 0x107   :  { %13011 = vmatmul.mubr.msk.f32.gmra.mrb[14].mxu1 %vm283_vm3, %v250_v59  ;;  %v12965_v60 = vpop.f32.mrb[15].mxu0  ;;  %v1351_v59 = vld [vmem:[%s21132_s30 + $0x28] sm:$0xff] }
 0x108   :  { %13013 = vmatprep.mubr.msk.f32.mxu1 %vm15373_vm0, %v20990_v4 }
 0x10a   :  { %v255_v61 = vpop.f32.mrb[16].mxu0 }
 0x10b   :  { %13014 = vmatmul.mubr.msk.f32.gmra.mrb[16].mxu1 %vm283_vm3, %v255_v61  ;;  %v12968_v62 = vpop.f32.mrb[17].mxu0 }
 0x10c   :  { %13016 = vmatprep.mubr.msk.f32.mxu1 %vm15373_vm0, %v20990_v4 }
 0x10e   :  { %v260_v63 = vpop.f32.mrb[18].mxu0 }
 0x10f   :  { %13017 = vmatmul.mubr.msk.f32.gmra.mrb[18].mxu1 %vm283_vm3, %v260_v63  ;;  %v12971_v0 = vpop.f32.mrb[19].mxu0  ;;  %v13826_v63 = vpack.c.bf16 %v1351_v59, %v1350_v58 }
 0x110   :  { %13019 = vmatprep.mubr.msk.f32.mxu1 %vm15373_vm0, %v20990_v4 }
 0x112   :  { %v265_v1 = vpop.f32.mrb[20].mxu0 }
 0x113   :  { %13020 = vmatmul.mubr.msk.f32.gmra.mrb[20].mxu1 %vm283_vm3, %v265_v1  ;;  %v12974_v3 = vpop.f32.mrb[21].mxu0 }
 0x114   :  { %13022 = vmatprep.mubr.msk.f32.mxu1 %vm15373_vm0, %v20990_v4 }
 0x116   :  { %v270_v5 = vpop.f32.mrb[22].mxu0 }
 0x117   :  { %13023 = vmatmul.mubr.msk.f32.gmra.mrb[22].mxu1 %vm283_vm3, %v270_v5  ;;  %v12977_v6 = vpop.f32.mrb[23].mxu0 }
 0x118   :  { %13025 = vmatprep.mubr.msk.f32.mxu1 %vm15373_vm0, %v20990_v4 }
 0x11a   :  { %v275_v7 = vpop.f32.mrb[24].mxu0 }
 0x11b   :  { %13026 = vmatmul.mubr.msk.f32.gmra.mrb[24].mxu1 %vm283_vm3, %v275_v7  ;;  %v12980_v8 = vpop.f32.mrb[25].mxu0 }
 0x11c   :  { %13065 = vmatprep.mubr.msk.f32.mxu1 %vm15373_vm0, %v20990_v4 }
 0x1be   :  { %v15702_v20 = vpop.f32.mrb[0].mxu1 }
 0x1bf   :  { %v12991_v21 = vpop.f32.mrb[1].mxu1  ;;  %13037 = vmatmul.mubr.msk.f32.vlgmr.msra.gmra.mrb[26].mxu0 %vm283_vm3, %v15702_v20 }
 0x1c0   :  { %13803 = vmatpush3.bf16.msra.mxu0 %v13802_v17  ;;  %13039 = vmatprep.mubr.msk.f32.mxu0 %vm15373_vm0, %v20990_v4  ;;  %v1525_v17 = vunpack.c.l.s4 %v15375_v16  ;;  %v15979_v21 = vld [vmem:[%s20967_s14] sm:$0xff] }
 0x1c1   :  { %13804 = vmatprep.subr.bf16.mxu0 %v20992_v2 }
 0x1c2   :  { %v15709_v23 = vpop.f32.mrb[2].mxu1  ;;  %v1526_v18 = vunpack.c.0.s8 %v1525_v17 }
 0x1c3   :  { %v12994_v24 = vpop.f32.mrb[3].mxu1  ;;  %13040 = vmatmul.mubr.msk.f32.gmra.mrb[28].mxu0 %vm283_vm3, %v15709_v23 }
 0x1c4   :  { %13042 = vmatprep.mubr.msk.f32.mxu0 %vm15373_vm0, %v20990_v4  ;;  %13806 = vmatpush3.bf16.msra.mxu0 %v13805_v22  ;;  %v15984_v24 = vsub.s32 0, %v15971_v19 }
 0x1c5   :  { %13828 = vmatprep.subr.bf16.mxu0 %v20992_v2 }
 0x1c6   :  { %v15716_v25 = vpop.f32.mrb[4].mxu1 }
 0x1c7   :  { %v12997_v26 = vpop.f32.mrb[5].mxu1  ;;  %13043 = vmatmul.mubr.msk.f32.gmra.mrb[30].mxu0 %vm283_vm3, %v15716_v25 }
 0x1c8   :  { %13045 = vmatprep.mubr.msk.f32.mxu0 %vm15373_vm0, %v20990_v4 }
 0x1ca   :  { %v15722_v27 = vpop.f32.mrb[6].mxu1 }
 0x1cb   :  { %v13000_v28 = vpop.f32.mrb[7].mxu1  ;;  %13046 = vmatmul.mubr.msk.f32.gmra.mrb[32].mxu0 %vm283_vm3, %v15722_v27 }
 0x1cc   :  { %13048 = vmatprep.mubr.msk.f32.mxu0 %vm15373_vm0, %v20990_v4 }
 0x1ce   :  { %v15728_v29 = vpop.f32.mrb[8].mxu1 }
 0x1cf   :  { %v13003_v30 = vpop.f32.mrb[9].mxu1  ;;  %13049 = vmatmul.mubr.msk.f32.gmra.mrb[34].mxu0 %vm283_vm3, %v15728_v29 }
 0x1d0   :  { %13051 = vmatprep.mubr.msk.f32.mxu0 %vm15373_vm0, %v20990_v4 }
 0x1d2   :  { %v15734_v31 = vpop.f32.mrb[10].mxu1 }
 0x1d3   :  { %v13006_v32 = vpop.f32.mrb[11].mxu1  ;;  %13052 = vmatmul.mubr.msk.f32.gmra.mrb[36].mxu0 %vm283_vm3, %v15734_v31 }
 0x1d4   :  { %13054 = vmatprep.mubr.msk.f32.mxu0 %vm15373_vm0, %v20990_v4 }
 0x1d6   :  { %v15746_v35 = vpop.f32.mrb[12].mxu1 }
 0x1d7   :  { %454 = vst.msk [vmem:[%s20976_s23 - $0x2] sm:$0xfc] %vm453_vm4, %v15746_v35  ;;  %v13009_v36 = vpop.f32.mrb[13].mxu1  ;;  %13055 = vmatmul.mubr.msk.f32.gmra.mrb[38].mxu0 %vm283_vm3, %v15746_v35  ;;  %v612_v40 = vrot.slane %v15746_v35, 2 }
 0x1d8   :  { %13094 = vmatprep.mubr.msk.f32.mxu0 %vm15373_vm0, %v20990_v4  ;;  %v10960_v36 = vld [vmem:[%s21139_s4] ss:$0 sm:$0xff] }
 0x1da   :  { %v15764_v39 = vpop.f32.mrb[14].mxu1 }
 0x1db   :  { %455 = vst.msk [vmem:[%s20976_s23 + $0x6] sm:$0xff] %vm283_vm3, %v15764_v39  ;;  %v613_v41 = vrot.slane %v15764_v39, 2  ;;  %13095 = vmatmul.mubr.msk.f32.vlgmr.msra.gmra.mrb[40].mxu0 %vm283_vm3, %v15702_v20  ;;  %v13012_v42 = vpop.f32.mrb[15].mxu1 }
 0x1dc   :  { %13831 = vmatpush3.bf16.xpose.msk.msra.mxu0 %vm15760_vm6, %v15756_v37  ;;  %13097 = vmatprep.mubr.msk.f32.mxu0 %vm15373_vm0, %v20990_v4 }
 0x1dd   :  { %v614_v43 = vsel %vm611_vm7, %v612_v40, %v613_v41  ;;  %13832 = vmatprep.subr.bf16.mxu0 %v20992_v2 }
 0x1de   :  { %v15782_v44 = vpop.f32.mrb[16].mxu1  ;;  %13066 = vmatmul.mubr.msk.f32.vlgmr.msra.gmra.mrb[26].mxu1 %vm283_vm3, %v614_v43 }
 0x1df   :  { %456 = vst.msk [vmem:[%s20976_s23 + $0xe] sm:$0xff] %vm283_vm3, %v15782_v44  ;;  %v615_v47 = vrot.slane %v15782_v44, 2  ;;  %13098 = vmatmul.mubr.msk.f32.gmra.mrb[42].mxu0 %vm283_vm3, %v15709_v23  ;;  %v13015_v48 = vpop.f32.mrb[17].mxu1  ;;  %13068 = vmatprep.mubr.msk.f32.mxu1 %vm15373_vm0, %v20990_v4 }
 0x1e0   :  { %13100 = vmatprep.mubr.msk.f32.mxu0 %vm15373_vm0, %v20990_v4 }
 0x1e1   :  { %v616_v49 = vsel %vm611_vm7, %v613_v41, %v615_v47 }
 0x1e2   :  { %v13808_v52 = vpack.c.bf16 %v616_v49, %v614_v43  ;;  %v15812_v53 = vpop.f32.mrb[18].mxu1  ;;  %13069 = vmatmul.mubr.msk.f32.gmra.mrb[28].mxu1 %vm283_vm3, %v616_v49 }
 0x1e3   :  { %13101 = vmatmul.mubr.msk.f32.gmra.mrb[44].mxu0 %vm283_vm3, %v15716_v25  ;;  %457 = vst.msk [vmem:[%s20976_s23 + $0x16] sm:$0xff] %vm283_vm3, %v15812_v53  ;;  %v617_v54 = vrot.slane %v15812_v53, 2  ;;  %v13018_v55 = vpop.f32.mrb[19].mxu1  ;;  %13071 = vmatprep.mubr.msk.f32.mxu1 %vm15373_vm0, %v20990_v4 }
 0x1e4   :  { %13810 = vmatpush3.bf16.xpose.msk.msra.mxu1 %vm15806_vm8, %v13808_v52  ;;  %13103 = vmatprep.mubr.msk.f32.mxu0 %vm15373_vm0, %v20990_v4 }
 0x1e5   :  { %13835 = vmatpush3.bf16.xpose.msk.msra.mxu0 %vm15760_vm6, %v15810_v51  ;;  %v618_v56 = vsel %vm611_vm7, %v615_v47, %v617_v54  ;;  %13811 = vmatprep.subr.bf16.mxu1 %v20992_v2 }
 0x1e6   :  { %v439_v57 = vpop.f32.mrb[20].mxu1  ;;  %13072 = vmatmul.mubr.msk.f32.gmra.mrb[30].mxu1 %vm283_vm3, %v618_v56  ;;  %13836 = vmatprep.subr.bf16.mxu0 %v20992_v2 }
 0x1e7   :  { %458 = vst.msk [vmem:[%s20976_s23 + $0x1e] sm:$0xff] %vm283_vm3, %v439_v57  ;;  %v619_v60 = vrot.slane %v439_v57, 2  ;;  %13104 = vmatmul.mubr.msk.f32.gmra.mrb[46].mxu0 %vm283_vm3, %v15722_v27  ;;  %v13021_v61 = vpop.f32.mrb[21].mxu1  ;;  %13074 = vmatprep.mubr.msk.f32.mxu1 %vm15373_vm0, %v20990_v4 }
 0x1e8   :  { %13106 = vmatprep.mubr.msk.f32.mxu0 %vm15373_vm0, %v20990_v4 }
 0x1e9   :  { %v620_v62 = vsel %vm611_vm7, %v617_v54, %v619_v60 }
 0x1ea   :  { %v13812_v0 = vpack.c.bf16 %v620_v62, %v618_v56  ;;  %v444_v1 = vpop.f32.mrb[22].mxu1  ;;  %13075 = vmatmul.mubr.msk.f32.gmra.mrb[32].mxu1 %vm283_vm3, %v620_v62 }
 0x1eb   :  { %13107 = vmatmul.mubr.msk.f32.gmra.mrb[48].mxu0 %vm283_vm3, %v15728_v29  ;;  %459 = vst.msk [vmem:[%s20976_s23 + $0x26] sm:$0xff] %vm283_vm3, %v444_v1  ;;  %v621_v3 = vrot.slane %v444_v1, 2  ;;  %v13024_v5 = vpop.f32.mrb[23].mxu1  ;;  %13077 = vmatprep.mubr.msk.f32.mxu1 %vm15373_vm0, %v20990_v4 }
 0x1ec   :  { %13814 = vmatpush3.bf16.xpose.msk.msra.mxu1 %vm15806_vm8, %v13812_v0  ;;  %13109 = vmatprep.mubr.msk.f32.mxu0 %vm15373_vm0, %v20990_v4 }
 0x1ed   :  { %v622_v6 = vsel %vm611_vm7, %v619_v60, %v621_v3  ;;  %13815 = vmatprep.subr.bf16.mxu1 %v20992_v2  ;;  %13839 = vmatpush3.bf16.xpose.msk.msra.mxu0 %vm15760_vm6, %v13826_v63 }
 0x1ee   :  { %v449_v7 = vpop.f32.mrb[24].mxu1  ;;  %13078 = vmatmul.mubr.msk.f32.gmra.mrb[34].mxu1 %vm283_vm3, %v622_v6  ;;  %13197 = vmatprep.subr.mxu0 %v20990_v4 }
 0x1ef   :  { %461 = vst.msk [vmem:[%s20976_s23 + $0x2e] sm:$0xf] %vm460_vm9, %v449_v7  ;;  %v623_v8 = vrot.slane %v449_v7, 2  ;;  %13110 = vmatmul.mubr.msk.f32.gmra.mrb[50].mxu0 %vm283_vm3, %v15734_v31  ;;  %13080 = vmatprep.mubr.msk.f32.mxu1 %vm15373_vm0, %v20990_v4  ;;  %v13027_v9 = vpop.f32.mrb[25].mxu1 }
 0x1f0   :  { %13112 = vmatprep.mubr.msk.f32.mxu0 %vm15373_vm0, %v20990_v4 }
 0x1f1   :  { %v624_v10 = vsel %vm611_vm7, %v621_v3, %v623_v8 }
 0x1f2   :  { %v13816_v11 = vpack.c.bf16 %v624_v10, %v622_v6  ;;  %13081 = vmatmul.mubr.msk.f32.gmra.mrb[36].mxu1 %vm283_vm3, %v624_v10  ;;  %v10968_v10 = vld [vmem:[%s21152_s6] ss:$0 sm:$0xff] }
 0x1f3   :  { %13113 = vmatmul.mubr.msk.f32.gmra.mrb[52].mxu0 %vm283_vm3, %v15746_v35  ;;  %13083 = vmatprep.mubr.msk.f32.mxu1 %vm15373_vm0, %v20990_v4 }
 0x1f4   :  { %13818 = vmatpush3.bf16.xpose.msk.msra.mxu1 %vm15806_vm8, %v13816_v11  ;;  %13115 = vmatprep.mubr.msk.f32.mxu0 %vm15373_vm0, %v20990_v4 }
 0x1f5   :  { %13145 = vmatprep.subr.mxu1 %v20990_v4  ;;  %13198 = vmatpush3.xpose.msk.msra.mxu0 %vm992_vm5, %v1352_v12 }
 0x1f6   :  { %13084 = vmatmul.mubr.msk.f32.gmra.mrb[38].mxu1 %vm283_vm3, %v623_v8  ;;  %13858 = vmatprep.subr.bf16.mxu0 %v20992_v2 }
 0x1f7   :  { %13116 = vmatmul.mubr.msk.f32.gmra.mrb[54].mxu0 %vm283_vm3, %v15764_v39  ;;  %13147 = vmatprep.mubr.msk.f32.mxu1 %vm15373_vm0, %v20990_v4 }
 0x1f8   :  { %13118 = vmatprep.mubr.msk.f32.mxu0 %vm15373_vm0, %v20990_v4 }
 0x1fb   :  { %13119 = vmatmul.mubr.msk.f32.gmra.mrb[56].mxu0 %vm283_vm3, %v15782_v44 }
 0x1fc   :  { %13146 = vmatpush3.xpose.msk.msra.mxu1 %vm283_vm3, %v623_v8  ;;  %13121 = vmatprep.mubr.msk.f32.mxu0 %vm15373_vm0, %v20990_v4 }
 0x1fd   :  { %13819 = vmatprep.subr.bf16.mxu1 %v20992_v2 }
 0x1ff   :  { %13122 = vmatmul.mubr.msk.f32.gmra.mrb[58].mxu0 %vm283_vm3, %v15812_v53  ;;  %13148 = vmatmul.mubr.msk.f32.vlgmr.msra.gmra.mrb[40].mxu1 %vm283_vm3, %v15702_v20  ;;  %v15974_v20 = vsub.s32 %v1526_v18, %v15971_v19  ;;  %v10976_v53 = vld [vmem:[%s20964_s11] ss:$0 sm:$0xff] }
 0x200   :  { %13124 = vmatprep.mubr.msk.f32.mxu0 %vm15373_vm0, %v20990_v4  ;;  %13150 = vmatprep.mubr.msk.f32.mxu1 %vm15373_vm0, %v20990_v4 }
 0x201   :  { %13821 = vmatpush3.bf16.msra.mxu1 %v15756_v37  ;;  %v1924_v22 = vrot.slane %v15979_v21, %v15974_v20 }
 0x202   :  { %13822 = vmatprep.subr.bf16.mxu1 %v20992_v2 }
 0x203   :  { %13125 = vmatmul.mubr.msk.f32.gmra.mrb[60].mxu0 %vm283_vm3, %v439_v57  ;;  %13151 = vmatmul.mubr.msk.f32.gmra.mrb[42].mxu1 %vm283_vm3, %v15709_v23  ;;  %v1932_v23 = vcombine.high %v1924_v22, %v1924_v22 }
 0x204   :  { %13127 = vmatprep.mubr.msk.f32.mxu0 %vm15373_vm0, %v20990_v4  ;;  %13153 = vmatprep.mubr.msk.f32.mxu1 %vm15373_vm0, %v20990_v4 }
 0x205   :  { %13824 = vmatpush3.bf16.msra.mxu1 %v15810_v51 }
 0x206   :  { %13825 = vmatprep.subr.bf16.mxu1 %v20992_v2 }
 0x207   :  { %13128 = vmatmul.mubr.msk.f32.gmra.mrb[62].mxu0 %vm283_vm3, %v444_v1  ;;  %13154 = vmatmul.mubr.msk.f32.gmra.mrb[44].mxu1 %vm283_vm3, %v15716_v25  ;;  %v1954_v25 = vrot.slane %v1932_v23, %v15974_v20 }
 0x208   :  { %13130 = vmatprep.mubr.msk.f32.mxu0 %vm15373_vm0, %v20990_v4  ;;  %13156 = vmatprep.mubr.msk.f32.mxu1 %vm15373_vm0, %v20990_v4 }
 0x209   :  { %13827 = vmatpush3.bf16.msra.mxu1 %v13826_v63  ;;  %v1973_v26 = vrot.slane %v1954_v25, %v15984_v24  ;;  %v1964_v28 = vcombine.high %v1954_v25, %v1954_v25 }
 0x20a   :  { %13180 = vmatprep.subr.mxu1 %v20990_v4 }
 0x20b   :  { %13131 = vmatmul.mubr.msk.f32.gmra.mrb[64].mxu0 %vm283_vm3, %v449_v7  ;;  %13157 = vmatmul.mubr.msk.f32.gmra.mrb[46].mxu1 %vm283_vm3, %v15722_v27  ;;  %v15376_v27 = vmov 0  }
 0x20c   :  { %13159 = vmatprep.mubr.msk.f32.mxu1 %vm15373_vm0, %v20990_v4  ;;  %13199 = vmatprep.mubr.msk.f32.mxu0 %vm15373_vm0, %v20990_v4 }
 0x20d   :  { %13181 = vmatpush3.msk.msra.mxu1 %vm97_vm2, %v1352_v12  ;;  %15154 = vset.pattern.permute.xlu1 %v15376_v27 }
 0x20e   :  { %13840 = vmatprep.subr.bf16.mxu1 %v20992_v2  ;;  %15153 = vset.pattern.permute.xlu0 %v15376_v27 }
 0x20f   :  { %13160 = vmatmul.mubr.msk.f32.gmra.mrb[48].mxu1 %vm283_vm3, %v15728_v29  ;;  %13200 = vmatmul.mubr.msk.f32.vlgmr.msra.gmra.mrb[66].mxu0 %vm992_vm5, %v1070_v13  ;;  %v15989_v29 = vrot.slane %v1924_v22, %v15974_v20 }
 0x210   :  { %13162 = vmatprep.mubr.msk.f32.mxu1 %vm15373_vm0, %v20990_v4  ;;  %13250 = vmatprep.mubr.msk.f32.mxu0 %vm15373_vm0, %v20990_v4 }
 0x211   :  { %2003 = vperm.xlu1 %15154, %v1973_v26   ;;  %v1969_v30 = vrot.slane %v15989_v29, %v15984_v24 }
 0x213   :  { %13163 = vmatmul.mubr.msk.f32.gmra.mrb[50].mxu1 %vm283_vm3, %v15734_v31  ;;  %v1981_v31 = vrot.slane %v1964_v28, %v15984_v24  ;;  %1999 = vperm.xlu0 %15153, %v1969_v30  }
 0x214   :  { %13165 = vmatprep.mubr.msk.f32.mxu1 %vm15373_vm0, %v20990_v4 }
 0x215   :  { %2011 = vperm.xlu1 %15154, %v1981_v31  }
 0x217   :  { %13166 = vmatmul.mubr.msk.f32.gmra.mrb[52].mxu1 %vm283_vm3, %v15746_v35 }
 0x218   :  { %13182 = vmatprep.mubr.msk.f32.mxu1 %vm15373_vm0, %v20990_v4 }
 0x21b   :  { %13183 = vmatmul.mubr.msk.f32.vlgmr.msra.gmra.mrb[54].mxu1 %vm992_vm5, %v1069_v14 }
 0x21c   :  { %13216 = vmatprep.mubr.msk.f32.mxu1 %vm15373_vm0, %v20990_v4 }
 0x292   :  { %v15994_v32 = vpop.f32.mrb[26].mxu0 }
 0x293   :  { %21137 = vst [vmem:[#allocation5_spill] sm:$0xff] %v15994_v32  ;;  %v13038_v33 = vpop.f32.mrb[27].mxu0 }
 0x296   :  { %v15996_v34 = vpop.f32.mrb[28].mxu0 }
 0x297   :  { %21138 = vst [vmem:[#allocation6_spill] sm:$0xff] %v15996_v34  ;;  %v13041_v35 = vpop.f32.mrb[29].mxu0 }
 0x29a   :  { %v570_v37 = vpop.f32.mrb[30].mxu0 }
 0x29b   :  { %v16001_v39 = vadd.f32 %v10960_v36, %v570_v37  ;;  %v13044_v40 = vpop.f32.mrb[31].mxu0 }
 0x29d   :  { %21140 = vst [vmem:[#allocation7_spill] sm:$0xff] %v16001_v39 }
 0x29e   :  { %v575_v41 = vpop.f32.mrb[32].mxu0 }
 0x29f   :  { %v16003_v42 = vadd.f32 %v10960_v36, %v575_v41  ;;  %v13047_v43 = vpop.f32.mrb[33].mxu0 }
 0x2a1   :  { %21141 = vst [vmem:[#allocation8_spill] sm:$0xff] %v16003_v42 }
 0x2a2   :  { %v580_v44 = vpop.f32.mrb[34].mxu0 }
 0x2a3   :  { %v16005_v45 = vadd.f32 %v10960_v36, %v580_v44  ;;  %v13050_v46 = vpop.f32.mrb[35].mxu0 }
 0x2a5   :  { %21142 = vst [vmem:[#allocation9_spill] sm:$0xff] %v16005_v45 }
 0x2a6   :  { %v585_v47 = vpop.f32.mrb[36].mxu0 }
 0x2a7   :  { %v16007_v48 = vadd.f32 %v10960_v36, %v585_v47  ;;  %v13053_v49 = vpop.f32.mrb[37].mxu0 }
 0x2a9   :  { %21143 = vst [vmem:[#allocation10_spill] sm:$0xff] %v16007_v48 }
 0x2aa   :  { %v590_v50 = vpop.f32.mrb[38].mxu0 }
 0x2ab   :  { %v16009_v51 = vadd.f32 %v10960_v36, %v590_v50  ;;  %v13056_v52 = vpop.f32.mrb[39].mxu0 }
 0x2ad   :  { %21144 = vst [vmem:[#allocation11_spill] sm:$0xff] %v16009_v51 }
 0x2ae   :  { %v828_v54 = vpop.f32.mrb[40].mxu0 }
 0x2af   :  { %v16014_v55 = vadd.f32 %v10976_v53, %v828_v54  ;;  %v13096_v56 = vpop.f32.mrb[41].mxu0 }
 0x2b1   :  { %21145 = vst [vmem:[#allocation12_spill] sm:$0xff] %v16014_v55  ;;  %v16016_v57 = vpop.f32.mrb[26].mxu1 }
 0x2b2   :  { %21146 = vst [vmem:[#allocation13_spill] sm:$0xff] %v16016_v57  ;;  %v13067_v58 = vpop.f32.mrb[27].mxu1  ;;  %v833_v59 = vpop.f32.mrb[42].mxu0 }
 0x2b3   :  { %v16018_v60 = vadd.f32 %v10976_v53, %v833_v59  ;;  %v13099_v61 = vpop.f32.mrb[43].mxu0 }
 0x2b5   :  { %21147 = vst [vmem:[#allocation14_spill] sm:$0xff] %v16018_v60  ;;  %v16020_v62 = vpop.f32.mrb[28].mxu1 }
 0x2b6   :  { %21148 = vst [vmem:[#allocation15_spill] sm:$0xff] %v16020_v62  ;;  %v838_v63 = vpop.f32.mrb[44].mxu0  ;;  %v13070_v0 = vpop.f32.mrb[29].mxu1 }
 0x2b7   :  { %v16022_v1 = vadd.f32 %v10976_v53, %v838_v63  ;;  %v13102_v3 = vpop.f32.mrb[45].mxu0 }
 0x2b9   :  { %21149 = vst [vmem:[#allocation16_spill] sm:$0xff] %v16022_v1  ;;  %v16024_v5 = vpop.f32.mrb[30].mxu1 }
 0x2ba   :  { %21150 = vst [vmem:[#allocation17_spill] sm:$0xff] %v16024_v5  ;;  %v843_v6 = vpop.f32.mrb[46].mxu0  ;;  %v13073_v7 = vpop.f32.mrb[31].mxu1 }
 0x2bb   :  { %v16026_v8 = vadd.f32 %v10976_v53, %v843_v6  ;;  %v13105_v9 = vpop.f32.mrb[47].mxu0 }
 0x2bd   :  { %21151 = vst [vmem:[#allocation18_spill] sm:$0xff] %v16026_v8  ;;  %v720_v11 = vpop.f32.mrb[32].mxu1 }
 0x2be   :  { %v848_v12 = vpop.f32.mrb[48].mxu0  ;;  %v16031_v13 = vadd.f32 %v10968_v10, %v720_v11  ;;  %v13076_v14 = vpop.f32.mrb[33].mxu1 }
 0x2bf   :  { %v16033_v16 = vadd.f32 %v10976_v53, %v848_v12  ;;  %v13108_v17 = vpop.f32.mrb[49].mxu0 }
 0x2c0   :  { %21153 = vst [vmem:[#allocation19_spill] sm:$0xff] %v16031_v13 }
 0x2c1   :  { %21154 = vst [vmem:[#allocation20_spill] sm:$0xff] %v16033_v16  ;;  %v725_v18 = vpop.f32.mrb[34].mxu1 }
 0x2c2   :  { %v853_v22 = vpop.f32.mrb[50].mxu0  ;;  %v16035_v23 = vadd.f32 %v10968_v10, %v725_v18  ;;  %v13079_v25 = vpop.f32.mrb[35].mxu1 }
 0x2c3   :  { %v16037_v26 = vadd.f32 %v10976_v53, %v853_v22  ;;  %v13111_v27 = vpop.f32.mrb[51].mxu0  ;;  %v1917_v25 = vcombine.high %v15979_v21, %v15979_v21 }
 0x2c4   :  { %21155 = vst [vmem:[#allocation21_spill] sm:$0xff] %v16035_v23 }
 0x2c5   :  { %21156 = vst [vmem:[#allocation22_spill] sm:$0xff] %v16037_v26  ;;  %v730_v28 = vpop.f32.mrb[36].mxu1 }
 0x2c6   :  { %v16039_v30 = vpop.f32.mrb[52].mxu0  ;;  %v16041_v31 = vadd.f32 %v10968_v10, %v730_v28  ;;  %v13082_v33 = vpop.f32.mrb[37].mxu1  ;;  %v16078_v28 = vsub.s32 1, %v15971_v19 }
 0x2c7   :  { %21157 = vst [vmem:[#allocation23_spill] sm:$0xff] %v16039_v30  ;;  %v13114_v35 = vpop.f32.mrb[53].mxu0 }
 0x2c8   :  { %21158 = vst [vmem:[#allocation24_spill] sm:$0xff] %v16041_v31  ;;  %21171 = vst [vmem:[#allocation37_spill] sm:$0xff] %v16078_v28  ;;  %v1931_v35 = vrot.slane %v1917_v25, %v15974_v20  ;;  %v16108_v25 = vsub.s32 2, %v15971_v19  ;;  %v21177_v31 = vmov 0.0|0.0  }
 0x2c9   :  { %v735_v36 = vpop.f32.mrb[38].mxu1 }
 0x2ca   :  { %v16043_v37 = vpop.f32.mrb[54].mxu0  ;;  %v16045_v40 = vadd.f32 %v10968_v10, %v735_v36  ;;  %v13085_v41 = vpop.f32.mrb[39].mxu1  ;;  %v1933_v21 = vcombine.high %v1931_v35, %v1931_v35  ;;  %21174 = vst [vmem:[#allocation40_spill] sm:$0xff] %v16108_v25 }
 0x2cb   :  { %v13117_v43 = vpop.f32.mrb[55].mxu0 }
 0x2cc   :  { %21159 = vst [vmem:[#allocation25_spill] sm:$0xff] %v16045_v40 }
 0x2ce   :  { %v16047_v44 = vpop.f32.mrb[56].mxu0 }
 0x2cf   :  { %21160 = vst [vmem:[#allocation26_spill] sm:$0xff] %v16047_v44  ;;  %v13120_v46 = vpop.f32.mrb[57].mxu0 }
 0x2d0   :  { %v1961_v46 = vrot.slane %v1933_v21, %v15974_v20 }
 0x2d2   :  { %v16049_v47 = vpop.f32.mrb[58].mxu0  ;;  %v16051_v49 = vpop.f32.mrb[40].mxu1 }
 0x2d3   :  { %21161 = vst [vmem:[#allocation27_spill] sm:$0xff] %v16049_v47  ;;  %21162 = vst [vmem:[#allocation28_spill] sm:$0xff] %v16051_v49  ;;  %v13123_v50 = vpop.f32.mrb[59].mxu0  ;;  %v13149_v52 = vpop.f32.mrb[41].mxu1 }
 0x2d4   :  { %v1989_v50 = vrot.slane %v1961_v46, %v15984_v24  ;;  %v16088_v52 = vsub.s32 3, %v15971_v19 }
 0x2d6   :  { %v16053_v53 = vpop.f32.mrb[60].mxu0  ;;  %v16055_v54 = vpop.f32.mrb[42].mxu1 }
 0x2d7   :  { %21163 = vst [vmem:[#allocation29_spill] sm:$0xff] %v16055_v54  ;;  %v13126_v56 = vpop.f32.mrb[61].mxu0  ;;  %v13152_v58 = vpop.f32.mrb[43].mxu1 }
 0x2d8   :  { %v16093_v58 = vsub.s32 5, %v15971_v19 }
 0x2da   :  { %v16057_v59 = vpop.f32.mrb[62].mxu0  ;;  %v16059_v61 = vpop.f32.mrb[44].mxu1  ;;  %21172 = vst [vmem:[#allocation38_spill] sm:$0xff] %v16093_v58 }
 0x2db   :  { %21164 = vst [vmem:[#allocation30_spill] sm:$0xff] %v16057_v59  ;;  %21165 = vst [vmem:[#allocation31_spill] sm:$0xff] %v16059_v61  ;;  %v13129_v63 = vpop.f32.mrb[63].mxu0  ;;  %v13155_v0 = vpop.f32.mrb[45].mxu1 }
 0x2dc   :  { %v1965_v0 = vcombine.high %v1961_v46, %v1961_v46  ;;  %v16120_v46 = vsub.s32 6, %v15971_v19 }
 0x2de   :  { %v16061_v3 = vpop.f32.mrb[64].mxu0  ;;  %v16063_v6 = vpop.f32.mrb[46].mxu1  ;;  %21176 = vst [vmem:[#allocation42_spill] sm:$0xff] %v16120_v46 }
 0x2df   :  { %21166 = vst [vmem:[#allocation32_spill] sm:$0xff] %v16061_v3  ;;  %21167 = vst [vmem:[#allocation33_spill] sm:$0xff] %v16063_v6  ;;  %v13132_v7 = vpop.f32.mrb[65].mxu0  ;;  %v13158_v9 = vpop.f32.mrb[47].mxu1 }
 0x2e0   :  { %v1997_v7 = vrot.slane %v1965_v0, %v15984_v24  ;;  %v16099_v9 = vsub.s32 7, %v15971_v19 }
 0x2e2   :  { %v16065_v10 = vpop.f32.mrb[48].mxu1  ;;  %v16067_v11 = vpop.f32.mrb[66].mxu0  ;;  %21173 = vst [vmem:[#allocation39_spill] sm:$0xff] %v16099_v9 }
 0x2e3   :  { %21168 = vst [vmem:[#allocation34_spill] sm:$0xff] %v16065_v10  ;;  %v1575_v12 = vrot.slane %v16067_v11, %v15984_v24  ;;  %v13161_v14 = vpop.f32.mrb[49].mxu1  ;;  %v13201_v17 = vpop.f32.mrb[67].mxu0  ;;  %v1606_v41 = vrot.slane %v16067_v11, %v16078_v28  ;;  %v1668_v56 = vrot.slane %v16067_v11, %v16088_v52  ;;  %v1730_v63 = vrot.slane %v16067_v11, %v16093_v58 }
 0x2e4   :  { %v1947_v14 = vrot.slane %v1931_v35, %v15974_v20  ;;  %v1962_v17 = vcombine.high %v15989_v29, %v15989_v29  ;;  %v16114_v29 = vsub.s32 4, %v15971_v19 }
 0x2e5   :  { %1581 = vbcast.lane.b32.xlu1 %v1575_v12, 264  ;;  %1577 = vbcast.lane.b32.xlu0 %v1575_v12, 256 }
 0x2e6   :  { %v16071_v18 = vpop.f32.mrb[50].mxu1  ;;  %21175 = vst [vmem:[#allocation41_spill] sm:$0xff] %v16114_v29  ;;  %v1699_v35 = vrot.slane %v16067_v11, %v16114_v29 }
 0x2e7   :  { %21169 = vst [vmem:[#allocation35_spill] sm:$0xff] %v16071_v18  ;;  %v13164_v22 = vpop.f32.mrb[51].mxu1 }
 0x2e8   :  { %v1985_v22 = vrot.slane %v1947_v14, %v15984_v24 }
 0x2e9   :  { %1585 = vbcast.lane.b32.xlu1 %v1575_v12, 272  ;;  %1589 = vbcast.lane.b32.xlu0 %v1575_v12, 280 }
 0x2ea   :  { %v16075_v27 = vpop.f32.mrb[52].mxu1 }
 0x2eb   :  { %21170 = vst [vmem:[#allocation36_spill] sm:$0xff] %v16075_v27  ;;  %v13167_v33 = vpop.f32.mrb[53].mxu1 }
 0x2ec   :  { %v1977_v33 = vrot.slane %v1962_v17, %v15984_v24 }
 0x2ed   :  { %1593 = vbcast.lane.b32.xlu1 %v1575_v12, 288  ;;  %1597 = vbcast.lane.b32.xlu0 %v1575_v12, 296 }
 0x2ee   :  { %v16081_v36 = vpop.f32.mrb[54].mxu1 }
 0x2ef   :  { %v13184_v43 = vpop.f32.mrb[55].mxu1 }
 0x2f0   :  { %v1963_v43 = vcombine.high %v1947_v14, %v1947_v14 }
 0x2f1   :  { %1608 = vbcast.lane.b32.xlu1 %v1606_v41, 256  ;;  %1601 = vbcast.lane.b32.xlu0 %v1575_v12, 304  ;;  %v1792_v12 = vrot.slane %v16067_v11, %v16099_v9 }
 0x2f2   :  { %v1993_v21 = vrot.slane %v1963_v43, %v15984_v24 }
 0x2f5   :  { %1616 = vbcast.lane.b32.xlu1 %v1606_v41, 272  ;;  %1612 = vbcast.lane.b32.xlu0 %v1606_v41, 264 }
 0x2f9   :  { %1624 = vbcast.lane.b32.xlu1 %v1606_v41, 288  ;;  %1620 = vbcast.lane.b32.xlu0 %v1606_v41, 280 }
 0x2fd   :  { %2019 = vperm.xlu1 %15154, %v1989_v50   ;;  %1628 = vbcast.lane.b32.xlu0 %v1606_v41, 296  ;;  %v1761_v50 = vrot.slane %v16067_v11, %v16120_v46 }
 0x301   :  { %1670 = vbcast.lane.b32.xlu1 %v1668_v56, 256  ;;  %1632 = vbcast.lane.b32.xlu0 %v1606_v41, 304  ;;  %v1637_v41 = vrot.slane %v16067_v11, %v16108_v25 }
 0x305   :  { %1678 = vbcast.lane.b32.xlu1 %v1668_v56, 272  ;;  %1674 = vbcast.lane.b32.xlu0 %v1668_v56, 264 }
 0x309   :  { %1686 = vbcast.lane.b32.xlu1 %v1668_v56, 288  ;;  %1682 = vbcast.lane.b32.xlu0 %v1668_v56, 280 }
 0x30d   :  { %1732 = vbcast.lane.b32.xlu1 %v1730_v63, 256  ;;  %1690 = vbcast.lane.b32.xlu0 %v1668_v56, 296 }
 0x311   :  { %1740 = vbcast.lane.b32.xlu1 %v1730_v63, 272  ;;  %1694 = vbcast.lane.b32.xlu0 %v1668_v56, 304  ;;  %v16124_v56 = vpop.permute.xlu1 %2003 }
 0x315   :  { %1748 = vbcast.lane.b32.xlu1 %v1730_v63, 288  ;;  %1736 = vbcast.lane.b32.xlu0 %v1730_v63, 264  ;;  %v16133_v19 = vpop.permute.xlu1 %2011 }
 0x319   :  { %2027 = vperm.xlu1 %15154, %v1997_v7   ;;  %1744 = vbcast.lane.b32.xlu0 %v1730_v63, 280  ;;  %v16131_v7 = vpop.permute.xlu0 %1999 }
 0x31d   :  { %1794 = vbcast.lane.b32.xlu1 %v1792_v12, 256  ;;  %1752 = vbcast.lane.b32.xlu0 %v1730_v63, 296 }
 0x321   :  { %1802 = vbcast.lane.b32.xlu1 %v1792_v12, 272  ;;  %1756 = vbcast.lane.b32.xlu0 %v1730_v63, 304  ;;  %v1530_v63 = vrot.slane %v16081_v36, %v15974_v20 }
 0x323   :  { %v16129_v0 = vrot.slane %v1530_v63, %v15974_v20  ;;  %v1538_v11 = vcombine.high %v1530_v63, %v1530_v63 }
 0x325   :  { %1810 = vbcast.lane.b32.xlu1 %v1792_v12, 288  ;;  %1798 = vbcast.lane.b32.xlu0 %v1792_v12, 264  ;;  %v16140_v43 = vrot.slane %v1538_v11, %v15974_v20 }
 0x329   :  { %1818 = vbcast.lane.b32.xlu1 %v1792_v12, 304  ;;  %1806 = vbcast.lane.b32.xlu0 %v1792_v12, 280 }
 0x32d   :  { %2015 = vperm.xlu1 %15154, %v1985_v22   ;;  %1814 = vbcast.lane.b32.xlu0 %v1792_v12, 296  ;;  %v1823_v12 = vrot.slane %v16129_v0, %v15984_v24 }
 0x331   :  { %1639 = vbcast.lane.b32.xlu1 %v1637_v41, 256  ;;  %2007 = vperm.xlu0 %15153, %v1977_v33  }
 0x335   :  { %1647 = vbcast.lane.b32.xlu1 %v1637_v41, 272  ;;  %1643 = vbcast.lane.b32.xlu0 %v1637_v41, 264 }
 0x339   :  { %1655 = vbcast.lane.b32.xlu1 %v1637_v41, 288  ;;  %1651 = vbcast.lane.b32.xlu0 %v1637_v41, 280 }
 0x33d   :  { %1701 = vbcast.lane.b32.xlu1 %v1699_v35, 256  ;;  %1659 = vbcast.lane.b32.xlu0 %v1637_v41, 296 }
 0x341   :  { %1709 = vbcast.lane.b32.xlu1 %v1699_v35, 272  ;;  %1663 = vbcast.lane.b32.xlu0 %v1637_v41, 304 }
 0x345   :  { %1717 = vbcast.lane.b32.xlu1 %v1699_v35, 288  ;;  %1705 = vbcast.lane.b32.xlu0 %v1699_v35, 264 }
 0x349   :  { %2023 = vperm.xlu1 %15154, %v1993_v21   ;;  %1713 = vbcast.lane.b32.xlu0 %v1699_v35, 280 }
 0x34d   :  { %1763 = vbcast.lane.b32.xlu1 %v1761_v50, 256  ;;  %1721 = vbcast.lane.b32.xlu0 %v1699_v35, 296 }
 0x351   :  { %1771 = vbcast.lane.b32.xlu1 %v1761_v50, 272  ;;  %1725 = vbcast.lane.b32.xlu0 %v1699_v35, 304 }
 0x355   :  { %1779 = vbcast.lane.b32.xlu1 %v1761_v50, 288  ;;  %1767 = vbcast.lane.b32.xlu0 %v1761_v50, 264 }
 0x357   :  { %v1582_v14 = vpop.permute.xlu1 %1581  ;;  %v1578_v17 = vpop.permute.xlu0 %1577 }
 0x358   :  { %v1861_v22 = vadd.f32 %v1823_v12, %v1582_v14  ;;  %v1860_v33 = vadd.f32 %v1823_v12, %v1578_v17 }
 0x359   :  { %1787 = vbcast.lane.b32.xlu1 %v1761_v50, 304  ;;  %1775 = vbcast.lane.b32.xlu0 %v1761_v50, 280 }
 0x35a   :  { %v2031_v41 = vadd.f32 %v16131_v7, %v1861_v22  ;;  %v2030_v35 = vadd.f32 %v16131_v7, %v1860_v33  ;;  %v16146_v22 = vrot.slane %v16140_v43, %v15984_v24 }
 0x35b   :  { %v1586_v21 = vpop.permute.xlu1 %1585  ;;  %v1590_v15 = vpop.permute.xlu0 %1589 }
 0x35c   :  { %v2087_v4 = vmul.f32 0.33, %v2031_v41  ;;  %v2086_v2 = vmul.f32 0.33, %v2030_v35  ;;  %v1862_v26 = vadd.f32 %v1823_v12, %v1586_v21  ;;  %v1863_v16 = vadd.f32 %v1823_v12, %v1590_v15 }
 0x35d   :  { %1783 = vbcast.lane.b32.xlu0 %v1761_v50, 296 }
 0x35e   :  { %v2143_v63 = vmax.f32 %v2031_v41, %v2087_v4  ;;  %v2142_v8 = vmax.f32 %v2030_v35, %v2086_v2  ;;  %v2032_v14 = vadd.f32 %v16131_v7, %v1862_v26  ;;  %v2033_v17 = vadd.f32 %v16131_v7, %v1863_v16 }
 0x35f   :  { %v1594_v33 = vpop.permute.xlu1 %1593  ;;  %v1598_v11 = vpop.permute.xlu0 %1597 }
 0x360   :  { %v2088_v1 = vmul.f32 0.33, %v2032_v14  ;;  %v2089_v60 = vmul.f32 0.33, %v2033_v17  ;;  %v1864_v55 = vadd.f32 %v1823_v12, %v1594_v33  ;;  %v1865_v27 = vadd.f32 %v1823_v12, %v1598_v11 }
 0x361   :  { %v16148_v40 = vpack.c.bf16 %v2143_v63, %v2142_v8 }
 0x362   :  { %v2144_v15 = vmax.f32 %v2032_v14, %v2088_v1  ;;  %v2145_v50 = vmax.f32 %v2033_v17, %v2089_v60  ;;  %v2034_v2 = vadd.f32 %v16131_v7, %v1864_v55  ;;  %v2035_v4 = vadd.f32 %v16131_v7, %v1865_v27 }
 0x363   :  { %13842 = vmatpush3.bf16.msra.mxu1 %v16148_v40  ;;  %v1609_v16 = vpop.permute.xlu1 %1608  ;;  %v1602_v26 = vpop.permute.xlu0 %1601 }
 0x364   :  { %v2090_v41 = vmul.f32 0.33, %v2034_v2  ;;  %v2091_v35 = vmul.f32 0.33, %v2035_v4  ;;  %v1867_v21 = vadd.f32 %v16146_v22, %v1609_v16  ;;  %v1866_v51 = vadd.f32 %v1823_v12, %v1602_v26  ;;  %13843 = vmatprep.subr.bf16.mxu1 %v21177_v31 }
 0x365   :  { %v16155_v33 = vpack.c.bf16 %v2145_v50, %v2144_v15 }
 0x366   :  { %v2146_v8 = vmax.f32 %v2034_v2, %v2090_v41  ;;  %v2147_v1 = vmax.f32 %v2035_v4, %v2091_v35  ;;  %v2037_v60 = vadd.f32 %v16124_v56, %v1867_v21  ;;  %v2036_v55 = vadd.f32 %v16131_v7, %v1866_v51 }
 0x367   :  { %13845 = vmatpush3.bf16.msra.mxu1 %v16155_v33  ;;  %v1617_v27 = vpop.permute.xlu1 %1616  ;;  %v1613_v63 = vpop.permute.xlu0 %1612  ;;  %v21178_v35 = vmov 0.0  }
 0x368   :  { %v1869_v14 = vadd.f32 %v16146_v22, %v1617_v27  ;;  %v1868_v17 = vadd.f32 %v16146_v22, %v1613_v63  ;;  %13846 = vmatprep.subr.bf16.mxu1 %v21177_v31  ;;  %v2093_v12 = vmul.f32 0.33, %v2037_v60  ;;  %v2092_v11 = vmul.f32 0.33, %v2036_v55 }
 0x369   :  { %v16163_v15 = vpack.c.bf16 %v2147_v1, %v2146_v8  ;;  %v1072_v8 = vld [vmem:[%s20968_s15] sm:$0xff] }
 0x36a   :  { %v2039_v50 = vadd.f32 %v16124_v56, %v1869_v14  ;;  %v2038_v2 = vadd.f32 %v16124_v56, %v1868_v17  ;;  %v2149_v21 = vmax.f32 %v2037_v60, %v2093_v12  ;;  %v16171_v27 = vmax.f32 %v2036_v55, %v2092_v11 }
 0x36b   :  { %13848 = vmatpush3.bf16.msra.mxu1 %v16163_v15  ;;  %v1625_v51 = vpop.permute.xlu1 %1624  ;;  %v1621_v4 = vpop.permute.xlu0 %1620 }
 0x36c   :  { %v2094_v16 = vmul.f32 0.33, %v2038_v2  ;;  %v1871_v26 = vadd.f32 %v16146_v22, %v1625_v51  ;;  %v1870_v41 = vadd.f32 %v16146_v22, %v1621_v4  ;;  %13214 = vmatprep.subr.mxu1 %v21178_v35  ;;  %v2095_v1 = vmul.f32 0.33, %v2039_v50 }
 0x36e   :  { %v2150_v63 = vmax.f32 %v2038_v2, %v2094_v16  ;;  %v2041_v14 = vadd.f32 %v16124_v56, %v1871_v26  ;;  %v2040_v17 = vadd.f32 %v16124_v56, %v1870_v41  ;;  %v2151_v55 = vmax.f32 %v2039_v50, %v2095_v1 }
 0x36f   :  { %13215 = vmatpush3.msk.msra.mxu1 %vm97_vm2, %v16171_v27  ;;  %v1629_v51 = vpop.permute.xlu0 %1628  ;;  %v1570_v26 = vcombine.high %v16140_v43, %v16140_v43  ;;  %v1523_v50 = vcombine.high %v16081_v36, %v16081_v36 }
 0x370   :  { %v2096_v4 = vmul.f32 0.33, %v2040_v17  ;;  %v1872_v48 = vadd.f32 %v16146_v22, %v1629_v51  ;;  %13849 = vmatprep.subr.bf16.mxu1 %v21177_v31  ;;  %13217 = vmatmul.mubr.msk.f32.vlgmr.msra.gmra.mrb[56].mxu1 %vm992_vm5, %v1072_v8  ;;  %v16183_v60 = vpack.c.bf16 %v2150_v63, %v2149_v21  ;;  %v2097_v12 = vmul.f32 0.33, %v2041_v14 }
 0x371   :  { %13233 = vmatprep.mubr.msk.f32.mxu1 %vm15373_vm0, %v21178_v35  ;;  %v1835_v51 = vrot.slane %v1570_v26, %v15984_v24 }
 0x372   :  { %v2152_v11 = vmax.f32 %v2040_v17, %v2096_v4  ;;  %v2042_v2 = vadd.f32 %v16124_v56, %v1872_v48  ;;  %13851 = vmatpush3.bf16.msra.mxu1 %v16183_v60  ;;  %v2153_v1 = vmax.f32 %v2041_v14, %v2097_v12 }
 0x373   :  { %v1633_v16 = vpop.permute.xlu0 %1632  ;;  %13852 = vmatprep.subr.bf16.mxu1 %v21177_v31 }
 0x374   :  { %v2098_v41 = vmul.f32 0.33, %v2042_v2  ;;  %v1873_v21 = vadd.f32 %v16146_v22, %v1633_v16  ;;  %v16193_v8 = vpack.c.bf16 %v2152_v11, %v2151_v55  ;;  %v16204_v22 = vrot.slane %v1523_v50, %v15974_v20  ;;  %v1073_v11 = vld [vmem:[%s20968_s15 + $0x8] sm:$0xff] }
 0x376   :  { %v2154_v63 = vmax.f32 %v2042_v2, %v2098_v41  ;;  %v2043_v48 = vadd.f32 %v16124_v56, %v1873_v21  ;;  %13854 = vmatpush3.bf16.msra.mxu1 %v16193_v8  ;;  %v1539_v2 = vcombine.high %v16204_v22, %v16204_v22 }
 0x377   :  { %v1675_v17 = vpop.permute.xlu0 %1674  ;;  %13855 = vmatprep.subr.bf16.mxu1 %v21177_v31 }
 0x378   :  { %v2099_v43 = vmul.f32 0.33, %v2043_v48  ;;  %v16201_v4 = vpack.c.bf16 %v2154_v63, %v2153_v1  ;;  %v1882_v55 = vadd.f32 %v1835_v51, %v1675_v17  ;;  %v16225_v1 = vrot.slane %v1539_v2, %v15974_v20 }
 0x37a   :  { %13857 = vmatpush3.bf16.msra.mxu1 %v16201_v4  ;;  %v16208_v14 = vmax.f32 %v2043_v48, %v2099_v43  ;;  %v2052_v16 = vadd.f32 %v16133_v19, %v1882_v55  ;;  %v1843_v45 = vrot.slane %v16225_v1, %v15984_v24 }
 0x37b   :  { %v1683_v36 = vpop.permute.xlu0 %1682  ;;  %13231 = vmatprep.subr.mxu1 %v21178_v35 }
 0x37c   :  { %v16210_v12 = vpop.permute.xlu1 %2019  ;;  %v1884_v26 = vadd.f32 %v1835_v51, %v1683_v36  ;;  %v2108_v63 = vmul.f32 0.33, %v2052_v16 }
 0x37e   :  { %13232 = vmatpush3.msk.msra.mxu1 %vm97_vm2, %v16208_v14  ;;  %v2054_v48 = vadd.f32 %v16133_v19, %v1884_v26  ;;  %v2164_v13 = vmax.f32 %v2052_v16, %v2108_v63 }
 0x37f   :  { %13234 = vmatmul.mubr.msk.f32.vlgmr.msra.gmra.mrb[58].mxu1 %vm992_vm5, %v1073_v11  ;;  %v1691_v41 = vpop.permute.xlu0 %1690  ;;  %13867 = vmatprep.subr.bf16.mxu1 %v21177_v31 }
 0x380   :  { %v1671_v21 = vpop.permute.xlu1 %1670  ;;  %13267 = vmatprep.mubr.msk.f32.mxu1 %vm15373_vm0, %v21178_v35  ;;  %v1886_v17 = vadd.f32 %v1835_v51, %v1691_v41  ;;  %v2110_v42 = vmul.f32 0.33, %v2054_v48 }
 0x381   :  { %v1881_v50 = vadd.f32 %v1835_v51, %v1671_v21 }
 0x382   :  { %v2056_v21 = vadd.f32 %v16133_v19, %v1886_v17  ;;  %v2166_v32 = vmax.f32 %v2054_v48, %v2110_v42 }
 0x383   :  { %v2051_v43 = vadd.f32 %v16133_v19, %v1881_v50  ;;  %v1695_v55 = vpop.permute.xlu0 %1694 }
 0x384   :  { %v1679_v36 = vpop.permute.xlu1 %1678  ;;  %v1887_v62 = vadd.f32 %v1835_v51, %v1695_v55 }
 0x385   :  { %v2107_v11 = vmul.f32 0.33, %v2051_v43  ;;  %v1883_v23 = vadd.f32 %v1835_v51, %v1679_v36  ;;  %v2112_v36 = vmul.f32 0.33, %v2056_v21 }
 0x386   :  { %v2057_v63 = vadd.f32 %v16133_v19, %v1887_v62 }
 0x387   :  { %v2163_v5 = vmax.f32 %v2051_v43, %v2107_v11  ;;  %v2053_v2 = vadd.f32 %v16133_v19, %v1883_v23  ;;  %v1737_v39 = vpop.permute.xlu0 %1736  ;;  %v2168_v42 = vmax.f32 %v2056_v21, %v2112_v36 }
 0x388   :  { %v1896_v26 = vadd.f32 %v1843_v45, %v1737_v39  ;;  %v1687_v41 = vpop.permute.xlu1 %1686  ;;  %v2113_v55 = vmul.f32 0.33, %v2057_v63 }
 0x389   :  { %v2109_v57 = vmul.f32 0.33, %v2053_v2  ;;  %v1885_v50 = vadd.f32 %v1835_v51, %v1687_v41  ;;  %v16233_v34 = vpack.c.bf16 %v2164_v13, %v2163_v5 }
 0x38a   :  { %v2066_v23 = vadd.f32 %v16210_v12, %v1896_v26  ;;  %v16252_v36 = vmax.f32 %v2057_v63, %v2113_v55 }
 0x38b   :  { %v2165_v18 = vmax.f32 %v2053_v2, %v2109_v57  ;;  %v2055_v10 = vadd.f32 %v16133_v19, %v1885_v50  ;;  %13869 = vmatpush3.bf16.msra.mxu1 %v16233_v34  ;;  %v1745_v16 = vpop.permute.xlu0 %1744 }
 0x38c   :  { %v1898_v17 = vadd.f32 %v1843_v45, %v1745_v16  ;;  %v1733_v43 = vpop.permute.xlu1 %1732  ;;  %13870 = vmatprep.subr.bf16.mxu1 %v21177_v31  ;;  %v2122_v11 = vmul.f32 0.33, %v2066_v23 }
 0x38d   :  { %v2111_v39 = vmul.f32 0.33, %v2055_v10  ;;  %v1895_v51 = vadd.f32 %v1843_v45, %v1733_v43  ;;  %v16240_v5 = vpack.c.bf16 %v2166_v32, %v2165_v18  ;;  %v1571_v32 = vcombine.high %v16225_v1, %v16225_v1  ;;  %v1075_v1 = vld [vmem:[%s20968_s15 + $0x18] sm:$0xff] }
 0x38e   :  { %v2068_v62 = vadd.f32 %v16210_v12, %v1898_v17  ;;  %v2178_v17 = vmax.f32 %v2066_v23, %v2122_v11 }
 0x38f   :  { %v2167_v13 = vmax.f32 %v2055_v10, %v2111_v39  ;;  %v2065_v57 = vadd.f32 %v16210_v12, %v1895_v51  ;;  %13872 = vmatpush3.bf16.msra.mxu1 %v16240_v5  ;;  %v1753_v48 = vpop.permute.xlu0 %1752 }
 0x390   :  { %v1741_v2 = vpop.permute.xlu1 %1740  ;;  %13873 = vmatprep.subr.bf16.mxu1 %v21177_v31  ;;  %v1900_v41 = vadd.f32 %v1843_v45, %v1753_v48  ;;  %v2124_v39 = vmul.f32 0.33, %v2068_v62 }
 0x391   :  { %v2121_v26 = vmul.f32 0.33, %v2065_v57  ;;  %v1897_v50 = vadd.f32 %v1843_v45, %v1741_v2  ;;  %v16246_v16 = vpack.c.bf16 %v2168_v42, %v2167_v13 }
 0x392   :  { %v2070_v51 = vadd.f32 %v16210_v12, %v1900_v41  ;;  %v2180_v41 = vmax.f32 %v2068_v62, %v2124_v39 }
 0x393   :  { %v2177_v10 = vmax.f32 %v2065_v57, %v2121_v26  ;;  %v2067_v18 = vadd.f32 %v16210_v12, %v1897_v50  ;;  %13875 = vmatpush3.bf16.msra.mxu1 %v16246_v16  ;;  %v1757_v21 = vpop.permute.xlu0 %1756  ;;  %v16260_v57 = vrot.slane %v1571_v32, %v15984_v24 }
 0x394   :  { %v1749_v43 = vpop.permute.xlu1 %1748  ;;  %13265 = vmatprep.subr.mxu1 %v21178_v35  ;;  %v1901_v48 = vadd.f32 %v1843_v45, %v1757_v21  ;;  %v2126_v50 = vmul.f32 0.33, %v2070_v51 }
 0x395   :  { %v2123_v42 = vmul.f32 0.33, %v2067_v18  ;;  %v1899_v13 = vadd.f32 %v1843_v45, %v1749_v43  ;;  %v16265_v55 = vpack.c.bf16 %v2178_v17, %v2177_v10 }
 0x396   :  { %v2071_v32 = vadd.f32 %v16210_v12, %v1901_v48  ;;  %v2182_v39 = vmax.f32 %v2070_v51, %v2126_v50 }
 0x397   :  { %v2179_v2 = vmax.f32 %v2067_v18, %v2123_v42  ;;  %v2069_v63 = vadd.f32 %v16210_v12, %v1899_v13  ;;  %13266 = vmatpush3.msk.msra.mxu1 %vm97_vm2, %v16252_v36  ;;  %v1799_v23 = vpop.permute.xlu0 %1798 }
 0x398   :  { %v1910_v11 = vadd.f32 %v16260_v57, %v1799_v23  ;;  %v16268_v26 = vpop.permute.xlu1 %2027  ;;  %13268 = vmatmul.mubr.msk.f32.vlgmr.msra.gmra.mrb[60].mxu1 %vm992_vm5, %v1075_v1  ;;  %13885 = vmatprep.subr.bf16.mxu1 %v21177_v31  ;;  %v2127_v13 = vmul.f32 0.33, %v2071_v32 }
 0x399   :  { %v2125_v45 = vmul.f32 0.33, %v2069_v63  ;;  %13887 = vmatpush3.bf16.msra.mxu1 %v16265_v55  ;;  %13301 = vmatprep.mubr.msk.f32.mxu1 %vm15373_vm0, %v21178_v35  ;;  %v16278_v17 = vpack.c.bf16 %v2180_v41, %v2179_v2 }
 0x39a   :  { %13888 = vmatprep.subr.bf16.mxu1 %v21177_v31  ;;  %v2080_v10 = vadd.f32 %v16268_v26, %v1910_v11  ;;  %v16291_v50 = vmax.f32 %v2071_v32, %v2127_v13 }
 0x39b   :  { %v2181_v18 = vmax.f32 %v2069_v63, %v2125_v45  ;;  %v1807_v21 = vpop.permute.xlu0 %1806 }
 0x39c   :  { %v1912_v43 = vadd.f32 %v16260_v57, %v1807_v21  ;;  %v1795_v62 = vpop.permute.xlu1 %1794  ;;  %v2136_v1 = vmul.f32 0.33, %v2080_v10 }
 0x39d   :  { %v1909_v42 = vadd.f32 %v16260_v57, %v1795_v62  ;;  %13890 = vmatpush3.bf16.msra.mxu1 %v16278_v17  ;;  %v16286_v11 = vpack.c.bf16 %v2182_v39, %v2181_v18  ;;  %v1077_v39 = vld [vmem:[%s20968_s15 + $0x28] sm:$0xff] }
 0x39e   :  { %13891 = vmatprep.subr.bf16.mxu1 %v21177_v31  ;;  %v2082_v48 = vadd.f32 %v16268_v26, %v1912_v43  ;;  %v2192_v21 = vmax.f32 %v2080_v10, %v2136_v1 }
 0x39f   :  { %v2079_v23 = vadd.f32 %v16268_v26, %v1909_v42  ;;  %v1815_v63 = vpop.permute.xlu0 %1814 }
 0x3a0   :  { %v1914_v2 = vadd.f32 %v16260_v57, %v1815_v63  ;;  %v1803_v41 = vpop.permute.xlu1 %1802  ;;  %v2138_v62 = vmul.f32 0.33, %v2082_v48 }
 0x3a1   :  { %v2135_v45 = vmul.f32 0.33, %v2079_v23  ;;  %v1911_v51 = vadd.f32 %v16260_v57, %v1803_v41  ;;  %13893 = vmatpush3.bf16.msra.mxu1 %v16286_v11 }
 0x3a2   :  { %13299 = vmatprep.subr.mxu1 %v21178_v35  ;;  %v2084_v42 = vadd.f32 %v16268_v26, %v1914_v2  ;;  %v2194_v10 = vmax.f32 %v2082_v48, %v2138_v62  ;;  %v1568_v48 = vcombine.high %v16129_v0, %v16129_v0 }
 0x3a3   :  { %v2191_v43 = vmax.f32 %v2079_v23, %v2135_v45  ;;  %v2081_v18 = vadd.f32 %v16268_v26, %v1911_v51 }
 0x3a4   :  { %v1811_v63 = vpop.permute.xlu1 %1810  ;;  %v2140_v13 = vmul.f32 0.33, %v2084_v42 }
 0x3a5   :  { %v2137_v61 = vmul.f32 0.33, %v2081_v18  ;;  %v1913_v41 = vadd.f32 %v16260_v57, %v1811_v63  ;;  %13300 = vmatpush3.msk.msra.mxu1 %vm97_vm2, %v16291_v50  ;;  %v16302_v32 = vpack.c.bf16 %v2192_v21, %v2191_v43 }
 0x3a6   :  { %13302 = vmatmul.mubr.msk.f32.vlgmr.msra.gmra.mrb[62].mxu1 %vm992_vm5, %v1077_v39  ;;  %13903 = vmatprep.subr.bf16.mxu1 %v21177_v31  ;;  %v2196_v62 = vmax.f32 %v2084_v42, %v2140_v13  ;;  %v1079_v13 = vld [vmem:[%s20968_s15 + $0x38] sm:$0xff] }
 0x3a7   :  { %v2193_v1 = vmax.f32 %v2081_v18, %v2137_v61  ;;  %v2083_v23 = vadd.f32 %v16268_v26, %v1913_v41  ;;  %13905 = vmatpush3.bf16.msra.mxu1 %v16302_v32  ;;  %13335 = vmatprep.mubr.msk.f32.mxu1 %vm15373_vm0, %v21178_v35 }
 0x3a8   :  { %v1819_v2 = vpop.permute.xlu1 %1818  ;;  %13906 = vmatprep.subr.bf16.mxu1 %v21177_v31 }
 0x3a9   :  { %v2139_v45 = vmul.f32 0.33, %v2083_v23  ;;  %v1915_v51 = vadd.f32 %v16260_v57, %v1819_v2  ;;  %v16312_v21 = vpack.c.bf16 %v2194_v10, %v2193_v1  ;;  %v1831_v57 = vrot.slane %v1568_v48, %v15984_v24 }
 0x3ab   :  { %v2195_v61 = vmax.f32 %v2083_v23, %v2139_v45  ;;  %v2085_v43 = vadd.f32 %v16268_v26, %v1915_v51  ;;  %13908 = vmatpush3.bf16.msra.mxu1 %v16312_v21 }
 0x3ac   :  { %v16318_v18 = vpop.permute.xlu1 %2015  ;;  %13909 = vmatprep.subr.bf16.mxu1 %v21177_v31 }
 0x3ad   :  { %v2141_v39 = vmul.f32 0.33, %v2085_v43  ;;  %v16321_v63 = vpack.c.bf16 %v2196_v62, %v2195_v61 }
 0x3af   :  { %13911 = vmatpush3.bf16.msra.mxu1 %v16321_v63  ;;  %v16328_v0 = vmax.f32 %v2085_v43, %v2141_v39 }
 0x3b0   :  { %v1640_v41 = vpop.permute.xlu1 %1639  ;;  %v16325_v10 = vpop.permute.xlu0 %2007  ;;  %13333 = vmatprep.subr.mxu1 %v21178_v35 }
 0x3b1   :  { %v1874_v42 = vadd.f32 %v1831_v57, %v1640_v41  ;;  %v1553_v41 = vrot.slane %v16204_v22, %v15974_v20 }
 0x3b3   :  { %13334 = vmatpush3.msk.msra.mxu1 %vm97_vm2, %v16328_v0  ;;  %v2044_v2 = vadd.f32 %v16325_v10, %v1874_v42  ;;  %v16351_v22 = vrot.slane %v1553_v41, %v15984_v24 }
 0x3b4   :  { %v1648_v1 = vpop.permute.xlu1 %1647  ;;  %v1644_v23 = vpop.permute.xlu0 %1643  ;;  %13336 = vmatmul.mubr.msk.f32.vlgmr.msra.gmra.mrb[64].mxu1 %vm992_vm5, %v1079_v13  ;;  %13924 = vmatprep.subr.bf16.mxu1 %v21177_v31 }
 0x3b5   :  { %v1876_v45 = vadd.f32 %v1831_v57, %v1648_v1  ;;  %v1875_v51 = vadd.f32 %v1831_v57, %v1644_v23  ;;  %13369 = vmatprep.mubr.msk.f32.mxu1 %vm15373_vm0, %v21178_v35  ;;  %v2100_v39 = vmul.f32 0.33, %v2044_v2 }
 0x3b7   :  { %v2045_v48 = vadd.f32 %v16325_v10, %v1875_v51  ;;  %v2046_v62 = vadd.f32 %v16325_v10, %v1876_v45  ;;  %v2156_v54 = vmax.f32 %v2044_v2, %v2100_v39 }
 0x3b8   :  { %v1656_v61 = vpop.permute.xlu1 %1655  ;;  %v1652_v43 = vpop.permute.xlu0 %1651 }
 0x3b9   :  { %v2101_v13 = vmul.f32 0.33, %v2045_v48  ;;  %v1878_v49 = vadd.f32 %v1831_v57, %v1656_v61  ;;  %v1877_v6 = vadd.f32 %v1831_v57, %v1652_v43  ;;  %v2102_v23 = vmul.f32 0.33, %v2046_v62 }
 0x3ba   :  { %13927 = vmatpush3.bf16.xpose.msk.msra.mxu1 %vm15760_vm6, %v16183_v60 }
 0x3bb   :  { %v2157_v42 = vmax.f32 %v2045_v48, %v2101_v13  ;;  %v2047_v1 = vadd.f32 %v16325_v10, %v1877_v6  ;;  %13928 = vmatprep.subr.bf16.mxu1 %v21177_v31  ;;  %v2048_v45 = vadd.f32 %v16325_v10, %v1878_v49  ;;  %v2158_v48 = vmax.f32 %v2046_v62, %v2102_v23 }
 0x3bc   :  { %v1702_v51 = vpop.permute.xlu1 %1701  ;;  %v1660_v59 = vpop.permute.xlu0 %1659 }
 0x3bd   :  { %v2103_v61 = vmul.f32 0.33, %v2047_v1  ;;  %v1879_v43 = vadd.f32 %v1831_v57, %v1660_v59  ;;  %v16353_v47 = vpack.c.bf16 %v2157_v42, %v2156_v54  ;;  %v1888_v60 = vadd.f32 %v16351_v22, %v1702_v51 }
 0x3be   :  { %v2104_v13 = vmul.f32 0.33, %v2048_v45 }
 0x3bf   :  { %v2159_v44 = vmax.f32 %v2047_v1, %v2103_v61  ;;  %v2049_v6 = vadd.f32 %v16325_v10, %v1879_v43  ;;  %13860 = vmatpush3.bf16.msra.mxu0 %v16353_v47  ;;  %v2058_v59 = vadd.f32 %v16318_v18, %v1888_v60  ;;  %v1569_v61 = vcombine.high %v1553_v41, %v1553_v41  ;;  %v1074_v41 = vld [vmem:[%s20968_s15 + $0x10] sm:$0xff] }
 0x3c0   :  { %v1710_v49 = vpop.permute.xlu1 %1709  ;;  %v1664_v3 = vpop.permute.xlu0 %1663  ;;  %13861 = vmatprep.subr.bf16.mxu0 %v21177_v31  ;;  %v2160_v42 = vmax.f32 %v2048_v45, %v2104_v13 }
 0x3c1   :  { %v2105_v30 = vmul.f32 0.33, %v2049_v6  ;;  %v1880_v2 = vadd.f32 %v1831_v57, %v1664_v3  ;;  %v16362_v54 = vpack.c.bf16 %v2159_v44, %v2158_v48  ;;  %v1890_v1 = vadd.f32 %v16351_v22, %v1710_v49 }
 0x3c2   :  { %13931 = vmatpush3.bf16.xpose.msk.msra.mxu1 %vm15760_vm6, %v16193_v8  ;;  %v2114_v51 = vmul.f32 0.33, %v2058_v59 }
 0x3c3   :  { %v2161_v39 = vmax.f32 %v2049_v6, %v2105_v30  ;;  %v2050_v62 = vadd.f32 %v16325_v10, %v1880_v2  ;;  %13932 = vmatprep.subr.bf16.mxu1 %v21177_v31  ;;  %13863 = vmatpush3.bf16.msra.mxu0 %v16362_v54  ;;  %v2060_v43 = vadd.f32 %v16318_v18, %v1890_v1 }
 0x3c4   :  { %v1718_v3 = vpop.permute.xlu1 %1717  ;;  %v1706_v57 = vpop.permute.xlu0 %1705  ;;  %13864 = vmatprep.subr.bf16.mxu0 %v21177_v31  ;;  %v2170_v2 = vmax.f32 %v2058_v59, %v2114_v51  ;;  %v16392_v1 = vrot.slane %v1569_v61, %v15984_v24 }
 0x3c5   :  { %v1889_v23 = vadd.f32 %v16351_v22, %v1706_v57  ;;  %v2106_v44 = vmul.f32 0.33, %v2050_v62  ;;  %v16371_v8 = vpack.c.bf16 %v2161_v39, %v2160_v42  ;;  %v1892_v45 = vadd.f32 %v16351_v22, %v1718_v3 }
 0x3c6   :  { %v2116_v3 = vmul.f32 0.33, %v2060_v43 }
 0x3c7   :  { %v2059_v30 = vadd.f32 %v16318_v18, %v1889_v23  ;;  %13866 = vmatpush3.bf16.msra.mxu0 %v16371_v8  ;;  %v16381_v49 = vmax.f32 %v2050_v62, %v2106_v44  ;;  %v2062_v62 = vadd.f32 %v16318_v18, %v1892_v45 }
 0x3c8   :  { %v16377_v60 = vpop.permute.xlu1 %2023  ;;  %v1714_v6 = vpop.permute.xlu0 %1713  ;;  %13248 = vmatprep.subr.mxu0 %v21178_v35  ;;  %v2172_v45 = vmax.f32 %v2060_v43, %v2116_v3 }
 0x3c9   :  { %v2115_v48 = vmul.f32 0.33, %v2059_v30  ;;  %v1891_v13 = vadd.f32 %v16351_v22, %v1714_v6  ;;  %v2118_v6 = vmul.f32 0.33, %v2062_v62 }
 0x3ca   :  { %13935 = vmatpush3.bf16.xpose.msk.msra.mxu1 %vm15760_vm6, %v16201_v4 }
 0x3cb   :  { %v2171_v39 = vmax.f32 %v2059_v30, %v2115_v48  ;;  %v2061_v42 = vadd.f32 %v16318_v18, %v1891_v13  ;;  %13367 = vmatprep.subr.mxu1 %v21178_v35  ;;  %13249 = vmatpush3.msk.msra.mxu0 %vm97_vm2, %v16381_v49 }
 0x3cc   :  { %v1764_v4 = vpop.permute.xlu1 %1763  ;;  %v1722_v57 = vpop.permute.xlu0 %1721  ;;  %13251 = vmatmul.mubr.msk.f32.vlgmr.msra.gmra.mrb[68].mxu0 %vm992_vm5, %v1074_v41  ;;  %13876 = vmatprep.subr.bf16.mxu0 %v21177_v31 }
 0x3cd   :  { %v2117_v23 = vmul.f32 0.33, %v2061_v42  ;;  %v1893_v59 = vadd.f32 %v16351_v22, %v1722_v57  ;;  %v16400_v44 = vpack.c.bf16 %v2171_v39, %v2170_v2  ;;  %v1902_v51 = vadd.f32 %v16392_v1, %v1764_v4  ;;  %13284 = vmatprep.mubr.msk.f32.mxu0 %vm15373_vm0, %v21178_v35 }
 0x3cf   :  { %v2173_v30 = vmax.f32 %v2061_v42, %v2117_v23  ;;  %v2063_v61 = vadd.f32 %v16318_v18, %v1893_v59  ;;  %13878 = vmatpush3.bf16.msra.mxu0 %v16400_v44  ;;  %v2072_v39 = vadd.f32 %v16377_v60, %v1902_v51  ;;  %v1081_v42 = vld [vmem:[%s20969_s16 + $0x8] sm:$0xff]  ;;  %v2174_v23 = vmax.f32 %v2062_v62, %v2118_v6 }
 0x3d0   :  { %v1772_v48 = vpop.permute.xlu1 %1771  ;;  %v1726_v13 = vpop.permute.xlu0 %1725  ;;  %13879 = vmatprep.subr.bf16.mxu0 %v21177_v31 }
 0x3d1   :  { %v2119_v41 = vmul.f32 0.33, %v2063_v61  ;;  %v1894_v2 = vadd.f32 %v16351_v22, %v1726_v13  ;;  %v16412_v4 = vpack.c.bf16 %v2173_v30, %v2172_v45  ;;  %v1904_v3 = vadd.f32 %v16392_v1, %v1772_v48 }
 0x3d2   :  { %13368 = vmatpush3.xpose.msk.msra.mxu1 %vm992_vm5, %v16208_v14  ;;  %v2128_v51 = vmul.f32 0.33, %v2072_v39 }
 0x3d3   :  { %v2175_v43 = vmax.f32 %v2063_v61, %v2119_v41  ;;  %v2064_v57 = vadd.f32 %v16318_v18, %v1894_v2  ;;  %13948 = vmatprep.subr.bf16.mxu1 %v21177_v31  ;;  %13881 = vmatpush3.bf16.msra.mxu0 %v16412_v4  ;;  %v2074_v62 = vadd.f32 %v16377_v60, %v1904_v3 }
 0x3d4   :  { %v1780_v22 = vpop.permute.xlu1 %1779  ;;  %v1768_v59 = vpop.permute.xlu0 %1767  ;;  %13882 = vmatprep.subr.bf16.mxu0 %v21177_v31 }
 0x3d5   :  { %v1903_v14 = vadd.f32 %v16392_v1, %v1768_v59  ;;  %13370 = vmatmul.mubr.msk.f32.vlgmr.msra.gmra.mrb[66].mxu1 %vm992_vm5, %v1081_v42  ;;  %v2120_v30 = vmul.f32 0.33, %v2064_v57  ;;  %v16427_v61 = vpack.c.bf16 %v2175_v43, %v2174_v23  ;;  %v1906_v45 = vadd.f32 %v16392_v1, %v1780_v22  ;;  %v1076_v43 = vld [vmem:[%s20968_s15 + $0x20] sm:$0xff] }
 0x3d6   :  { %13951 = vmatpush3.bf16.xpose.msk.msra.mxu1 %vm15760_vm6, %v16233_v34  ;;  %13403 = vmatprep.mubr.msk.f32.mxu1 %vm15373_vm0, %v21178_v35  ;;  %v2184_v34 = vmax.f32 %v2072_v39, %v2128_v51  ;;  %v2130_v3 = vmul.f32 0.33, %v2074_v62 }
 0x3d7   :  { %v2073_v6 = vadd.f32 %v16377_v60, %v1903_v14  ;;  %13952 = vmatprep.subr.bf16.mxu1 %v21177_v31  ;;  %13884 = vmatpush3.bf16.msra.mxu0 %v16427_v61  ;;  %v16438_v2 = vmax.f32 %v2064_v57, %v2120_v30  ;;  %v2076_v23 = vadd.f32 %v16377_v60, %v1906_v45 }
 0x3d8   :  { %v1776_v48 = vpop.permute.xlu0 %1775  ;;  %13282 = vmatprep.subr.mxu0 %v21178_v35  ;;  %v1788_v42 = vpop.permute.xlu1 %1787  ;;  %v2186_v30 = vmax.f32 %v2074_v62, %v2130_v3 }
 0x3d9   :  { %v2129_v13 = vmul.f32 0.33, %v2073_v6  ;;  %v1905_v41 = vadd.f32 %v16392_v1, %v1776_v48  ;;  %v1908_v48 = vadd.f32 %v16392_v1, %v1788_v42  ;;  %v2132_v45 = vmul.f32 0.33, %v2076_v23 }
 0x3db   :  { %v2185_v22 = vmax.f32 %v2073_v6, %v2129_v13  ;;  %v2075_v59 = vadd.f32 %v16377_v60, %v1905_v41  ;;  %13283 = vmatpush3.msk.msra.mxu0 %vm97_vm2, %v16438_v2 }
 0x3dc   :  { %v1784_v14 = vpop.permute.xlu0 %1783  ;;  %13285 = vmatmul.mubr.msk.f32.vlgmr.msra.gmra.mrb[70].mxu0 %vm992_vm5, %v1076_v43  ;;  %13894 = vmatprep.subr.bf16.mxu0 %v21177_v31 }
 0x3dd   :  { %v2131_v39 = vmul.f32 0.33, %v2075_v59  ;;  %v1907_v57 = vadd.f32 %v16392_v1, %v1784_v14  ;;  %v16451_v51 = vpack.c.bf16 %v2185_v22, %v2184_v34  ;;  %13318 = vmatprep.mubr.msk.f32.mxu0 %vm15373_vm0, %v21178_v35  ;;  %v2078_v1 = vadd.f32 %v16377_v60, %v1908_v48  ;;  %v15314_v14 = vld [vmem:[%s20966_s13] sm:$0xff]  ;;  %v1086_v48 = vld [vmem:[%s20969_s16 + $0x30] sm:$0xff] }
 0x3de   :  { %13955 = vmatpush3.bf16.xpose.msk.msra.mxu1 %vm15760_vm6, %v16240_v5  ;;  %v2188_v5 = vmax.f32 %v2076_v23, %v2132_v45  ;;  %v1078_v23 = vld [vmem:[%s20968_s15 + $0x30] sm:$0xff] }
 0x3df   :  { %v2187_v6 = vmax.f32 %v2075_v59, %v2131_v39  ;;  %v2077_v13 = vadd.f32 %v16377_v60, %v1907_v57  ;;  %13896 = vmatpush3.bf16.msra.mxu0 %v16451_v51  ;;  %13956 = vmatprep.subr.bf16.mxu1 %v21177_v31  ;;  %v2134_v62 = vmul.f32 0.33, %v2078_v1 }
 0x3e0   :  { %13897 = vmatprep.subr.bf16.mxu0 %v21177_v31 }
 0x3e1   :  { %v2133_v41 = vmul.f32 0.33, %v2077_v13  ;;  %v16463_v34 = vpack.c.bf16 %v2187_v6, %v2186_v30  ;;  %v16475_v3 = vmax.f32 %v2078_v1, %v2134_v62 }
 0x3e3   :  { %v2189_v42 = vmax.f32 %v2077_v13, %v2133_v41  ;;  %13899 = vmatpush3.bf16.msra.mxu0 %v16463_v34 }
 0x3e4   :  { %13900 = vmatprep.subr.bf16.mxu0 %v21177_v31 }
 0x3e5   :  { %v16467_v43 = vpack.c.bf16 %v2189_v42, %v2188_v5 }
 0x3e6   :  { %13959 = vmatpush3.bf16.xpose.msk.msra.mxu1 %vm15760_vm6, %v16246_v16  ;;  %v1083_v16 = vld [vmem:[%s20969_s16 + $0x18] sm:$0xff] }
 0x3e7   :  { %13902 = vmatpush3.bf16.msra.mxu0 %v16467_v43  ;;  %13401 = vmatprep.subr.mxu1 %v21178_v35 }
 0x3e8   :  { %13316 = vmatprep.subr.mxu0 %v21178_v35 }
 0x3eb   :  { %13317 = vmatpush3.msk.msra.mxu0 %vm97_vm2, %v16475_v3 }
 0x3ec   :  { %13319 = vmatmul.mubr.msk.f32.vlgmr.msra.gmra.mrb[72].mxu0 %vm992_vm5, %v1078_v23  ;;  %13912 = vmatprep.subr.bf16.mxu0 %v21177_v31 }
 0x3ed   :  { %13352 = vmatprep.mubr.msk.f32.mxu0 %vm15373_vm0, %v21178_v35 }
 0x3ee   :  { %13402 = vmatpush3.xpose.msk.msra.mxu1 %vm992_vm5, %v16252_v36  ;;  %v1087_v36 = vld [vmem:[%s20969_s16 + $0x38] sm:$0xff] }
 0x3ef   :  { %13972 = vmatprep.subr.bf16.mxu1 %v21177_v31 }
 0x3f1   :  { %13404 = vmatmul.mubr.msk.f32.vlgmr.msra.gmra.mrb[68].mxu1 %vm992_vm5, %v1083_v16 }
 0x3f2   :  { %13915 = vmatpush3.bf16.xpose.msk.msra.mxu0 %vm15760_vm6, %v16148_v40  ;;  %13975 = vmatpush3.bf16.xpose.msk.msra.mxu1 %vm15760_vm6, %v16265_v55  ;;  %v1080_v40 = vld [vmem:[%s20969_s16] sm:$0xff] }
 0x3f3   :  { %13916 = vmatprep.subr.bf16.mxu0 %v21177_v31  ;;  %13976 = vmatprep.subr.bf16.mxu1 %v21177_v31 }
 0x3f4   :  { %13437 = vmatprep.mubr.msk.f32.mxu1 %vm15373_vm0, %v21178_v35 }
 0x3fa   :  { %13919 = vmatpush3.bf16.xpose.msk.msra.mxu0 %vm15760_vm6, %v16155_v33  ;;  %13979 = vmatpush3.bf16.xpose.msk.msra.mxu1 %vm15760_vm6, %v16278_v17  ;;  %v1085_v33 = vld [vmem:[%s20969_s16 + $0x28] sm:$0xff]  ;;  %v6231_v17 = vld [vmem:[%s21179_s0 + $0x10] sm:$0xff] }
 0x3fb   :  { %13920 = vmatprep.subr.bf16.mxu0 %v21177_v31  ;;  %13980 = vmatprep.subr.bf16.mxu1 %v21177_v31 }
 0x402   :  { %13923 = vmatpush3.bf16.xpose.msk.msra.mxu0 %vm15760_vm6, %v16163_v15  ;;  %13983 = vmatpush3.bf16.xpose.msk.msra.mxu1 %vm15760_vm6, %v16286_v11  ;;  %v6230_v15 = vld [vmem:[%s21179_s0 + $0x8] sm:$0xff]  ;;  %v6232_v11 = vld [vmem:[%s21179_s0 + $0x18] sm:$0xff] }
 0x403   :  { %13350 = vmatprep.subr.mxu0 %v21178_v35  ;;  %13435 = vmatprep.subr.mxu1 %v21178_v35 }
 0x40a   :  { %13351 = vmatpush3.xpose.msk.msra.mxu0 %vm992_vm5, %v16171_v27  ;;  %13436 = vmatpush3.xpose.msk.msra.mxu1 %vm992_vm5, %v16291_v50  ;;  %v1082_v27 = vld [vmem:[%s20969_s16 + $0x10] sm:$0xff]  ;;  %v14396_v50 = vpack.c.bf16 %v6232_v11, %v6231_v17 }
 0x40b   :  { %13936 = vmatprep.subr.bf16.mxu0 %v21177_v31  ;;  %13996 = vmatprep.subr.bf16.mxu1 %v21177_v31 }
 0x40d   :  { %13353 = vmatmul.mubr.msk.f32.vlgmr.msra.gmra.mrb[74].mxu0 %vm992_vm5, %v1080_v40  ;;  %13438 = vmatmul.mubr.msk.f32.vlgmr.msra.gmra.mrb[70].mxu1 %vm992_vm5, %v1085_v33 }
 0x40e   :  { %13939 = vmatpush3.bf16.xpose.msk.msra.mxu0 %vm15760_vm6, %v16353_v47  ;;  %13999 = vmatpush3.bf16.xpose.msk.msra.mxu1 %vm15760_vm6, %v16302_v32  ;;  %v6229_v47 = vld [vmem:[%s21179_s0] sm:$0xff] }
 0x40f   :  { %13940 = vmatprep.subr.bf16.mxu0 %v21177_v31  ;;  %14000 = vmatprep.subr.bf16.mxu1 %v21177_v31  ;;  %v14393_v55 = vpack.c.bf16 %v6230_v15, %v6229_v47  ;;  %v6233_v32 = vld [vmem:[%s21179_s0 + $0x20] sm:$0xff] }
 0x410   :  { %13386 = vmatprep.mubr.msk.f32.mxu0 %vm15373_vm0, %v21178_v35  ;;  %13471 = vmatprep.mubr.msk.f32.mxu1 %vm15373_vm0, %v21178_v35 }
 0x416   :  { %13943 = vmatpush3.bf16.xpose.msk.msra.mxu0 %vm15760_vm6, %v16362_v54  ;;  %14003 = vmatpush3.bf16.xpose.msk.msra.mxu1 %vm15760_vm6, %v16312_v21  ;;  %v6234_v21 = vld [vmem:[%s21179_s0 + $0x28] sm:$0xff]  ;;  %v15313_v54 = vld [vmem:[%s20965_s12] sm:$0xff] }
 0x417   :  { %13944 = vmatprep.subr.bf16.mxu0 %v21177_v31  ;;  %14004 = vmatprep.subr.bf16.mxu1 %v21177_v31 }
 0x41e   :  { %13947 = vmatpush3.bf16.xpose.msk.msra.mxu0 %vm15760_vm6, %v16371_v8  ;;  %14007 = vmatpush3.bf16.xpose.msk.msra.mxu1 %vm15760_vm6, %v16321_v63  ;;  %v14399_v63 = vpack.c.bf16 %v6234_v21, %v6233_v32  ;;  %v1084_v8 = vld [vmem:[%s20969_s16 + $0x20] sm:$0xff] }
 0x41f   :  { %13384 = vmatprep.subr.mxu0 %v21178_v35  ;;  %13469 = vmatprep.subr.mxu1 %v21178_v35 }
 0x426   :  { %13385 = vmatpush3.xpose.msk.msra.mxu0 %vm992_vm5, %v16381_v49  ;;  %13470 = vmatpush3.xpose.msk.msra.mxu1 %vm992_vm5, %v16328_v0  ;;  %v6235_v0 = vld [vmem:[%s21179_s0 + $0x30] sm:$0x3] }
 0x427   :  { %13960 = vmatprep.subr.bf16.mxu0 %v21177_v31  ;;  %14392 = vmatprep.subr.bf16.mxu1 %v21177_v31 }
 0x429   :  { %13387 = vmatmul.mubr.msk.f32.vlgmr.msra.gmra.mrb[76].mxu0 %vm992_vm5, %v1082_v27  ;;  %13472 = vmatmul.mubr.msk.f32.vlgmr.msra.gmra.mrb[72].mxu1 %vm992_vm5, %v1087_v36 }
 0x42a   :  { %13963 = vmatpush3.bf16.xpose.msk.msra.mxu0 %vm15760_vm6, %v16400_v44  ;;  %14394 = vmatpush3.bf16.msra.mxu1 %v14393_v55 }
 0x42b   :  { %14395 = vmatprep.subr.bf16.mxu1 %v21177_v31  ;;  %13964 = vmatprep.subr.bf16.mxu0 %v21177_v31 }
 0x42c   :  { %13488 = vmatprep.mubr.msk.f32.mxu1 %vm15373_vm0, %v21178_v35  ;;  %13420 = vmatprep.mubr.msk.f32.mxu0 %vm15373_vm0, %v21178_v35 }
 0x42e   :  { %14397 = vmatpush3.bf16.msra.mxu1 %v14396_v50 }
 0x42f   :  { %14398 = vmatprep.subr.bf16.mxu1 %v21177_v31 }
 0x432   :  { %13967 = vmatpush3.bf16.xpose.msk.msra.mxu0 %vm15760_vm6, %v16412_v4  ;;  %14400 = vmatpush3.bf16.msra.mxu1 %v14399_v63 }
 0x433   :  { %13486 = vmatprep.subr.mxu1 %v21178_v35  ;;  %13968 = vmatprep.subr.bf16.mxu0 %v21177_v31 }
 0x436   :  { %13487 = vmatpush3.msk.msra.mxu1 %vm97_vm2, %v6235_v0 }
 0x437   :  { %13489 = vmatmul.mubr.msk.f32.vlgmr.msra.gmra.mrb[74].mxu1 %vm992_vm5, %v15313_v54  ;;  %14401 = vmatprep.subr.bf16.mxu1 %v21177_v31 }
 0x438   :  { %13505 = vmatprep.mubr.msk.f32.mxu1 %vm15373_vm0, %v21178_v35 }
 0x43a   :  { %13971 = vmatpush3.bf16.xpose.msk.msra.mxu0 %vm15760_vm6, %v16427_v61 }
 0x43b   :  { %13418 = vmatprep.subr.mxu0 %v21178_v35 }
 0x43d   :  { %14404 = vmatpush3.bf16.xpose.msk.msra.mxu1 %vm15760_vm6, %v14393_v55 }
 0x43e   :  { %14405 = vmatprep.subr.bf16.mxu1 %v21177_v31 }
 0x442   :  { %13419 = vmatpush3.xpose.msk.msra.mxu0 %vm992_vm5, %v16438_v2 }
 0x443   :  { %13984 = vmatprep.subr.bf16.mxu0 %v21177_v31  ;;  %v2270_v49 = vpop.f32.mrb[56].mxu1 }
 0x444   :  { %v13218_v44 = vpop.f32.mrb[57].mxu1  ;;  %v2806_v61 = vsel %vm992_vm5, %v2270_v49, 0.0 }
 0x445   :  { %13421 = vmatmul.mubr.msk.f32.vlgmr.msra.gmra.mrb[78].mxu0 %vm992_vm5, %v1084_v8  ;;  %14408 = vmatpush3.bf16.xpose.msk.msra.mxu1 %vm15760_vm6, %v14396_v50 }
 0x446   :  { %13987 = vmatpush3.bf16.xpose.msk.msra.mxu0 %vm15760_vm6, %v16451_v51  ;;  %14409 = vmatprep.subr.bf16.mxu1 %v21177_v31 }
 0x447   :  { %13988 = vmatprep.subr.bf16.mxu0 %v21177_v31  ;;  %13454 = vmatprep.mubr.msk.f32.mxu0 %vm15373_vm0, %v21178_v35 }
 0x44d   :  { %14412 = vmatpush3.bf16.xpose.msk.msra.mxu1 %vm15760_vm6, %v14399_v63 }
 0x44e   :  { %13991 = vmatpush3.bf16.xpose.msk.msra.mxu0 %vm15760_vm6, %v16463_v34  ;;  %13503 = vmatprep.subr.mxu1 %v21178_v35 }
 0x44f   :  { %13992 = vmatprep.subr.bf16.mxu0 %v21177_v31 }
 0x452   :  { %v2346_v4 = vpop.f32.mrb[58].mxu1 }
 0x453   :  { %v2807_v2 = vsel %vm992_vm5, %v2346_v4, 0.0  ;;  %v13235_v22 = vpop.f32.mrb[59].mxu1 }
 0x454   :  { %v2808_v59 = vadd.f32 %v2807_v2, %v2806_v61 }
 0x455   :  { %13504 = vmatpush3.xpose.msk.msra.mxu1 %vm992_vm5, %v6235_v0 }
 0x456   :  { %13995 = vmatpush3.bf16.xpose.msk.msra.mxu0 %vm15760_vm6, %v16467_v43  ;;  %14413 = vmatprep.subr.bf16.mxu1 %v21177_v31 }
 0x457   :  { %13452 = vmatprep.subr.mxu0 %v21178_v35 }
 0x458   :  { %13506 = vmatmul.mubr.msk.f32.vlgmr.msra.gmra.mrb[76].mxu1 %vm992_vm5, %v15314_v14 }
 0x459   :  { %13522 = vmatprep.mubr.msk.f32.mxu1 %vm15373_vm0, %v21178_v35 }
 0x45e   :  { %13453 = vmatpush3.xpose.msk.msra.mxu0 %vm992_vm5, %v16475_v3 }
 0x461   :  { %13455 = vmatmul.mubr.msk.f32.vlgmr.msra.gmra.mrb[80].mxu0 %vm992_vm5, %v1086_v48 }
 0x46b   :  { %v2498_v39 = vpop.f32.mrb[60].mxu1 }
 0x46c   :  { %v13269_v57 = vpop.f32.mrb[61].mxu1  ;;  %v2811_v5 = vsel %vm992_vm5, %v2498_v39, 0.0 }
 0x479   :  { %v2650_v51 = vpop.f32.mrb[62].mxu1 }
 0x47a   :  { %v13303_v30 = vpop.f32.mrb[63].mxu1  ;;  %v2815_v33 = vsel %vm992_vm5, %v2650_v51, 0.0 }
 0x487   :  { %v2802_v45 = vpop.f32.mrb[64].mxu1 }
 0x488   :  { %v13337_v6 = vpop.f32.mrb[65].mxu1  ;;  %v2819_v17 = vsel %vm992_vm5, %v2802_v45, 0.0 }
 0x49f   :  { %v2422_v13 = vpop.f32.mrb[68].mxu0 }
 0x4a0   :  { %v2809_v1 = vsel %vm992_vm5, %v2422_v13, 0.0  ;;  %v13252_v41 = vpop.f32.mrb[69].mxu0 }
 0x4a1   :  { %v2810_v34 = vadd.f32 %v2809_v1, %v2808_v59 }
 0x4a3   :  { %v2812_v42 = vadd.f32 %v2811_v5, %v2810_v34 }
 0x4a8   :  { %v3003_v62 = vpop.f32.mrb[66].mxu1 }
 0x4a9   :  { %v13371_v43 = vpop.f32.mrb[67].mxu1  ;;  %v3566_v0 = vsel %vm992_vm5, %v3003_v62, 0.0 }
 0x4af   :  { %v2574_v3 = vpop.f32.mrb[70].mxu0 }
 0x4b0   :  { %v2813_v23 = vsel %vm992_vm5, %v2574_v3, 0.0  ;;  %v13286_v16 = vpop.f32.mrb[71].mxu0 }
 0x4b1   :  { %v2814_v40 = vadd.f32 %v2813_v23, %v2812_v42 }
 0x4b3   :  { %v2816_v47 = vadd.f32 %v2815_v33, %v2814_v40 }
 0x4bf   :  { %v2726_v15 = vpop.f32.mrb[72].mxu0 }
 0x4c0   :  { %v2817_v27 = vsel %vm992_vm5, %v2726_v15, 0.0  ;;  %v13320_v36 = vpop.f32.mrb[73].mxu0 }
 0x4c1   :  { %v2818_v55 = vadd.f32 %v2817_v27, %v2816_v47  ;;  %v1105_v27 = vld [vmem:[%s20971_s18 + $0x80] sm:$0xff]  ;;  %v1106_v36 = vld [vmem:[%s20971_s18 + $0x88] sm:$0xff] }
 0x4c3   :  { %v16675_v11 = vadd.f32 %v2819_v17, %v2818_v55  ;;  %v16707_v17 = vpack.c.bf16 %v1106_v36, %v1105_v27  ;;  %v1100_v27 = vld [vmem:[%s20971_s18 + $0x58] sm:$0xff]  ;;  %v16836_v36 = vld [vmem:[%s20970_s17] sm:$0xff] }
 0x4c4   :  { %v3189_v50 = vpop.f32.mrb[68].mxu1 }
 0x4c5   :  { %v13405_v32 = vpop.f32.mrb[69].mxu1  ;;  %v3570_v48 = vsel %vm992_vm5, %v3189_v50, 0.0  ;;  %21180 = vst [vmem:[#allocation43_spill] sm:$0xff] %v16707_v17  ;;  %v1089_v50 = vld [vmem:[%s20971_s18] sm:$0xff]  ;;  %14010 = vmatprep.subr.msk.bf16.mxu0 %vm15760_vm6, %v16707_v17 }
 0x4c6   :  { %v1090_v32 = vld [vmem:[%s20971_s18 + $0x8] sm:$0xff] }
 0x4e0   :  { %v2910_v21 = vpop.f32.mrb[74].mxu0  ;;  %v3375_v63 = vpop.f32.mrb[70].mxu1 }
 0x4e1   :  { %v3565_v54 = vsel %vm992_vm5, %v2910_v21, 0.0  ;;  %v13439_v8 = vpop.f32.mrb[71].mxu1  ;;  %v13354_v49 = vpop.f32.mrb[75].mxu0  ;;  %v3574_v1 = vsel %vm992_vm5, %v3375_v63, 0.0  ;;  %v16715_v21 = vpack.c.bf16 %v1090_v32, %v1089_v50  ;;  %v1107_v63 = vld [vmem:[%s20971_s18 + $0x90] sm:$0xff]  ;;  %v1117_v50 = vld [vmem:[%s20971_s18 + $0xe0] sm:$0xff] }
 0x4e2   :  { %v3567_v44 = vadd.f32 %v3566_v0, %v3565_v54  ;;  %v1108_v0 = vld [vmem:[%s20971_s18 + $0x98] sm:$0xff]  ;;  %v1091_v8 = vld [vmem:[%s20971_s18 + $0x10] sm:$0xff]  ;;  %v1118_v32 = vld [vmem:[%s20971_s18 + $0xe8] sm:$0xff] }
 0x4e3   :  { %21181 = vst [vmem:[#allocation44_spill] sm:$0xff] %v16715_v21  ;;  %14013 = vmatpush3.bf16.xpose.msk.msra.mxu0 %vm15760_vm6, %v16715_v21  ;;  %v16729_v54 = vpack.c.bf16 %v1108_v0, %v1107_v63  ;;  %v1092_v49 = vld [vmem:[%s20971_s18 + $0x18] sm:$0xff]  ;;  %v16855_v0 = vpack.c.bf16 %v1118_v32, %v1117_v50 }
 0x4e5   :  { %21182 = vst [vmem:[#allocation45_spill] sm:$0xff] %v16729_v54  ;;  %14016 = vmatprep.subr.msk.bf16.mxu0 %vm15760_vm6, %v16729_v54  ;;  %21192 = vst [vmem:[#allocation55_spill] sm:$0xff] %v16855_v0 }
 0x4fc   :  { %v3096_v4 = vpop.f32.mrb[76].mxu0  ;;  %v3561_v61 = vpop.f32.mrb[72].mxu1 }
 0x4fd   :  { %v3568_v2 = vsel %vm992_vm5, %v3096_v4, 0.0  ;;  %v13473_v22 = vpop.f32.mrb[73].mxu1  ;;  %v13388_v59 = vpop.f32.mrb[77].mxu0  ;;  %v3578_v16 = vsel %vm992_vm5, %v3561_v61, 0.0  ;;  %v1109_v61 = vld [vmem:[%s20971_s18 + $0xa0] sm:$0xff] }
 0x4fe   :  { %v3569_v14 = vadd.f32 %v3568_v2, %v3567_v44  ;;  %v16737_v44 = vpack.c.bf16 %v1092_v49, %v1091_v8  ;;  %v1110_v2 = vld [vmem:[%s20971_s18 + $0xa8] sm:$0xff]  ;;  %v1093_v59 = vld [vmem:[%s20971_s18 + $0x20] sm:$0xff] }
 0x4ff   :  { %v16753_v22 = vpack.c.bf16 %v1110_v2, %v1109_v61  ;;  %v1101_v8 = vld [vmem:[%s20971_s18 + $0x60] sm:$0xff]  ;;  %v1102_v49 = vld [vmem:[%s20971_s18 + $0x68] sm:$0xff] }
 0x500   :  { %v3571_v39 = vadd.f32 %v3570_v48, %v3569_v14  ;;  %21183 = vst [vmem:[#allocation46_spill] sm:$0xff] %v16737_v44  ;;  %14019 = vmatpush3.bf16.xpose.msk.msra.mxu0 %vm15760_vm6, %v16737_v44  ;;  %v1094_v14 = vld [vmem:[%s20971_s18 + $0x28] sm:$0xff]  ;;  %v16865_v61 = vpack.c.bf16 %v1102_v49, %v1101_v8 }
 0x501   :  { %21184 = vst [vmem:[#allocation47_spill] sm:$0xff] %v16753_v22  ;;  %v16761_v48 = vpack.c.bf16 %v1094_v14, %v1093_v59  ;;  %14022 = vmatprep.subr.msk.bf16.mxu0 %vm15760_vm6, %v16753_v22 }
 0x502   :  { %21193 = vst [vmem:[#allocation56_spill] sm:$0xff] %v16865_v61 }
 0x503   :  { %21185 = vst [vmem:[#allocation48_spill] sm:$0xff] %v16761_v48 }
 0x508   :  { %14025 = vmatpush3.bf16.xpose.msk.msra.mxu0 %vm15760_vm6, %v16761_v48 }
 0x50a   :  { %v16681_v57 = vpop.f32.mrb[74].mxu1 }
 0x50b   :  { %v13490_v51 = vpop.f32.mrb[75].mxu1 }
 0x50c   :  { %v1112_v51 = vld [vmem:[%s20971_s18 + $0xb8] sm:$0xff] }
 0x518   :  { %v3282_v30 = vpop.f32.mrb[78].mxu0 }
 0x519   :  { %v3572_v45 = vsel %vm992_vm5, %v3282_v30, 0.0  ;;  %v13422_v6 = vpop.f32.mrb[79].mxu0 }
 0x51a   :  { %v3573_v13 = vadd.f32 %v3572_v45, %v3571_v39  ;;  %v1111_v39 = vld [vmem:[%s20971_s18 + $0xb0] sm:$0xff]  ;;  %v1096_v6 = vld [vmem:[%s20971_s18 + $0x38] sm:$0xff] }
 0x51b   :  { %v16775_v30 = vpack.c.bf16 %v1112_v51, %v1111_v39  ;;  %v1095_v45 = vld [vmem:[%s20971_s18 + $0x30] sm:$0xff]  ;;  %v1120_v51 = vld [vmem:[%s20971_s18 + $0xf8] sm:$0xff] }
 0x51c   :  { %v3575_v41 = vadd.f32 %v3574_v1, %v3573_v13  ;;  %v16783_v13 = vpack.c.bf16 %v1096_v6, %v1095_v45  ;;  %v1119_v39 = vld [vmem:[%s20971_s18 + $0xf0] sm:$0xff] }
 0x51d   :  { %21186 = vst [vmem:[#allocation49_spill] sm:$0xff] %v16775_v30  ;;  %14028 = vmatprep.subr.msk.bf16.mxu0 %vm15760_vm6, %v16775_v30  ;;  %v16889_v6 = vpack.c.bf16 %v1120_v51, %v1119_v39 }
 0x51e   :  { %21187 = vst [vmem:[#allocation50_spill] sm:$0xff] %v16783_v13  ;;  %14031 = vmatpush3.bf16.xpose.msk.msra.mxu0 %vm15760_vm6, %v16783_v13 }
 0x51f   :  { %21194 = vst [vmem:[#allocation57_spill] sm:$0xff] %v16889_v6 }
 0x52b   :  { %v16685_v34 = vpop.f32.mrb[76].mxu1 }
 0x52c   :  { %v6452_v5 = vrot.slane %v16685_v34, %v15984_v24  ;;  %v13507_v42 = vpop.f32.mrb[77].mxu1  ;;  %v6483_v40 = vrot.slane %v16685_v34, %v16078_v28  ;;  %v6514_v47 = vrot.slane %v16685_v34, %v16108_v25  ;;  %v6545_v15 = vrot.slane %v16685_v34, %v16088_v52 }
 0x52d   :  { %v6576_v55 = vrot.slane %v16685_v34, %v16114_v29  ;;  %v6607_v4 = vrot.slane %v16685_v34, %v16093_v58  ;;  %v6638_v1 = vrot.slane %v16685_v34, %v16120_v46 }
 0x52e   :  { %6458 = vbcast.lane.b32.xlu1 %v6452_v5, 264  ;;  %6454 = vbcast.lane.b32.xlu0 %v6452_v5, 256 }
 0x532   :  { %6466 = vbcast.lane.b32.xlu1 %v6452_v5, 280  ;;  %6462 = vbcast.lane.b32.xlu0 %v6452_v5, 272 }
 0x534   :  { %v3468_v62 = vpop.f32.mrb[80].mxu0 }
 0x535   :  { %v3576_v43 = vsel %vm992_vm5, %v3468_v62, 0.0  ;;  %v13456_v3 = vpop.f32.mrb[81].mxu0  ;;  %v1097_v62 = vld [vmem:[%s20971_s18 + $0x40] sm:$0xff] }
 0x536   :  { %v3577_v23 = vadd.f32 %v3576_v43, %v3575_v41  ;;  %6474 = vbcast.lane.b32.xlu1 %v6452_v5, 296  ;;  %6470 = vbcast.lane.b32.xlu0 %v6452_v5, 288  ;;  %v1113_v41 = vld [vmem:[%s20971_s18 + $0xc0] sm:$0xff]  ;;  %v1098_v43 = vld [vmem:[%s20971_s18 + $0x48] sm:$0xff] }
 0x537   :  { %v16807_v3 = vpack.c.bf16 %v1098_v43, %v1097_v62 }
 0x538   :  { %v16693_v33 = vadd.f32 %v3578_v16, %v3577_v23  ;;  %v6669_v23 = vrot.slane %v16685_v34, %v16099_v9  ;;  %v1115_v16 = vld [vmem:[%s20971_s18 + $0xd0] sm:$0xff] }
 0x539   :  { %21189 = vst [vmem:[#allocation52_spill] sm:$0xff] %v16807_v3 }
 0x53a   :  { %6485 = vbcast.lane.b32.xlu1 %v6483_v40, 256  ;;  %6478 = vbcast.lane.b32.xlu0 %v6452_v5, 304  ;;  %v1114_v5 = vld [vmem:[%s20971_s18 + $0xc8] sm:$0xff]  ;;  %v16880_v14 = vrot.slane %v16693_v33, %v15984_v24 }
 0x53b   :  { %v16799_v42 = vpack.c.bf16 %v1114_v5, %v1113_v41  ;;  %v1104_v41 = vld [vmem:[%s20971_s18 + $0x78] sm:$0xff] }
 0x53d   :  { %21188 = vst [vmem:[#allocation51_spill] sm:$0xff] %v16799_v42  ;;  %14034 = vmatprep.subr.msk.bf16.mxu0 %vm15760_vm6, %v16799_v42 }
 0x53e   :  { %6493 = vbcast.lane.b32.xlu1 %v6483_v40, 272  ;;  %6489 = vbcast.lane.b32.xlu0 %v6483_v40, 264 }
 0x53f   :  { %14037 = vmatpush3.bf16.xpose.msk.msra.mxu0 %vm15760_vm6, %v16807_v3 }
 0x542   :  { %6501 = vbcast.lane.b32.xlu1 %v6483_v40, 288  ;;  %6497 = vbcast.lane.b32.xlu0 %v6483_v40, 280 }
 0x546   :  { %6509 = vbcast.lane.b32.xlu1 %v6483_v40, 304  ;;  %6505 = vbcast.lane.b32.xlu0 %v6483_v40, 296  ;;  %v1116_v40 = vld [vmem:[%s20971_s18 + $0xd8] sm:$0xff] }
 0x54a   :  { %6520 = vbcast.lane.b32.xlu1 %v6514_v47, 264  ;;  %6516 = vbcast.lane.b32.xlu0 %v6514_v47, 256 }
 0x54e   :  { %6528 = vbcast.lane.b32.xlu1 %v6514_v47, 280  ;;  %6524 = vbcast.lane.b32.xlu0 %v6514_v47, 272 }
 0x552   :  { %6536 = vbcast.lane.b32.xlu1 %v6514_v47, 296  ;;  %6532 = vbcast.lane.b32.xlu0 %v6514_v47, 288 }
 0x556   :  { %6547 = vbcast.lane.b32.xlu1 %v6545_v15, 256  ;;  %6540 = vbcast.lane.b32.xlu0 %v6514_v47, 304  ;;  %v16823_v47 = vpack.c.bf16 %v1116_v40, %v1115_v16 }
 0x558   :  { %21190 = vst [vmem:[#allocation53_spill] sm:$0xff] %v16823_v47  ;;  %14040 = vmatprep.subr.msk.bf16.mxu0 %vm15760_vm6, %v16823_v47 }
 0x55a   :  { %6555 = vbcast.lane.b32.xlu1 %v6545_v15, 272  ;;  %6551 = vbcast.lane.b32.xlu0 %v6545_v15, 264 }
 0x55e   :  { %6563 = vbcast.lane.b32.xlu1 %v6545_v15, 288  ;;  %6559 = vbcast.lane.b32.xlu0 %v6545_v15, 280 }
 0x562   :  { %6571 = vbcast.lane.b32.xlu1 %v6545_v15, 304  ;;  %6567 = vbcast.lane.b32.xlu0 %v6545_v15, 296  ;;  %v1099_v15 = vld [vmem:[%s20971_s18 + $0x50] sm:$0xff] }
 0x563   :  { %v16831_v34 = vpack.c.bf16 %v1100_v27, %v1099_v15 }
 0x565   :  { %21191 = vst [vmem:[#allocation54_spill] sm:$0xff] %v16831_v34  ;;  %14043 = vmatpush3.bf16.xpose.msk.msra.mxu0 %vm15760_vm6, %v16831_v34 }
 0x566   :  { %6582 = vbcast.lane.b32.xlu1 %v6576_v55, 264  ;;  %6578 = vbcast.lane.b32.xlu0 %v6576_v55, 256 }
 0x567   :  { %14046 = vmatprep.subr.msk.bf16.mxu0 %vm15760_vm6, %v16855_v0 }
 0x56a   :  { %6590 = vbcast.lane.b32.xlu1 %v6576_v55, 280  ;;  %6586 = vbcast.lane.b32.xlu0 %v6576_v55, 272 }
 0x56d   :  { %14049 = vmatpush3.bf16.xpose.msk.msra.mxu0 %vm15760_vm6, %v16865_v61 }
 0x56e   :  { %6598 = vbcast.lane.b32.xlu1 %v6576_v55, 296  ;;  %6594 = vbcast.lane.b32.xlu0 %v6576_v55, 288 }
 0x56f   :  { %14052 = vmatprep.subr.msk.bf16.mxu0 %vm15760_vm6, %v16889_v6 }
 0x572   :  { %6609 = vbcast.lane.b32.xlu1 %v6607_v4, 256  ;;  %6602 = vbcast.lane.b32.xlu0 %v6576_v55, 304  ;;  %v3982_v55 = vrot.slane %v16836_v36, %v15974_v20 }
 0x574   :  { %v16853_v63 = vrot.slane %v3982_v55, %v15974_v20  ;;  %v3990_v45 = vcombine.high %v3982_v55, %v3982_v55 }
 0x576   :  { %6617 = vbcast.lane.b32.xlu1 %v6607_v4, 272  ;;  %6613 = vbcast.lane.b32.xlu0 %v6607_v4, 264  ;;  %v4027_v2 = vrot.slane %v16853_v63, %v15984_v24  ;;  %v16910_v27 = vrot.slane %v3990_v45, %v15974_v20 }
 0x57a   :  { %6625 = vbcast.lane.b32.xlu1 %v6607_v4, 288  ;;  %6621 = vbcast.lane.b32.xlu0 %v6607_v4, 280 }
 0x57e   :  { %6633 = vbcast.lane.b32.xlu1 %v6607_v4, 304  ;;  %6629 = vbcast.lane.b32.xlu0 %v6607_v4, 296  ;;  %v6407_v4 = vrot.slane %v16681_v57, %v15974_v20 }
 0x580   :  { %v16876_v59 = vrot.slane %v6407_v4, %v15974_v20  ;;  %v6415_v15 = vcombine.high %v6407_v4, %v6407_v4  ;;  %v1137_v4 = vld [vmem:[%s20971_s18 + $0x180] sm:$0xff] }
 0x582   :  { %6644 = vbcast.lane.b32.xlu1 %v6638_v1, 264  ;;  %6640 = vbcast.lane.b32.xlu0 %v6638_v1, 256  ;;  %v6700_v5 = vrot.slane %v16876_v59, %v15984_v24  ;;  %v16921_v45 = vrot.slane %v6415_v15, %v15974_v20 }
 0x586   :  { %6652 = vbcast.lane.b32.xlu1 %v6638_v1, 280  ;;  %6648 = vbcast.lane.b32.xlu0 %v6638_v1, 272 }
 0x58a   :  { %6660 = vbcast.lane.b32.xlu1 %v6638_v1, 296  ;;  %6656 = vbcast.lane.b32.xlu0 %v6638_v1, 288 }
 0x58e   :  { %6671 = vbcast.lane.b32.xlu1 %v6669_v23, 256  ;;  %6664 = vbcast.lane.b32.xlu0 %v6638_v1, 304  ;;  %v1103_v1 = vld [vmem:[%s20971_s18 + $0x70] sm:$0xff] }
 0x58f   :  { %v16899_v62 = vpack.c.bf16 %v1104_v41, %v1103_v1  ;;  %v1138_v1 = vld [vmem:[%s20971_s18 + $0x188] sm:$0xff]  ;;  %v4031_v41 = vrot.slane %v16910_v27, %v15984_v24 }
 0x591   :  { %21195 = vst [vmem:[#allocation58_spill] sm:$0xff] %v16899_v62  ;;  %14055 = vmatpush3.bf16.xpose.msk.msra.mxu0 %vm15760_vm6, %v16899_v62 }
 0x592   :  { %6679 = vbcast.lane.b32.xlu1 %v6669_v23, 272  ;;  %6675 = vbcast.lane.b32.xlu0 %v6669_v23, 264 }
 0x596   :  { %6687 = vbcast.lane.b32.xlu1 %v6669_v23, 288  ;;  %6683 = vbcast.lane.b32.xlu0 %v6669_v23, 280 }
 0x59a   :  { %6695 = vbcast.lane.b32.xlu1 %v6669_v23, 304  ;;  %6691 = vbcast.lane.b32.xlu0 %v6669_v23, 296 }
 0x59e   :  { %4057 = vperm.xlu0 %15153, %v4027_v2   ;;  %3635 = vbcast.lane.b32.xlu1 %v16880_v14, 256 }
 0x5a0   :  { %v6459_v43 = vpop.permute.xlu1 %6458  ;;  %v6455_v23 = vpop.permute.xlu0 %6454 }
 0x5a1   :  { %v6738_v16 = vadd.f32 %v6700_v5, %v6459_v43  ;;  %v6737_v40 = vadd.f32 %v6700_v5, %v6455_v23  ;;  %v16927_v43 = vpack.c.bf16 %v1138_v1, %v1137_v4  ;;  %v16936_v4 = vrot.slane %v16921_v45, %v15984_v24 }
 0x5a2   :  { %3639 = vbcast.lane.b32.xlu0 %v16880_v14, 264  ;;  %3643 = vbcast.lane.b32.xlu1 %v16880_v14, 272 }
 0x5a3   :  { %v6794_v55 = vadd.f32 %v6738_v16, %v16131_v7  ;;  %v6793_v50 = vadd.f32 %v6737_v40, %v16131_v7  ;;  %21196 = vst [vmem:[#allocation59_spill] sm:$0xff] %v16927_v43  ;;  %14058 = vmatprep.subr.msk.bf16.mxu0 %vm15760_vm6, %v16927_v43 }
 0x5a4   :  { %v6467_v32 = vpop.permute.xlu1 %6466  ;;  %v6463_v8 = vpop.permute.xlu0 %6462 }
 0x5a5   :  { %v6850_v49 = vmul.f32 0.33, %v6794_v55  ;;  %v6849_v2 = vmul.f32 0.33, %v6793_v50  ;;  %v6740_v39 = vadd.f32 %v6700_v5, %v6467_v32  ;;  %v6739_v51 = vadd.f32 %v6700_v5, %v6463_v8 }
 0x5a6   :  { %3647 = vbcast.lane.b32.xlu0 %v16880_v14, 280  ;;  %3651 = vbcast.lane.b32.xlu1 %v16880_v14, 288 }
 0x5a7   :  { %v6906_v23 = vmax.f32 %v6794_v55, %v6850_v49  ;;  %v6905_v16 = vmax.f32 %v6793_v50, %v6849_v2  ;;  %v6796_v40 = vadd.f32 %v6740_v39, %v16131_v7  ;;  %v6795_v32 = vadd.f32 %v6739_v51, %v16131_v7 }
 0x5a8   :  { %v6475_v8 = vpop.permute.xlu1 %6474  ;;  %v6471_v62 = vpop.permute.xlu0 %6470 }
 0x5a9   :  { %v6852_v15 = vmul.f32 0.33, %v6796_v40  ;;  %v6851_v6 = vmul.f32 0.33, %v6795_v32  ;;  %v6742_v61 = vadd.f32 %v6700_v5, %v6475_v8  ;;  %v6741_v0 = vadd.f32 %v6700_v5, %v6471_v62 }
 0x5aa   :  { %3655 = vbcast.lane.b32.xlu0 %v16880_v14, 296  ;;  %4061 = vperm.xlu1 %15154, %v4031_v41   ;;  %v16939_v55 = vpack.c.bf16 %v6906_v23, %v6905_v16  ;;  %v16946_v62 = vrot.slane %v16693_v33, %v16078_v28 }
 0x5ab   :  { %v6908_v50 = vmax.f32 %v6796_v40, %v6852_v15  ;;  %v6907_v49 = vmax.f32 %v6795_v32, %v6851_v6  ;;  %v6798_v2 = vadd.f32 %v6742_v61, %v16131_v7  ;;  %v6797_v39 = vadd.f32 %v6741_v0, %v16131_v7 }
 0x5ac   :  { %14415 = vmatpush3.bf16.msra.mxu1 %v16939_v55  ;;  %v6486_v51 = vpop.permute.xlu1 %6485  ;;  %v6479_v1 = vpop.permute.xlu0 %6478 }
 0x5ad   :  { %v6854_v8 = vmul.f32 0.33, %v6798_v2  ;;  %v6853_v43 = vmul.f32 0.33, %v6797_v39  ;;  %v6744_v41 = vadd.f32 %v16936_v4, %v6486_v51  ;;  %v6743_v23 = vadd.f32 %v6700_v5, %v6479_v1  ;;  %14416 = vmatprep.subr.bf16.mxu1 %v21177_v31 }
 0x5ae   :  { %3659 = vbcast.lane.b32.xlu0 %v16880_v14, 304  ;;  %3666 = vbcast.lane.b32.xlu1 %v16946_v62, 256  ;;  %v16952_v0 = vpack.c.bf16 %v6908_v50, %v6907_v49 }
 0x5af   :  { %v6910_v61 = vmax.f32 %v6798_v2, %v6854_v8  ;;  %v6909_v6 = vmax.f32 %v6797_v39, %v6853_v43  ;;  %v6799_v16 = vadd.f32 %v6743_v23, %v16131_v7  ;;  %v6800_v40 = vadd.f32 %v6744_v41, %v16124_v56 }
 0x5b0   :  { %14418 = vmatpush3.bf16.msra.mxu1 %v16952_v0  ;;  %v6494_v32 = vpop.permute.xlu1 %6493  ;;  %v6490_v15 = vpop.permute.xlu0 %6489  ;;  %v4020_v7 = vcombine.high %v16853_v63, %v16853_v63 }
 0x5b1   :  { %v6746_v5 = vadd.f32 %v16936_v4, %v6494_v32  ;;  %v6745_v51 = vadd.f32 %v16936_v4, %v6490_v15  ;;  %14419 = vmatprep.subr.bf16.mxu1 %v21177_v31  ;;  %v6855_v14 = vmul.f32 0.33, %v6799_v16  ;;  %v16962_v43 = vpack.c.bf16 %v6910_v61, %v6909_v6 }
 0x5b2   :  { %3670 = vbcast.lane.b32.xlu0 %v16946_v62, 264  ;;  %3674 = vbcast.lane.b32.xlu1 %v16946_v62, 272  ;;  %v6856_v49 = vmul.f32 0.33, %v6800_v40  ;;  %v4035_v63 = vrot.slane %v4020_v7, %v15984_v24  ;;  %v6445_v6 = vcombine.high %v16876_v59, %v16876_v59  ;;  %v15315_v7 = vld [vmem:[%s20968_s15] sm:$0xff] }
 0x5b3   :  { %v6801_v50 = vadd.f32 %v6745_v51, %v16124_v56  ;;  %v6802_v2 = vadd.f32 %v6746_v5, %v16124_v56  ;;  %v16972_v61 = vmax.f32 %v6799_v16, %v6855_v14 }
 0x5b4   :  { %14421 = vmatpush3.bf16.msra.mxu1 %v16962_v43  ;;  %v6502_v39 = vpop.permute.xlu1 %6501  ;;  %v6498_v1 = vpop.permute.xlu0 %6497  ;;  %v6912_v5 = vmax.f32 %v6800_v40, %v6856_v49 }
 0x5b5   :  { %v6857_v8 = vmul.f32 0.33, %v6801_v50  ;;  %v6748_v41 = vadd.f32 %v16936_v4, %v6502_v39  ;;  %v6747_v23 = vadd.f32 %v16936_v4, %v6498_v1  ;;  %13520 = vmatprep.subr.mxu1 %v21178_v35  ;;  %v6858_v51 = vmul.f32 0.33, %v6802_v2 }
 0x5b6   :  { %3678 = vbcast.lane.b32.xlu0 %v16946_v62, 280  ;;  %3682 = vbcast.lane.b32.xlu1 %v16946_v62, 288 }
 0x5b7   :  { %v6913_v32 = vmax.f32 %v6801_v50, %v6857_v8  ;;  %v6803_v15 = vadd.f32 %v6747_v23, %v16124_v56  ;;  %v6804_v39 = vadd.f32 %v6748_v41, %v16124_v56  ;;  %v16994_v50 = vrot.slane %v6445_v6, %v15984_v24 }
 0x5b8   :  { %13521 = vmatpush3.msk.msra.mxu1 %vm97_vm2, %v16972_v61  ;;  %v6510_v16 = vpop.permute.xlu1 %6509  ;;  %v6506_v14 = vpop.permute.xlu0 %6505  ;;  %v6914_v41 = vmax.f32 %v6802_v2, %v6858_v51 }
 0x5b9   :  { %v6859_v1 = vmul.f32 0.33, %v6803_v15  ;;  %v6749_v28 = vadd.f32 %v16936_v4, %v6506_v14  ;;  %13523 = vmatmul.mubr.msk.f32.vlgmr.msra.gmra.mrb[78].mxu1 %vm992_vm5, %v15315_v7  ;;  %14422 = vmatprep.subr.bf16.mxu1 %v21177_v31  ;;  %v6750_v59 = vadd.f32 %v16936_v4, %v6510_v16  ;;  %v16991_v40 = vpack.c.bf16 %v6913_v32, %v6912_v5 }
 0x5ba   :  { %3686 = vbcast.lane.b32.xlu0 %v16946_v62, 296  ;;  %4065 = vperm.xlu1 %15154, %v4035_v63   ;;  %v6860_v23 = vmul.f32 0.33, %v6804_v39  ;;  %v17002_v63 = vrot.slane %v16693_v33, %v16108_v25 }
 0x5bb   :  { %v6915_v49 = vmax.f32 %v6803_v15, %v6859_v1  ;;  %v6805_v8 = vadd.f32 %v6749_v28, %v16124_v56  ;;  %13539 = vmatprep.mubr.msk.f32.mxu1 %vm15373_vm0, %v21178_v35  ;;  %14424 = vmatpush3.bf16.msra.mxu1 %v16991_v40  ;;  %v6806_v28 = vadd.f32 %v6750_v59, %v16124_v56 }
 0x5bc   :  { %v6521_v14 = vpop.permute.xlu1 %6520  ;;  %v6517_v4 = vpop.permute.xlu0 %6516  ;;  %14425 = vmatprep.subr.bf16.mxu1 %v21177_v31  ;;  %v6916_v1 = vmax.f32 %v6804_v39, %v6860_v23  ;;  %v6447_v59 = vcombine.high %v16921_v45, %v16921_v45 }
 0x5bd   :  { %v6861_v32 = vmul.f32 0.33, %v6805_v8  ;;  %v6752_v6 = vadd.f32 %v16994_v50, %v6521_v14  ;;  %v6751_v15 = vadd.f32 %v16994_v50, %v6517_v4  ;;  %v17010_v2 = vpack.c.bf16 %v6915_v49, %v6914_v41 }
 0x5be   :  { %3690 = vbcast.lane.b32.xlu0 %v16946_v62, 304  ;;  %3697 = vbcast.lane.b32.xlu1 %v17002_v63, 256  ;;  %v6862_v49 = vmul.f32 0.33, %v6806_v28 }
 0x5bf   :  { %v6917_v5 = vmax.f32 %v6805_v8, %v6861_v32  ;;  %v6808_v51 = vadd.f32 %v6752_v6, %v16325_v10  ;;  %v6807_v16 = vadd.f32 %v6751_v15, %v16325_v10  ;;  %14427 = vmatpush3.bf16.msra.mxu1 %v17010_v2  ;;  %v4022_v8 = vcombine.high %v16910_v27, %v16910_v27 }
 0x5c0   :  { %v6529_v7 = vpop.permute.xlu1 %6528  ;;  %v6525_v14 = vpop.permute.xlu0 %6524  ;;  %14428 = vmatprep.subr.bf16.mxu1 %v21177_v31  ;;  %v17033_v27 = vrot.slane %v6447_v59, %v15984_v24 }
 0x5c1   :  { %v6864_v4 = vmul.f32 0.33, %v6808_v51  ;;  %v6863_v25 = vmul.f32 0.33, %v6807_v16  ;;  %v6754_v56 = vadd.f32 %v16994_v50, %v6529_v7  ;;  %v6753_v62 = vadd.f32 %v16994_v50, %v6525_v14 }
 0x5c2   :  { %3701 = vbcast.lane.b32.xlu0 %v17002_v63, 264  ;;  %3705 = vbcast.lane.b32.xlu1 %v17002_v63, 272  ;;  %v17022_v39 = vpack.c.bf16 %v6917_v5, %v6916_v1  ;;  %v17035_v1 = vmax.f32 %v6806_v28, %v6862_v49 }
 0x5c3   :  { %v6810_v41 = vadd.f32 %v6754_v56, %v16325_v10  ;;  %v6809_v23 = vadd.f32 %v6753_v62, %v16325_v10  ;;  %v6920_v32 = vmax.f32 %v6808_v51, %v6864_v4  ;;  %v6919_v6 = vmax.f32 %v6807_v16, %v6863_v25 }
 0x5c4   :  { %14430 = vmatpush3.bf16.msra.mxu1 %v17022_v39  ;;  %v6537_v15 = vpop.permute.xlu1 %6536  ;;  %v6533_v45 = vpop.permute.xlu0 %6532  ;;  %v4039_v25 = vrot.slane %v4022_v8, %v15984_v24  ;;  %v15316_v8 = vld [vmem:[%s20968_s15 + $0x8] sm:$0xff] }
 0x5c5   :  { %v6866_v7 = vmul.f32 0.33, %v6810_v41  ;;  %v6865_v14 = vmul.f32 0.33, %v6809_v23  ;;  %v6756_v34 = vadd.f32 %v16994_v50, %v6537_v15  ;;  %v6755_v5 = vadd.f32 %v16994_v50, %v6533_v45  ;;  %13537 = vmatprep.subr.mxu1 %v21178_v35 }
 0x5c6   :  { %3709 = vbcast.lane.b32.xlu0 %v17002_v63, 280  ;;  %3713 = vbcast.lane.b32.xlu1 %v17002_v63, 288  ;;  %v17044_v15 = vpack.c.bf16 %v6920_v32, %v6919_v6  ;;  %v3975_v6 = vcombine.high %v16836_v36, %v16836_v36 }
 0x5c7   :  { %v6922_v51 = vmax.f32 %v6810_v41, %v6866_v7  ;;  %v6921_v16 = vmax.f32 %v6809_v23, %v6865_v14  ;;  %v6812_v4 = vadd.f32 %v6756_v34, %v16325_v10  ;;  %v6811_v56 = vadd.f32 %v6755_v5, %v16325_v10 }
 0x5c8   :  { %13538 = vmatpush3.msk.msra.mxu1 %vm97_vm2, %v17035_v1  ;;  %v6548_v62 = vpop.permute.xlu1 %6547  ;;  %v6541_v59 = vpop.permute.xlu0 %6540  ;;  %v6400_v41 = vcombine.high %v16681_v57, %v16681_v57 }
 0x5c9   :  { %v6868_v28 = vmul.f32 0.33, %v6812_v4  ;;  %v6867_v49 = vmul.f32 0.33, %v6811_v56  ;;  %v6758_v45 = vadd.f32 %v17033_v27, %v6548_v62  ;;  %13540 = vmatmul.mubr.msk.f32.vlgmr.msra.gmra.mrb[80].mxu1 %vm992_vm5, %v15316_v8  ;;  %14431 = vmatprep.subr.bf16.mxu1 %v21177_v31  ;;  %v6757_v34 = vadd.f32 %v16994_v50, %v6541_v59 }
 0x5ca   :  { %14433 = vmatpush3.bf16.msra.mxu1 %v17044_v15  ;;  %3717 = vbcast.lane.b32.xlu0 %v17002_v63, 296  ;;  %v17057_v32 = vpack.c.bf16 %v6922_v51, %v6921_v16  ;;  %v17070_v51 = vrot.slane %v16693_v33, %v16088_v52  ;;  %v17078_v16 = vrot.slane %v3975_v6, %v15974_v20 }
 0x5cb   :  { %v6924_v23 = vmax.f32 %v6812_v4, %v6868_v28  ;;  %4069 = vperm.xlu1 %15154, %v4039_v25   ;;  %v6923_v7 = vmax.f32 %v6811_v56, %v6867_v49  ;;  %v6814_v14 = vadd.f32 %v6758_v45, %v16133_v19  ;;  %v6813_v5 = vadd.f32 %v6757_v34, %v16325_v10 }
 0x5cc   :  { %v6556_v50 = vpop.permute.xlu1 %6555  ;;  %14434 = vmatprep.subr.bf16.mxu1 %v21177_v31  ;;  %v6552_v62 = vpop.permute.xlu0 %6551  ;;  %13556 = vmatprep.mubr.msk.f32.mxu1 %vm15373_vm0, %v21178_v35  ;;  %v6414_v10 = vrot.slane %v6400_v41, %v15974_v20 }
 0x5cd   :  { %v6760_v57 = vadd.f32 %v17033_v27, %v6556_v50  ;;  %v6759_v25 = vadd.f32 %v17033_v27, %v6552_v62  ;;  %v6870_v4 = vmul.f32 0.33, %v6814_v14  ;;  %v6869_v56 = vmul.f32 0.33, %v6813_v5 }
 0x5ce   :  { %14436 = vmatpush3.bf16.msra.mxu1 %v17057_v32  ;;  %3721 = vbcast.lane.b32.xlu0 %v17002_v63, 304  ;;  %v17082_v45 = vpack.c.bf16 %v6924_v23, %v6923_v7  ;;  %v17089_v41 = vrot.slane %v6414_v10, %v15974_v20  ;;  %v17095_v23 = vrot.slane %v17078_v16, %v15974_v20 }
 0x5cf   :  { %v6815_v36 = vadd.f32 %v6759_v25, %v16133_v19  ;;  %3728 = vbcast.lane.b32.xlu1 %v17070_v51, 256  ;;  %v6816_v59 = vadd.f32 %v6760_v57, %v16133_v19  ;;  %14437 = vmatprep.subr.bf16.mxu1 %v21177_v31  ;;  %v6926_v7 = vmax.f32 %v6814_v14, %v6870_v4 }
 0x5d0   :  { %v6564_v28 = vpop.permute.xlu1 %6563  ;;  %v6560_v49 = vpop.permute.xlu0 %6559  ;;  %v17097_v62 = vmax.f32 %v6813_v5, %v6869_v56  ;;  %v17110_v5 = vrot.slane %v17089_v41, %v15984_v24 }
 0x5d1   :  { %v6871_v63 = vmul.f32 0.33, %v6815_v36  ;;  %v6762_v8 = vadd.f32 %v17033_v27, %v6564_v28  ;;  %v6761_v34 = vadd.f32 %v17033_v27, %v6560_v49  ;;  %v6872_v57 = vmul.f32 0.33, %v6816_v59 }
 0x5d2   :  { %14439 = vmatpush3.bf16.msra.mxu1 %v17082_v45  ;;  %3732 = vbcast.lane.b32.xlu0 %v17070_v51, 264 }
 0x5d3   :  { %v6927_v6 = vmax.f32 %v6815_v36, %v6871_v63  ;;  %v6817_v50 = vadd.f32 %v6761_v34, %v16133_v19  ;;  %3736 = vbcast.lane.b32.xlu1 %v17070_v51, 272  ;;  %v6818_v25 = vadd.f32 %v6762_v8, %v16133_v19  ;;  %13554 = vmatprep.subr.mxu1 %v21178_v35  ;;  %v15317_v8 = vld [vmem:[%s20968_s15 + $0x10] sm:$0xff] }
 0x5d4   :  { %v6572_v28 = vpop.permute.xlu1 %6571  ;;  %v6568_v49 = vpop.permute.xlu0 %6567  ;;  %v6928_v34 = vmax.f32 %v6816_v59, %v6872_v57 }
 0x5d5   :  { %v6873_v47 = vmul.f32 0.33, %v6817_v50  ;;  %v6763_v36 = vadd.f32 %v17033_v27, %v6568_v49  ;;  %v6764_v63 = vadd.f32 %v17033_v27, %v6572_v28  ;;  %v17106_v14 = vpack.c.bf16 %v6927_v6, %v6926_v7 }
 0x5d6   :  { %13555 = vmatpush3.msk.msra.mxu1 %vm97_vm2, %v17097_v62  ;;  %3740 = vbcast.lane.b32.xlu0 %v17070_v51, 280  ;;  %v6416_v27 = vcombine.high %v6414_v10, %v6414_v10  ;;  %v6874_v28 = vmul.f32 0.33, %v6818_v25 }
 0x5d7   :  { %v6929_v4 = vmax.f32 %v6817_v50, %v6873_v47  ;;  %v6819_v56 = vadd.f32 %v6763_v36, %v16133_v19  ;;  %13557 = vmatmul.mubr.msk.f32.vlgmr.msra.gmra.mrb[82].mxu1 %vm992_vm5, %v15317_v8  ;;  %14440 = vmatprep.subr.bf16.mxu1 %v21177_v31  ;;  %v4043_v47 = vrot.slane %v17095_v23, %v15984_v24 }
 0x5d8   :  { %3744 = vbcast.lane.b32.xlu1 %v17070_v51, 288  ;;  %v6583_v6 = vpop.permute.xlu1 %6582  ;;  %v6579_v7 = vpop.permute.xlu0 %6578  ;;  %14442 = vmatpush3.bf16.msra.mxu1 %v17106_v14  ;;  %v6820_v10 = vadd.f32 %v6764_v63, %v16133_v19 }
 0x5d9   :  { %v6875_v50 = vmul.f32 0.33, %v6819_v56  ;;  %v6766_v49 = vadd.f32 %v17110_v5, %v6583_v6  ;;  %v6765_v36 = vadd.f32 %v17110_v5, %v6579_v7  ;;  %13573 = vmatprep.mubr.msk.f32.mxu1 %vm15373_vm0, %v21178_v35  ;;  %14443 = vmatprep.subr.bf16.mxu1 %v21177_v31  ;;  %v17129_v59 = vpack.c.bf16 %v6929_v4, %v6928_v34 }
 0x5da   :  { %3748 = vbcast.lane.b32.xlu0 %v17070_v51, 296  ;;  %v17134_v6 = vrot.slane %v6416_v27, %v15974_v20  ;;  %v6930_v7 = vmax.f32 %v6818_v25, %v6874_v28  ;;  %v17143_v27 = vrot.slane %v16693_v33, %v16114_v29  ;;  %v3991_v34 = vcombine.high %v17078_v16, %v17078_v16 }
 0x5db   :  { %v6931_v57 = vmax.f32 %v6819_v56, %v6875_v50  ;;  %v6822_v8 = vadd.f32 %v6766_v49, %v16318_v18  ;;  %v6821_v3 = vadd.f32 %v6765_v36, %v16318_v18  ;;  %v6876_v56 = vmul.f32 0.33, %v6820_v10 }
 0x5dc   :  { %4073 = vperm.xlu1 %15154, %v4043_v47   ;;  %v6591_v42 = vpop.permute.xlu1 %6590  ;;  %v6587_v13 = vpop.permute.xlu0 %6586  ;;  %14445 = vmatpush3.bf16.msra.mxu1 %v17129_v59  ;;  %v17157_v16 = vrot.slane %v17134_v6, %v15984_v24 }
 0x5dd   :  { %v6878_v30 = vmul.f32 0.33, %v6822_v8  ;;  %v6877_v19 = vmul.f32 0.33, %v6821_v3  ;;  %v6768_v63 = vadd.f32 %v17110_v5, %v6591_v42  ;;  %v6767_v4 = vadd.f32 %v17110_v5, %v6587_v13  ;;  %14446 = vmatprep.subr.bf16.mxu1 %v21177_v31 }
 0x5de   :  { %3752 = vbcast.lane.b32.xlu0 %v17070_v51, 304  ;;  %v17145_v25 = vpack.c.bf16 %v6931_v57, %v6930_v7 }
 0x5df   :  { %v6824_v28 = vadd.f32 %v6768_v63, %v16318_v18  ;;  %v6823_v42 = vadd.f32 %v6767_v4, %v16318_v18  ;;  %v6934_v47 = vmax.f32 %v6822_v8, %v6878_v30  ;;  %v6933_v13 = vmax.f32 %v6821_v3, %v6877_v19 }
 0x5e0   :  { %3759 = vbcast.lane.b32.xlu1 %v17143_v27, 256  ;;  %v6599_v50 = vpop.permute.xlu1 %6598  ;;  %v6595_v49 = vpop.permute.xlu0 %6594  ;;  %14448 = vmatpush3.bf16.msra.mxu1 %v17145_v25  ;;  %v17159_v63 = vmax.f32 %v6820_v10, %v6876_v56  ;;  %v17164_v30 = vrot.slane %v3991_v34, %v15974_v20 }
 0x5e1   :  { %v6880_v51 = vmul.f32 0.33, %v6824_v28  ;;  %v6879_v36 = vmul.f32 0.33, %v6823_v42  ;;  %v6770_v57 = vadd.f32 %v17110_v5, %v6599_v50  ;;  %v6769_v7 = vadd.f32 %v17110_v5, %v6595_v49  ;;  %13571 = vmatprep.subr.mxu1 %v21178_v35 }
 0x5e2   :  { %3763 = vbcast.lane.b32.xlu0 %v17143_v27, 264  ;;  %v17169_v48 = vpack.c.bf16 %v6934_v47, %v6933_v13  ;;  %v4047_v13 = vrot.slane %v17164_v30, %v15984_v24 }
 0x5e3   :  { %v6936_v3 = vmax.f32 %v6824_v28, %v6880_v51  ;;  %v6935_v8 = vmax.f32 %v6823_v42, %v6879_v36  ;;  %v6826_v19 = vadd.f32 %v6770_v57, %v16318_v18  ;;  %v6825_v4 = vadd.f32 %v6769_v7, %v16318_v18  ;;  %v15318_v42 = vld [vmem:[%s20968_s15 + $0x18] sm:$0xff] }
 0x5e4   :  { %3767 = vbcast.lane.b32.xlu1 %v17143_v27, 272  ;;  %v6610_v50 = vpop.permute.xlu1 %6609  ;;  %v6603_v49 = vpop.permute.xlu0 %6602  ;;  %13572 = vmatpush3.msk.msra.mxu1 %vm97_vm2, %v17159_v63 }
 0x5e5   :  { %v6882_v10 = vmul.f32 0.33, %v6826_v19  ;;  %v6881_v56 = vmul.f32 0.33, %v6825_v4  ;;  %v6772_v34 = vadd.f32 %v17157_v16, %v6610_v50  ;;  %v6771_v28 = vadd.f32 %v17110_v5, %v6603_v49  ;;  %13574 = vmatmul.mubr.msk.f32.vlgmr.msra.gmra.mrb[84].mxu1 %vm992_vm5, %v15318_v42  ;;  %14449 = vmatprep.subr.bf16.mxu1 %v21177_v31 }
 0x5e6   :  { %14451 = vmatpush3.bf16.msra.mxu1 %v17169_v48  ;;  %v17181_v47 = vpack.c.bf16 %v6936_v3, %v6935_v8  ;;  %3771 = vbcast.lane.b32.xlu0 %v17143_v27, 280 }
 0x5e7   :  { %v6938_v51 = vmax.f32 %v6826_v19, %v6882_v10  ;;  %v6828_v36 = vadd.f32 %v6772_v34, %v16210_v12  ;;  %v6827_v5 = vadd.f32 %v6771_v28, %v16318_v18  ;;  %v6937_v50 = vmax.f32 %v6825_v4, %v6881_v56  ;;  %14452 = vmatprep.subr.bf16.mxu1 %v21177_v31 }
 0x5e8   :  { %3775 = vbcast.lane.b32.xlu1 %v17143_v27, 288  ;;  %v6618_v57 = vpop.permute.xlu1 %6617  ;;  %v6614_v7 = vpop.permute.xlu0 %6613  ;;  %13590 = vmatprep.mubr.msk.f32.mxu1 %vm15373_vm0, %v21178_v35 }
 0x5e9   :  { %v6774_v49 = vadd.f32 %v17157_v16, %v6618_v57  ;;  %v6773_v3 = vadd.f32 %v17157_v16, %v6614_v7  ;;  %v6884_v18 = vmul.f32 0.33, %v6828_v36  ;;  %v6883_v19 = vmul.f32 0.33, %v6827_v5 }
 0x5ea   :  { %14454 = vmatpush3.bf16.msra.mxu1 %v17181_v47  ;;  %3779 = vbcast.lane.b32.xlu0 %v17143_v27, 296  ;;  %v17201_v57 = vpack.c.bf16 %v6938_v51, %v6937_v50  ;;  %v17205_v7 = vrot.slane %v16693_v33, %v16093_v58 }
 0x5eb   :  { %v6829_v8 = vadd.f32 %v6773_v3, %v16210_v12  ;;  %v6830_v10 = vadd.f32 %v6774_v49, %v16210_v12  ;;  %14455 = vmatprep.subr.bf16.mxu1 %v21177_v31  ;;  %v6446_v49 = vcombine.high %v17089_v41, %v17089_v41  ;;  %v6940_v22 = vmax.f32 %v6828_v36, %v6884_v18 }
 0x5ec   :  { %4077 = vperm.xlu1 %15154, %v4047_v13   ;;  %v6626_v4 = vpop.permute.xlu1 %6625  ;;  %v6622_v56 = vpop.permute.xlu0 %6621 }
 0x5ed   :  { %v6885_v34 = vmul.f32 0.33, %v6829_v8  ;;  %v6776_v28 = vadd.f32 %v17157_v16, %v6626_v4  ;;  %v6775_v42 = vadd.f32 %v17157_v16, %v6622_v56  ;;  %v6886_v4 = vmul.f32 0.33, %v6830_v10 }
 0x5ee   :  { %14457 = vmatpush3.bf16.msra.mxu1 %v17201_v57  ;;  %3783 = vbcast.lane.b32.xlu0 %v17143_v27, 304  ;;  %v17214_v56 = vmax.f32 %v6827_v5, %v6883_v19  ;;  %v17221_v36 = vrot.slane %v6446_v49, %v15984_v24  ;;  %v15319_v19 = vld [vmem:[%s20968_s15 + $0x20] sm:$0xff] }
 0x5ef   :  { %v6941_v3 = vmax.f32 %v6829_v8, %v6885_v34  ;;  %v6831_v13 = vadd.f32 %v6775_v42, %v16210_v12  ;;  %v6832_v44 = vadd.f32 %v6776_v28, %v16210_v12  ;;  %13588 = vmatprep.subr.mxu1 %v21178_v35  ;;  %v6942_v27 = vmax.f32 %v6830_v10, %v6886_v4 }
 0x5f0   :  { %3790 = vbcast.lane.b32.xlu1 %v17205_v7, 256  ;;  %v6634_v51 = vpop.permute.xlu1 %6633  ;;  %v6630_v50 = vpop.permute.xlu0 %6629 }
 0x5f1   :  { %v6887_v58 = vmul.f32 0.33, %v6831_v13  ;;  %v6777_v41 = vadd.f32 %v17157_v16, %v6630_v50  ;;  %v17218_v8 = vpack.c.bf16 %v6941_v3, %v6940_v22  ;;  %v6888_v28 = vmul.f32 0.33, %v6832_v44 }
 0x5f2   :  { %13589 = vmatpush3.msk.msra.mxu1 %vm97_vm2, %v17214_v56  ;;  %v6778_v5 = vadd.f32 %v17157_v16, %v6634_v51  ;;  %3794 = vbcast.lane.b32.xlu0 %v17205_v7, 264 }
 0x5f3   :  { %v6943_v18 = vmax.f32 %v6831_v13, %v6887_v58  ;;  %v6833_v34 = vadd.f32 %v6777_v41, %v16210_v12  ;;  %13591 = vmatmul.mubr.msk.f32.vlgmr.msra.gmra.mrb[86].mxu1 %vm992_vm5, %v15319_v19  ;;  %14458 = vmatprep.subr.bf16.mxu1 %v21177_v31  ;;  %v4021_v58 = vcombine.high %v17095_v23, %v17095_v23 }
 0x5f4   :  { %v6645_v22 = vpop.permute.xlu1 %6644  ;;  %v6641_v42 = vpop.permute.xlu0 %6640  ;;  %3798 = vbcast.lane.b32.xlu1 %v17205_v7, 272  ;;  %14460 = vmatpush3.bf16.msra.mxu1 %v17218_v8  ;;  %v6944_v51 = vmax.f32 %v6832_v44, %v6888_v28  ;;  %v6834_v50 = vadd.f32 %v6778_v5, %v16210_v12  ;;  %v6448_v12 = vcombine.high %v17134_v6, %v17134_v6 }
 0x5f5   :  { %v6889_v49 = vmul.f32 0.33, %v6833_v34  ;;  %v6780_v16 = vadd.f32 %v17221_v36, %v6645_v22  ;;  %v6779_v10 = vadd.f32 %v17221_v36, %v6641_v42  ;;  %v17239_v3 = vpack.c.bf16 %v6943_v18, %v6942_v27  ;;  %13607 = vmatprep.mubr.msk.f32.mxu1 %vm15373_vm0, %v21178_v35  ;;  %14461 = vmatprep.subr.bf16.mxu1 %v21177_v31 }
 0x5f6   :  { %v4051_v22 = vrot.slane %v4021_v58, %v15984_v24  ;;  %3802 = vbcast.lane.b32.xlu0 %v17205_v7, 280  ;;  %v6890_v5 = vmul.f32 0.33, %v6834_v50 }
 0x5f7   :  { %v6945_v13 = vmax.f32 %v6833_v34, %v6889_v49  ;;  %v6836_v4 = vadd.f32 %v6780_v16, %v16377_v60  ;;  %v6835_v23 = vadd.f32 %v6779_v10, %v16377_v60 }
 0x5f8   :  { %v6653_v41 = vpop.permute.xlu1 %6652  ;;  %v6649_v19 = vpop.permute.xlu0 %6648  ;;  %3806 = vbcast.lane.b32.xlu1 %v17205_v7, 288  ;;  %14463 = vmatpush3.bf16.msra.mxu1 %v17239_v3 }
 0x5f9   :  { %v6892_v42 = vmul.f32 0.33, %v6836_v4  ;;  %v6891_v18 = vmul.f32 0.33, %v6835_v23  ;;  %v6782_v34 = vadd.f32 %v17221_v36, %v6653_v41  ;;  %v6781_v27 = vadd.f32 %v17221_v36, %v6649_v19  ;;  %14464 = vmatprep.subr.bf16.mxu1 %v21177_v31 }
 0x5fa   :  { %v17253_v49 = vpack.c.bf16 %v6945_v13, %v6944_v51  ;;  %3810 = vbcast.lane.b32.xlu0 %v17205_v7, 296  ;;  %v17265_v19 = vrot.slane %v6448_v12, %v15984_v24 }
 0x5fb   :  { %v6838_v44 = vadd.f32 %v6782_v34, %v16377_v60  ;;  %v6837_v28 = vadd.f32 %v6781_v27, %v16377_v60  ;;  %v6948_v58 = vmax.f32 %v6836_v4, %v6892_v42  ;;  %v6947_v41 = vmax.f32 %v6835_v23, %v6891_v18 }
 0x5fc   :  { %v6661_v16 = vpop.permute.xlu1 %6660  ;;  %v6657_v10 = vpop.permute.xlu0 %6656  ;;  %4081 = vperm.xlu1 %15154, %v4051_v22   ;;  %14466 = vmatpush3.bf16.msra.mxu1 %v17253_v49  ;;  %v17272_v23 = vrot.slane %v16693_v33, %v16120_v46  ;;  %v17274_v22 = vmax.f32 %v6834_v50, %v6890_v5 }
 0x5fd   :  { %v6894_v54 = vmul.f32 0.33, %v6838_v44  ;;  %v6784_v13 = vadd.f32 %v17221_v36, %v6661_v16  ;;  %v6783_v51 = vadd.f32 %v17221_v36, %v6657_v10  ;;  %v6893_v6 = vmul.f32 0.33, %v6837_v28  ;;  %13605 = vmatprep.subr.mxu1 %v21178_v35 }
 0x5fe   :  { %3814 = vbcast.lane.b32.xlu0 %v17205_v7, 304  ;;  %v17279_v16 = vpack.c.bf16 %v6948_v58, %v6947_v41 }
 0x5ff   :  { %v6840_v34 = vadd.f32 %v6784_v13, %v16377_v60  ;;  %v6839_v4 = vadd.f32 %v6783_v51, %v16377_v60  ;;  %v6950_v27 = vmax.f32 %v6838_v44, %v6894_v54  ;;  %v6949_v10 = vmax.f32 %v6837_v28, %v6893_v6  ;;  %v15320_v54 = vld [vmem:[%s20968_s15 + $0x28] sm:$0xff] }
 0x600   :  { %v6672_v42 = vpop.permute.xlu1 %6671  ;;  %v6665_v18 = vpop.permute.xlu0 %6664  ;;  %3821 = vbcast.lane.b32.xlu1 %v17272_v23, 256  ;;  %13606 = vmatpush3.msk.msra.mxu1 %vm97_vm2, %v17274_v22 }
 0x601   :  { %v6786_v12 = vadd.f32 %v17265_v19, %v6672_v42  ;;  %v6896_v13 = vmul.f32 0.33, %v6840_v34  ;;  %v6895_v51 = vmul.f32 0.33, %v6839_v4  ;;  %v6785_v50 = vadd.f32 %v17221_v36, %v6665_v18  ;;  %13608 = vmatmul.mubr.msk.f32.vlgmr.msra.gmra.mrb[88].mxu1 %vm992_vm5, %v15320_v54  ;;  %14467 = vmatprep.subr.bf16.mxu1 %v21177_v31 }
 0x602   :  { %14469 = vmatpush3.bf16.msra.mxu1 %v17279_v16  ;;  %13624 = vmatprep.mubr.msk.f32.mxu1 %vm15373_vm0, %v21178_v35  ;;  %v17299_v42 = vpack.c.bf16 %v6950_v27, %v6949_v10 }
 0x603   :  { %v6842_v7 = vadd.f32 %v6786_v12, %v16268_v26  ;;  %3829 = vbcast.lane.b32.xlu0 %v17272_v23, 272  ;;  %v6952_v58 = vmax.f32 %v6840_v34, %v6896_v13  ;;  %v6951_v41 = vmax.f32 %v6839_v4, %v6895_v51  ;;  %v6841_v6 = vadd.f32 %v6785_v50, %v16377_v60 }
 0x604   :  { %v6680_v44 = vpop.permute.xlu1 %6679  ;;  %v6676_v28 = vpop.permute.xlu0 %6675  ;;  %3825 = vbcast.lane.b32.xlu1 %v17272_v23, 264  ;;  %14470 = vmatprep.subr.bf16.mxu1 %v21177_v31  ;;  %v17314_v51 = vrot.slane %v16693_v33, %v16099_v9 }
 0x605   :  { %v6788_v36 = vadd.f32 %v17265_v19, %v6680_v44  ;;  %v6787_v5 = vadd.f32 %v17265_v19, %v6676_v28  ;;  %v6898_v12 = vmul.f32 0.33, %v6842_v7  ;;  %v6897_v4 = vmul.f32 0.33, %v6841_v6 }
 0x606   :  { %14472 = vmatpush3.bf16.msra.mxu1 %v17299_v42  ;;  %v17309_v27 = vpack.c.bf16 %v6952_v58, %v6951_v41 }
 0x607   :  { %v6843_v18 = vadd.f32 %v6787_v5, %v16268_v26  ;;  %v6844_v21 = vadd.f32 %v6788_v36, %v16268_v26  ;;  %3845 = vbcast.lane.b32.xlu0 %v17272_v23, 304  ;;  %14473 = vmatprep.subr.bf16.mxu1 %v21177_v31  ;;  %v6954_v50 = vmax.f32 %v6842_v7, %v6898_v12 }
 0x608   :  { %v6688_v54 = vpop.permute.xlu1 %6687  ;;  %v6684_v46 = vpop.permute.xlu0 %6683  ;;  %3833 = vbcast.lane.b32.xlu1 %v17272_v23, 280  ;;  %v17321_v41 = vmax.f32 %v6841_v6, %v6897_v4  ;;  %v15321_v6 = vld [vmem:[%s20968_s15 + $0x30] sm:$0xff]  ;;  %v17337_v4 = vrot.slane %v16675_v11, %v15974_v20 }
 0x609   :  { %v6899_v44 = vmul.f32 0.33, %v6843_v18  ;;  %v6790_v60 = vadd.f32 %v17265_v19, %v6688_v54  ;;  %v6789_v34 = vadd.f32 %v17265_v19, %v6684_v46  ;;  %v6900_v36 = vmul.f32 0.33, %v6844_v21 }
 0x60a   :  { %14475 = vmatpush3.bf16.msra.mxu1 %v17309_v27 }
 0x60b   :  { %v6955_v10 = vmax.f32 %v6843_v18, %v6899_v44  ;;  %v6845_v13 = vadd.f32 %v6789_v34, %v16268_v26  ;;  %v6846_v5 = vadd.f32 %v6790_v60, %v16268_v26  ;;  %3852 = vbcast.lane.b32.xlu0 %v17314_v51, 256  ;;  %13622 = vmatprep.subr.mxu1 %v21178_v35 }
 0x60c   :  { %v6692_v28 = vpop.permute.xlu0 %6691  ;;  %3837 = vbcast.lane.b32.xlu1 %v17272_v23, 288  ;;  %v6696_v18 = vpop.permute.xlu1 %6695  ;;  %v6956_v54 = vmax.f32 %v6844_v21, %v6900_v36 }
 0x60d   :  { %v6901_v46 = vmul.f32 0.33, %v6845_v13  ;;  %v6791_v58 = vadd.f32 %v17265_v19, %v6692_v28  ;;  %v17325_v12 = vpack.c.bf16 %v6955_v10, %v6954_v50  ;;  %v6902_v44 = vmul.f32 0.33, %v6846_v5 }
 0x60e   :  { %13623 = vmatpush3.msk.msra.mxu1 %vm97_vm2, %v17321_v41  ;;  %v6792_v60 = vadd.f32 %v17265_v19, %v6696_v18  ;;  %v17350_v50 = vrot.slane %v17337_v4, %v15974_v20 }
 0x60f   :  { %v6957_v33 = vmax.f32 %v6845_v13, %v6901_v46  ;;  %v6847_v7 = vadd.f32 %v6791_v58, %v16268_v26  ;;  %13625 = vmatmul.mubr.msk.f32.vlgmr.msra.gmra.mrb[90].mxu1 %vm992_vm5, %v15321_v6  ;;  %14476 = vmatprep.subr.bf16.mxu1 %v21177_v31  ;;  %v6958_v10 = vmax.f32 %v6846_v5, %v6902_v44  ;;  %v1139_v6 = vld [vmem:[%s20971_s18 + $0x190] sm:$0xff] }
 0x610   :  { %3856 = vbcast.lane.b32.xlu0 %v17314_v51, 264  ;;  %3841 = vbcast.lane.b32.xlu1 %v17272_v23, 296  ;;  %v6848_v13 = vadd.f32 %v6792_v60, %v16268_v26  ;;  %v3636_v23 = vpop.permute.xlu1 %3635  ;;  %v17360_v5 = vrot.slane %v17350_v50, %v15984_v24  ;;  %v15322_v60 = vld [vmem:[%s20968_s15 + $0x38] sm:$0xff] }
 0x611   :  { %v6903_v34 = vmul.f32 0.33, %v6847_v7  ;;  %14478 = vmatpush3.bf16.msra.mxu1 %v17325_v12  ;;  %v17342_v19 = vpack.c.bf16 %v6957_v33, %v6956_v54  ;;  %13641 = vmatprep.mubr.msk.f32.mxu1 %vm15373_vm0, %v21178_v35  ;;  %v1122_v54 = vld [vmem:[%s20971_s18 + $0x108] sm:$0xff] }
 0x612   :  { %14479 = vmatprep.subr.bf16.mxu1 %v21177_v31  ;;  %v6904_v36 = vmul.f32 0.33, %v6848_v13  ;;  %v3918_v26 = vadd.f32 %v17360_v5, %v3636_v23 }
 0x613   :  { %v6959_v21 = vmax.f32 %v6847_v7, %v6903_v34  ;;  %v1121_v7 = vld [vmem:[%s20971_s18 + $0x100] sm:$0xff] }
 0x614   :  { %3864 = vbcast.lane.b32.xlu0 %v17314_v51, 280  ;;  %3860 = vbcast.lane.b32.xlu1 %v17314_v51, 272  ;;  %v17366_v46 = vmax.f32 %v6848_v13, %v6904_v36  ;;  %v3644_v58 = vpop.permute.xlu1 %3643  ;;  %v17396_v36 = vpack.c.bf16 %v1122_v54, %v1121_v7  ;;  %v1123_v7 = vld [vmem:[%s20971_s18 + $0x110] sm:$0xff]  ;;  %v1124_v54 = vld [vmem:[%s20971_s18 + $0x118] sm:$0xff] }
 0x615   :  { %14481 = vmatpush3.bf16.msra.mxu1 %v17342_v19  ;;  %v17355_v28 = vpack.c.bf16 %v6959_v21, %v6958_v10  ;;  %v3920_v44 = vadd.f32 %v17360_v5, %v3644_v58  ;;  %v1140_v21 = vld [vmem:[%s20971_s18 + $0x198] sm:$0xff] }
 0x616   :  { %14482 = vmatprep.subr.bf16.mxu1 %v21177_v31  ;;  %v17399_v58 = vpack.c.bf16 %v1140_v21, %v1139_v6  ;;  %v17423_v6 = vpack.c.bf16 %v1124_v54, %v1123_v7  ;;  %v1141_v21 = vld [vmem:[%s20971_s18 + $0x1a0] sm:$0xff] }
 0x618   :  { %3868 = vbcast.lane.b32.xlu0 %v17314_v51, 288  ;;  %21197 = vst [vmem:[#allocation60_spill] sm:$0xff] %v17399_v58  ;;  %v3652_v9 = vpop.permute.xlu1 %3651  ;;  %21198 = vst [vmem:[#allocation61_spill] sm:$0xff] %v17423_v6 }
 0x619   :  { %14484 = vmatpush3.bf16.msra.mxu1 %v17355_v28 }
 0x61a   :  { %13639 = vmatprep.subr.mxu1 %v21178_v35 }
 0x61c   :  { %3872 = vbcast.lane.b32.xlu0 %v17314_v51, 296 }
 0x61d   :  { %v17368_v18 = vpop.permute.xlu0 %4057  ;;  %13640 = vmatpush3.msk.msra.mxu1 %vm97_vm2, %v17366_v46 }
 0x61e   :  { %v4088_v33 = vadd.f32 %v17368_v18, %v3918_v26  ;;  %13642 = vmatmul.mubr.msk.f32.vlgmr.msra.gmra.mrb[92].mxu1 %vm992_vm5, %v15322_v60  ;;  %14485 = vmatprep.subr.bf16.mxu1 %v21177_v31  ;;  %v4090_v26 = vadd.f32 %v17368_v18, %v3920_v44 }
 0x61f   :  { %13658 = vmatprep.mubr.msk.f32.mxu1 %vm15373_vm0, %v21178_v35 }
 0x620   :  { %v4144_v34 = vmul.f32 0.33, %v4088_v33  ;;  %3876 = vbcast.lane.b32.xlu0 %v17314_v51, 304 }
 0x621   :  { %v3640_v10 = vpop.permute.xlu0 %3639 }
 0x622   :  { %v3919_v13 = vadd.f32 %v17360_v5, %v3640_v10  ;;  %v4200_v23 = vmax.f32 %v4088_v33, %v4144_v34  ;;  %v4146_v33 = vmul.f32 0.33, %v4090_v26  ;;  %v1142_v10 = vld [vmem:[%s20971_s18 + $0x1a8] sm:$0xff] }
 0x623   :  { %v17440_v7 = vpack.c.bf16 %v1142_v10, %v1141_v21 }
 0x624   :  { %v4089_v60 = vadd.f32 %v17368_v18, %v3919_v13  ;;  %12090 = vmatprep.mubr.msk.f32.mxu0 %vm992_vm5, %v4200_v23  ;;  %14488 = vmatpush3.bf16.xpose.msk.msra.mxu1 %vm15760_vm6, %v16939_v55 }
 0x625   :  { %v3648_v29 = vpop.permute.xlu0 %3647  ;;  %12091 = vmatmul.mubr.msk.f32.vlgmr.msra.gmra.mrb[82].mxu0 %vm992_vm5, %v4200_v23  ;;  %14489 = vmatprep.subr.bf16.mxu1 %v21177_v31  ;;  %21200 = vst [vmem:[#allocation63_spill] sm:$0xff] %v17440_v7 }
 0x626   :  { %v4145_v17 = vmul.f32 0.33, %v4089_v60  ;;  %v3921_v51 = vadd.f32 %v17360_v5, %v3648_v29  ;;  %14061 = vmatpush3.bf16.xpose.msk.msra.mxu0 %vm15760_vm6, %v17396_v36  ;;  %v3922_v29 = vadd.f32 %v17360_v5, %v3652_v9  ;;  %v4202_v9 = vmax.f32 %v4090_v26, %v4146_v33 }
 0x627   :  { %14064 = vmatprep.subr.msk.bf16.mxu0 %vm15760_vm6, %v17399_v58 }
 0x628   :  { %v4201_v55 = vmax.f32 %v4089_v60, %v4145_v17  ;;  %v4091_v44 = vadd.f32 %v17368_v18, %v3921_v51  ;;  %v4092_v17 = vadd.f32 %v17368_v18, %v3922_v29  ;;  %v3596_v60 = vcombine.high %v17337_v4, %v17337_v4  ;;  %v1125_v29 = vld [vmem:[%s20971_s18 + $0x120] sm:$0xff] }
 0x629   :  { %v3656_v34 = vpop.permute.xlu0 %3655  ;;  %v17437_v51 = vpop.permute.xlu1 %4061 }
 0x62a   :  { %v4147_v13 = vmul.f32 0.33, %v4091_v44  ;;  %v3923_v23 = vadd.f32 %v17360_v5, %v3656_v34  ;;  %12092 = vmatprep.mubr.msk.f32.mxu0 %vm992_vm5, %v4201_v55  ;;  %21199 = vst [vmem:[#allocation62_spill] sm:$0xff] %v17437_v51  ;;  %v4148_v4 = vmul.f32 0.33, %v4092_v17  ;;  %v17451_v33 = vrot.slane %v3596_v60, %v15974_v20 }
 0x62b   :  { %12093 = vmatmul.mubr.msk.f32.gmra.mrb[84].mxu0 %vm992_vm5, %v4201_v55 }
 0x62c   :  { %12094 = vmatprep.mubr.msk.f32.mxu0 %vm992_vm5, %v4202_v9  ;;  %v4203_v58 = vmax.f32 %v4091_v44, %v4147_v13  ;;  %v4093_v34 = vadd.f32 %v17368_v18, %v3923_v23  ;;  %14492 = vmatpush3.bf16.xpose.msk.msra.mxu1 %vm15760_vm6, %v16952_v0  ;;  %v1126_v0 = vld [vmem:[%s20971_s18 + $0x128] sm:$0xff]  ;;  %v4204_v21 = vmax.f32 %v4092_v17, %v4148_v4  ;;  %v1143_v13 = vld [vmem:[%s20971_s18 + $0x1b0] sm:$0xff]  ;;  %v1144_v23 = vld [vmem:[%s20971_s18 + $0x1b8] sm:$0xff] }
 0x62d   :  { %v3660_v54 = vpop.permute.xlu0 %3659  ;;  %14493 = vmatprep.subr.bf16.mxu1 %v21177_v31  ;;  %v3667_v44 = vpop.permute.xlu1 %3666  ;;  %v17466_v10 = vpack.c.bf16 %v1126_v0, %v1125_v29  ;;  %v15323_v17 = vld [vmem:[%s20964_s11] ss:$0 sm:$0xff] }
 0x62e   :  { %v3924_v26 = vadd.f32 %v17360_v5, %v3660_v54  ;;  %14067 = vmatpush3.bf16.xpose.msk.msra.mxu0 %vm15760_vm6, %v17423_v6  ;;  %v4149_v5 = vmul.f32 0.33, %v4093_v34  ;;  %v17484_v60 = vadd.f32 %v15323_v17, %v16043_v37  ;;  %v1127_v37 = vld [vmem:[%s20971_s18 + $0x130] sm:$0xff] }
 0x62f   :  { %12095 = vmatmul.mubr.msk.f32.gmra.mrb[86].mxu0 %vm992_vm5, %v4202_v9  ;;  %14070 = vmatprep.subr.msk.bf16.mxu0 %vm15760_vm6, %v17440_v7  ;;  %21201 = vst [vmem:[#allocation64_spill] sm:$0xff] %v17466_v10  ;;  %v17476_v9 = vrot.slane %v17451_v33, %v15984_v24 }
 0x630   :  { %12096 = vmatprep.mubr.msk.f32.mxu0 %vm992_vm5, %v4203_v58  ;;  %v4094_v55 = vadd.f32 %v17368_v18, %v3924_v26  ;;  %21202 = vst [vmem:[#allocation65_spill] sm:$0xff] %v17484_v60  ;;  %v17487_v26 = vpack.c.bf16 %v1144_v23, %v1143_v13  ;;  %v4205_v4 = vmax.f32 %v4093_v34, %v4149_v5  ;;  %v10626_v0 = vsel %vm10625_vm10, %v17484_v60, -inf  ;;  %v1145_v5 = vld [vmem:[%s20971_s18 + $0x1c0] sm:$0xff]  ;;  %v21206_v13 = vld [vmem:[#allocation23_spill] sm:$0xff] }
 0x631   :  { %v3925_v54 = vadd.f32 %v17476_v9, %v3667_v44  ;;  %v1146_v44 = vld [vmem:[%s20971_s18 + $0x1c8] sm:$0xff]  ;;  %v17523_v23 = vadd.f32 %v15323_v17, %v21206_v13  ;;  %v21209_v60 = vld [vmem:[#allocation32_spill] sm:$0xff] }
 0x632   :  { %21203 = vst [vmem:[#allocation66_spill] sm:$0xff] %v17487_v26  ;;  %v4150_v29 = vmul.f32 0.33, %v4094_v55 }
 0x633   :  { %12097 = vmatmul.mubr.msk.f32.gmra.mrb[88].mxu0 %vm992_vm5, %v4203_v58  ;;  %v1128_v58 = vld [vmem:[%s20971_s18 + $0x138] sm:$0xff]  ;;  %v4095_v34 = vadd.f32 %v17437_v51, %v3925_v54  ;;  %21207 = vst [vmem:[#allocation23_spill] sm:$0xff] %v17523_v23  ;;  %v17526_v54 = vpack.c.bf16 %v1146_v44, %v1145_v5 }
 0x634   :  { %12098 = vmatprep.mubr.msk.f32.mxu0 %vm992_vm5, %v4204_v21  ;;  %14496 = vmatpush3.bf16.xpose.msk.msra.mxu1 %vm15760_vm6, %v16962_v43  ;;  %v17505_v43 = vadd.f32 %v15323_v17, %v16053_v53  ;;  %v17520_v53 = vpack.c.bf16 %v1128_v58, %v1127_v37  ;;  %v15324_v37 = vld [vmem:[%s20969_s16] sm:$0xff]  ;;  %v1148_v5 = vld [vmem:[%s20971_s18 + $0x1d8] sm:$0xff] }
 0x635   :  { %13656 = vmatprep.subr.mxu1 %v21178_v35  ;;  %21208 = vst [vmem:[#allocation69_spill] sm:$0xff] %v17526_v54 }
 0x636   :  { %14073 = vmatpush3.bf16.xpose.msk.msra.mxu0 %vm15760_vm6, %v17466_v10  ;;  %21204 = vst [vmem:[#allocation67_spill] sm:$0xff] %v17505_v43  ;;  %21205 = vst [vmem:[#allocation68_spill] sm:$0xff] %v17520_v53  ;;  %v4151_v10 = vmul.f32 0.33, %v4095_v34  ;;  %v10635_v7 = vsel %vm10625_vm10, %v17505_v43, -inf  ;;  %v15325_v43 = vld [vmem:[%s20969_s16 + $0x8] sm:$0xff] }
 0x637   :  { %12099 = vmatmul.mubr.msk.f32.gmra.mrb[90].mxu0 %vm992_vm5, %v4204_v21  ;;  %14076 = vmatprep.subr.msk.bf16.mxu0 %vm15760_vm6, %v17487_v26  ;;  %v4206_v21 = vmax.f32 %v4094_v55, %v4150_v29  ;;  %v17529_v26 = vadd.f32 %v15323_v17, %v21209_v60  ;;  %v21211_v55 = vld [vmem:[#allocation26_spill] sm:$0xff]  ;;  %v10622_v60 = vsel %vm10621_vm11, %v17523_v23, -inf }
 0x638   :  { %12100 = vmatprep.mubr.msk.f32.mxu0 %vm992_vm5, %v4205_v4  ;;  %10627 = vmax.xlane.f32.xlu1 %v10626_v0  ;;  %v17554_v29 = vmax.f32 %v4095_v34, %v4151_v10  ;;  %v1147_v0 = vld [vmem:[%s20971_s18 + $0x1d0] sm:$0xff] }
 0x639   :  { %21210 = vst [vmem:[#allocation32_spill] sm:$0xff] %v17529_v26  ;;  %v10642_v58 = vsel %vm10641_vm12, %v17529_v26, -inf  ;;  %v21214_v34 = vld [vmem:[#allocation27_spill] sm:$0xff]  ;;  %v17581_v13 = vpack.c.bf16 %v1148_v5, %v1147_v0  ;;  %v21220_v0 = vld [vmem:[#allocation33_spill] sm:$0xff] }
 0x63a   :  { %v17577_v44 = vadd.f32 %v15323_v17, %v21214_v34  ;;  %v1149_v5 = vld [vmem:[%s20971_s18 + $0x1e0] sm:$0xff]  ;;  %v1150_v34 = vld [vmem:[%s20971_s18 + $0x1e8] sm:$0xff] }
 0x63b   :  { %12101 = vmatmul.mubr.msk.f32.gmra.mrb[92].mxu0 %vm992_vm5, %v4205_v4  ;;  %v17540_v4 = vadd.f32 %v15323_v17, %v21211_v55  ;;  %21216 = vst [vmem:[#allocation71_spill] sm:$0xff] %v17581_v13 }
 0x63c   :  { %12102 = vmatprep.mubr.msk.f32.mxu0 %vm992_vm5, %v4206_v21  ;;  %13657 = vmatpush3.xpose.msk.msra.mxu1 %vm992_vm5, %v16972_v61  ;;  %v1129_v61 = vld [vmem:[%s20971_s18 + $0x140] sm:$0xff]  ;;  %21215 = vst [vmem:[#allocation27_spill] sm:$0xff] %v17577_v44 }
 0x63d   :  { %10636 = vmax.xlane.f32.xlu1 %v10635_v7  ;;  %14497 = vmatprep.subr.bf16.mxu1 %v21177_v31  ;;  %21212 = vst [vmem:[#allocation26_spill] sm:$0xff] %v17540_v4  ;;  %v1130_v7 = vld [vmem:[%s20971_s18 + $0x148] sm:$0xff] }
 0x63e   :  { %14079 = vmatpush3.bf16.xpose.msk.msra.mxu0 %vm15760_vm6, %v17520_v53  ;;  %v17574_v10 = vpack.c.bf16 %v1130_v7, %v1129_v61  ;;  %v10632_v7 = vsel %vm10625_vm10, %v17577_v44, -inf }
 0x63f   :  { %12103 = vmatmul.mubr.msk.f32.gmra.mrb[94].mxu0 %vm992_vm5, %v4206_v21  ;;  %14082 = vmatprep.subr.msk.bf16.mxu0 %vm15760_vm6, %v17526_v54  ;;  %v10629_v21 = vsel %vm10625_vm10, %v17540_v4, -inf }
 0x640   :  { %13659 = vmatmul.mubr.msk.f32.vlgmr.msra.gmra.mrb[94].mxu1 %vm992_vm5, %v15324_v37  ;;  %10623 = vmax.xlane.f32.xlu0 %v10622_v60  ;;  %21213 = vst [vmem:[#allocation70_spill] sm:$0xff] %v17574_v10  ;;  %v21218_v60 = vld [vmem:[#allocation30_spill] sm:$0xff] }
 0x641   :  { %14500 = vmatpush3.bf16.xpose.msk.msra.mxu1 %vm15760_vm6, %v16991_v40  ;;  %10643 = vmax.xlane.f32.xlu1 %v10642_v58  ;;  %v21217_v40 = vld [vmem:[#allocation29_spill] sm:$0xff]  ;;  %v17591_v61 = vadd.f32 %v15323_v17, %v21218_v60  ;;  %v1131_v37 = vld [vmem:[%s20971_s18 + $0x150] sm:$0xff]  ;;  %v1132_v58 = vld [vmem:[%s20971_s18 + $0x158] sm:$0xff]  ;;  %v1002_v17 = vsel %vm992_vm5, %v21220_v0, -inf  ;;  %v17620_v60 = vpack.c.bf16 %v1150_v34, %v1149_v5  ;;  %v4023_v34 = vcombine.high %v17164_v30, %v17164_v30 }
 0x642   :  { %12136 = vmatprep.mubr.msk.f32.mxu0 %vm992_vm5, %v17554_v29  ;;  %14501 = vmatprep.subr.bf16.mxu1 %v21177_v31  ;;  %v996_v55 = vsel %vm992_vm5, %v21217_v40, -inf  ;;  %v1135_v30 = vld [vmem:[%s20971_s18 + $0x170] sm:$0xff] }
 0x643   :  { %13675 = vmatprep.mubr.msk.f32.mxu1 %vm15373_vm0, %v21178_v35  ;;  %21219 = vst [vmem:[#allocation30_spill] sm:$0xff] %v17591_v61  ;;  %21222 = vst [vmem:[#allocation73_spill] sm:$0xff] %v17620_v60 }
 0x644   :  { %10630 = vmax.xlane.f32.xlu0 %v10629_v21  ;;  %v17616_v21 = vpack.c.bf16 %v1132_v58, %v1131_v37  ;;  %v1134_v37 = vld [vmem:[%s20971_s18 + $0x168] sm:$0xff]  ;;  %v1151_v58 = vld [vmem:[%s20971_s18 + $0x1f0] sm:$0xff] }
 0x645   :  { %997 = vmax.xlane.f32.xlu1 %v996_v55  ;;  %v10638_v55 = vsel %vm10625_vm10, %v17591_v61, -inf }
 0x646   :  { %14085 = vmatpush3.bf16.xpose.msk.msra.mxu0 %vm15760_vm6, %v17574_v10  ;;  %21221 = vst [vmem:[#allocation72_spill] sm:$0xff] %v17616_v21 }
 0x647   :  { %14088 = vmatprep.subr.msk.bf16.mxu0 %vm15760_vm6, %v17581_v13 }
 0x648   :  { %10633 = vmax.xlane.f32.xlu0 %v10632_v7  ;;  %v21223_v7 = vld [vmem:[#allocation28_spill] sm:$0xff] }
 0x649   :  { %14504 = vmatpush3.bf16.xpose.msk.msra.mxu1 %vm15760_vm6, %v17010_v2  ;;  %1003 = vmax.xlane.f32.xlu1 %v1002_v17  ;;  %v993_v0 = vsel %vm992_vm5, %v21223_v7, -inf  ;;  %v1133_v2 = vld [vmem:[%s20971_s18 + $0x160] sm:$0xff]  ;;  %v1152_v17 = vld [vmem:[%s20971_s18 + $0x1f8] sm:$0xff]  ;;  %v3671_v7 = vpop.permute.xlu0 %3670 }
 0x64a   :  { %14505 = vmatprep.subr.bf16.mxu1 %v21177_v31  ;;  %v17646_v5 = vpack.c.bf16 %v1134_v37, %v1133_v2  ;;  %v17652_v40 = vpack.c.bf16 %v1152_v17, %v1151_v58  ;;  %v1136_v2 = vld [vmem:[%s20971_s18 + $0x178] sm:$0xff]  ;;  %v3926_v37 = vadd.f32 %v17476_v9, %v3671_v7  ;;  %v1169_v58 = vld [vmem:[%s20971_s18 + $0x280] sm:$0xff]  ;;  %v1170_v17 = vld [vmem:[%s20971_s18 + $0x288] sm:$0xff] }
 0x64c   :  { %10639 = vmax.xlane.f32.xlu0 %v10638_v55  ;;  %21224 = vst [vmem:[#allocation74_spill] sm:$0xff] %v17646_v5  ;;  %21226 = vst [vmem:[#allocation75_spill] sm:$0xff] %v17652_v40  ;;  %v4096_v7 = vadd.f32 %v17437_v51, %v3926_v37  ;;  %v1172_v37 = vld [vmem:[%s20971_s18 + $0x298] sm:$0xff] }
 0x64d   :  { %v3679_v4 = vpop.permute.xlu0 %3678 }
 0x64e   :  { %14091 = vmatpush3.bf16.xpose.msk.msra.mxu0 %vm15760_vm6, %v17616_v21 }
 0x64f   :  { %14094 = vmatprep.subr.msk.bf16.mxu0 %vm15760_vm6, %v17620_v60 }
 0x650   :  { %994 = vmax.xlane.f32.xlu0 %v993_v0  ;;  %v21225_v0 = vld [vmem:[#allocation31_spill] sm:$0xff] }
 0x651   :  { %14508 = vmatpush3.bf16.xpose.msk.msra.mxu1 %vm15760_vm6, %v17022_v39  ;;  %v999_v55 = vsel %vm992_vm5, %v21225_v0, -inf  ;;  %v4055_v39 = vrot.slane %v4023_v34, %v15984_v24  ;;  %v3675_v34 = vpop.permute.xlu1 %3674  ;;  %v17679_v0 = vpack.c.bf16 %v1170_v17, %v1169_v58 }
 0x652   :  { %13673 = vmatprep.subr.mxu1 %v21178_v35  ;;  %v3927_v26 = vadd.f32 %v17476_v9, %v3675_v34  ;;  %v3687_v34 = vpop.permute.xlu0 %3686 }
 0x653   :  { %21228 = vst [vmem:[#allocation77_spill] sm:$0xff] %v17679_v0 }
 0x654   :  { %1000 = vmax.xlane.f32.xlu0 %v999_v55  ;;  %v17677_v55 = vpack.c.bf16 %v1136_v2, %v1135_v30  ;;  %v3928_v30 = vadd.f32 %v17476_v9, %v3679_v4  ;;  %v1171_v2 = vld [vmem:[%s20971_s18 + $0x290] sm:$0xff] }
 0x655   :  { %v3683_v58 = vpop.permute.xlu1 %3682  ;;  %v17715_v23 = vpack.c.bf16 %v1172_v37, %v1171_v2  ;;  %v1173_v2 = vld [vmem:[%s20971_s18 + $0x2a0] sm:$0xff]  ;;  %v1174_v37 = vld [vmem:[%s20971_s18 + $0x2a8] sm:$0xff] }
 0x656   :  { %14097 = vmatpush3.bf16.xpose.msk.msra.mxu0 %vm15760_vm6, %v17646_v5  ;;  %21227 = vst [vmem:[#allocation76_spill] sm:$0xff] %v17677_v55  ;;  %v3929_v4 = vadd.f32 %v17476_v9, %v3683_v58  ;;  %v3691_v58 = vpop.permute.xlu0 %3690 }
 0x657   :  { %14100 = vmatprep.subr.msk.bf16.mxu0 %vm15760_vm6, %v17652_v40  ;;  %21230 = vst [vmem:[#allocation79_spill] sm:$0xff] %v17715_v23 }
 0x659   :  { %13674 = vmatpush3.xpose.msk.msra.mxu1 %vm992_vm5, %v17035_v1  ;;  %v1153_v1 = vld [vmem:[%s20971_s18 + $0x200] sm:$0xff] }
 0x65a   :  { %4085 = vperm.xlu1 %15154, %v4055_v39   ;;  %14509 = vmatprep.subr.bf16.mxu1 %v21177_v31  ;;  %v4097_v39 = vadd.f32 %v17437_v51, %v3927_v26  ;;  %v4098_v26 = vadd.f32 %v17437_v51, %v3928_v30  ;;  %v3930_v30 = vadd.f32 %v17476_v9, %v3687_v34 }
 0x65c   :  { %13676 = vmatmul.mubr.msk.f32.vlgmr.msra.gmra.mrb[96].mxu1 %vm992_vm5, %v15325_v43  ;;  %v4152_v43 = vmul.f32 0.33, %v4096_v7  ;;  %v4153_v44 = vmul.f32 0.33, %v4097_v39 }
 0x65d   :  { %14512 = vmatpush3.bf16.xpose.msk.msra.mxu1 %vm15760_vm6, %v17044_v15  ;;  %13692 = vmatprep.mubr.msk.f32.mxu1 %vm15373_vm0, %v21178_v35  ;;  %v1154_v15 = vld [vmem:[%s20971_s18 + $0x208] sm:$0xff] }
 0x65e   :  { %14103 = vmatpush3.bf16.xpose.msk.msra.mxu0 %vm15760_vm6, %v17677_v55  ;;  %14513 = vmatprep.subr.bf16.mxu1 %v21177_v31  ;;  %v17713_v17 = vpack.c.bf16 %v1154_v15, %v1153_v1  ;;  %v4208_v61 = vmax.f32 %v4096_v7, %v4152_v43  ;;  %v17728_v1 = vpop.permute.xlu1 %4065  ;;  %v4209_v7 = vmax.f32 %v4097_v39, %v4153_v44  ;;  %v4154_v15 = vmul.f32 0.33, %v4098_v26 }
 0x65f   :  { %14106 = vmatprep.subr.msk.bf16.mxu0 %vm15760_vm6, %v17679_v0  ;;  %21231 = vst [vmem:[#allocation80_spill] sm:$0xff] %v17728_v1  ;;  %v4099_v43 = vadd.f32 %v17437_v51, %v3929_v4  ;;  %v17754_v39 = vpack.c.bf16 %v1174_v37, %v1173_v2  ;;  %v3931_v0 = vadd.f32 %v17476_v9, %v3691_v58  ;;  %v15326_v37 = vld [vmem:[%s20969_s16 + $0x10] sm:$0xff]  ;;  %v1160_v58 = vld [vmem:[%s20971_s18 + $0x238] sm:$0xff] }
 0x660   :  { %21229 = vst [vmem:[#allocation78_spill] sm:$0xff] %v17713_v17  ;;  %v4210_v34 = vmax.f32 %v4098_v26, %v4154_v15 }
 0x661   :  { %21233 = vst [vmem:[#allocation82_spill] sm:$0xff] %v17754_v39  ;;  %v4155_v4 = vmul.f32 0.33, %v4099_v43 }
 0x662   :  { %v3698_v55 = vpop.permute.xlu1 %3697 }
 0x663   :  { %v4211_v9 = vmax.f32 %v4099_v43, %v4155_v4  ;;  %v1178_v4 = vld [vmem:[%s20971_s18 + $0x2c8] sm:$0xff] }
 0x665   :  { %14516 = vmatpush3.bf16.xpose.msk.msra.mxu1 %vm15760_vm6, %v17057_v32  ;;  %12137 = vmatmul.mubr.msk.f32.vlgmr.msra.gmra.mrb[82].mxu0 %vm992_vm5, %v17554_v29  ;;  %v1155_v32 = vld [vmem:[%s20971_s18 + $0x210] sm:$0xff]  ;;  %v1156_v29 = vld [vmem:[%s20971_s18 + $0x218] sm:$0xff] }
 0x666   :  { %12138 = vmatprep.mubr.msk.f32.mxu0 %vm992_vm5, %v4208_v61  ;;  %14109 = vmatpush3.bf16.xpose.msk.msra.mxu0 %vm15760_vm6, %v17713_v17  ;;  %v17752_v44 = vpack.c.bf16 %v1156_v29, %v1155_v32  ;;  %v4100_v17 = vadd.f32 %v17437_v51, %v3930_v30  ;;  %v1158_v32 = vld [vmem:[%s20971_s18 + $0x228] sm:$0xff]  ;;  %v1175_v29 = vld [vmem:[%s20971_s18 + $0x2b0] sm:$0xff] }
 0x667   :  { %14517 = vmatprep.subr.bf16.mxu1 %v21177_v31  ;;  %14112 = vmatprep.subr.msk.bf16.mxu0 %vm15760_vm6, %v17715_v23  ;;  %v3626_v23 = vcombine.high %v17350_v50, %v17350_v50 }
 0x668   :  { %21232 = vst [vmem:[#allocation81_spill] sm:$0xff] %v17752_v44 }
 0x669   :  { %12139 = vmatmul.mubr.msk.f32.gmra.mrb[84].mxu0 %vm992_vm5, %v4208_v61  ;;  %v17763_v50 = vrot.slane %v3626_v23, %v15984_v24  ;;  %v4156_v61 = vmul.f32 0.33, %v4100_v17  ;;  %v1157_v23 = vld [vmem:[%s20971_s18 + $0x220] sm:$0xff] }
 0x66a   :  { %12140 = vmatprep.mubr.msk.f32.mxu0 %vm992_vm5, %v4209_v7 }
 0x66b   :  { %v3932_v26 = vadd.f32 %v17763_v50, %v3698_v55  ;;  %v17789_v55 = vpack.c.bf16 %v1158_v32, %v1157_v23  ;;  %v1179_v23 = vld [vmem:[%s20971_s18 + $0x2d0] sm:$0xff]  ;;  %v1180_v32 = vld [vmem:[%s20971_s18 + $0x2d8] sm:$0xff] }
 0x66d   :  { %14520 = vmatpush3.bf16.xpose.msk.msra.mxu1 %vm15760_vm6, %v17082_v45  ;;  %12141 = vmatmul.mubr.msk.f32.gmra.mrb[86].mxu0 %vm992_vm5, %v4209_v7  ;;  %v4101_v45 = vadd.f32 %v17437_v51, %v3931_v0  ;;  %v1176_v0 = vld [vmem:[%s20971_s18 + $0x2b8] sm:$0xff]  ;;  %21234 = vst [vmem:[#allocation83_spill] sm:$0xff] %v17789_v55  ;;  %v4212_v7 = vmax.f32 %v4100_v17, %v4156_v61 }
 0x66e   :  { %12142 = vmatprep.mubr.msk.f32.mxu0 %vm992_vm5, %v4210_v34  ;;  %14115 = vmatpush3.bf16.xpose.msk.msra.mxu0 %vm15760_vm6, %v17752_v44  ;;  %v4102_v43 = vadd.f32 %v17728_v1, %v3932_v26  ;;  %v17792_v30 = vpack.c.bf16 %v1176_v0, %v1175_v29  ;;  %v1162_v26 = vld [vmem:[%s20971_s18 + $0x248] sm:$0xff]  ;;  %v17862_v0 = vpack.c.bf16 %v1180_v32, %v1179_v23  ;;  %v1167_v32 = vld [vmem:[%s20971_s18 + $0x270] sm:$0xff] }
 0x66f   :  { %13690 = vmatprep.subr.mxu1 %v21178_v35  ;;  %14118 = vmatprep.subr.msk.bf16.mxu0 %vm15760_vm6, %v17754_v39  ;;  %v4157_v15 = vmul.f32 0.33, %v4101_v45 }
 0x670   :  { %21235 = vst [vmem:[#allocation84_spill] sm:$0xff] %v17792_v30  ;;  %v4158_v17 = vmul.f32 0.33, %v4102_v43  ;;  %21239 = vst [vmem:[#allocation88_spill] sm:$0xff] %v17862_v0 }
 0x671   :  { %12143 = vmatmul.mubr.msk.f32.gmra.mrb[88].mxu0 %vm992_vm5, %v4210_v34  ;;  %v4213_v2 = vmax.f32 %v4101_v45, %v4157_v15  ;;  %v1177_v34 = vld [vmem:[%s20971_s18 + $0x2c0] sm:$0xff] }
 0x672   :  { %12144 = vmatprep.mubr.msk.f32.mxu0 %vm992_vm5, %v4211_v9  ;;  %v17833_v61 = vpack.c.bf16 %v1178_v4, %v1177_v34  ;;  %v1161_v45 = vld [vmem:[%s20971_s18 + $0x240] sm:$0xff]  ;;  %v1183_v34 = vld [vmem:[%s20971_s18 + $0x2f0] sm:$0xff]  ;;  %v1184_v4 = vld [vmem:[%s20971_s18 + $0x2f8] sm:$0xff] }
 0x673   :  { %v17860_v29 = vpack.c.bf16 %v1162_v26, %v1161_v45  ;;  %v1181_v15 = vld [vmem:[%s20971_s18 + $0x2e0] sm:$0xff]  ;;  %v15327_v26 = vld [vmem:[%s20969_s16 + $0x18] sm:$0xff]  ;;  %v17917_v23 = vpack.c.bf16 %v1184_v4, %v1183_v34 }
 0x674   :  { %21237 = vst [vmem:[#allocation86_spill] sm:$0xff] %v17833_v61 }
 0x675   :  { %13691 = vmatpush3.xpose.msk.msra.mxu1 %vm992_vm5, %v17097_v62  ;;  %12145 = vmatmul.mubr.msk.f32.gmra.mrb[90].mxu0 %vm992_vm5, %v4211_v9  ;;  %v1159_v62 = vld [vmem:[%s20971_s18 + $0x230] sm:$0xff]  ;;  %21238 = vst [vmem:[#allocation87_spill] sm:$0xff] %v17860_v29  ;;  %21243 = vst [vmem:[#allocation92_spill] sm:$0xff] %v17917_v23 }
 0x676   :  { %14521 = vmatprep.subr.bf16.mxu1 %v21177_v31  ;;  %12146 = vmatprep.mubr.msk.f32.mxu0 %vm992_vm5, %v4212_v7  ;;  %v17827_v9 = vpack.c.bf16 %v1160_v58, %v1159_v62  ;;  %v1166_v58 = vld [vmem:[%s20971_s18 + $0x268] sm:$0xff] }
 0x677   :  { %14121 = vmatpush3.bf16.xpose.msk.msra.mxu0 %vm15760_vm6, %v17789_v55 }
 0x678   :  { %13693 = vmatmul.mubr.msk.f32.vlgmr.msra.gmra.mrb[98].mxu1 %vm992_vm5, %v15326_v37  ;;  %14124 = vmatprep.subr.msk.bf16.mxu0 %vm15760_vm6, %v17792_v30  ;;  %21236 = vst [vmem:[#allocation85_spill] sm:$0xff] %v17827_v9 }
 0x679   :  { %14524 = vmatpush3.bf16.xpose.msk.msra.mxu1 %vm15760_vm6, %v17106_v14  ;;  %12147 = vmatmul.mubr.msk.f32.gmra.mrb[92].mxu0 %vm992_vm5, %v4212_v7  ;;  %v17831_v14 = vmax.f32 %v4102_v43, %v4158_v17  ;;  %v1164_v7 = vld [vmem:[%s20971_s18 + $0x258] sm:$0xff]  ;;  %v1182_v43 = vld [vmem:[%s20971_s18 + $0x2e8] sm:$0xff] }
 0x67a   :  { %12148 = vmatprep.mubr.msk.f32.mxu0 %vm992_vm5, %v4213_v2  ;;  %14525 = vmatprep.subr.bf16.mxu1 %v21177_v31  ;;  %v17888_v62 = vpack.c.bf16 %v1182_v43, %v1181_v15  ;;  %v1202_v15 = vld [vmem:[%s20971_s18 + $0x388] sm:$0xff]  ;;  %v3706_v43 = vpop.permute.xlu1 %3705 }
 0x67b   :  { %13709 = vmatprep.mubr.msk.f32.mxu1 %vm15373_vm0, %v21178_v35 }
 0x67c   :  { %21241 = vst [vmem:[#allocation90_spill] sm:$0xff] %v17888_v62 }
 0x67d   :  { %12149 = vmatmul.mubr.msk.f32.gmra.mrb[96].mxu0 %vm992_vm5, %v4213_v2 }
 0x67e   :  { %12182 = vmatprep.mubr.msk.f32.mxu0 %vm992_vm5, %v17831_v14 }
 0x67f   :  { %14127 = vmatpush3.bf16.xpose.msk.msra.mxu0 %vm15760_vm6, %v17827_v9 }
 0x680   :  { %14130 = vmatprep.subr.msk.bf16.mxu0 %vm15760_vm6, %v17833_v61 }
 0x681   :  { %14528 = vmatpush3.bf16.xpose.msk.msra.mxu1 %vm15760_vm6, %v17129_v59  ;;  %v1163_v59 = vld [vmem:[%s20971_s18 + $0x250] sm:$0xff] }
 0x682   :  { %14529 = vmatprep.subr.bf16.mxu1 %v21177_v31  ;;  %v17886_v17 = vpack.c.bf16 %v1164_v7, %v1163_v59  ;;  %v1201_v7 = vld [vmem:[%s20971_s18 + $0x380] sm:$0xff] }
 0x684   :  { %21240 = vst [vmem:[#allocation89_spill] sm:$0xff] %v17886_v17 }
 0x687   :  { %14133 = vmatpush3.bf16.xpose.msk.msra.mxu0 %vm15760_vm6, %v17860_v29 }
 0x688   :  { %14136 = vmatprep.subr.msk.bf16.mxu0 %vm15760_vm6, %v17862_v0 }
 0x689   :  { %14532 = vmatpush3.bf16.xpose.msk.msra.mxu1 %vm15760_vm6, %v17145_v25  ;;  %v1165_v25 = vld [vmem:[%s20971_s18 + $0x260] sm:$0xff] }
 0x68a   :  { %13707 = vmatprep.subr.mxu1 %v21178_v35  ;;  %v17911_v45 = vpack.c.bf16 %v1166_v58, %v1165_v25 }
 0x68c   :  { %v7030_v2 = vpop.f32.mrb[78].mxu1  ;;  %21242 = vst [vmem:[#allocation91_spill] sm:$0xff] %v17911_v45 }
 0x68d   :  { %v13524_v37 = vpop.f32.mrb[79].mxu1  ;;  %v7545_v58 = vsel %vm992_vm5, %v7030_v2, 0.0  ;;  %v1185_v2 = vld [vmem:[%s20971_s18 + $0x300] sm:$0xff] }
 0x68f   :  { %14139 = vmatpush3.bf16.xpose.msk.msra.mxu0 %vm15760_vm6, %v17886_v17 }
 0x690   :  { %14142 = vmatprep.subr.msk.bf16.mxu0 %vm15760_vm6, %v17888_v62 }
 0x691   :  { %13708 = vmatpush3.xpose.msk.msra.mxu1 %vm992_vm5, %v17159_v63  ;;  %v3702_v63 = vpop.permute.xlu0 %3701 }
 0x692   :  { %14533 = vmatprep.subr.bf16.mxu1 %v21177_v31  ;;  %v3933_v59 = vadd.f32 %v17763_v50, %v3702_v63 }
 0x694   :  { %13710 = vmatmul.mubr.msk.f32.vlgmr.msra.gmra.mrb[100].mxu1 %vm992_vm5, %v15327_v26  ;;  %v17948_v26 = vpack.c.bf16 %v1202_v15, %v1201_v7  ;;  %v4103_v63 = vadd.f32 %v17728_v1, %v3933_v59  ;;  %v1203_v7 = vld [vmem:[%s20971_s18 + $0x390] sm:$0xff]  ;;  %v1204_v15 = vld [vmem:[%s20971_s18 + $0x398] sm:$0xff] }
 0x695   :  { %14536 = vmatpush3.bf16.xpose.msk.msra.mxu1 %vm15760_vm6, %v17169_v48  ;;  %13726 = vmatprep.mubr.msk.f32.mxu1 %vm15373_vm0, %v21178_v35  ;;  %v1168_v48 = vld [vmem:[%s20971_s18 + $0x278] sm:$0xff]  ;;  %v3710_v62 = vpop.permute.xlu0 %3709 }
 0x696   :  { %14537 = vmatprep.subr.bf16.mxu1 %v21177_v31  ;;  %v17944_v25 = vpack.c.bf16 %v1168_v48, %v1167_v32  ;;  %v4159_v32 = vmul.f32 0.33, %v4103_v63  ;;  %v3935_v59 = vadd.f32 %v17763_v50, %v3710_v62 }
 0x697   :  { %14145 = vmatpush3.bf16.xpose.msk.msra.mxu0 %vm15760_vm6, %v17911_v45 }
 0x698   :  { %14148 = vmatprep.subr.msk.bf16.mxu0 %vm15760_vm6, %v17917_v23  ;;  %21244 = vst [vmem:[#allocation93_spill] sm:$0xff] %v17944_v25  ;;  %v3934_v23 = vadd.f32 %v17763_v50, %v3706_v43  ;;  %v3714_v43 = vpop.permute.xlu1 %3713 }
 0x699   :  { %v3936_v62 = vadd.f32 %v17763_v50, %v3714_v43  ;;  %v1206_v43 = vld [vmem:[%s20971_s18 + $0x3a8] sm:$0xff] }
 0x69a   :  { %v4104_v48 = vadd.f32 %v17728_v1, %v3934_v23  ;;  %v4105_v23 = vadd.f32 %v17728_v1, %v3935_v59 }
 0x69c   :  { %v7103_v37 = vpop.f32.mrb[80].mxu1 }
 0x69d   :  { %v7546_v34 = vsel %vm992_vm5, %v7103_v37, 0.0  ;;  %v13541_v4 = vpop.f32.mrb[81].mxu1  ;;  %14540 = vmatpush3.bf16.xpose.msk.msra.mxu1 %vm15760_vm6, %v17181_v47  ;;  %v1186_v47 = vld [vmem:[%s20971_s18 + $0x308] sm:$0xff] }
 0x69e   :  { %v7547_v45 = vadd.f32 %v7546_v34, %v7545_v58  ;;  %14541 = vmatprep.subr.bf16.mxu1 %v21177_v31  ;;  %v17976_v37 = vpack.c.bf16 %v1186_v47, %v1185_v2  ;;  %v3718_v58 = vpop.permute.xlu0 %3717  ;;  %v17978_v34 = vpack.c.bf16 %v1204_v15, %v1203_v7  ;;  %v4215_v4 = vmax.f32 %v4103_v63, %v4159_v32  ;;  %v17992_v63 = vpop.permute.xlu1 %4069  ;;  %v1205_v15 = vld [vmem:[%s20971_s18 + $0x3a0] sm:$0xff] }
 0x69f   :  { %14151 = vmatpush3.bf16.xpose.msk.msra.mxu0 %vm15760_vm6, %v17944_v25  ;;  %v4160_v25 = vmul.f32 0.33, %v4104_v48  ;;  %v4161_v47 = vmul.f32 0.33, %v4105_v23  ;;  %v4106_v32 = vadd.f32 %v17728_v1, %v3936_v62  ;;  %v3937_v59 = vadd.f32 %v17763_v50, %v3718_v58 }
 0x6a0   :  { %14154 = vmatprep.subr.msk.bf16.mxu0 %vm15760_vm6, %v17948_v26  ;;  %v18018_v29 = vpack.c.bf16 %v1206_v43, %v1205_v15 }
 0x6a1   :  { %v4216_v2 = vmax.f32 %v4104_v48, %v4160_v25  ;;  %v3628_v48 = vcombine.high %v17451_v33, %v17451_v33  ;;  %v4217_v61 = vmax.f32 %v4105_v23, %v4161_v47  ;;  %v4162_v9 = vmul.f32 0.33, %v4106_v32 }
 0x6a2   :  { %v3722_v17 = vpop.permute.xlu0 %3721  ;;  %v4107_v30 = vadd.f32 %v17728_v1, %v3937_v59  ;;  %v1192_v59 = vld [vmem:[%s20971_s18 + $0x338] sm:$0xff] }
 0x6a3   :  { %v3938_v55 = vadd.f32 %v17763_v50, %v3722_v17  ;;  %v18027_v33 = vrot.slane %v3628_v48, %v15984_v24  ;;  %v15328_v50 = vld [vmem:[%s20969_s16 + $0x20] sm:$0xff]  ;;  %v4218_v17 = vmax.f32 %v4106_v32, %v4162_v9 }
 0x6a4   :  { %v1209_v48 = vld [vmem:[%s20971_s18 + $0x3c0] sm:$0xff] }
 0x6a5   :  { %14544 = vmatpush3.bf16.xpose.msk.msra.mxu1 %vm15760_vm6, %v17201_v57  ;;  %v1187_v57 = vld [vmem:[%s20971_s18 + $0x310] sm:$0xff]  ;;  %v4108_v23 = vadd.f32 %v17728_v1, %v3938_v55 }
 0x6a6   :  { %12183 = vmatmul.mubr.msk.f32.vlgmr.msra.gmra.mrb[82].mxu0 %vm992_vm5, %v17831_v14  ;;  %13724 = vmatprep.subr.mxu1 %v21178_v35  ;;  %v1188_v14 = vld [vmem:[%s20971_s18 + $0x318] sm:$0xff] }
 0x6a7   :  { %12184 = vmatprep.mubr.msk.f32.mxu0 %vm992_vm5, %v4215_v4  ;;  %14157 = vmatpush3.bf16.xpose.msk.msra.mxu0 %vm15760_vm6, %v17976_v37  ;;  %v18016_v62 = vpack.c.bf16 %v1188_v14, %v1187_v57  ;;  %v1207_v14 = vld [vmem:[%s20971_s18 + $0x3b0] sm:$0xff]  ;;  %v4164_v47 = vmul.f32 0.33, %v4108_v23 }
 0x6a8   :  { %14160 = vmatprep.subr.msk.bf16.mxu0 %vm15760_vm6, %v17978_v34 }
 0x6aa   :  { %v7176_v7 = vpop.f32.mrb[82].mxu1  ;;  %12185 = vmatmul.mubr.msk.f32.gmra.mrb[84].mxu0 %vm992_vm5, %v4215_v4  ;;  %v3729_v4 = vpop.permute.xlu1 %3728 }
 0x6ab   :  { %v7548_v0 = vsel %vm992_vm5, %v7176_v7, 0.0  ;;  %v13558_v25 = vpop.f32.mrb[83].mxu1  ;;  %12186 = vmatprep.mubr.msk.f32.mxu0 %vm992_vm5, %v4216_v2  ;;  %v3939_v57 = vadd.f32 %v18027_v33, %v3729_v4  ;;  %v4220_v7 = vmax.f32 %v4108_v23, %v4164_v47  ;;  %v1210_v4 = vld [vmem:[%s20971_s18 + $0x3c8] sm:$0xff]  ;;  %v1212_v23 = vld [vmem:[%s20971_s18 + $0x3d8] sm:$0xff] }
 0x6ac   :  { %v7549_v58 = vadd.f32 %v7548_v0, %v7547_v45  ;;  %v1190_v0 = vld [vmem:[%s20971_s18 + $0x328] sm:$0xff]  ;;  %v4163_v45 = vmul.f32 0.33, %v4107_v30 }
 0x6ad   :  { %13725 = vmatpush3.xpose.msk.msra.mxu1 %vm992_vm5, %v17214_v56  ;;  %v1189_v56 = vld [vmem:[%s20971_s18 + $0x320] sm:$0xff]  ;;  %v4109_v32 = vadd.f32 %v17992_v63, %v3939_v57 }
 0x6ae   :  { %12187 = vmatmul.mubr.msk.f32.gmra.mrb[86].mxu0 %vm992_vm5, %v4216_v2  ;;  %14545 = vmatprep.subr.bf16.mxu1 %v21177_v31  ;;  %v1208_v2 = vld [vmem:[%s20971_s18 + $0x3b8] sm:$0xff]  ;;  %v18062_v55 = vpack.c.bf16 %v1190_v0, %v1189_v56  ;;  %v4219_v9 = vmax.f32 %v4107_v30, %v4163_v45  ;;  %v1191_v30 = vld [vmem:[%s20971_s18 + $0x330] sm:$0xff] }
 0x6af   :  { %12188 = vmatprep.mubr.msk.f32.mxu0 %vm992_vm5, %v4217_v61  ;;  %14163 = vmatpush3.bf16.xpose.msk.msra.mxu0 %vm15760_vm6, %v18016_v62  ;;  %v4165_v15 = vmul.f32 0.33, %v4109_v32  ;;  %v18094_v56 = vpack.c.bf16 %v1192_v59, %v1191_v30  ;;  %v1211_v45 = vld [vmem:[%s20971_s18 + $0x3d0] sm:$0xff]  ;;  %v1213_v30 = vld [vmem:[%s20971_s18 + $0x3e0] sm:$0xff]  ;;  %v1214_v59 = vld [vmem:[%s20971_s18 + $0x3e8] sm:$0xff] }
 0x6b0   :  { %13727 = vmatmul.mubr.msk.f32.vlgmr.msra.gmra.mrb[102].mxu1 %vm992_vm5, %v15328_v50  ;;  %14166 = vmatprep.subr.msk.bf16.mxu0 %vm15760_vm6, %v18018_v29 }
 0x6b1   :  { %14548 = vmatpush3.bf16.xpose.msk.msra.mxu1 %vm15760_vm6, %v17218_v8  ;;  %13743 = vmatprep.mubr.msk.f32.mxu1 %vm15373_vm0, %v21178_v35  ;;  %v18064_v8 = vpack.c.bf16 %v1208_v2, %v1207_v14  ;;  %v18098_v0 = vmax.f32 %v4109_v32, %v4165_v15  ;;  %v18127_v14 = vpack.c.bf16 %v1212_v23, %v1211_v45  ;;  %v1195_v32 = vld [vmem:[%s20971_s18 + $0x350] sm:$0xff]  ;;  %v15329_v15 = vld [vmem:[%s20969_s16 + $0x28] sm:$0xff] }
 0x6b2   :  { %12189 = vmatmul.mubr.msk.f32.gmra.mrb[88].mxu0 %vm992_vm5, %v4217_v61  ;;  %14549 = vmatprep.subr.bf16.mxu1 %v21177_v31 }
 0x6b3   :  { %12190 = vmatprep.mubr.msk.f32.mxu0 %vm992_vm5, %v4218_v17 }
 0x6b6   :  { %12191 = vmatmul.mubr.msk.f32.gmra.mrb[90].mxu0 %vm992_vm5, %v4218_v17  ;;  %v1194_v17 = vld [vmem:[%s20971_s18 + $0x348] sm:$0xff] }
 0x6b7   :  { %12192 = vmatprep.mubr.msk.f32.mxu0 %vm992_vm5, %v4219_v9  ;;  %14169 = vmatpush3.bf16.xpose.msk.msra.mxu0 %vm15760_vm6, %v18062_v55 }
 0x6b8   :  { %v7249_v61 = vpop.f32.mrb[84].mxu1  ;;  %14172 = vmatprep.subr.msk.bf16.mxu0 %vm15760_vm6, %v18064_v8 }
 0x6b9   :  { %14552 = vmatpush3.bf16.xpose.msk.msra.mxu1 %vm15760_vm6, %v17239_v3  ;;  %v7550_v43 = vsel %vm992_vm5, %v7249_v61, 0.0  ;;  %v13575_v25 = vpop.f32.mrb[85].mxu1  ;;  %v18096_v3 = vpack.c.bf16 %v1210_v4, %v1209_v48  ;;  %v1196_v61 = vld [vmem:[%s20971_s18 + $0x358] sm:$0xff] }
 0x6ba   :  { %v7551_v50 = vadd.f32 %v7550_v43, %v7549_v58  ;;  %12193 = vmatmul.mubr.msk.f32.gmra.mrb[92].mxu0 %vm992_vm5, %v4219_v9  ;;  %14553 = vmatprep.subr.bf16.mxu1 %v21177_v31  ;;  %v1193_v58 = vld [vmem:[%s20971_s18 + $0x340] sm:$0xff]  ;;  %v18157_v43 = vpack.c.bf16 %v1214_v59, %v1213_v30  ;;  %v1215_v25 = vld [vmem:[%s20971_s18 + $0x3f0] sm:$0xff]  ;;  %v1216_v48 = vld [vmem:[%s20971_s18 + $0x3f8] sm:$0xff] }
 0x6bb   :  { %12194 = vmatprep.mubr.msk.f32.mxu0 %vm992_vm5, %v4220_v7  ;;  %v18125_v57 = vpack.c.bf16 %v1194_v17, %v1193_v58  ;;  %v3733_v17 = vpop.permute.xlu0 %3732 }
 0x6be   :  { %12195 = vmatmul.mubr.msk.f32.gmra.mrb[98].mxu0 %vm992_vm5, %v4220_v7  ;;  %v18151_v7 = vpack.c.bf16 %v1196_v61, %v1195_v32  ;;  %v3737_v32 = vpop.permute.xlu1 %3736  ;;  %v1234_v61 = vld [vmem:[%s20971_s18 + $0x488] sm:$0xff] }
 0x6bf   :  { %14175 = vmatpush3.bf16.xpose.msk.msra.mxu0 %vm15760_vm6, %v18094_v56  ;;  %12228 = vmatprep.mubr.msk.f32.mxu0 %vm992_vm5, %v18098_v0  ;;  %v3941_v59 = vadd.f32 %v18027_v33, %v3737_v32 }
 0x6c0   :  { %14178 = vmatprep.subr.msk.bf16.mxu0 %vm15760_vm6, %v18096_v3 }
 0x6c1   :  { %14556 = vmatpush3.bf16.xpose.msk.msra.mxu1 %vm15760_vm6, %v17253_v49 }
 0x6c2   :  { %13741 = vmatprep.subr.mxu1 %v21178_v35 }
 0x6c6   :  { %v7322_v2 = vpop.f32.mrb[86].mxu1 }
 0x6c7   :  { %14181 = vmatpush3.bf16.xpose.msk.msra.mxu0 %vm15760_vm6, %v18125_v57  ;;  %v7552_v49 = vsel %vm992_vm5, %v7322_v2, 0.0  ;;  %v13592_v9 = vpop.f32.mrb[87].mxu1 }
 0x6c8   :  { %v7553_v47 = vadd.f32 %v7552_v49, %v7551_v50  ;;  %14184 = vmatprep.subr.msk.bf16.mxu0 %vm15760_vm6, %v18127_v14  ;;  %v18185_v50 = vpack.c.bf16 %v1216_v48, %v1215_v25  ;;  %v1200_v49 = vld [vmem:[%s20971_s18 + $0x378] sm:$0xff]  ;;  %v3940_v9 = vadd.f32 %v18027_v33, %v3733_v17  ;;  %v4111_v25 = vadd.f32 %v17992_v63, %v3941_v59  ;;  %v1217_v48 = vld [vmem:[%s20971_s18 + $0x400] sm:$0xff] }
 0x6c9   :  { %13742 = vmatpush3.xpose.msk.msra.mxu1 %vm992_vm5, %v17274_v22  ;;  %v1197_v22 = vld [vmem:[%s20971_s18 + $0x360] sm:$0xff] }
 0x6ca   :  { %14557 = vmatprep.subr.bf16.mxu1 %v21177_v31 }
 0x6cc   :  { %13744 = vmatmul.mubr.msk.f32.vlgmr.msra.gmra.mrb[104].mxu1 %vm992_vm5, %v15329_v15 }
 0x6cd   :  { %14560 = vmatpush3.bf16.xpose.msk.msra.mxu1 %vm15760_vm6, %v17279_v16  ;;  %13760 = vmatprep.mubr.msk.f32.mxu1 %vm15373_vm0, %v21178_v35  ;;  %v1198_v16 = vld [vmem:[%s20971_s18 + $0x368] sm:$0xff] }
 0x6ce   :  { %14561 = vmatprep.subr.bf16.mxu1 %v21177_v31  ;;  %v18183_v4 = vpack.c.bf16 %v1198_v16, %v1197_v22  ;;  %v4110_v22 = vadd.f32 %v17992_v63, %v3940_v9  ;;  %v3741_v16 = vpop.permute.xlu0 %3740 }
 0x6cf   :  { %14187 = vmatpush3.bf16.xpose.msk.msra.mxu0 %vm15760_vm6, %v18151_v7  ;;  %v3942_v17 = vadd.f32 %v18027_v33, %v3741_v16 }
 0x6d0   :  { %14190 = vmatprep.subr.msk.bf16.mxu0 %vm15760_vm6, %v18157_v43 }
 0x6d1   :  { %v4112_v44 = vadd.f32 %v17992_v63, %v3942_v17 }
 0x6d4   :  { %v7395_v58 = vpop.f32.mrb[88].mxu1 }
 0x6d5   :  { %14564 = vmatpush3.bf16.xpose.msk.msra.mxu1 %vm15760_vm6, %v17299_v42  ;;  %v7554_v45 = vsel %vm992_vm5, %v7395_v58, 0.0  ;;  %v13609_v23 = vpop.f32.mrb[89].mxu1  ;;  %v1199_v42 = vld [vmem:[%s20971_s18 + $0x370] sm:$0xff]  ;;  %v4166_v58 = vmul.f32 0.33, %v4110_v22 }
 0x6d6   :  { %14565 = vmatprep.subr.bf16.mxu1 %v21177_v31  ;;  %v7555_v2 = vadd.f32 %v7554_v45, %v7553_v47  ;;  %v1233_v47 = vld [vmem:[%s20971_s18 + $0x480] sm:$0xff]  ;;  %v18211_v30 = vpack.c.bf16 %v1200_v49, %v1199_v42  ;;  %v1235_v45 = vld [vmem:[%s20971_s18 + $0x490] sm:$0xff]  ;;  %v1236_v23 = vld [vmem:[%s20971_s18 + $0x498] sm:$0xff]  ;;  %v3745_v42 = vpop.permute.xlu1 %3744  ;;  %v3581_v49 = vcombine.high %v16675_v11, %v16675_v11 }
 0x6d7   :  { %14193 = vmatpush3.bf16.xpose.msk.msra.mxu0 %vm15760_vm6, %v18183_v4  ;;  %v18214_v15 = vpack.c.bf16 %v1234_v61, %v1233_v47  ;;  %v4167_v47 = vmul.f32 0.33, %v4111_v25  ;;  %v3749_v61 = vpop.permute.xlu0 %3748  ;;  %v18246_v39 = vpack.c.bf16 %v1236_v23, %v1235_v45  ;;  %v4222_v1 = vmax.f32 %v4110_v22, %v4166_v58  ;;  %v1237_v45 = vld [vmem:[%s20971_s18 + $0x4a0] sm:$0xff]  ;;  %v1238_v23 = vld [vmem:[%s20971_s18 + $0x4a8] sm:$0xff] }
 0x6d8   :  { %14196 = vmatprep.subr.msk.bf16.mxu0 %vm15760_vm6, %v18185_v50  ;;  %v3943_v51 = vadd.f32 %v18027_v33, %v3745_v42  ;;  %v18256_v11 = vrot.slane %v3581_v49, %v15974_v20  ;;  %v3944_v17 = vadd.f32 %v18027_v33, %v3749_v61  ;;  %v18299_v42 = vpack.c.bf16 %v1238_v23, %v1237_v45 }
 0x6da   :  { %v18262_v22 = vpop.permute.xlu1 %4073  ;;  %v4113_v58 = vadd.f32 %v17992_v63, %v3943_v51  ;;  %v18294_v51 = vrot.slane %v18256_v11, %v15974_v20 }
 0x6dd   :  { %14568 = vmatpush3.bf16.xpose.msk.msra.mxu1 %vm15760_vm6, %v17309_v27  ;;  %v1218_v27 = vld [vmem:[%s20971_s18 + $0x408] sm:$0xff] }
 0x6de   :  { %13758 = vmatprep.subr.mxu1 %v21178_v35  ;;  %v18243_v32 = vpack.c.bf16 %v1218_v27, %v1217_v48  ;;  %v4223_v48 = vmax.f32 %v4111_v25, %v4167_v47  ;;  %v4168_v27 = vmul.f32 0.33, %v4112_v44  ;;  %v3753_v25 = vpop.permute.xlu0 %3752  ;;  %v4114_v47 = vadd.f32 %v17992_v63, %v3944_v17 }
 0x6df   :  { %14199 = vmatpush3.bf16.xpose.msk.msra.mxu0 %vm15760_vm6, %v18211_v30  ;;  %v3945_v61 = vadd.f32 %v18027_v33, %v3753_v25  ;;  %v1222_v33 = vld [vmem:[%s20971_s18 + $0x428] sm:$0xff] }
 0x6e0   :  { %14202 = vmatprep.subr.msk.bf16.mxu0 %vm15760_vm6, %v18214_v15  ;;  %v4224_v49 = vmax.f32 %v4112_v44, %v4168_v27  ;;  %v1221_v44 = vld [vmem:[%s20971_s18 + $0x420] sm:$0xff]  ;;  %v1240_v27 = vld [vmem:[%s20971_s18 + $0x4b8] sm:$0xff] }
 0x6e1   :  { %v18336_v45 = vpack.c.bf16 %v1222_v33, %v1221_v44  ;;  %v1241_v44 = vld [vmem:[%s20971_s18 + $0x4c0] sm:$0xff]  ;;  %v1242_v33 = vld [vmem:[%s20971_s18 + $0x4c8] sm:$0xff] }
 0x6e2   :  { %v7468_v9 = vpop.f32.mrb[90].mxu1 }
 0x6e3   :  { %v7556_v59 = vsel %vm992_vm5, %v7468_v9, 0.0  ;;  %v13626_v16 = vpop.f32.mrb[91].mxu1  ;;  %v4169_v9 = vmul.f32 0.33, %v4113_v58 }
 0x6e4   :  { %v7557_v40 = vadd.f32 %v7556_v59, %v7555_v2  ;;  %v1220_v2 = vld [vmem:[%s20971_s18 + $0x418] sm:$0xff]  ;;  %v3760_v59 = vpop.permute.xlu1 %3759 }
 0x6e5   :  { %13759 = vmatpush3.xpose.msk.msra.mxu1 %vm992_vm5, %v17321_v41  ;;  %v15330_v41 = vld [vmem:[%s20969_s16 + $0x30] sm:$0xff]  ;;  %v4225_v16 = vmax.f32 %v4113_v58, %v4169_v9 }
 0x6e6   :  { %12229 = vmatmul.mubr.msk.f32.vlgmr.msra.gmra.mrb[82].mxu0 %vm992_vm5, %v18098_v0  ;;  %14569 = vmatprep.subr.bf16.mxu1 %v21177_v31  ;;  %v1219_v0 = vld [vmem:[%s20971_s18 + $0x410] sm:$0xff] }
 0x6e7   :  { %12230 = vmatprep.mubr.msk.f32.mxu0 %vm992_vm5, %v4222_v1  ;;  %14205 = vmatpush3.bf16.xpose.msk.msra.mxu0 %vm15760_vm6, %v18243_v32 }
 0x6e8   :  { %13761 = vmatmul.mubr.msk.f32.vlgmr.msra.gmra.mrb[106].mxu1 %vm992_vm5, %v15330_v41  ;;  %14208 = vmatprep.subr.msk.bf16.mxu0 %vm15760_vm6, %v18246_v39  ;;  %v4170_v41 = vmul.f32 0.33, %v4114_v47 }
 0x6e9   :  { %14572 = vmatpush3.bf16.xpose.msk.msra.mxu1 %vm15760_vm6, %v17325_v12  ;;  %13777 = vmatprep.mubr.msk.f32.mxu1 %vm15373_vm0, %v21178_v35  ;;  %v18297_v12 = vpack.c.bf16 %v1220_v2, %v1219_v0  ;;  %v4115_v0 = vadd.f32 %v17992_v63, %v3945_v61 }
 0x6ea   :  { %12231 = vmatmul.mubr.msk.f32.gmra.mrb[84].mxu0 %vm992_vm5, %v4222_v1  ;;  %14573 = vmatprep.subr.bf16.mxu1 %v21177_v31  ;;  %v18306_v1 = vrot.slane %v18294_v51, %v15984_v24  ;;  %v4226_v9 = vmax.f32 %v4114_v47, %v4170_v41  ;;  %v18371_v41 = vpack.c.bf16 %v1242_v33, %v1241_v44 }
 0x6eb   :  { %12232 = vmatprep.mubr.msk.f32.mxu0 %vm992_vm5, %v4223_v48  ;;  %v4171_v61 = vmul.f32 0.33, %v4115_v0 }
 0x6ec   :  { %v3946_v2 = vadd.f32 %v18306_v1, %v3760_v59 }
 0x6ee   :  { %12233 = vmatmul.mubr.msk.f32.gmra.mrb[86].mxu0 %vm992_vm5, %v4223_v48  ;;  %v1239_v48 = vld [vmem:[%s20971_s18 + $0x4b0] sm:$0xff]  ;;  %v4116_v59 = vadd.f32 %v18262_v22, %v3946_v2  ;;  %v1226_v2 = vld [vmem:[%s20971_s18 + $0x448] sm:$0xff] }
 0x6ef   :  { %12234 = vmatprep.mubr.msk.f32.mxu0 %vm992_vm5, %v4224_v49  ;;  %14211 = vmatpush3.bf16.xpose.msk.msra.mxu0 %vm15760_vm6, %v18297_v12  ;;  %v18340_v25 = vpack.c.bf16 %v1240_v27, %v1239_v48  ;;  %v1243_v48 = vld [vmem:[%s20971_s18 + $0x4d0] sm:$0xff]  ;;  %v1244_v27 = vld [vmem:[%s20971_s18 + $0x4d8] sm:$0xff] }
 0x6f0   :  { %14214 = vmatprep.subr.msk.bf16.mxu0 %vm15760_vm6, %v18299_v42  ;;  %v4172_v47 = vmul.f32 0.33, %v4116_v59 }
 0x6f1   :  { %14576 = vmatpush3.bf16.xpose.msk.msra.mxu1 %vm15760_vm6, %v17342_v19  ;;  %v7541_v17 = vpop.f32.mrb[92].mxu1 }
 0x6f2   :  { %12235 = vmatmul.mubr.msk.f32.gmra.mrb[88].mxu0 %vm992_vm5, %v4224_v49  ;;  %14577 = vmatprep.subr.bf16.mxu1 %v21177_v31  ;;  %v7558_v58 = vsel %vm992_vm5, %v7541_v17, 0.0  ;;  %v13643_v19 = vpop.f32.mrb[93].mxu1  ;;  %v1223_v31 = vld [vmem:[%s20971_s18 + $0x430] sm:$0xff]  ;;  %v4227_v49 = vmax.f32 %v4115_v0, %v4171_v61  ;;  %v18373_v0 = vmax.f32 %v4116_v59, %v4172_v47  ;;  %v1229_v59 = vld [vmem:[%s20971_s18 + $0x460] sm:$0xff] }
 0x6f3   :  { %12236 = vmatprep.mubr.msk.f32.mxu0 %vm992_vm5, %v4225_v16  ;;  %v18338_v23 = vadd.f32 %v7558_v58, %v7557_v40  ;;  %v1224_v40 = vld [vmem:[%s20971_s18 + $0x438] sm:$0xff]  ;;  %v1246_v19 = vld [vmem:[%s20971_s18 + $0x4e8] sm:$0xff] }
 0x6f4   :  { %v15331_v58 = vld [vmem:[%s20969_s16 + $0x38] sm:$0xff] }
 0x6f6   :  { %12237 = vmatmul.mubr.msk.f32.gmra.mrb[90].mxu0 %vm992_vm5, %v4225_v16  ;;  %v18368_v16 = vpack.c.bf16 %v1224_v40, %v1223_v31  ;;  %v1248_v31 = vld [vmem:[%s20971_s18 + $0x4f8] sm:$0xff] }
 0x6f7   :  { %12238 = vmatprep.mubr.msk.f32.mxu0 %vm992_vm5, %v4226_v9  ;;  %14217 = vmatpush3.bf16.xpose.msk.msra.mxu0 %vm15760_vm6, %v18336_v45 }
 0x6f8   :  { %14220 = vmatprep.subr.msk.bf16.mxu0 %vm15760_vm6, %v18340_v25 }
 0x6f9   :  { %14580 = vmatpush3.bf16.xpose.msk.msra.mxu1 %vm15760_vm6, %v17355_v28  ;;  %v1225_v28 = vld [vmem:[%s20971_s18 + $0x440] sm:$0xff] }
 0x6fa   :  { %12239 = vmatmul.mubr.msk.f32.gmra.mrb[92].mxu0 %vm992_vm5, %v4226_v9  ;;  %13775 = vmatprep.subr.mxu1 %v21178_v35  ;;  %v18401_v17 = vpack.c.bf16 %v1226_v2, %v1225_v28  ;;  %v3764_v2 = vpop.permute.xlu0 %3763 }
 0x6fb   :  { %12240 = vmatprep.mubr.msk.f32.mxu0 %vm992_vm5, %v4227_v49 }
 0x6fe   :  { %12241 = vmatmul.mubr.msk.f32.gmra.mrb[100].mxu0 %vm992_vm5, %v4227_v49 }
 0x6ff   :  { %14223 = vmatpush3.bf16.xpose.msk.msra.mxu0 %vm15760_vm6, %v18368_v16  ;;  %12274 = vmatprep.mubr.msk.f32.mxu0 %vm992_vm5, %v18373_v0 }
 0x700   :  { %14226 = vmatprep.subr.msk.bf16.mxu0 %vm15760_vm6, %v18371_v41 }
 0x701   :  { %13776 = vmatpush3.xpose.msk.msra.mxu1 %vm992_vm5, %v17366_v46  ;;  %v18407_v46 = vpack.c.bf16 %v1244_v27, %v1243_v48  ;;  %v1231_v48 = vld [vmem:[%s20971_s18 + $0x470] sm:$0xff]  ;;  %v3947_v27 = vadd.f32 %v18306_v1, %v3764_v2 }
 0x702   :  { %14727 = vmatprep.subr.msk.bf16.mxu1 %vm15760_vm6, %v17948_v26  ;;  %v1227_v26 = vld [vmem:[%s20971_s18 + $0x450] sm:$0xff] }
 0x704   :  { %13778 = vmatmul.mubr.msk.f32.vlgmr.msra.gmra.mrb[108].mxu1 %vm992_vm5, %v15331_v58  ;;  %v1266_v58 = vld [vmem:[%s20971_s18 + $0x588] sm:$0xff] }
 0x705   :  { %14730 = vmatpush3.bf16.xpose.msk.msra.mxu1 %vm15760_vm6, %v17976_v37  ;;  %v1228_v37 = vld [vmem:[%s20971_s18 + $0x458] sm:$0xff] }
 0x706   :  { %14733 = vmatprep.subr.msk.bf16.mxu1 %vm15760_vm6, %v17978_v34  ;;  %v1245_v34 = vld [vmem:[%s20971_s18 + $0x4e0] sm:$0xff]  ;;  %v18433_v9 = vpack.c.bf16 %v1228_v37, %v1227_v26  ;;  %v3768_v26 = vpop.permute.xlu1 %3767 }
 0x707   :  { %14229 = vmatpush3.bf16.xpose.msk.msra.mxu0 %vm15760_vm6, %v18401_v17  ;;  %v18435_v61 = vpack.c.bf16 %v1246_v19, %v1245_v34  ;;  %v4117_v19 = vadd.f32 %v18262_v22, %v3947_v27 }
 0x708   :  { %14232 = vmatprep.subr.msk.bf16.mxu0 %vm15760_vm6, %v18407_v46 }
 0x70a   :  { %v3776_v2 = vpop.permute.xlu1 %3775 }
 0x70d   :  { %14736 = vmatpush3.bf16.xpose.msk.msra.mxu1 %vm15760_vm6, %v18016_v62  ;;  %v1230_v62 = vld [vmem:[%s20971_s18 + $0x468] sm:$0xff] }
 0x70e   :  { %14739 = vmatprep.subr.msk.bf16.mxu1 %vm15760_vm6, %v18018_v29  ;;  %v1247_v29 = vld [vmem:[%s20971_s18 + $0x4f0] sm:$0xff]  ;;  %v18467_v44 = vpack.c.bf16 %v1230_v62, %v1229_v59  ;;  %v3948_v59 = vadd.f32 %v18306_v1, %v3768_v26  ;;  %v3772_v62 = vpop.permute.xlu0 %3771 }
 0x70f   :  { %14235 = vmatpush3.bf16.xpose.msk.msra.mxu0 %vm15760_vm6, %v18433_v9  ;;  %v18469_v28 = vpack.c.bf16 %v1248_v31, %v1247_v29  ;;  %v1249_v29 = vld [vmem:[%s20971_s18 + $0x500] sm:$0xff]  ;;  %v4173_v31 = vmul.f32 0.33, %v4117_v19 }
 0x710   :  { %14238 = vmatprep.subr.msk.bf16.mxu0 %vm15760_vm6, %v18435_v61 }
 0x711   :  { %v4229_v35 = vmax.f32 %v4117_v19, %v4173_v31 }
 0x712   :  { %v18461_v40 = vpop.f32.mrb[94].mxu0 }
 0x713   :  { %v18463_v49 = vpop.f32.mrb[94].mxu1  ;;  %v18465_v47 = vpop.f32.mrb[95].mxu0 }
 0x714   :  { %v13660_v33 = vpop.f32.mrb[95].mxu1 }
 0x715   :  { %14742 = vmatpush3.bf16.xpose.msk.msra.mxu1 %vm15760_vm6, %v18062_v55  ;;  %v1232_v55 = vld [vmem:[%s20971_s18 + $0x478] sm:$0xff]  ;;  %v4118_v33 = vadd.f32 %v18262_v22, %v3948_v59 }
 0x716   :  { %14745 = vmatprep.subr.msk.bf16.mxu1 %vm15760_vm6, %v18064_v8  ;;  %v1265_v8 = vld [vmem:[%s20971_s18 + $0x580] sm:$0xff]  ;;  %v18496_v37 = vpack.c.bf16 %v1232_v55, %v1231_v48  ;;  %v1267_v48 = vld [vmem:[%s20971_s18 + $0x590] sm:$0xff]  ;;  %v1268_v55 = vld [vmem:[%s20971_s18 + $0x598] sm:$0xff] }
 0x717   :  { %14241 = vmatpush3.bf16.xpose.msk.msra.mxu0 %vm15760_vm6, %v18467_v44  ;;  %v18498_v34 = vpack.c.bf16 %v1266_v58, %v1265_v8  ;;  %v3950_v8 = vadd.f32 %v18306_v1, %v3776_v2  ;;  %v3780_v58 = vpop.permute.xlu0 %3779  ;;  %v18531_v26 = vpack.c.bf16 %v1268_v55, %v1267_v48  ;;  %v4174_v59 = vmul.f32 0.33, %v4118_v33  ;;  %v1270_v2 = vld [vmem:[%s20971_s18 + $0x5a8] sm:$0xff] }
 0x718   :  { %14244 = vmatprep.subr.msk.bf16.mxu0 %vm15760_vm6, %v18469_v28  ;;  %v3951_v31 = vadd.f32 %v18306_v1, %v3780_v58 }
 0x719   :  { %v4120_v19 = vadd.f32 %v18262_v22, %v3950_v8 }
 0x71a   :  { %v4121_v5 = vadd.f32 %v18262_v22, %v3951_v31 }
 0x71b   :  { %v3784_v48 = vpop.permute.xlu0 %3783  ;;  %v4176_v8 = vmul.f32 0.33, %v4120_v19 }
 0x71c   :  { %v3952_v60 = vadd.f32 %v18306_v1, %v3784_v48 }
 0x71d   :  { %14748 = vmatpush3.bf16.xpose.msk.msra.mxu1 %vm15760_vm6, %v18094_v56  ;;  %v1250_v56 = vld [vmem:[%s20971_s18 + $0x508] sm:$0xff] }
 0x71e   :  { %14751 = vmatprep.subr.msk.bf16.mxu1 %vm15760_vm6, %v18096_v3  ;;  %v3949_v3 = vadd.f32 %v18306_v1, %v3772_v62  ;;  %v18528_v27 = vpack.c.bf16 %v1250_v56, %v1249_v29  ;;  %v3597_v29 = vcombine.high %v18256_v11, %v18256_v11  ;;  %v18549_v56 = vpop.permute.xlu1 %4077  ;;  %v4230_v11 = vmax.f32 %v4118_v33, %v4174_v59 }
 0x71f   :  { %14247 = vmatpush3.bf16.xpose.msk.msra.mxu0 %vm15760_vm6, %v18496_v37  ;;  %v4232_v1 = vmax.f32 %v4120_v19, %v4176_v8  ;;  %v4122_v19 = vadd.f32 %v18262_v22, %v3952_v60 }
 0x720   :  { %14250 = vmatprep.subr.msk.bf16.mxu0 %vm15760_vm6, %v18498_v34  ;;  %v4119_v62 = vadd.f32 %v18262_v22, %v3949_v3  ;;  %v1269_v3 = vld [vmem:[%s20971_s18 + $0x5a0] sm:$0xff]  ;;  %v18569_v55 = vrot.slane %v3597_v29, %v15974_v20 }
 0x721   :  { %v18574_v58 = vpack.c.bf16 %v1270_v2, %v1269_v3  ;;  %v1271_v3 = vld [vmem:[%s20971_s18 + $0x5b0] sm:$0xff]  ;;  %v1272_v2 = vld [vmem:[%s20971_s18 + $0x5b8] sm:$0xff] }
 0x722   :  { %v18587_v29 = vrot.slane %v18569_v55, %v15984_v24  ;;  %v18617_v8 = vpack.c.bf16 %v1272_v2, %v1271_v3  ;;  %v1259_v3 = vld [vmem:[%s20971_s18 + $0x550] sm:$0xff]  ;;  %v1260_v2 = vld [vmem:[%s20971_s18 + $0x558] sm:$0xff] }
 0x725   :  { %14754 = vmatpush3.bf16.xpose.msk.msra.mxu1 %vm15760_vm6, %v18125_v57  ;;  %v1251_v57 = vld [vmem:[%s20971_s18 + $0x510] sm:$0xff] }
 0x726   :  { %12275 = vmatmul.mubr.msk.f32.vlgmr.msra.gmra.mrb[82].mxu0 %vm992_vm5, %v18373_v0  ;;  %14757 = vmatprep.subr.msk.bf16.mxu1 %vm15760_vm6, %v18127_v14  ;;  %v1252_v14 = vld [vmem:[%s20971_s18 + $0x518] sm:$0xff]  ;;  %v4175_v0 = vmul.f32 0.33, %v4119_v62 }
 0x727   :  { %12276 = vmatprep.mubr.msk.f32.mxu0 %vm992_vm5, %v4229_v35  ;;  %14253 = vmatpush3.bf16.xpose.msk.msra.mxu0 %vm15760_vm6, %v18528_v27  ;;  %v18572_v33 = vpack.c.bf16 %v1252_v14, %v1251_v57 }
 0x728   :  { %14256 = vmatprep.subr.msk.bf16.mxu0 %vm15760_vm6, %v18531_v26  ;;  %v4231_v59 = vmax.f32 %v4119_v62, %v4175_v0  ;;  %v4177_v0 = vmul.f32 0.33, %v4121_v5 }
 0x72a   :  { %12277 = vmatmul.mubr.msk.f32.gmra.mrb[84].mxu0 %vm992_vm5, %v4229_v35  ;;  %v3791_v35 = vpop.permute.xlu1 %3790  ;;  %v4233_v60 = vmax.f32 %v4121_v5, %v4177_v0  ;;  %v1255_v5 = vld [vmem:[%s20971_s18 + $0x530] sm:$0xff]  ;;  %v1276_v0 = vld [vmem:[%s20971_s18 + $0x5d8] sm:$0xff] }
 0x72b   :  { %12278 = vmatprep.mubr.msk.f32.mxu0 %vm992_vm5, %v4230_v11 }
 0x72d   :  { %14760 = vmatpush3.bf16.xpose.msk.msra.mxu1 %vm15760_vm6, %v18151_v7  ;;  %v8280_v7 = vsel %vm992_vm5, %v18463_v49, 0.0  ;;  %v3953_v49 = vadd.f32 %v18587_v29, %v3791_v35 }
 0x72e   :  { %12279 = vmatmul.mubr.msk.f32.gmra.mrb[86].mxu0 %vm992_vm5, %v4230_v11  ;;  %14763 = vmatprep.subr.msk.bf16.mxu1 %vm15760_vm6, %v18157_v43  ;;  %v1253_v43 = vld [vmem:[%s20971_s18 + $0x520] sm:$0xff]  ;;  %v1254_v11 = vld [vmem:[%s20971_s18 + $0x528] sm:$0xff] }
 0x72f   :  { %v7736_v62 = vpop.f32.mrb[96].mxu1  ;;  %12280 = vmatprep.mubr.msk.f32.mxu0 %vm992_vm5, %v4231_v59  ;;  %14259 = vmatpush3.bf16.xpose.msk.msra.mxu0 %vm15760_vm6, %v18572_v33  ;;  %v18615_v48 = vpack.c.bf16 %v1254_v11, %v1253_v43  ;;  %v4123_v35 = vadd.f32 %v18549_v56, %v3953_v49  ;;  %v1258_v11 = vld [vmem:[%s20971_s18 + $0x548] sm:$0xff] }
 0x730   :  { %v8281_v57 = vsel %vm992_vm5, %v7736_v62, 0.0  ;;  %v13677_v14 = vpop.f32.mrb[97].mxu1  ;;  %14262 = vmatprep.subr.msk.bf16.mxu0 %vm15760_vm6, %v18574_v58  ;;  %v4178_v62 = vmul.f32 0.33, %v4122_v19 }
 0x731   :  { %v8282_v31 = vadd.f32 %v8281_v57, %v8280_v7  ;;  %v1274_v7 = vld [vmem:[%s20971_s18 + $0x5c8] sm:$0xff] }
 0x732   :  { %12281 = vmatmul.mubr.msk.f32.gmra.mrb[88].mxu0 %vm992_vm5, %v4231_v59  ;;  %v4234_v59 = vmax.f32 %v4122_v19, %v4178_v62  ;;  %v1278_v62 = vld [vmem:[%s20971_s18 + $0x5e8] sm:$0xff] }
 0x733   :  { %12282 = vmatprep.mubr.msk.f32.mxu0 %vm992_vm5, %v4232_v1 }
 0x735   :  { %14766 = vmatpush3.bf16.xpose.msk.msra.mxu1 %vm15760_vm6, %v18183_v4  ;;  %v1256_v4 = vld [vmem:[%s20971_s18 + $0x538] sm:$0xff] }
 0x736   :  { %12283 = vmatmul.mubr.msk.f32.gmra.mrb[90].mxu0 %vm992_vm5, %v4232_v1  ;;  %14769 = vmatprep.subr.msk.bf16.mxu1 %vm15760_vm6, %v18185_v50  ;;  %v4179_v50 = vmul.f32 0.33, %v4123_v35  ;;  %v1273_v1 = vld [vmem:[%s20971_s18 + $0x5c0] sm:$0xff]  ;;  %v18648_v57 = vpack.c.bf16 %v1256_v4, %v1255_v5  ;;  %v18703_v5 = vpack.c.bf16 %v1260_v2, %v1259_v3  ;;  %v1279_v3 = vld [vmem:[%s20971_s18 + $0x5f0] sm:$0xff]  ;;  %v1280_v2 = vld [vmem:[%s20971_s18 + $0x5f8] sm:$0xff] }
 0x737   :  { %12284 = vmatprep.mubr.msk.f32.mxu0 %vm992_vm5, %v4233_v60  ;;  %14265 = vmatpush3.bf16.xpose.msk.msra.mxu0 %vm15760_vm6, %v18615_v48  ;;  %v18650_v14 = vpack.c.bf16 %v1274_v7, %v1273_v1 }
 0x738   :  { %14268 = vmatprep.subr.msk.bf16.mxu0 %vm15760_vm6, %v18617_v8  ;;  %v18652_v43 = vmax.f32 %v4123_v35, %v4179_v50 }
 0x73a   :  { %12285 = vmatmul.mubr.msk.f32.gmra.mrb[92].mxu0 %vm992_vm5, %v4233_v60  ;;  %v1277_v60 = vld [vmem:[%s20971_s18 + $0x5e0] sm:$0xff] }
 0x73b   :  { %12286 = vmatprep.mubr.msk.f32.mxu0 %vm992_vm5, %v4234_v59  ;;  %v18706_v50 = vpack.c.bf16 %v1278_v62, %v1277_v60  ;;  %v6147_v60 = vsel %vm97_vm2, %v18465_v47, 0.0  ;;  %v1263_v47 = vld [vmem:[%s20971_s18 + $0x570] sm:$0xff] }
 0x73d   :  { %14772 = vmatpush3.bf16.xpose.msk.msra.mxu1 %vm15760_vm6, %v18211_v30  ;;  %v1257_v30 = vld [vmem:[%s20971_s18 + $0x540] sm:$0xff] }
 0x73e   :  { %12287 = vmatmul.mubr.msk.f32.gmra.mrb[102].mxu0 %vm992_vm5, %v4234_v59  ;;  %14775 = vmatprep.subr.msk.bf16.mxu1 %vm15760_vm6, %v18214_v15  ;;  %v1275_v15 = vld [vmem:[%s20971_s18 + $0x5d0] sm:$0xff]  ;;  %v18681_v19 = vpack.c.bf16 %v1258_v11, %v1257_v30  ;;  %v1261_v30 = vld [vmem:[%s20971_s18 + $0x560] sm:$0xff]  ;;  %v1262_v11 = vld [vmem:[%s20971_s18 + $0x568] sm:$0xff] }
 0x73f   :  { %14271 = vmatpush3.bf16.xpose.msk.msra.mxu0 %vm15760_vm6, %v18648_v57  ;;  %12320 = vmatprep.mubr.msk.f32.mxu0 %vm992_vm5, %v18652_v43  ;;  %v18683_v49 = vpack.c.bf16 %v1276_v0, %v1275_v15 }
 0x740   :  { %14274 = vmatprep.subr.msk.bf16.mxu0 %vm15760_vm6, %v18650_v14 }
 0x747   :  { %14277 = vmatpush3.bf16.xpose.msk.msra.mxu0 %vm15760_vm6, %v18681_v19 }
 0x748   :  { %14280 = vmatprep.subr.msk.bf16.mxu0 %vm15760_vm6, %v18683_v49 }
 0x74b   :  { %v7826_v35 = vpop.f32.mrb[98].mxu1 }
 0x74c   :  { %v8283_v4 = vsel %vm992_vm5, %v7826_v35, 0.0  ;;  %v13694_v59 = vpop.f32.mrb[99].mxu1 }
 0x74d   :  { %v8284_v1 = vadd.f32 %v8283_v4, %v8282_v31  ;;  %v6132_v31 = vsel %vm97_vm2, %v18461_v40, 0.0  ;;  %v18736_v40 = vpack.c.bf16 %v1262_v11, %v1261_v30  ;;  %v18738_v59 = vpack.c.bf16 %v1280_v2, %v1279_v3  ;;  %v1264_v30 = vld [vmem:[%s20971_s18 + $0x578] sm:$0xff] }
 0x74e   :  { %v18759_v3 = vpack.c.bf16 %v1264_v30, %v1263_v47  ;;  %v1281_v47 = vld [vmem:[%s20971_s18 + $0x600] sm:$0xff]  ;;  %v1282_v30 = vld [vmem:[%s20971_s18 + $0x608] sm:$0xff] }
 0x74f   :  { %14283 = vmatpush3.bf16.xpose.msk.msra.mxu0 %vm15760_vm6, %v18703_v5  ;;  %21245 = vst [vmem:[#allocation94_spill] sm:$0xff] %v18736_v40  ;;  %21246 = vst [vmem:[#allocation95_spill] sm:$0xff] %v18738_v59  ;;  %v18785_v13 = vpack.c.bf16 %v1282_v30, %v1281_v47 }
 0x750   :  { %v4699_v7 = vpop.f32.mrb[96].mxu0  ;;  %14286 = vmatprep.subr.msk.bf16.mxu0 %vm15760_vm6, %v18706_v50  ;;  %21247 = vst [vmem:[#allocation96_spill] sm:$0xff] %v18759_v3 }
 0x751   :  { %v6133_v15 = vsel %vm97_vm2, %v4699_v7, 0.0  ;;  %v4701_v0 = vpop.f32.mrb[97].mxu0  ;;  %v3795_v7 = vpop.permute.xlu0 %3794  ;;  %21249 = vst [vmem:[#allocation98_spill] sm:$0xff] %v18785_v13 }
 0x752   :  { %v18731_v62 = vadd.f32 %v6133_v15, %v6132_v31  ;;  %v6148_v35 = vsel %vm97_vm2, %v4701_v0, 0.0  ;;  %v3954_v11 = vadd.f32 %v18587_v29, %v3795_v7  ;;  %v3799_v31 = vpop.permute.xlu1 %3798  ;;  %v1297_v15 = vld [vmem:[%s20971_s18 + $0x680] sm:$0xff]  ;;  %v1298_v0 = vld [vmem:[%s20971_s18 + $0x688] sm:$0xff] }
 0x753   :  { %v18734_v4 = vadd.f32 %v6148_v35, %v6147_v60  ;;  %v3955_v2 = vadd.f32 %v18587_v29, %v3799_v31  ;;  %v18762_v60 = vpack.c.bf16 %v1298_v0, %v1297_v15  ;;  %v1299_v15 = vld [vmem:[%s20971_s18 + $0x690] sm:$0xff]  ;;  %v1300_v0 = vld [vmem:[%s20971_s18 + $0x698] sm:$0xff] }
 0x754   :  { %v4124_v35 = vadd.f32 %v18549_v56, %v3954_v11  ;;  %v18787_v53 = vpack.c.bf16 %v1300_v0, %v1299_v15 }
 0x755   :  { %21248 = vst [vmem:[#allocation97_spill] sm:$0xff] %v18762_v60  ;;  %v3803_v21 = vpop.permute.xlu0 %3802  ;;  %v4125_v7 = vadd.f32 %v18549_v56, %v3955_v2 }
 0x756   :  { %v4180_v11 = vmul.f32 0.33, %v4124_v35  ;;  %v3956_v31 = vadd.f32 %v18587_v29, %v3803_v21  ;;  %v3807_v2 = vpop.permute.xlu1 %3806  ;;  %21250 = vst [vmem:[#allocation99_spill] sm:$0xff] %v18787_v53 }
 0x757   :  { %14289 = vmatpush3.bf16.xpose.msk.msra.mxu0 %vm15760_vm6, %v18736_v40  ;;  %v4181_v10 = vmul.f32 0.33, %v4125_v7  ;;  %v3957_v21 = vadd.f32 %v18587_v29, %v3807_v2  ;;  %v1302_v2 = vld [vmem:[%s20971_s18 + $0x6a8] sm:$0xff] }
 0x758   :  { %14292 = vmatprep.subr.msk.bf16.mxu0 %vm15760_vm6, %v18738_v59 }
 0x759   :  { %v3811_v54 = vpop.permute.xlu0 %3810  ;;  %v4237_v47 = vmax.f32 %v4125_v7, %v4181_v10  ;;  %v4127_v10 = vadd.f32 %v18549_v56, %v3957_v21 }
 0x75a   :  { %v18797_v30 = vpop.permute.xlu1 %4081  ;;  %v3958_v7 = vadd.f32 %v18587_v29, %v3811_v54 }
 0x75e   :  { %v3822_v40 = vpop.permute.xlu1 %3821 }
 0x75f   :  { %14295 = vmatpush3.bf16.xpose.msk.msra.mxu0 %vm15760_vm6, %v18759_v3  ;;  %v4126_v3 = vadd.f32 %v18549_v56, %v3956_v31 }
 0x760   :  { %14298 = vmatprep.subr.msk.bf16.mxu0 %vm15760_vm6, %v18762_v60  ;;  %v4236_v60 = vmax.f32 %v4124_v35, %v4180_v11  ;;  %v1284_v11 = vld [vmem:[%s20971_s18 + $0x618] sm:$0xff] }
 0x761   :  { %v4182_v31 = vmul.f32 0.33, %v4126_v3 }
 0x766   :  { %12321 = vmatmul.mubr.msk.f32.vlgmr.msra.gmra.mrb[82].mxu0 %vm992_vm5, %v18652_v43  ;;  %v1283_v43 = vld [vmem:[%s20971_s18 + $0x610] sm:$0xff] }
 0x767   :  { %v7916_v6 = vpop.f32.mrb[100].mxu1  ;;  %12322 = vmatprep.mubr.msk.f32.mxu0 %vm992_vm5, %v4236_v60  ;;  %14301 = vmatpush3.bf16.xpose.msk.msra.mxu0 %vm15760_vm6, %v18785_v13  ;;  %v18823_v21 = vpack.c.bf16 %v1284_v11, %v1283_v43  ;;  %v4128_v13 = vadd.f32 %v18549_v56, %v3958_v7  ;;  %v1303_v11 = vld [vmem:[%s20971_s18 + $0x6b0] sm:$0xff] }
 0x768   :  { %v8285_v15 = vsel %vm992_vm5, %v7916_v6, 0.0  ;;  %v13711_v35 = vpop.f32.mrb[101].mxu1  ;;  %14304 = vmatprep.subr.msk.bf16.mxu0 %vm15760_vm6, %v18787_v53  ;;  %v1301_v6 = vld [vmem:[%s20971_s18 + $0x6a0] sm:$0xff]  ;;  %v3627_v53 = vcombine.high %v18294_v51, %v18294_v51 }
 0x769   :  { %v18811_v0 = vadd.f32 %v8285_v15, %v8284_v1  ;;  %v3815_v35 = vpop.permute.xlu0 %3814  ;;  %21251 = vst [vmem:[#allocation100_spill] sm:$0xff] %v18823_v21  ;;  %v18825_v54 = vpack.c.bf16 %v1302_v2, %v1301_v6  ;;  %v4238_v1 = vmax.f32 %v4126_v3, %v4182_v31  ;;  %v4183_v15 = vmul.f32 0.33, %v4127_v10  ;;  %v1285_v51 = vld [vmem:[%s20971_s18 + $0x620] sm:$0xff]  ;;  %v1304_v31 = vld [vmem:[%s20971_s18 + $0x6b8] sm:$0xff]  ;;  %v3826_v2 = vpop.permute.xlu1 %3825 }
 0x76a   :  { %12323 = vmatmul.mubr.msk.f32.gmra.mrb[84].mxu0 %vm992_vm5, %v4236_v60  ;;  %v3959_v59 = vadd.f32 %v18587_v29, %v3815_v35  ;;  %v18831_v60 = vrot.slane %v3627_v53, %v15984_v24  ;;  %v1286_v29 = vld [vmem:[%s20971_s18 + $0x628] sm:$0xff]  ;;  %v4184_v3 = vmul.f32 0.33, %v4128_v13  ;;  %v1288_v35 = vld [vmem:[%s20971_s18 + $0x638] sm:$0xff] }
 0x76b   :  { %12324 = vmatprep.mubr.msk.f32.mxu0 %vm992_vm5, %v4237_v47  ;;  %21252 = vst [vmem:[#allocation101_spill] sm:$0xff] %v18825_v54  ;;  %v4239_v53 = vmax.f32 %v4127_v10, %v4183_v15  ;;  %v18856_v7 = vpack.c.bf16 %v1286_v29, %v1285_v51  ;;  %v18858_v10 = vpack.c.bf16 %v1304_v31, %v1303_v11  ;;  %v1305_v51 = vld [vmem:[%s20971_s18 + $0x6c0] sm:$0xff]  ;;  %v1306_v29 = vld [vmem:[%s20971_s18 + $0x6c8] sm:$0xff] }
 0x76c   :  { %v3960_v43 = vadd.f32 %v18831_v60, %v3822_v40  ;;  %v4240_v6 = vmax.f32 %v4128_v13, %v4184_v3  ;;  %v1287_v13 = vld [vmem:[%s20971_s18 + $0x630] sm:$0xff]  ;;  %v18885_v3 = vpack.c.bf16 %v1306_v29, %v1305_v51  ;;  %v1289_v11 = vld [vmem:[%s20971_s18 + $0x640] sm:$0xff]  ;;  %v1290_v31 = vld [vmem:[%s20971_s18 + $0x648] sm:$0xff] }
 0x76d   :  { %21253 = vst [vmem:[#allocation102_spill] sm:$0xff] %v18856_v7  ;;  %21254 = vst [vmem:[#allocation103_spill] sm:$0xff] %v18858_v10 }
 0x76e   :  { %12325 = vmatmul.mubr.msk.f32.gmra.mrb[86].mxu0 %vm992_vm5, %v4237_v47  ;;  %v4129_v47 = vadd.f32 %v18549_v56, %v3959_v59  ;;  %v4130_v40 = vadd.f32 %v18797_v30, %v3960_v43  ;;  %21256 = vst [vmem:[#allocation105_spill] sm:$0xff] %v18885_v3 }
 0x76f   :  { %12326 = vmatprep.mubr.msk.f32.mxu0 %vm992_vm5, %v4238_v1  ;;  %14307 = vmatpush3.bf16.xpose.msk.msra.mxu0 %vm15760_vm6, %v18823_v21 }
 0x770   :  { %14310 = vmatprep.subr.msk.bf16.mxu0 %vm15760_vm6, %v18825_v54  ;;  %v4185_v59 = vmul.f32 0.33, %v4129_v47  ;;  %v4186_v15 = vmul.f32 0.33, %v4130_v40 }
 0x772   :  { %12327 = vmatmul.mubr.msk.f32.gmra.mrb[88].mxu0 %vm992_vm5, %v4238_v1  ;;  %v4241_v1 = vmax.f32 %v4129_v47, %v4185_v59  ;;  %v18887_v43 = vmax.f32 %v4130_v40, %v4186_v15  ;;  %v18889_v47 = vpop.permute.xlu1 %3833  ;;  %v1308_v59 = vld [vmem:[%s20971_s18 + $0x6d8] sm:$0xff] }
 0x773   :  { %12328 = vmatprep.mubr.msk.f32.mxu0 %vm992_vm5, %v4239_v53 }
 0x776   :  { %12329 = vmatmul.mubr.msk.f32.gmra.mrb[90].mxu0 %vm992_vm5, %v4239_v53  ;;  %v18883_v53 = vpack.c.bf16 %v1288_v35, %v1287_v13  ;;  %v18912_v13 = vpack.c.bf16 %v1290_v31, %v1289_v11  ;;  %v3838_v35 = vpop.permute.xlu1 %3837  ;;  %v1291_v11 = vld [vmem:[%s20971_s18 + $0x650] sm:$0xff]  ;;  %v1292_v31 = vld [vmem:[%s20971_s18 + $0x658] sm:$0xff] }
 0x777   :  { %12330 = vmatprep.mubr.msk.f32.mxu0 %vm992_vm5, %v4240_v6  ;;  %14313 = vmatpush3.bf16.xpose.msk.msra.mxu0 %vm15760_vm6, %v18856_v7 }
 0x778   :  { %14316 = vmatprep.subr.msk.bf16.mxu0 %vm15760_vm6, %v18858_v10  ;;  %21255 = vst [vmem:[#allocation104_spill] sm:$0xff] %v18883_v53  ;;  %21257 = vst [vmem:[#allocation106_spill] sm:$0xff] %v18912_v13 }
 0x77a   :  { %12331 = vmatmul.mubr.msk.f32.gmra.mrb[92].mxu0 %vm992_vm5, %v4240_v6  ;;  %v1307_v6 = vld [vmem:[%s20971_s18 + $0x6d0] sm:$0xff] }
 0x77b   :  { %12332 = vmatprep.mubr.msk.f32.mxu0 %vm992_vm5, %v4241_v1  ;;  %v18915_v51 = vpack.c.bf16 %v1308_v59, %v1307_v6  ;;  %v1310_v6 = vld [vmem:[%s20971_s18 + $0x6e8] sm:$0xff]  ;;  %v3842_v59 = vpop.permute.xlu1 %3841 }
 0x77d   :  { %21258 = vst [vmem:[#allocation107_spill] sm:$0xff] %v18915_v51 }
 0x77e   :  { %12333 = vmatmul.mubr.msk.f32.gmra.mrb[104].mxu0 %vm992_vm5, %v4241_v1 }
 0x77f   :  { %14319 = vmatpush3.bf16.xpose.msk.msra.mxu0 %vm15760_vm6, %v18883_v53  ;;  %12366 = vmatprep.mubr.msk.f32.mxu0 %vm992_vm5, %v18887_v43 }
 0x780   :  { %14322 = vmatprep.subr.msk.bf16.mxu0 %vm15760_vm6, %v18885_v3 }
 0x783   :  { %v8006_v40 = vpop.f32.mrb[102].mxu1 }
 0x784   :  { %v8287_v1 = vsel %vm992_vm5, %v8006_v40, 0.0  ;;  %v13728_v15 = vpop.f32.mrb[103].mxu1  ;;  %v18936_v40 = vpack.c.bf16 %v1292_v31, %v1291_v11  ;;  %v1294_v11 = vld [vmem:[%s20971_s18 + $0x668] sm:$0xff] }
 0x785   :  { %v8288_v29 = vadd.f32 %v8287_v1, %v18811_v0  ;;  %v1309_v0 = vld [vmem:[%s20971_s18 + $0x6e0] sm:$0xff]  ;;  %v18943_v15 = vpop.permute.xlu1 %3860 }
 0x786   :  { %21259 = vst [vmem:[#allocation108_spill] sm:$0xff] %v18936_v40  ;;  %v18938_v1 = vpack.c.bf16 %v1310_v6, %v1309_v0  ;;  %v1311_v0 = vld [vmem:[%s20971_s18 + $0x6f0] sm:$0xff]  ;;  %v1312_v6 = vld [vmem:[%s20971_s18 + $0x6f8] sm:$0xff] }
 0x787   :  { %14325 = vmatpush3.bf16.xpose.msk.msra.mxu0 %vm15760_vm6, %v18912_v13  ;;  %v18972_v54 = vpack.c.bf16 %v1312_v6, %v1311_v0 }
 0x788   :  { %14328 = vmatprep.subr.msk.bf16.mxu0 %vm15760_vm6, %v18915_v51  ;;  %21260 = vst [vmem:[#allocation109_spill] sm:$0xff] %v18938_v1  ;;  %v1293_v51 = vld [vmem:[%s20971_s18 + $0x660] sm:$0xff] }
 0x789   :  { %v18965_v53 = vpack.c.bf16 %v1294_v11, %v1293_v51  ;;  %v18967_v10 = vpop.xlane.xlu1 %10627  ;;  %21263 = vst [vmem:[#allocation112_spill] sm:$0xff] %v18972_v54  ;;  %v1296_v51 = vld [vmem:[%s20971_s18 + $0x678] sm:$0xff] }
 0x78a   :  { %21262 = vst [vmem:[#allocation111_spill] sm:$0xff] %v18967_v10 }
 0x78b   :  { %21261 = vst [vmem:[#allocation110_spill] sm:$0xff] %v18965_v53 }
 0x78d   :  { %v18993_v11 = vpop.xlane.xlu1 %10636 }
 0x78e   :  { %21264 = vst [vmem:[#allocation113_spill] sm:$0xff] %v18993_v11 }
 0x78f   :  { %14331 = vmatpush3.bf16.xpose.msk.msra.mxu0 %vm15760_vm6, %v18936_v40 }
 0x790   :  { %14334 = vmatprep.subr.msk.bf16.mxu0 %vm15760_vm6, %v18938_v1 }
 0x791   :  { %v4923_v31 = vpop.f32.mrb[98].mxu0 }
 0x792   :  { %v6135_v40 = vsel %vm97_vm2, %v4923_v31, 0.0  ;;  %v4925_v1 = vpop.f32.mrb[99].mxu0 }
 0x793   :  { %v18962_v13 = vadd.f32 %v6135_v40, %v18731_v62  ;;  %v6150_v3 = vsel %vm97_vm2, %v4925_v1, 0.0  ;;  %v1295_v62 = vld [vmem:[%s20971_s18 + $0x670] sm:$0xff]  ;;  %v1330_v40 = vld [vmem:[%s20971_s18 + $0x788] sm:$0xff]  ;;  %v3830_v1 = vpop.permute.xlu0 %3829 }
 0x794   :  { %v18970_v7 = vadd.f32 %v6150_v3, %v18734_v4  ;;  %v3961_v4 = vadd.f32 %v18831_v60, %v3826_v2  ;;  %v1329_v3 = vld [vmem:[%s20971_s18 + $0x780] sm:$0xff]  ;;  %v18995_v31 = vpack.c.bf16 %v1296_v51, %v1295_v62  ;;  %v3962_v6 = vadd.f32 %v18831_v60, %v3830_v1  ;;  %v1314_v51 = vld [vmem:[%s20971_s18 + $0x708] sm:$0xff] }
 0x795   :  { %v18997_v0 = vpack.c.bf16 %v1330_v40, %v1329_v3  ;;  %v1313_v62 = vld [vmem:[%s20971_s18 + $0x700] sm:$0xff]  ;;  %v3963_v40 = vadd.f32 %v18831_v60, %v18889_v47  ;;  %v3964_v47 = vadd.f32 %v18831_v60, %v3838_v35  ;;  %v1316_v35 = vld [vmem:[%s20971_s18 + $0x718] sm:$0xff] }
 0x796   :  { %21265 = vst [vmem:[#allocation114_spill] sm:$0xff] %v18995_v31 }
 0x797   :  { %14337 = vmatpush3.bf16.xpose.msk.msra.mxu0 %vm15760_vm6, %v18965_v53  ;;  %21266 = vst [vmem:[#allocation115_spill] sm:$0xff] %v18997_v0  ;;  %v19004_v53 = vpop.xlane.xlu1 %10643 }
 0x798   :  { %14340 = vmatprep.subr.msk.bf16.mxu0 %vm15760_vm6, %v18972_v54  ;;  %v4131_v54 = vadd.f32 %v18797_v30, %v3961_v4  ;;  %21267 = vst [vmem:[#allocation116_spill] sm:$0xff] %v19004_v53  ;;  %v4132_v4 = vadd.f32 %v18797_v30, %v3962_v6  ;;  %v19027_v53 = vpack.c.bf16 %v1314_v51, %v1313_v62 }
 0x799   :  { %v4134_v62 = vadd.f32 %v18797_v30, %v3964_v47  ;;  %v3965_v51 = vadd.f32 %v18831_v60, %v3842_v59 }
 0x79a   :  { %v4187_v3 = vmul.f32 0.33, %v4131_v54  ;;  %21268 = vst [vmem:[#allocation117_spill] sm:$0xff] %v19027_v53 }
 0x79c   :  { %v4243_v6 = vmax.f32 %v4131_v54, %v4187_v3  ;;  %v1315_v54 = vld [vmem:[%s20971_s18 + $0x710] sm:$0xff]  ;;  %v1333_v3 = vld [vmem:[%s20971_s18 + $0x7a0] sm:$0xff] }
 0x79f   :  { %v8096_v2 = vpop.f32.mrb[104].mxu1  ;;  %14343 = vmatpush3.bf16.xpose.msk.msra.mxu0 %vm15760_vm6, %v18995_v31  ;;  %v4133_v31 = vadd.f32 %v18797_v30, %v3963_v40  ;;  %v1334_v40 = vld [vmem:[%s20971_s18 + $0x7a8] sm:$0xff] }
 0x7a0   :  { %v8289_v10 = vsel %vm992_vm5, %v8096_v2, 0.0  ;;  %v13745_v21 = vpop.f32.mrb[105].mxu1  ;;  %14346 = vmatprep.subr.msk.bf16.mxu0 %vm15760_vm6, %v18997_v0  ;;  %v1332_v2 = vld [vmem:[%s20971_s18 + $0x798] sm:$0xff]  ;;  %v4188_v0 = vmul.f32 0.33, %v4132_v4  ;;  %v19066_v59 = vpack.c.bf16 %v1334_v40, %v1333_v3 }
 0x7a1   :  { %v19019_v1 = vadd.f32 %v8289_v10, %v8288_v29  ;;  %v1331_v21 = vld [vmem:[%s20971_s18 + $0x790] sm:$0xff]  ;;  %v19033_v10 = vpop.xlane.xlu1 %997 }
 0x7a2   :  { %v19029_v11 = vpack.c.bf16 %v1332_v2, %v1331_v21  ;;  %21270 = vst [vmem:[#allocation119_spill] sm:$0xff] %v19033_v10  ;;  %v4244_v29 = vmax.f32 %v4132_v4, %v4188_v0  ;;  %v3846_v21 = vpop.permute.xlu0 %3845  ;;  %v19060_v2 = vpack.c.bf16 %v1316_v35, %v1315_v54  ;;  %v3629_v0 = vcombine.high %v18569_v55, %v18569_v55  ;;  %v1317_v55 = vld [vmem:[%s20971_s18 + $0x720] sm:$0xff] }
 0x7a3   :  { %v3966_v47 = vadd.f32 %v18831_v60, %v3846_v21  ;;  %v1318_v60 = vld [vmem:[%s20971_s18 + $0x728] sm:$0xff] }
 0x7a4   :  { %21269 = vst [vmem:[#allocation118_spill] sm:$0xff] %v19029_v11  ;;  %v19099_v21 = vpack.c.bf16 %v1318_v60, %v1317_v55  ;;  %v1337_v60 = vld [vmem:[%s20971_s18 + $0x7c0] sm:$0xff] }
 0x7a5   :  { %v19064_v4 = vpop.xlane.xlu1 %1003  ;;  %v4136_v54 = vadd.f32 %v18797_v30, %v3966_v47 }
 0x7a6   :  { %12367 = vmatmul.mubr.msk.f32.vlgmr.msra.gmra.mrb[82].mxu0 %vm992_vm5, %v18887_v43  ;;  %v4189_v43 = vmul.f32 0.33, %v4133_v31  ;;  %21271 = vst [vmem:[#allocation120_spill] sm:$0xff] %v19064_v4  ;;  %21272 = vst [vmem:[#allocation121_spill] sm:$0xff] %v19099_v21 }
 0x7a7   :  { %12368 = vmatprep.mubr.msk.f32.mxu0 %vm992_vm5, %v4243_v6  ;;  %14349 = vmatpush3.bf16.xpose.msk.msra.mxu0 %vm15760_vm6, %v19027_v53  ;;  %v4135_v53 = vadd.f32 %v18797_v30, %v3965_v51  ;;  %v1336_v51 = vld [vmem:[%s20971_s18 + $0x7b8] sm:$0xff] }
 0x7a8   :  { %14352 = vmatprep.subr.msk.bf16.mxu0 %vm15760_vm6, %v19029_v11  ;;  %v4245_v10 = vmax.f32 %v4133_v31, %v4189_v43  ;;  %v4190_v11 = vmul.f32 0.33, %v4134_v62  ;;  %v19085_v31 = vrot.slane %v3629_v0, %v15984_v24  ;;  %v1335_v43 = vld [vmem:[%s20971_s18 + $0x7b0] sm:$0xff] }
 0x7a9   :  { %v19094_v3 = vpop.permute.xlu1 %4085 }
 0x7aa   :  { %12369 = vmatmul.mubr.msk.f32.gmra.mrb[84].mxu0 %vm992_vm5, %v4243_v6  ;;  %v3853_v6 = vpop.permute.xlu0 %3852  ;;  %v4246_v35 = vmax.f32 %v4134_v62, %v4190_v11  ;;  %v19101_v11 = vpack.c.bf16 %v1336_v51, %v1335_v43  ;;  %v4192_v62 = vmul.f32 0.33, %v4136_v54 }
 0x7ab   :  { %12370 = vmatprep.mubr.msk.f32.mxu0 %vm992_vm5, %v4244_v29  ;;  %v3967_v40 = vadd.f32 %v19085_v31, %v3853_v6 }
 0x7ac   :  { %21273 = vst [vmem:[#allocation122_spill] sm:$0xff] %v19101_v11  ;;  %v4248_v6 = vmax.f32 %v4136_v54, %v4192_v62 }
 0x7ad   :  { %v4137_v47 = vadd.f32 %v19094_v3, %v3967_v40 }
 0x7ae   :  { %12371 = vmatmul.mubr.msk.f32.gmra.mrb[86].mxu0 %vm992_vm5, %v4244_v29  ;;  %v4191_v29 = vmul.f32 0.33, %v4135_v53 }
 0x7af   :  { %12372 = vmatprep.mubr.msk.f32.mxu0 %vm992_vm5, %v4245_v10  ;;  %14355 = vmatpush3.bf16.xpose.msk.msra.mxu0 %vm15760_vm6, %v19060_v2  ;;  %v4193_v55 = vmul.f32 0.33, %v4137_v47 }
 0x7b0   :  { %14358 = vmatprep.subr.msk.bf16.mxu0 %vm15760_vm6, %v19066_v59  ;;  %v4247_v0 = vmax.f32 %v4135_v53, %v4191_v29  ;;  %v1320_v53 = vld [vmem:[%s20971_s18 + $0x738] sm:$0xff] }
 0x7b1   :  { %v19132_v4 = vmax.f32 %v4137_v47, %v4193_v55  ;;  %v1339_v47 = vld [vmem:[%s20971_s18 + $0x7d0] sm:$0xff] }
 0x7b2   :  { %12373 = vmatmul.mubr.msk.f32.gmra.mrb[88].mxu0 %vm992_vm5, %v4245_v10  ;;  %v1319_v10 = vld [vmem:[%s20971_s18 + $0x730] sm:$0xff] }
 0x7b3   :  { %12374 = vmatprep.mubr.msk.f32.mxu0 %vm992_vm5, %v4246_v35  ;;  %v19126_v43 = vpack.c.bf16 %v1320_v53, %v1319_v10  ;;  %v1340_v10 = vld [vmem:[%s20971_s18 + $0x7d8] sm:$0xff]  ;;  %v1323_v55 = vld [vmem:[%s20971_s18 + $0x750] sm:$0xff] }
 0x7b5   :  { %21274 = vst [vmem:[#allocation123_spill] sm:$0xff] %v19126_v43 }
 0x7b6   :  { %12375 = vmatmul.mubr.msk.f32.gmra.mrb[90].mxu0 %vm992_vm5, %v4246_v35  ;;  %v1338_v35 = vld [vmem:[%s20971_s18 + $0x7c8] sm:$0xff] }
 0x7b7   :  { %12376 = vmatprep.mubr.msk.f32.mxu0 %vm992_vm5, %v4247_v0  ;;  %14361 = vmatpush3.bf16.xpose.msk.msra.mxu0 %vm15760_vm6, %v19099_v21  ;;  %v19129_v54 = vpack.c.bf16 %v1338_v35, %v1337_v60  ;;  %v1324_v60 = vld [vmem:[%s20971_s18 + $0x758] sm:$0xff]  ;;  %v1341_v35 = vld [vmem:[%s20971_s18 + $0x7e0] sm:$0xff] }
 0x7b8   :  { %14364 = vmatprep.subr.msk.bf16.mxu0 %vm15760_vm6, %v19101_v11 }
 0x7b9   :  { %21275 = vst [vmem:[#allocation124_spill] sm:$0xff] %v19129_v54 }
 0x7ba   :  { %12377 = vmatmul.mubr.msk.f32.gmra.mrb[92].mxu0 %vm992_vm5, %v4247_v0  ;;  %v1321_v0 = vld [vmem:[%s20971_s18 + $0x740] sm:$0xff] }
 0x7bb   :  { %v8186_v29 = vpop.f32.mrb[106].mxu1  ;;  %12378 = vmatprep.mubr.msk.f32.mxu0 %vm992_vm5, %v4248_v6 }
 0x7bc   :  { %v8291_v51 = vsel %vm992_vm5, %v8186_v29, 0.0  ;;  %v13762_v40 = vpop.f32.mrb[107].mxu1  ;;  %v1342_v29 = vld [vmem:[%s20971_s18 + $0x7e8] sm:$0xff] }
 0x7bd   :  { %v8292_v62 = vadd.f32 %v8291_v51, %v19019_v1  ;;  %v1322_v1 = vld [vmem:[%s20971_s18 + $0x748] sm:$0xff]  ;;  %v19177_v51 = vpack.c.bf16 %v1324_v60, %v1323_v55  ;;  %v19179_v40 = vpack.c.bf16 %v1342_v29, %v1341_v35  ;;  %v1344_v55 = vld [vmem:[%s20971_s18 + $0x7f8] sm:$0xff] }
 0x7be   :  { %12379 = vmatmul.mubr.msk.f32.gmra.mrb[106].mxu0 %vm992_vm5, %v4248_v6  ;;  %v19155_v53 = vpack.c.bf16 %v1322_v1, %v1321_v0  ;;  %v19157_v6 = vpack.c.bf16 %v1340_v10, %v1339_v47  ;;  %v1325_v0 = vld [vmem:[%s20971_s18 + $0x760] sm:$0xff]  ;;  %v1326_v1 = vld [vmem:[%s20971_s18 + $0x768] sm:$0xff]  ;;  %v1343_v10 = vld [vmem:[%s20971_s18 + $0x7f0] sm:$0xff] }
 0x7bf   :  { %14367 = vmatpush3.bf16.xpose.msk.msra.mxu0 %vm15760_vm6, %v19126_v43  ;;  %12412 = vmatprep.mubr.msk.f32.mxu0 %vm992_vm5, %v19132_v4  ;;  %21278 = vst [vmem:[#allocation127_spill] sm:$0xff] %v19177_v51  ;;  %21279 = vst [vmem:[#allocation128_spill] sm:$0xff] %v19179_v40 }
 0x7c0   :  { %14370 = vmatprep.subr.msk.bf16.mxu0 %vm15760_vm6, %v19129_v54  ;;  %21276 = vst [vmem:[#allocation125_spill] sm:$0xff] %v19155_v53  ;;  %21277 = vst [vmem:[#allocation126_spill] sm:$0xff] %v19157_v6  ;;  %v19209_v54 = vpack.c.bf16 %v1344_v55, %v1343_v10  ;;  %v3969_v55 = vadd.f32 %v19085_v31, %v18943_v15 }
 0x7c2   :  { %21281 = vst [vmem:[#allocation130_spill] sm:$0xff] %v19209_v54 }
 0x7c7   :  { %14373 = vmatpush3.bf16.xpose.msk.msra.mxu0 %vm15760_vm6, %v19155_v53 }
 0x7c8   :  { %14376 = vmatprep.subr.msk.bf16.mxu0 %vm15760_vm6, %v19157_v6  ;;  %v3857_v6 = vpop.permute.xlu0 %3856 }
 0x7cf   :  { %14379 = vmatpush3.bf16.xpose.msk.msra.mxu0 %vm15760_vm6, %v19177_v51  ;;  %v19204_v51 = vpack.c.bf16 %v1326_v1, %v1325_v0  ;;  %v3865_v0 = vpop.permute.xlu0 %3864  ;;  %v3968_v1 = vadd.f32 %v19085_v31, %v3857_v6  ;;  %v21283_v6 = vld [vmem:[#allocation43_spill] sm:$0xff] }
 0x7d0   :  { %14382 = vmatprep.subr.msk.bf16.mxu0 %vm15760_vm6, %v19179_v40 }
 0x7d1   :  { %v5147_v47 = vpop.f32.mrb[100].mxu0  ;;  %21280 = vst [vmem:[#allocation129_spill] sm:$0xff] %v19204_v51  ;;  %v4138_v10 = vadd.f32 %v19094_v3, %v3968_v1 }
 0x7d2   :  { %v6137_v60 = vsel %vm97_vm2, %v5147_v47, 0.0  ;;  %v5149_v35 = vpop.f32.mrb[101].mxu0 }
 0x7d3   :  { %v19201_v29 = vadd.f32 %v6137_v60, %v18962_v13  ;;  %v6152_v40 = vsel %vm97_vm2, %v5149_v35, 0.0  ;;  %v1327_v13 = vld [vmem:[%s20971_s18 + $0x770] sm:$0xff]  ;;  %v4139_v60 = vadd.f32 %v19094_v3, %v3969_v55  ;;  %v3970_v35 = vadd.f32 %v19085_v31, %v3865_v0  ;;  %v21285_v55 = vld [vmem:[#allocation44_spill] sm:$0xff]  ;;  %v21286_v0 = vld [vmem:[#allocation45_spill] sm:$0xff] }
 0x7d4   :  { %v19207_v53 = vadd.f32 %v6152_v40, %v18970_v7  ;;  %v1328_v7 = vld [vmem:[%s20971_s18 + $0x778] sm:$0xff] }
 0x7d5   :  { %v4140_v1 = vadd.f32 %v19094_v3, %v3970_v35 }
 0x7d7   :  { %v8276_v43 = vpop.f32.mrb[108].mxu1  ;;  %14385 = vmatpush3.bf16.xpose.msk.msra.mxu0 %vm15760_vm6, %v19204_v51 }
 0x7d8   :  { %v8293_v47 = vsel %vm992_vm5, %v8276_v43, 0.0  ;;  %v13779_v11 = vpop.f32.mrb[109].mxu1  ;;  %14388 = vmatprep.subr.msk.bf16.mxu0 %vm15760_vm6, %v19209_v54  ;;  %v19231_v43 = vpack.c.bf16 %v1328_v7, %v1327_v13  ;;  %v4195_v7 = vmul.f32 0.33, %v4139_v60 }
 0x7d9   :  { %v19224_v40 = vadd.f32 %v8293_v47, %v8292_v62  ;;  %v3869_v62 = vpop.permute.xlu0 %3868  ;;  %v21284_v47 = vld [vmem:[#allocation41_spill] sm:$0xff] }
 0x7da   :  { %21282 = vst [vmem:[#allocation131_spill] sm:$0xff] %v19231_v43 }
 0x7db   :  { %v19229_v11 = vrot.slane %v19224_v40, %v16088_v52  ;;  %v4194_v52 = vmul.f32 0.33, %v4138_v10  ;;  %v19249_v13 = vrot.slane %v19224_v40, %v21284_v47 }
 0x7dd   :  { %8443 = vbcast.lane.b32.xlu0 %v19229_v11, 256  ;;  %8459 = vbcast.lane.b32.xlu1 %v19229_v11, 288  ;;  %v4250_v15 = vmax.f32 %v4138_v10, %v4194_v52  ;;  %v4251_v10 = vmax.f32 %v4139_v60, %v4195_v7  ;;  %v4196_v52 = vmul.f32 0.33, %v4140_v1  ;;  %v21287_v60 = vld [vmem:[#allocation46_spill] sm:$0xff] }
 0x7df   :  { %14391 = vmatpush3.bf16.xpose.msk.msra.mxu0 %vm15760_vm6, %v19231_v43  ;;  %v3873_v43 = vpop.permute.xlu0 %3872  ;;  %v4252_v47 = vmax.f32 %v4140_v1, %v4196_v52  ;;  %v21291_v52 = vld [vmem:[#allocation34_spill] sm:$0xff] }
 0x7e0   :  { %14583 = vmatprep.subr.msk.bf16.mxu0 %vm15760_vm6, %v21283_v6  ;;  %v3971_v6 = vadd.f32 %v19085_v31, %v3869_v62 }
 0x7e1   :  { %8463 = vbcast.lane.b32.xlu1 %v19229_v11, 296 }
 0x7e2   :  { %v4141_v35 = vadd.f32 %v19094_v3, %v3971_v6 }
 0x7e3   :  { %v3877_v62 = vpop.permute.xlu0 %3876 }
 0x7e4   :  { %v4197_v54 = vmul.f32 0.33, %v4141_v35 }
 0x7e5   :  { %8474 = vbcast.lane.b32.xlu1 %v19249_v13, 256 }
 0x7e6   :  { %12413 = vmatmul.mubr.msk.f32.vlgmr.msra.gmra.mrb[82].mxu0 %vm992_vm5, %v19132_v4  ;;  %v3972_v4 = vadd.f32 %v19085_v31, %v3873_v43  ;;  %v4253_v43 = vmax.f32 %v4141_v35, %v4197_v54  ;;  %v1005_v35 = vsel %vm992_vm5, %v21291_v52, -inf }
 0x7e7   :  { %12414 = vmatprep.mubr.msk.f32.mxu0 %vm992_vm5, %v4250_v15  ;;  %14586 = vmatpush3.bf16.xpose.msk.msra.mxu0 %vm15760_vm6, %v21285_v55  ;;  %v3973_v55 = vadd.f32 %v19085_v31, %v3877_v62  ;;  %v21294_v62 = vld [vmem:[#allocation52_spill] sm:$0xff] }
 0x7e8   :  { %14589 = vmatprep.subr.msk.bf16.mxu0 %vm15760_vm6, %v21286_v0  ;;  %v4142_v51 = vadd.f32 %v19094_v3, %v3972_v4  ;;  %v21289_v0 = vld [vmem:[#allocation48_spill] sm:$0xff]  ;;  %v21293_v4 = vld [vmem:[#allocation51_spill] sm:$0xff] }
 0x7e9   :  { %v4143_v1 = vadd.f32 %v19094_v3, %v3973_v55 }
 0x7ea   :  { %12415 = vmatmul.mubr.msk.f32.gmra.mrb[84].mxu0 %vm992_vm5, %v4250_v15  ;;  %v21288_v15 = vld [vmem:[#allocation47_spill] sm:$0xff]  ;;  %v4198_v7 = vmul.f32 0.33, %v4142_v51 }
 0x7eb   :  { %12416 = vmatprep.mubr.msk.f32.mxu0 %vm992_vm5, %v4251_v10  ;;  %v4199_v31 = vmul.f32 0.33, %v4143_v1 }
 0x7ec   :  { %v4254_v6 = vmax.f32 %v4142_v51, %v4198_v7  ;;  %v21292_v51 = vld [vmem:[#allocation50_spill] sm:$0xff] }
 0x7ed   :  { %v4255_v54 = vmax.f32 %v4143_v1, %v4199_v31 }
 0x7ee   :  { %12417 = vmatmul.mubr.msk.f32.gmra.mrb[86].mxu0 %vm992_vm5, %v4251_v10  ;;  %v21290_v10 = vld [vmem:[#allocation49_spill] sm:$0xff] }
 0x7ef   :  { %12418 = vmatprep.mubr.msk.f32.mxu0 %vm992_vm5, %v4252_v47  ;;  %14592 = vmatpush3.bf16.xpose.msk.msra.mxu0 %vm15760_vm6, %v21287_v60  ;;  %v21296_v60 = vld [vmem:[#allocation53_spill] sm:$0xff] }
 0x7f0   :  { %14595 = vmatprep.subr.msk.bf16.mxu0 %vm15760_vm6, %v21288_v15  ;;  %v21297_v15 = vld [vmem:[#allocation54_spill] sm:$0xff] }
 0x7f2   :  { %12419 = vmatmul.mubr.msk.f32.gmra.mrb[88].mxu0 %vm992_vm5, %v4252_v47  ;;  %v21295_v47 = vld [vmem:[#allocation35_spill] sm:$0xff] }
 0x7f3   :  { %12420 = vmatprep.mubr.msk.f32.mxu0 %vm992_vm5, %v4253_v43  ;;  %v1008_v55 = vsel %vm992_vm5, %v21295_v47, -inf }
 0x7f6   :  { %12421 = vmatmul.mubr.msk.f32.gmra.mrb[90].mxu0 %vm992_vm5, %v4253_v43  ;;  %v21298_v43 = vld [vmem:[#allocation55_spill] sm:$0xff] }
 0x7f7   :  { %12422 = vmatprep.mubr.msk.f32.mxu0 %vm992_vm5, %v4254_v6  ;;  %14598 = vmatpush3.bf16.xpose.msk.msra.mxu0 %vm15760_vm6, %v21289_v0 }
 0x7f8   :  { %14601 = vmatprep.subr.msk.bf16.mxu0 %vm15760_vm6, %v21290_v10 }
 0x7fa   :  { %12423 = vmatmul.mubr.msk.f32.gmra.mrb[92].mxu0 %vm992_vm5, %v4254_v6 }
 0x7fb   :  { %12424 = vmatprep.mubr.msk.f32.mxu0 %vm992_vm5, %v4255_v54 }
 0x7fc   :  { %1006 = vmax.xlane.f32.xlu0 %v1005_v35  ;;  %v21300_v35 = vld [vmem:[#allocation57_spill] sm:$0xff] }
 0x7fe   :  { %12425 = vmatmul.mubr.msk.f32.gmra.mrb[108].mxu0 %vm992_vm5, %v4255_v54  ;;  %v21299_v54 = vld [vmem:[#allocation56_spill] sm:$0xff] }
 0x7ff   :  { %14604 = vmatpush3.bf16.xpose.msk.msra.mxu0 %vm15760_vm6, %v21292_v51  ;;  %v21303_v51 = vld [vmem:[#allocation38_spill] sm:$0xff] }
 0x800   :  { %14607 = vmatprep.subr.msk.bf16.mxu0 %vm15760_vm6, %v21293_v4  ;;  %v19340_v4 = vrot.slane %v19224_v40, %v21303_v51 }
 0x807   :  { %14610 = vmatpush3.bf16.xpose.msk.msra.mxu0 %vm15760_vm6, %v21294_v62 }
 0x808   :  { %14613 = vmatprep.subr.msk.bf16.mxu0 %vm15760_vm6, %v21296_v60  ;;  %v21306_v60 = vld [vmem:[#allocation5_spill] sm:$0xff] }
 0x809   :  { %1009 = vmax.xlane.f32.xlu1 %v1008_v55  ;;  %v15332_v55 = vld [vmem:[%s21139_s4] ss:$0 sm:$0xff] }
 0x80f   :  { %14616 = vmatpush3.bf16.xpose.msk.msra.mxu0 %vm15760_vm6, %v21297_v15  ;;  %v19351_v15 = vadd.f32 %v15332_v55, %v21306_v60 }
 0x810   :  { %14619 = vmatprep.subr.msk.bf16.mxu0 %vm15760_vm6, %v21298_v43 }
 0x811   :  { %v5371_v7 = vpop.f32.mrb[102].mxu0  ;;  %21307 = vst [vmem:[#allocation44_spill] sm:$0xff] %v19351_v15  ;;  %v10059_v43 = vmul.f32 %v19351_v15, %v19351_v15 }
 0x812   :  { %8447 = vbcast.lane.b32.xlu0 %v19229_v11, 264  ;;  %v6139_v1 = vsel %vm97_vm2, %v5371_v7, 0.0  ;;  %v5373_v6 = vpop.f32.mrb[103].mxu0 }
 0x813   :  { %v6140_v31 = vadd.f32 %v6139_v1, %v19201_v29  ;;  %v6154_v0 = vsel %vm97_vm2, %v5373_v6, 0.0  ;;  %v21301_v29 = vld [vmem:[#allocation58_spill] sm:$0xff]  ;;  %v10066_v1 = vsel %vm115_vm1, %v10059_v43, 0.0  ;;  %v19360_v6 = vrot.slane %v18338_v23, %v15974_v20 }
 0x814   :  { %v6155_v10 = vadd.f32 %v6154_v0, %v19207_v53  ;;  %v21302_v53 = vld [vmem:[#allocation59_spill] sm:$0xff] }
 0x816   :  { %8451 = vbcast.lane.b32.xlu0 %v19229_v11, 272 }
 0x817   :  { %14622 = vmatpush3.bf16.xpose.msk.msra.mxu0 %vm15760_vm6, %v21299_v54  ;;  %v8311_v54 = vcombine.high %v19360_v6, %v19360_v6 }
 0x818   :  { %14625 = vmatprep.subr.msk.bf16.mxu0 %vm15760_vm6, %v21300_v35 }
 0x81a   :  { %8455 = vbcast.lane.b32.xlu0 %v19229_v11, 280  ;;  %8478 = vbcast.lane.b32.xlu1 %v19249_v13, 264 }
 0x81e   :  { %8467 = vbcast.lane.b32.xlu0 %v19229_v11, 304  ;;  %8482 = vbcast.lane.b32.xlu1 %v19249_v13, 272  ;;  %v19342_v11 = vpop.xlane.xlu0 %10623 }
 0x81f   :  { %14628 = vmatpush3.bf16.xpose.msk.msra.mxu0 %vm15760_vm6, %v21301_v29  ;;  %21304 = vst [vmem:[#allocation43_spill] sm:$0xff] %v19342_v11  ;;  %v19369_v29 = vrot.slane %v8311_v54, %v15974_v20 }
 0x820   :  { %14631 = vmatprep.subr.msk.bf16.mxu0 %vm15760_vm6, %v21302_v53  ;;  %v21309_v53 = vld [vmem:[#allocation6_spill] sm:$0xff] }
 0x821   :  { %v19372_v51 = vadd.f32 %v15332_v55, %v21309_v53  ;;  %v8343_v60 = vcombine.high %v19369_v29, %v19369_v29  ;;  %v19387_v55 = vrot.slane %v19224_v40, %v15984_v24 }
 0x822   :  { %8486 = vbcast.lane.b32.xlu1 %v19249_v13, 280  ;;  %v19345_v62 = vpop.xlane.xlu0 %10630 }
 0x823   :  { %21305 = vst [vmem:[#allocation41_spill] sm:$0xff] %v19345_v62  ;;  %21310 = vst [vmem:[#allocation46_spill] sm:$0xff] %v19372_v51  ;;  %v19381_v47 = vrot.slane %v8343_v60, %v15984_v24 }
 0x826   :  { %8490 = vbcast.lane.b32.xlu1 %v19249_v13, 288  ;;  %v19355_v7 = vpop.xlane.xlu0 %10633 }
 0x82a   :  { %8494 = vbcast.lane.b32.xlu1 %v19249_v13, 296  ;;  %v19362_v0 = vpop.xlane.xlu0 %10639 }
 0x82e   :  { %8505 = vbcast.lane.b32.xlu1 %v19340_v4, 256  ;;  %v19366_v35 = vpop.xlane.xlu0 %994 }
 0x82f   :  { %21308 = vst [vmem:[#allocation45_spill] sm:$0xff] %v19366_v35 }
 0x832   :  { %v19376_v43 = vpop.xlane.xlu0 %1000 }
 0x833   :  { %21311 = vst [vmem:[#allocation47_spill] sm:$0xff] %v19376_v43 }
 0x83d   :  { %10067 = vadd.xlane.f32.xlu0 %v10066_v1  ;;  %v10060_v1 = vmul.f32 %v19372_v51, %v19372_v51 }
 0x83f   :  { %v10069_v54 = vsel %vm115_vm1, %v10060_v1, 0.0 }
 0x84f   :  { %v8444_v52 = vpop.permute.xlu0 %8443 }
 0x850   :  { %v8654_v35 = vadd.f32 %v19381_v47, %v8444_v52 }
 0x851   :  { %v5595_v15 = vpop.f32.mrb[104].mxu0 }
 0x852   :  { %v8710_v53 = vadd.f32 %v8654_v35, %v17992_v63  ;;  %10070 = vadd.xlane.f32.xlu1 %v10069_v54  ;;  %v6141_v43 = vsel %vm97_vm2, %v5595_v15, 0.0  ;;  %v5597_v62 = vpop.f32.mrb[105].mxu0 }
 0x853   :  { %v6142_v51 = vadd.f32 %v6141_v43, %v6140_v31  ;;  %8350 = vbcast.lane.b32.xlu0 %v19387_v55, 256  ;;  %v6156_v60 = vsel %vm97_vm2, %v5597_v62, 0.0 }
 0x854   :  { %v8766_v21 = vmul.f32 0.33, %v8710_v53  ;;  %v6157_v52 = vadd.f32 %v6156_v60, %v6155_v10 }
 0x856   :  { %v8822_v11 = vmax.f32 %v8710_v53, %v8766_v21 }
 0x857   :  { %8498 = vbcast.lane.b32.xlu0 %v19249_v13, 304 }
 0x858   :  { %12740 = vmatprep.mubr.msk.f32.mxu1 %vm992_vm5, %v8822_v11 }
 0x859   :  { %12741 = vmatmul.mubr.msk.f32.vlgmr.msra.gmra.mrb[110].mxu1 %vm992_vm5, %v8822_v11 }
 0x85a   :  { %14778 = vmatpush3.bf16.xpose.msk.msra.mxu1 %vm15760_vm6, %v18243_v32 }
 0x85b   :  { %14781 = vmatprep.subr.msk.bf16.mxu1 %vm15760_vm6, %v18246_v39  ;;  %v10052_v39 = vld [vmem:[%s21127_s1] sm:$0xff] }
 0x85c   :  { %v10158_v32 = vmul.f32 %v10052_v39, %v10052_v39 }
 0x862   :  { %14784 = vmatpush3.bf16.xpose.msk.msra.mxu1 %vm15760_vm6, %v18297_v12  ;;  %v10165_v12 = vsel %vm115_vm1, %v10158_v32, 0.0 }
 0x863   :  { %8358 = vbcast.lane.b32.xlu1 %v19387_v55, 272  ;;  %14787 = vmatprep.subr.msk.bf16.mxu1 %vm15760_vm6, %v18299_v42  ;;  %v21312_v42 = vld [vmem:[#allocation42_spill] sm:$0xff] }
 0x867   :  { %8509 = vbcast.lane.b32.xlu1 %v19340_v4, 264 }
 0x86a   :  { %14790 = vmatpush3.bf16.xpose.msk.msra.mxu1 %vm15760_vm6, %v18336_v45  ;;  %v8534_v45 = vrot.slane %v19224_v40, %v21312_v42 }
 0x86b   :  { %8513 = vbcast.lane.b32.xlu1 %v19340_v4, 272  ;;  %14793 = vmatprep.subr.msk.bf16.mxu1 %vm15760_vm6, %v18340_v25  ;;  %v21313_v25 = vld [vmem:[#allocation37_spill] sm:$0xff] }
 0x86f   :  { %8517 = vbcast.lane.b32.xlu1 %v19340_v4, 280 }
 0x872   :  { %14796 = vmatpush3.bf16.xpose.msk.msra.mxu1 %vm15760_vm6, %v18368_v16  ;;  %v19440_v16 = vrot.slane %v19224_v40, %v21313_v25 }
 0x873   :  { %8521 = vbcast.lane.b32.xlu1 %v19340_v4, 288  ;;  %14799 = vmatprep.subr.msk.bf16.mxu1 %vm15760_vm6, %v18371_v41  ;;  %v8460_v41 = vpop.permute.xlu1 %8459 }
 0x874   :  { %v8658_v10 = vadd.f32 %v19381_v47, %v8460_v41 }
 0x876   :  { %10166 = vadd.xlane.f32.xlu0 %v10165_v12 }
 0x877   :  { %8525 = vbcast.lane.b32.xlu1 %v19340_v4, 296 }
 0x87a   :  { %14802 = vmatpush3.bf16.xpose.msk.msra.mxu1 %vm15760_vm6, %v18401_v17 }
 0x87b   :  { %8536 = vbcast.lane.b32.xlu1 %v8534_v45, 256  ;;  %14805 = vmatprep.subr.msk.bf16.mxu1 %vm15760_vm6, %v18407_v46  ;;  %v8464_v46 = vpop.permute.xlu1 %8463 }
 0x87c   :  { %v8659_v39 = vadd.f32 %v19381_v47, %v8464_v46 }
 0x87f   :  { %8389 = vbcast.lane.b32.xlu1 %v19440_v16, 272  ;;  %v8475_v11 = vpop.permute.xlu1 %8474 }
 0x882   :  { %14808 = vmatpush3.bf16.xpose.msk.msra.mxu1 %vm15760_vm6, %v18433_v9 }
 0x883   :  { %8540 = vbcast.lane.b32.xlu1 %v8534_v45, 264  ;;  %14811 = vmatprep.subr.msk.bf16.mxu1 %vm15760_vm6, %v18435_v61  ;;  %v8296_v61 = vcombine.high %v18338_v23, %v18338_v23 }
 0x885   :  { %v19476_v1 = vrot.slane %v8296_v61, %v15974_v20 }
 0x887   :  { %8544 = vbcast.lane.b32.xlu1 %v8534_v45, 272 }
 0x889   :  { %v19449_v17 = vpop.xlane.xlu0 %1006 }
 0x88a   :  { %14814 = vmatpush3.bf16.xpose.msk.msra.mxu1 %vm15760_vm6, %v18467_v44 }
 0x88b   :  { %8548 = vbcast.lane.b32.xlu1 %v8534_v45, 280  ;;  %14817 = vmatprep.subr.msk.bf16.mxu1 %vm15760_vm6, %v18469_v28 }
 0x88c   :  { %8354 = vbcast.lane.b32.xlu0 %v19387_v55, 264 }
 0x88d   :  { %v8448_v9 = vpop.permute.xlu0 %8447 }
 0x88e   :  { %v8655_v21 = vadd.f32 %v19381_v47, %v8448_v9  ;;  %v21314_v9 = vld [vmem:[#allocation39_spill] sm:$0xff] }
 0x88f   :  { %8552 = vbcast.lane.b32.xlu1 %v8534_v45, 288 }
 0x890   :  { %v8711_v13 = vadd.f32 %v8655_v21, %v17992_v63  ;;  %8362 = vbcast.lane.b32.xlu0 %v19387_v55, 280  ;;  %v19497_v21 = vrot.slane %v19224_v40, %v21314_v9 }
 0x891   :  { %v8452_v44 = vpop.permute.xlu0 %8451  ;;  %v5819_v31 = vpop.f32.mrb[106].mxu0 }
 0x892   :  { %v8767_v28 = vmul.f32 0.33, %v8711_v13  ;;  %v8656_v62 = vadd.f32 %v19381_v47, %v8452_v44  ;;  %v6143_v15 = vsel %vm97_vm2, %v5819_v31, 0.0  ;;  %v5821_v35 = vpop.f32.mrb[107].mxu0  ;;  %14820 = vmatpush3.bf16.xpose.msk.msra.mxu1 %vm15760_vm6, %v18496_v37 }
 0x893   :  { %v19469_v23 = vadd.f32 %v6143_v15, %v6142_v51  ;;  %8556 = vbcast.lane.b32.xlu1 %v8534_v45, 296  ;;  %v6158_v43 = vsel %vm97_vm2, %v5821_v35, 0.0  ;;  %14823 = vmatprep.subr.msk.bf16.mxu1 %vm15760_vm6, %v18498_v34  ;;  %v8714_v51 = vadd.f32 %v8658_v10, %v17992_v63 }
 0x894   :  { %v8823_v54 = vmax.f32 %v8711_v13, %v8767_v28  ;;  %v8712_v53 = vadd.f32 %v8656_v62, %v17992_v63  ;;  %v19479_v60 = vadd.f32 %v6158_v43, %v6157_v52  ;;  %8366 = vbcast.lane.b32.xlu0 %v19387_v55, 288  ;;  %v19491_v52 = vrot.slane %v19476_v1, %v15974_v20 }
 0x895   :  { %v8456_v37 = vpop.permute.xlu0 %8455  ;;  %v8770_v61 = vmul.f32 0.33, %v8714_v51  ;;  %v8715_v13 = vadd.f32 %v8659_v39, %v17992_v63 }
 0x896   :  { %v8768_v32 = vmul.f32 0.33, %v8712_v53  ;;  %v8657_v12 = vadd.f32 %v19381_v47, %v8456_v37  ;;  %12742 = vmatprep.mubr.msk.f32.mxu1 %vm992_vm5, %v8823_v54  ;;  %v19486_v34 = vpop.xlane.xlu1 %1009  ;;  %v19506_v10 = vrot.slane %v19491_v52, %v15984_v24 }
 0x897   :  { %12743 = vmatmul.mubr.msk.f32.gmra.mrb[112].mxu1 %vm992_vm5, %v8823_v54  ;;  %8560 = vbcast.lane.b32.xlu1 %v8534_v45, 304  ;;  %v8826_v62 = vmax.f32 %v8714_v51, %v8770_v61  ;;  %v8771_v15 = vmul.f32 0.33, %v8715_v13 }
 0x898   :  { %v8824_v42 = vmax.f32 %v8712_v53, %v8768_v32  ;;  %v8713_v41 = vadd.f32 %v8657_v12, %v17992_v63  ;;  %8370 = vbcast.lane.b32.xlu0 %v19387_v55, 296  ;;  %v8661_v35 = vadd.f32 %v19506_v10, %v8475_v11 }
 0x899   :  { %v8468_v46 = vpop.permute.xlu0 %8467  ;;  %v8827_v54 = vmax.f32 %v8715_v13, %v8771_v15 }
 0x89a   :  { %v8769_v44 = vmul.f32 0.33, %v8713_v41  ;;  %v8660_v45 = vadd.f32 %v19381_v47, %v8468_v46  ;;  %12744 = vmatprep.mubr.msk.f32.mxu1 %vm992_vm5, %v8824_v42  ;;  %v8479_v31 = vpop.permute.xlu1 %8478 }
 0x89b   :  { %12745 = vmatmul.mubr.msk.f32.gmra.mrb[114].mxu1 %vm992_vm5, %v8824_v42  ;;  %8567 = vbcast.lane.b32.xlu1 %v19497_v21, 256  ;;  %v8662_v37 = vadd.f32 %v19506_v10, %v8479_v31 }
 0x89c   :  { %v8825_v28 = vmax.f32 %v8713_v41, %v8769_v44  ;;  %8374 = vbcast.lane.b32.xlu0 %v19387_v55, 304  ;;  %v8716_v47 = vadd.f32 %v8660_v45, %v17992_v63  ;;  %v8717_v55 = vadd.f32 %v8661_v35, %v18262_v22 }
 0x89d   :  { %v8718_v32 = vadd.f32 %v8662_v37, %v18262_v22 }
 0x89e   :  { %12746 = vmatprep.mubr.msk.f32.mxu1 %vm992_vm5, %v8825_v28  ;;  %v8483_v43 = vpop.permute.xlu1 %8482  ;;  %v8772_v53 = vmul.f32 0.33, %v8716_v47  ;;  %v8773_v11 = vmul.f32 0.33, %v8717_v55 }
 0x89f   :  { %12747 = vmatmul.mubr.msk.f32.gmra.mrb[116].mxu1 %vm992_vm5, %v8825_v28  ;;  %8571 = vbcast.lane.b32.xlu1 %v19497_v21, 264  ;;  %v8663_v39 = vadd.f32 %v19506_v10, %v8483_v43  ;;  %v8774_v41 = vmul.f32 0.33, %v8718_v32 }
 0x8a0   :  { %8381 = vbcast.lane.b32.xlu0 %v19440_v16, 256  ;;  %12748 = vmatprep.mubr.msk.f32.mxu1 %vm992_vm5, %v8826_v62  ;;  %v8828_v51 = vmax.f32 %v8716_v47, %v8772_v53  ;;  %v8829_v12 = vmax.f32 %v8717_v55, %v8773_v11 }
 0x8a1   :  { %v8719_v42 = vadd.f32 %v8663_v39, %v18262_v22  ;;  %v8830_v13 = vmax.f32 %v8718_v32, %v8774_v41 }
 0x8a2   :  { %v8487_v63 = vpop.permute.xlu1 %8486 }
 0x8a3   :  { %8575 = vbcast.lane.b32.xlu1 %v19497_v21, 272  ;;  %12749 = vmatmul.mubr.msk.f32.gmra.mrb[118].mxu1 %vm992_vm5, %v8826_v62  ;;  %v8664_v46 = vadd.f32 %v19506_v10, %v8487_v63  ;;  %v8775_v9 = vmul.f32 0.33, %v8719_v42  ;;  %v1345_v62 = vld [vmem:[%s20972_s19] sm:$0x3] }
 0x8a4   :  { %8529 = vbcast.lane.b32.xlu0 %v19340_v4, 304  ;;  %12750 = vmatprep.mubr.msk.f32.mxu1 %vm992_vm5, %v8827_v54  ;;  %v19557_v47 = vrot.slane %v1345_v62, %v21313_v25  ;;  %v21317_v63 = vld [vmem:[#allocation40_spill] sm:$0xff] }
 0x8a5   :  { %v8720_v44 = vadd.f32 %v8664_v46, %v18262_v22  ;;  %v8831_v31 = vmax.f32 %v8719_v42, %v8775_v9  ;;  %v19572_v11 = vrot.slane %v19224_v40, %v21317_v63  ;;  %v19624_v63 = vrot.slane %v19360_v6, %v15974_v20 }
 0x8a6   :  { %v8491_v4 = vpop.permute.xlu1 %8490  ;;  %21316 = vst [vmem:[#allocation49_spill] sm:$0xff] %v19557_v47 }
 0x8a7   :  { %8579 = vbcast.lane.b32.xlu1 %v19497_v21, 280  ;;  %12751 = vmatmul.mubr.msk.f32.gmra.mrb[120].mxu1 %vm992_vm5, %v8827_v54  ;;  %v8665_v61 = vadd.f32 %v19506_v10, %v8491_v4  ;;  %v8776_v15 = vmul.f32 0.33, %v8720_v44 }
 0x8a8   :  { %8385 = vbcast.lane.b32.xlu0 %v19440_v16, 264  ;;  %12752 = vmatprep.mubr.msk.f32.mxu1 %vm992_vm5, %v8828_v51 }
 0x8a9   :  { %v8721_v28 = vadd.f32 %v8665_v61, %v18262_v22  ;;  %v8832_v43 = vmax.f32 %v8720_v44, %v8776_v15 }
 0x8aa   :  { %v8495_v45 = vpop.permute.xlu1 %8494 }
 0x8ab   :  { %8583 = vbcast.lane.b32.xlu1 %v19497_v21, 288  ;;  %12753 = vmatmul.mubr.msk.f32.gmra.mrb[122].mxu1 %vm992_vm5, %v8828_v51  ;;  %v8666_v35 = vadd.f32 %v19506_v10, %v8495_v45 }
 0x8ac   :  { %8393 = vbcast.lane.b32.xlu0 %v19440_v16, 280  ;;  %12786 = vmatprep.mubr.msk.f32.mxu1 %vm992_vm5, %v8829_v12 }
 0x8ad   :  { %v8722_v54 = vadd.f32 %v8666_v35, %v18262_v22  ;;  %v10053_v35 = vld [vmem:[%s21127_s1 + $0x8] sm:$0xff] }
 0x8af   :  { %12787 = vmatmul.mubr.msk.f32.vlgmr.msra.gmra.mrb[110].mxu1 %vm992_vm5, %v8829_v12  ;;  %v8778_v51 = vmul.f32 0.33, %v8722_v54 }
 0x8b0   :  { %14826 = vmatpush3.bf16.xpose.msk.msra.mxu1 %vm15760_vm6, %v18528_v27  ;;  %8397 = vbcast.lane.b32.xlu0 %v19440_v16, 288  ;;  %v19554_v27 = vrot.slane %v1345_v62, %v15984_v24 }
 0x8b1   :  { %12788 = vmatprep.mubr.msk.f32.mxu1 %vm992_vm5, %v8830_v13  ;;  %14829 = vmatprep.subr.msk.bf16.mxu1 %vm15760_vm6, %v18531_v26  ;;  %v8777_v26 = vmul.f32 0.33, %v8721_v28  ;;  %v8834_v4 = vmax.f32 %v8722_v54, %v8778_v51 }
 0x8b2   :  { %21315 = vst [vmem:[#allocation48_spill] sm:$0xff] %v19554_v27 }
 0x8b3   :  { %12789 = vmatmul.mubr.msk.f32.gmra.mrb[112].mxu1 %vm992_vm5, %v8830_v13  ;;  %v8833_v25 = vmax.f32 %v8721_v28, %v8777_v26  ;;  %v8312_v28 = vcombine.high %v19476_v1, %v19476_v1 }
 0x8b4   :  { %8401 = vbcast.lane.b32.xlu0 %v19440_v16, 296  ;;  %12790 = vmatprep.mubr.msk.f32.mxu1 %vm992_vm5, %v8831_v31 }
 0x8b7   :  { %12791 = vmatmul.mubr.msk.f32.gmra.mrb[114].mxu1 %vm992_vm5, %v8831_v31 }
 0x8b8   :  { %14832 = vmatpush3.bf16.xpose.msk.msra.mxu1 %vm15760_vm6, %v18572_v33  ;;  %8405 = vbcast.lane.b32.xlu0 %v19440_v16, 304 }
 0x8b9   :  { %12792 = vmatprep.mubr.msk.f32.mxu1 %vm992_vm5, %v8832_v43  ;;  %v6007_v55 = vpop.f32.mrb[82].mxu0  ;;  %14835 = vmatprep.subr.msk.bf16.mxu1 %vm15760_vm6, %v18574_v58 }
 0x8ba   :  { %v6173_v53 = vadd.f32 %v19554_v27, %v6007_v55  ;;  %v6009_v37 = vpop.f32.mrb[83].mxu0 }
 0x8bb   :  { %v6174_v33 = vadd.f32 %v19557_v47, %v6009_v37  ;;  %12793 = vmatmul.mubr.msk.f32.gmra.mrb[116].mxu1 %vm992_vm5, %v8832_v43  ;;  %v10159_v37 = vmul.f32 %v10053_v35, %v10053_v35 }
 0x8bc   :  { %v6187_v16 = vmul.f32 0.33, %v6173_v53  ;;  %8412 = vbcast.lane.b32.xlu0 %v19572_v11, 256  ;;  %12794 = vmatprep.mubr.msk.f32.mxu1 %vm992_vm5, %v8833_v25 }
 0x8bd   :  { %v6188_v39 = vmul.f32 0.33, %v6174_v33  ;;  %v6013_v58 = vpop.f32.mrb[84].mxu0 }
 0x8be   :  { %v6201_v32 = vmax.f32 %v6173_v53, %v6187_v16  ;;  %v6175_v12 = vadd.f32 %v19554_v27, %v6013_v58  ;;  %v6015_v42 = vpop.f32.mrb[85].mxu0 }
 0x8bf   :  { %v6202_v41 = vmax.f32 %v6174_v33, %v6188_v39  ;;  %v6176_v40 = vadd.f32 %v19557_v47, %v6015_v42  ;;  %12795 = vmatmul.mubr.msk.f32.gmra.mrb[118].mxu1 %vm992_vm5, %v8833_v25  ;;  %v19613_v25 = vrot.slane %v8312_v28, %v15974_v20 }
 0x8c0   :  { %6215 = vst [vmem:[%s20977_s24] sm:$0xff] %v6201_v32  ;;  %v6189_v46 = vmul.f32 0.33, %v6175_v12  ;;  %14838 = vmatpush3.bf16.xpose.msk.msra.mxu1 %vm15760_vm6, %v18615_v48  ;;  %8416 = vbcast.lane.b32.xlu0 %v19572_v11, 264  ;;  %v8506_v32 = vpop.permute.xlu1 %8505 }
 0x8c1   :  { %6216 = vst [vmem:[%s20977_s24 + $0x8] sm:$0xff] %v6202_v41  ;;  %v6190_v9 = vmul.f32 0.33, %v6176_v40  ;;  %12796 = vmatprep.mubr.msk.f32.mxu1 %vm992_vm5, %v8834_v4  ;;  %v6019_v61 = vpop.f32.mrb[86].mxu0  ;;  %14841 = vmatprep.subr.msk.bf16.mxu1 %vm15760_vm6, %v18617_v8  ;;  %v19637_v20 = vrot.slane %v19613_v25, %v15984_v24 }
 0x8c2   :  { %v6203_v13 = vmax.f32 %v6175_v12, %v6189_v46  ;;  %v6177_v44 = vadd.f32 %v19554_v27, %v6019_v61  ;;  %v6021_v45 = vpop.f32.mrb[87].mxu0 }
 0x8c3   :  { %v6204_v31 = vmax.f32 %v6176_v40, %v6190_v9  ;;  %v6178_v48 = vadd.f32 %v19557_v47, %v6021_v45  ;;  %12797 = vmatmul.mubr.msk.f32.gmra.mrb[120].mxu1 %vm992_vm5, %v8834_v4  ;;  %v19647_v4 = vrot.slane %v19624_v63, %v15984_v24  ;;  %v8668_v40 = vadd.f32 %v19637_v20, %v8506_v32 }
 0x8c4   :  { %6217 = vst [vmem:[%s20977_s24 + $0x10] sm:$0xff] %v6203_v13  ;;  %v6191_v62 = vmul.f32 0.33, %v6177_v44  ;;  %8420 = vbcast.lane.b32.xlu0 %v19572_v11, 272 }
 0x8c5   :  { %6218 = vst [vmem:[%s20977_s24 + $0x18] sm:$0xff] %v6204_v31  ;;  %v6192_v8 = vmul.f32 0.33, %v6178_v48  ;;  %v6025_v15 = vpop.f32.mrb[88].mxu0  ;;  %v8724_v35 = vadd.f32 %v8668_v40, %v18549_v56 }
 0x8c6   :  { %v6205_v26 = vmax.f32 %v6177_v44, %v6191_v62  ;;  %v6179_v1 = vadd.f32 %v19554_v27, %v6025_v15  ;;  %v6027_v43 = vpop.f32.mrb[89].mxu0 }
 0x8c7   :  { %v6206_v54 = vmax.f32 %v6178_v48, %v6192_v8  ;;  %v6180_v55 = vadd.f32 %v19557_v47, %v6027_v43 }
 0x8c8   :  { %6219 = vst [vmem:[%s20977_s24 + $0x20] sm:$0xff] %v6205_v26  ;;  %v6193_v53 = vmul.f32 0.33, %v6179_v1  ;;  %14844 = vmatpush3.bf16.xpose.msk.msra.mxu1 %vm15760_vm6, %v18648_v57  ;;  %8424 = vbcast.lane.b32.xlu0 %v19572_v11, 280 }
 0x8c9   :  { %6220 = vst [vmem:[%s20977_s24 + $0x28] sm:$0xff] %v6206_v54  ;;  %v6194_v51 = vmul.f32 0.33, %v6180_v55  ;;  %v6031_v33 = vpop.f32.mrb[90].mxu0  ;;  %14847 = vmatprep.subr.msk.bf16.mxu1 %vm15760_vm6, %v18650_v14  ;;  %v10168_v14 = vsel %vm115_vm1, %v10159_v37, 0.0 }
 0x8ca   :  { %v6207_v16 = vmax.f32 %v6179_v1, %v6193_v53  ;;  %v19632_v39 = vpop.xlane.xlu0 %10067  ;;  %v6181_v57 = vadd.f32 %v19554_v27, %v6031_v33  ;;  %v6033_v58 = vpop.f32.mrb[91].mxu0 }
 0x8cb   :  { %v6208_v12 = vmax.f32 %v6180_v55, %v6194_v51  ;;  %v6182_v42 = vadd.f32 %v19557_v47, %v6033_v58  ;;  %vm10090_vm0 = vcmp.eq.f32.partialorder %v19632_v39, inf }
 0x8cc   :  { %6221 = vst [vmem:[%s20977_s24 + $0x30] sm:$0xff] %v6207_v16  ;;  %v6195_v6 = vmul.f32 0.33, %v6181_v57  ;;  %8428 = vbcast.lane.b32.xlu0 %v19572_v11, 288 }
 0x8cd   :  { %6222 = vst [vmem:[%s20977_s24 + $0x38] sm:$0xff] %v6208_v12  ;;  %v6037_v41 = vpop.f32.mrb[92].mxu0  ;;  %v6196_v9 = vmul.f32 0.33, %v6182_v42 }
 0x8ce   :  { %v6209_v46 = vmax.f32 %v6181_v57, %v6195_v6  ;;  %v8351_v61 = vpop.permute.xlu0 %8350  ;;  %v6183_v13 = vadd.f32 %v19554_v27, %v6037_v41  ;;  %v6039_v44 = vpop.f32.mrb[93].mxu0  ;;  %v21322_v41 = vld [vmem:[#allocation63_spill] sm:$0xff] }
 0x8cf   :  { %v8633_v45 = vadd.f32 %v19647_v4, %v8351_v61  ;;  %10169 = vadd.xlane.f32.xlu1 %v10168_v14  ;;  %v6184_v31 = vadd.f32 %v19557_v47, %v6039_v44  ;;  %v6210_v48 = vmax.f32 %v6182_v42, %v6196_v9  ;;  %v21320_v42 = vld [vmem:[#allocation95_spill] sm:$0xff]  ;;  %v21321_v14 = vld [vmem:[#allocation61_spill] sm:$0xff]  ;;  %v21323_v9 = vld [vmem:[#allocation96_spill] sm:$0xff] }
 0x8d0   :  { %6223 = vst [vmem:[%s20977_s24 + $0x40] sm:$0xff] %v6209_v46  ;;  %v6197_v28 = vmul.f32 0.33, %v6183_v13  ;;  %14850 = vmatpush3.bf16.xpose.msk.msra.mxu1 %vm15760_vm6, %v18681_v19  ;;  %8432 = vbcast.lane.b32.xlu0 %v19572_v11, 296  ;;  %v21325_v44 = vld [vmem:[#allocation64_spill] sm:$0xff] }
 0x8d1   :  { %v8689_v62 = vadd.f32 %v8633_v45, %v17368_v18  ;;  %v6198_v8 = vmul.f32 0.33, %v6184_v31  ;;  %v6043_v15 = vpop.f32.mrb[108].mxu0  ;;  %14853 = vmatprep.subr.msk.bf16.mxu1 %vm15760_vm6, %v18683_v49  ;;  %6224 = vst [vmem:[%s20977_s24 + $0x48] sm:$0xff] %v6210_v48  ;;  %v19739_v45 = vld [vmem:[%s21152_s6] ss:$0 sm:$0xff] }
 0x8d2   :  { %v6211_v26 = vmax.f32 %v6183_v13, %v6197_v28  ;;  %v8499_v1 = vpop.permute.xlu0 %8498  ;;  %v6145_v19 = vsel %vm97_vm2, %v6043_v15, 0.0  ;;  %v6045_v43 = vpop.f32.mrb[109].mxu0  ;;  %v21324_v13 = vld [vmem:[#allocation97_spill] sm:$0xff] }
 0x8d3   :  { %v8745_v54 = vmul.f32 0.33, %v8689_v62  ;;  %v6212_v55 = vmax.f32 %v6184_v31, %v6198_v8  ;;  %v8667_v53 = vadd.f32 %v19506_v10, %v8499_v1  ;;  %v6146_v37 = vadd.f32 %v6145_v19, %v19469_v23  ;;  %v21326_v31 = vld [vmem:[#allocation13_spill] sm:$0xff] }
 0x8d4   :  { %6225 = vst [vmem:[%s20977_s24 + $0x50] sm:$0xff] %v6211_v26  ;;  %v6160_v49 = vsel %vm97_vm2, %v6045_v43, 0.0  ;;  %8436 = vbcast.lane.b32.xlu0 %v19572_v11, 304  ;;  %v8780_v23 = vmul.f32 0.33, %v8724_v35  ;;  %v19743_v48 = vadd.f32 %v19739_v45, %v21326_v31 }
 0x8d5   :  { %v8801_v51 = vmax.f32 %v8689_v62, %v8745_v54  ;;  %6226 = vst [vmem:[%s20977_s24 + $0x58] sm:$0xff] %v6212_v55  ;;  %v8723_v33 = vadd.f32 %v8667_v53, %v18262_v22  ;;  %v6185_v16 = vadd.f32 %v19554_v27, %v6146_v37  ;;  %v6161_v10 = vadd.f32 %v6160_v49, %v19479_v60  ;;  %v21318_v60 = vld [vmem:[#allocation60_spill] sm:$0xff]  ;;  %v21327_v62 = vld [vmem:[#allocation66_spill] sm:$0xff]  ;;  %v21329_v37 = vld [vmem:[#allocation99_spill] sm:$0xff] }
 0x8d6   :  { %v8836_v6 = vmax.f32 %v8724_v35, %v8780_v23  ;;  %v10320_v26 = vmul.f32 %v19743_v48, %v19743_v48  ;;  %v21328_v55 = vld [vmem:[#allocation98_spill] sm:$0xff]  ;;  %v21330_v49 = vld [vmem:[#allocation68_spill] sm:$0xff] }
 0x8d7   :  { %v8779_v57 = vmul.f32 0.33, %v8723_v33  ;;  %v6199_v58 = vmul.f32 0.33, %v6185_v16  ;;  %v6186_v32 = vadd.f32 %v19557_v47, %v6161_v10  ;;  %12602 = vmatprep.mubr.msk.f32.mxu0 %vm992_vm5, %v8801_v51  ;;  %v21331_v10 = vld [vmem:[#allocation69_spill] sm:$0xff] }
 0x8d8   :  { %14856 = vmatpush3.bf16.xpose.msk.msra.mxu1 %vm15760_vm6, %v18703_v5  ;;  %12603 = vmatmul.mubr.msk.f32.vlgmr.msra.gmra.mrb[110].mxu0 %vm992_vm5, %v8801_v51 }
 0x8d9   :  { %v8835_v11 = vmax.f32 %v8723_v33, %v8779_v57  ;;  %v6213_v12 = vmax.f32 %v6185_v16, %v6199_v58  ;;  %v6200_v22 = vmul.f32 0.33, %v6186_v32  ;;  %14859 = vmatprep.subr.msk.bf16.mxu1 %vm15760_vm6, %v18706_v50  ;;  %14634 = vmatpush3.bf16.xpose.msk.msra.mxu0 %vm15760_vm6, %v17396_v36  ;;  %v21319_v50 = vld [vmem:[#allocation94_spill] sm:$0xff]  ;;  %v10327_v16 = vsel %vm115_vm1, %v10320_v26, 0.0  ;;  %v21340_v26 = vld [vmem:[#allocation73_spill] sm:$0xff] }
 0x8da   :  { %14637 = vmatprep.subr.msk.bf16.mxu0 %vm15760_vm6, %v21318_v60  ;;  %v21332_v60 = vld [vmem:[#allocation100_spill] sm:$0xff] }
 0x8db   :  { %6227 = vst [vmem:[%s20977_s24 + $0x60] sm:$0x3] %v6213_v12  ;;  %v6214_v5 = vmax.f32 %v6186_v32, %v6200_v22  ;;  %12798 = vmatprep.mubr.msk.f32.mxu1 %vm992_vm5, %v8835_v11 }
 0x8dc   :  { %12799 = vmatmul.mubr.msk.f32.gmra.mrb[124].mxu1 %vm992_vm5, %v8835_v11 }
 0x8dd   :  { %6228 = vst [vmem:[%s20977_s24 + $0x68] sm:$0x3] %v6214_v5  ;;  %12832 = vmatprep.mubr.msk.f32.mxu1 %vm992_vm5, %v8836_v6  ;;  %v21333_v5 = vld [vmem:[#allocation101_spill] sm:$0xff] }
 0x8df   :  { %v19709_v36 = vpop.xlane.xlu1 %10070 }
 0x8e0   :  { %14862 = vmatpush3.bf16.xpose.msk.msra.mxu1 %vm15760_vm6, %v21319_v50  ;;  %8591 = vbcast.lane.b32.xlu1 %v19497_v21, 304  ;;  %v21334_v50 = vld [vmem:[#allocation70_spill] sm:$0xff]  ;;  %vm10097_vm9 = vcmp.eq.f32.partialorder %v19709_v36, inf }
 0x8e1   :  { %14865 = vmatprep.subr.msk.bf16.mxu1 %vm15760_vm6, %v21320_v42  ;;  %14640 = vmatpush3.bf16.xpose.msk.msra.mxu0 %vm15760_vm6, %v21321_v14 }
 0x8e2   :  { %14643 = vmatprep.subr.msk.bf16.mxu0 %vm15760_vm6, %v21322_v41  ;;  %v21335_v41 = vld [vmem:[#allocation71_spill] sm:$0xff] }
 0x8e3   :  { %v19724_v40 = vpop.permute.xlu1 %8358 }
 0x8e7   :  { %v8510_v46 = vpop.permute.xlu1 %8509 }
 0x8e8   :  { %14868 = vmatpush3.bf16.xpose.msk.msra.mxu1 %vm15760_vm6, %v21323_v9  ;;  %v8669_v61 = vadd.f32 %v19637_v20, %v8510_v46  ;;  %v21336_v46 = vld [vmem:[#allocation15_spill] sm:$0xff] }
 0x8e9   :  { %14871 = vmatprep.subr.msk.bf16.mxu1 %vm15760_vm6, %v21324_v13  ;;  %14646 = vmatpush3.bf16.xpose.msk.msra.mxu0 %vm15760_vm6, %v21325_v44  ;;  %v19792_v9 = vadd.f32 %v19739_v45, %v21336_v46  ;;  %v10314_v44 = vld [vmem:[%s21129_s5 + $0x8] sm:$0xff] }
 0x8ea   :  { %v8725_v28 = vadd.f32 %v8669_v61, %v18549_v56  ;;  %14649 = vmatprep.subr.msk.bf16.mxu0 %vm15760_vm6, %v21327_v62  ;;  %v21338_v62 = vld [vmem:[#allocation103_spill] sm:$0xff] }
 0x8eb   :  { %v8514_v8 = vpop.permute.xlu1 %8513  ;;  %v10321_v31 = vmul.f32 %v19792_v9, %v19792_v9 }
 0x8ec   :  { %v8781_v15 = vmul.f32 0.33, %v8725_v28  ;;  %v8670_v35 = vadd.f32 %v19637_v20, %v8514_v8  ;;  %v10419_v8 = vmul.f32 %v10314_v44, %v10314_v44 }
 0x8ee   :  { %v8837_v1 = vmax.f32 %v8725_v28, %v8781_v15  ;;  %v8726_v19 = vadd.f32 %v8670_v35, %v18549_v56  ;;  %v21337_v28 = vld [vmem:[#allocation102_spill] sm:$0xff]  ;;  %v21339_v15 = vld [vmem:[#allocation72_spill] sm:$0xff] }
 0x8ef   :  { %12833 = vmatmul.mubr.msk.f32.vlgmr.msra.gmra.mrb[110].mxu1 %vm992_vm5, %v8836_v6  ;;  %v8518_v43 = vpop.permute.xlu1 %8517  ;;  %v10054_v35 = vld [vmem:[%s21127_s1 + $0x10] sm:$0xff] }
 0x8f0   :  { %v8782_v54 = vmul.f32 0.33, %v8726_v19  ;;  %14874 = vmatpush3.bf16.xpose.msk.msra.mxu1 %vm15760_vm6, %v21328_v55  ;;  %v8671_v53 = vadd.f32 %v19637_v20, %v8518_v43  ;;  %12834 = vmatprep.mubr.msk.f32.mxu1 %vm992_vm5, %v8837_v1  ;;  %v8635_v43 = vadd.f32 %v19647_v4, %v19724_v40  ;;  %v10160_v55 = vmul.f32 %v10054_v35, %v10054_v35  ;;  %v10056_v35 = vld [vmem:[%s21127_s1 + $0x20] sm:$0xff] }
 0x8f1   :  { %14877 = vmatprep.subr.msk.bf16.mxu1 %vm15760_vm6, %v21329_v37  ;;  %14652 = vmatpush3.bf16.xpose.msk.msra.mxu0 %vm15760_vm6, %v21330_v49 }
 0x8f2   :  { %v8838_v51 = vmax.f32 %v8726_v19, %v8782_v54  ;;  %v8727_v33 = vadd.f32 %v8671_v53, %v18549_v56  ;;  %14655 = vmatprep.subr.msk.bf16.mxu0 %vm15760_vm6, %v21331_v10  ;;  %v10330_v19 = vsel %vm115_vm1, %v10321_v31, 0.0  ;;  %v10428_v54 = vsel %vm115_vm1, %v10419_v8, 0.0  ;;  %v10315_v53 = vld [vmem:[%s21129_s5 + $0x10] sm:$0xff]  ;;  %v21342_v10 = vld [vmem:[#allocation105_spill] sm:$0xff] }
 0x8f3   :  { %12835 = vmatmul.mubr.msk.f32.gmra.mrb[112].mxu1 %vm992_vm5, %v8837_v1  ;;  %10328 = vadd.xlane.f32.xlu0 %v10327_v16  ;;  %v8522_v23 = vpop.permute.xlu1 %8521  ;;  %v8691_v16 = vadd.f32 %v8635_v43, %v17368_v18  ;;  %v10171_v40 = vsel %vm115_vm1, %v10160_v55, 0.0  ;;  %v21347_v43 = vld [vmem:[#allocation76_spill] sm:$0xff]  ;;  %v21348_v55 = vld [vmem:[#allocation77_spill] sm:$0xff] }
 0x8f4   :  { %v8783_v57 = vmul.f32 0.33, %v8727_v33  ;;  %v8672_v58 = vadd.f32 %v19637_v20, %v8522_v23  ;;  %12836 = vmatprep.mubr.msk.f32.mxu1 %vm992_vm5, %v8838_v51  ;;  %v10420_v23 = vmul.f32 %v10315_v53, %v10315_v53 }
 0x8f6   :  { %v8839_v32 = vmax.f32 %v8727_v33, %v8783_v57  ;;  %v8728_v11 = vadd.f32 %v8672_v58, %v18549_v56  ;;  %v21341_v33 = vld [vmem:[#allocation104_spill] sm:$0xff] }
 0x8f7   :  { %12837 = vmatmul.mubr.msk.f32.gmra.mrb[114].mxu1 %vm992_vm5, %v8838_v51  ;;  %v8526_v12 = vpop.permute.xlu1 %8525  ;;  %v10055_v58 = vld [vmem:[%s21127_s1 + $0x18] sm:$0xff] }
 0x8f8   :  { %v8784_v22 = vmul.f32 0.33, %v8728_v11  ;;  %14880 = vmatpush3.bf16.xpose.msk.msra.mxu1 %vm15760_vm6, %v21332_v60  ;;  %v8673_v6 = vadd.f32 %v19637_v20, %v8526_v12  ;;  %12838 = vmatprep.mubr.msk.f32.mxu1 %vm992_vm5, %v8839_v32  ;;  %v21344_v12 = vld [vmem:[#allocation75_spill] sm:$0xff]  ;;  %v8747_v60 = vmul.f32 0.33, %v8691_v16 }
 0x8f9   :  { %14883 = vmatprep.subr.msk.bf16.mxu1 %vm15760_vm6, %v21333_v5  ;;  %14658 = vmatpush3.bf16.xpose.msk.msra.mxu0 %vm15760_vm6, %v21334_v50  ;;  %v10431_v5 = vsel %vm115_vm1, %v10420_v23, 0.0  ;;  %v10161_v50 = vmul.f32 %v10055_v58, %v10055_v58  ;;  %v21349_v58 = vld [vmem:[#allocation108_spill] sm:$0xff] }
 0x8fa   :  { %v8840_v42 = vmax.f32 %v8728_v11, %v8784_v22  ;;  %v8729_v14 = vadd.f32 %v8673_v6, %v18549_v56  ;;  %14661 = vmatprep.subr.msk.bf16.mxu0 %vm15760_vm6, %v21335_v41  ;;  %v10316_v41 = vld [vmem:[%s21129_s5 + $0x18] sm:$0xff]  ;;  %v8803_v44 = vmax.f32 %v8691_v16, %v8747_v60  ;;  %v19904_v60 = vrot.slane %v19369_v29, %v15984_v24 }
 0x8fb   :  { %12839 = vmatmul.mubr.msk.f32.gmra.mrb[116].mxu1 %vm992_vm5, %v8839_v32  ;;  %v19828_v37 = vpop.permute.xlu1 %8536  ;;  %v21343_v32 = vld [vmem:[#allocation74_spill] sm:$0xff]  ;;  %v10421_v8 = vmul.f32 %v10316_v41, %v10316_v41 }
 0x8fc   :  { %v8785_v61 = vmul.f32 0.33, %v8729_v14  ;;  %12840 = vmatprep.mubr.msk.f32.mxu1 %vm992_vm5, %v8840_v42 }
 0x8fe   :  { %v8841_v13 = vmax.f32 %v8729_v14, %v8785_v61 }
 0x8ff   :  { %12841 = vmatmul.mubr.msk.f32.gmra.mrb[118].mxu1 %vm992_vm5, %v8840_v42  ;;  %v19851_v6 = vpop.permute.xlu1 %8389 }
 0x900   :  { %14886 = vmatpush3.bf16.xpose.msk.msra.mxu1 %vm15760_vm6, %v21337_v28  ;;  %12842 = vmatprep.mubr.msk.f32.mxu1 %vm992_vm5, %v8841_v13  ;;  %v10174_v28 = vsel %vm115_vm1, %v10161_v50, 0.0 }
 0x901   :  { %14889 = vmatprep.subr.msk.bf16.mxu1 %vm15760_vm6, %v21338_v62  ;;  %14664 = vmatpush3.bf16.xpose.msk.msra.mxu0 %vm15760_vm6, %v21339_v15  ;;  %v21346_v62 = vld [vmem:[#allocation107_spill] sm:$0xff] }
 0x902   :  { %14667 = vmatprep.subr.msk.bf16.mxu0 %vm15760_vm6, %v21340_v26 }
 0x903   :  { %12843 = vmatmul.mubr.msk.f32.gmra.mrb[120].mxu1 %vm992_vm5, %v8841_v13  ;;  %v19819_v1 = vpop.xlane.xlu0 %10166  ;;  %v21345_v13 = vld [vmem:[#allocation106_spill] sm:$0xff]  ;;  %v8541_v26 = vpop.permute.xlu1 %8540 }
 0x904   :  { %10331 = vadd.xlane.f32.xlu1 %v10330_v19  ;;  %vm10188_vm15 = vcmp.eq.f32.partialorder %v19819_v1, inf  ;;  %vm10190_vm4 = vcmp.eq.f32.partialorder %v19819_v1, 0.0 }
 0x907   :  { %v8355_v49 = vpop.permute.xlu0 %8354 }
 0x908   :  { %v8634_v51 = vadd.f32 %v19647_v4, %v8355_v49  ;;  %14892 = vmatpush3.bf16.xpose.msk.msra.mxu1 %vm15760_vm6, %v21341_v33  ;;  %10429 = vadd.xlane.f32.xlu1 %v10428_v54  ;;  %v10162_v33 = vmul.f32 %v10056_v35, %v10056_v35  ;;  %v10318_v35 = vld [vmem:[%s21129_s5 + $0x28] sm:$0xff] }
 0x909   :  { %8587 = vbcast.lane.b32.xlu0 %v19497_v21, 296  ;;  %14895 = vmatprep.subr.msk.bf16.mxu1 %vm15760_vm6, %v21342_v10  ;;  %v8342_v10 = vcombine.high %v19491_v52, %v19491_v52 }
 0x90a   :  { %v8690_v57 = vadd.f32 %v8634_v51, %v17368_v18  ;;  %14670 = vmatpush3.bf16.xpose.msk.msra.mxu0 %vm15760_vm6, %v21343_v32  ;;  %v10434_v51 = vsel %vm115_vm1, %v10421_v8, 0.0  ;;  %v19893_v32 = vpop.permute.xlu1 %8544 }
 0x90b   :  { %v8363_v11 = vpop.permute.xlu0 %8362  ;;  %14673 = vmatprep.subr.msk.bf16.mxu0 %vm15760_vm6, %v21344_v12  ;;  %v19909_v50 = vrot.slane %v8342_v10, %v15984_v24  ;;  %v10423_v10 = vmul.f32 %v10318_v35, %v10318_v35 }
 0x90c   :  { %v8746_v21 = vmul.f32 0.33, %v8690_v57  ;;  %v8636_v22 = vadd.f32 %v19647_v4, %v8363_v11  ;;  %10172 = vadd.xlane.f32.xlu1 %v10171_v40  ;;  %v10317_v40 = vld [vmem:[%s21129_s5 + $0x20] sm:$0xff] }
 0x90d   :  { %v10422_v52 = vmul.f32 %v10317_v40, %v10317_v40 }
 0x90e   :  { %v8802_v42 = vmax.f32 %v8690_v57, %v8746_v21  ;;  %v8692_v14 = vadd.f32 %v8636_v22, %v17368_v18  ;;  %v10177_v21 = vsel %vm115_vm1, %v10162_v33, 0.0  ;;  %v21350_v22 = vld [vmem:[#allocation109_spill] sm:$0xff] }
 0x90f   :  { %v8367_v46 = vpop.permute.xlu0 %8366 }
 0x910   :  { %v8637_v61 = vadd.f32 %v19647_v4, %v8367_v46  ;;  %14898 = vmatpush3.bf16.xpose.msk.msra.mxu1 %vm15760_vm6, %v21345_v13  ;;  %10432 = vadd.xlane.f32.xlu1 %v10431_v5  ;;  %v8748_v31 = vmul.f32 0.33, %v8692_v14  ;;  %v8675_v46 = vadd.f32 %v19909_v50, %v19828_v37  ;;  %v10437_v13 = vsel %vm115_vm1, %v10422_v52, 0.0 }
 0x911   :  { %12604 = vmatprep.mubr.msk.f32.mxu0 %vm992_vm5, %v8802_v42  ;;  %14901 = vmatprep.subr.msk.bf16.mxu1 %vm15760_vm6, %v21346_v62  ;;  %v21353_v62 = vld [vmem:[#allocation65_spill] sm:$0xff] }
 0x912   :  { %v8693_v15 = vadd.f32 %v8637_v61, %v17368_v18  ;;  %12605 = vmatmul.mubr.msk.f32.gmra.mrb[112].mxu0 %vm992_vm5, %v8802_v42  ;;  %v8804_v53 = vmax.f32 %v8692_v14, %v8748_v31 }
 0x913   :  { %12606 = vmatprep.mubr.msk.f32.mxu0 %vm992_vm5, %v8803_v44  ;;  %v8371_v19 = vpop.permute.xlu0 %8370  ;;  %14676 = vmatpush3.bf16.xpose.msk.msra.mxu0 %vm15760_vm6, %v21347_v43  ;;  %v21354_v43 = vld [vmem:[#allocation110_spill] sm:$0xff] }
 0x914   :  { %v8638_v54 = vadd.f32 %v19647_v4, %v8371_v19  ;;  %10175 = vadd.xlane.f32.xlu1 %v10174_v28  ;;  %14679 = vmatprep.subr.msk.bf16.mxu0 %vm15760_vm6, %v21348_v55  ;;  %v8749_v49 = vmul.f32 0.33, %v8693_v15  ;;  %v21352_v28 = vld [vmem:[#allocation111_spill] sm:$0xff] }
 0x915   :  { %v19923_v8 = vsub.f32 %v21353_v62, %v21352_v28  ;;  %v21359_v62 = vld [vmem:[#allocation30_spill] sm:$0xff] }
 0x916   :  { %v8694_v16 = vadd.f32 %v8638_v54, %v17368_v18  ;;  %12607 = vmatmul.mubr.msk.f32.gmra.mrb[114].mxu0 %vm992_vm5, %v8803_v44  ;;  %v8805_v11 = vmax.f32 %v8693_v15, %v8749_v49  ;;  %v21351_v44 = vld [vmem:[#allocation62_spill] sm:$0xff]  ;;  %v8549_v15 = vpop.permute.xlu1 %8548  ;;  %v8642_v49 = vadd.f32 %v19904_v60, %v19851_v6 }
 0x917   :  { %12608 = vmatprep.mubr.msk.f32.mxu0 %vm992_vm5, %v8804_v53  ;;  %v8375_v23 = vpop.permute.xlu0 %8374 }
 0x918   :  { %v8639_v57 = vadd.f32 %v19647_v4, %v8375_v23  ;;  %14904 = vmatpush3.bf16.xpose.msk.msra.mxu1 %vm15760_vm6, %v21349_v58  ;;  %10435 = vadd.xlane.f32.xlu1 %v10434_v51  ;;  %v8750_v12 = vmul.f32 0.33, %v8694_v16  ;;  %v10057_v4 = vld [vmem:[%s21127_s1 + $0x28] sm:$0xff]  ;;  %v10058_v23 = vld [vmem:[%s21127_s1 + $0x30] sm:$0x3]  ;;  %v21356_v58 = vld [vmem:[#allocation27_spill] sm:$0xff] }
 0x919   :  { %14907 = vmatprep.subr.msk.bf16.mxu1 %vm15760_vm6, %v21350_v22  ;;  %v10163_v41 = vmul.f32 %v10057_v4, %v10057_v4  ;;  %v8698_v22 = vadd.f32 %v8642_v49, %v21351_v44  ;;  %v8678_v49 = vadd.f32 %v19909_v50, %v8549_v15 }
 0x91a   :  { %v8695_v5 = vadd.f32 %v8639_v57, %v17368_v18  ;;  %12609 = vmatmul.mubr.msk.f32.gmra.mrb[116].mxu0 %vm992_vm5, %v8804_v53  ;;  %v8806_v61 = vmax.f32 %v8694_v16, %v8750_v12  ;;  %v10313_v18 = vld [vmem:[%s21129_s5] sm:$0xff]  ;;  %v8731_v53 = vadd.f32 %v8675_v46, %v18797_v30  ;;  %v10654_v57 = vmul.f32 1.442695, %v19923_v8  ;;  %v8553_v52 = vpop.permute.xlu1 %8552  ;;  %v21357_v46 = vld [vmem:[#allocation7_spill] sm:$0xff] }
 0x91b   :  { %12610 = vmatprep.mubr.msk.f32.mxu0 %vm992_vm5, %v8805_v11  ;;  %v8382_v42 = vpop.permute.xlu0 %8381  ;;  %v10180_v54 = vsel %vm115_vm1, %v10163_v41, 0.0  ;;  %v10418_v55 = vmul.f32 %v10313_v18, %v10313_v18  ;;  %v21355_v16 = vld [vmem:[#allocation112_spill] sm:$0xff]  ;;  %v8677_v18 = vadd.f32 %v19909_v50, %v19893_v32 }
 0x91c   :  { %v8640_v14 = vadd.f32 %v19904_v60, %v8382_v42  ;;  %10178 = vadd.xlane.f32.xlu1 %v10177_v21  ;;  %v8751_v29 = vmul.f32 0.33, %v8695_v5  ;;  %v8787_v21 = vmul.f32 0.33, %v8731_v53  ;;  %15157 = vpow2.f32 %v10654_v57 }
 0x91d   :  { %v10425_v12 = vsel %vm115_vm1, %v10418_v55, 0.0 }
 0x91e   :  { %v8696_v31 = vadd.f32 %v8640_v14, %v21351_v44  ;;  %12611 = vmatmul.mubr.msk.f32.gmra.mrb[118].mxu0 %vm992_vm5, %v8805_v11  ;;  %v8807_v51 = vmax.f32 %v8695_v5, %v8751_v29  ;;  %v19950_v11 = vsub.f32 %v21356_v58, %v19355_v7  ;;  %v10164_v5 = vmul.f32 %v10058_v23, %v10058_v23  ;;  %v21358_v29 = vld [vmem:[#allocation17_spill] sm:$0xff] }
 0x91f   :  { %12612 = vmatprep.mubr.msk.f32.mxu0 %vm992_vm5, %v8806_v61  ;;  %v8530_v37 = vpop.permute.xlu0 %8529  ;;  %v10440_v7 = vsel %vm115_vm1, %v10423_v10, 0.0  ;;  %v8843_v32 = vmax.f32 %v8731_v53, %v8787_v21 }
 0x920   :  { %v8674_v19 = vadd.f32 %v19637_v20, %v8530_v37  ;;  %14910 = vmatpush3.bf16.xpose.msk.msra.mxu1 %vm15760_vm6, %v21354_v43  ;;  %10438 = vadd.xlane.f32.xlu1 %v10437_v13  ;;  %v8752_v33 = vmul.f32 0.33, %v8696_v31  ;;  %v8676_v20 = vadd.f32 %v19909_v50, %v8541_v26  ;;  %v19963_v13 = vadd.f32 %v19739_v45, %v21358_v29  ;;  %v21360_v43 = vld [vmem:[#allocation114_spill] sm:$0xff] }
 0x921   :  { %14913 = vmatprep.subr.msk.bf16.mxu1 %vm15760_vm6, %v21355_v16  ;;  %v10658_v28 = vmul.f32 1.442695, %v19950_v11  ;;  %v19971_v37 = vsub.f32 %v21359_v62, %v19362_v0  ;;  %v10319_v45 = vld [vmem:[%s21129_s5 + $0x30] sm:$0x3]  ;;  %v10183_v0 = vsel %vm10084_vm13, %v10164_v5, 0.0  ;;  %v8733_v16 = vadd.f32 %v8677_v18, %v18797_v30  ;;  %v21364_v62 = vld [vmem:[#allocation117_spill] sm:$0xff] }
 0x922   :  { %v8730_v40 = vadd.f32 %v8674_v19, %v18549_v56  ;;  %12613 = vmatmul.mubr.msk.f32.gmra.mrb[120].mxu0 %vm992_vm5, %v8806_v61  ;;  %v8808_v4 = vmax.f32 %v8696_v31, %v8752_v33  ;;  %v8732_v42 = vadd.f32 %v8676_v20, %v18797_v30  ;;  %v10061_v61 = vmul.f32 %v21357_v46, %v21357_v46  ;;  %v8557_v20 = vpop.permute.xlu1 %8556 }
 0x923   :  { %12614 = vmatprep.mubr.msk.f32.mxu0 %vm992_vm5, %v8807_v51  ;;  %v8386_v6 = vpop.permute.xlu0 %8385  ;;  %v10424_v23 = vmul.f32 %v10319_v45, %v10319_v45  ;;  %v10322_v15 = vmul.f32 %v19963_v13, %v19963_v13  ;;  %15159 = vpow2.f32 %v10658_v28  ;;  %v10662_v57 = vmul.f32 1.442695, %v19971_v37 }
 0x924   :  { %v8786_v26 = vmul.f32 0.33, %v8730_v40  ;;  %v8641_v56 = vadd.f32 %v19904_v60, %v8386_v6  ;;  %10181 = vadd.xlane.f32.xlu1 %v10180_v54  ;;  %v8754_v54 = vmul.f32 0.33, %v8698_v22  ;;  %v8788_v55 = vmul.f32 0.33, %v8732_v42 }
 0x925   :  { %v10072_v10 = vsel %vm115_vm1, %v10061_v61, 0.0  ;;  %v8679_v5 = vadd.f32 %v19909_v50, %v8553_v52  ;;  %15161 = vpow2.f32 %v10662_v57  ;;  %v10333_v52 = vsel %vm115_vm1, %v10322_v15, 0.0 }
 0x926   :  { %v8842_v14 = vmax.f32 %v8730_v40, %v8786_v26  ;;  %v8697_v41 = vadd.f32 %v8641_v56, %v21351_v44  ;;  %12615 = vmatmul.mubr.msk.f32.gmra.mrb[122].mxu0 %vm992_vm5, %v8807_v51  ;;  %v21361_v40 = vld [vmem:[#allocation78_spill] sm:$0xff]  ;;  %v8810_v58 = vmax.f32 %v8698_v22, %v8754_v54  ;;  %v8844_v26 = vmax.f32 %v8732_v42, %v8788_v55  ;;  %v15158_v29 = vpop.eup %15157  ;;  %v8561_v28 = vpop.permute.xlu1 %8560  ;;  %v21366_v55 = vld [vmem:[#allocation19_spill] sm:$0xff] }
 0x927   :  { %12648 = vmatprep.mubr.msk.f32.mxu0 %vm992_vm5, %v8808_v4  ;;  %v8394_v31 = vpop.permute.xlu0 %8393  ;;  %v8734_v56 = vadd.f32 %v8678_v49, %v18797_v30  ;;  %v10443_v22 = vsel %vm10084_vm13, %v10424_v23, 0.0  ;;  %v8341_v18 = vcombine.high %v19624_v63, %v19624_v63  ;;  %v8735_v63 = vadd.f32 %v8679_v5, %v18797_v30  ;;  %v21369_v5 = vld [vmem:[#allocation9_spill] sm:$0xff] }
 0x928   :  { %v8753_v35 = vmul.f32 0.33, %v8697_v41  ;;  %v8643_v19 = vadd.f32 %v19904_v60, %v8394_v31  ;;  %14916 = vmatpush3.bf16.xpose.msk.msra.mxu1 %vm15760_vm6, %v21360_v43  ;;  %10426 = vadd.xlane.f32.xlu0 %v10425_v12  ;;  %v8680_v31 = vadd.f32 %v19909_v50, %v8557_v20  ;;  %v10323_v49 = vmul.f32 %v21366_v55, %v21366_v55 }
 0x929   :  { %10441 = vadd.xlane.f32.xlu1 %v10440_v7  ;;  %12844 = vmatprep.mubr.msk.f32.mxu1 %vm992_vm5, %v8842_v14  ;;  %v21363_v7 = vld [vmem:[#allocation115_spill] sm:$0xff] }
 0x92a   :  { %v8809_v51 = vmax.f32 %v8697_v41, %v8753_v35  ;;  %v8699_v33 = vadd.f32 %v8643_v19, %v21351_v44  ;;  %12649 = vmatmul.mubr.msk.f32.vlgmr.msra.gmra.mrb[110].mxu0 %vm992_vm5, %v8808_v4  ;;  %12845 = vmatmul.mubr.msk.f32.gmra.mrb[126].mxu1 %vm992_vm5, %v8842_v14  ;;  %v8789_v4 = vmul.f32 0.33, %v8733_v16  ;;  %v21362_v41 = vld [vmem:[#allocation8_spill] sm:$0xff]  ;;  %v8790_v35 = vmul.f32 0.33, %v8734_v56 }
 0x92b   :  { %14682 = vmatpush3.bf16.xpose.msk.msra.mxu0 %vm15760_vm6, %v21361_v40  ;;  %v8398_v53 = vpop.permute.xlu0 %8397  ;;  %12878 = vmatprep.mubr.msk.f32.mxu1 %vm992_vm5, %v8843_v32  ;;  %v10062_v42 = vmul.f32 %v21362_v41, %v21362_v41  ;;  %v20036_v40 = vrot.slane %v8341_v18, %v15984_v24  ;;  %v21371_v18 = vld [vmem:[#allocation82_spill] sm:$0xff] }
 0x92c   :  { %v8644_v6 = vadd.f32 %v19904_v60, %v8398_v53  ;;  %10073 = vadd.xlane.f32.xlu0 %v10072_v10  ;;  %12650 = vmatprep.mubr.msk.f32.mxu0 %vm992_vm5, %v8809_v51  ;;  %v8755_v12 = vmul.f32 0.33, %v8699_v33  ;;  %v8845_v54 = vmax.f32 %v8733_v16, %v8789_v4  ;;  %v8736_v53 = vadd.f32 %v8680_v31, %v18797_v30 }
 0x92d   :  { %10184 = vadd.xlane.f32.xlu1 %v10183_v0  ;;  %14919 = vmatprep.subr.msk.bf16.mxu1 %vm15760_vm6, %v21363_v7  ;;  %v10075_v20 = vsel %vm115_vm1, %v10062_v42, 0.0  ;;  %v15160_v10 = vpop.eup %15159  ;;  %v8846_v23 = vmax.f32 %v8734_v56, %v8790_v35  ;;  %v10063_v56 = vmul.f32 %v21369_v5, %v21369_v5  ;;  %v21373_v35 = vld [vmem:[#allocation83_spill] sm:$0xff] }
 0x92e   :  { %v8700_v21 = vadd.f32 %v8644_v6, %v21351_v44  ;;  %12651 = vmatmul.mubr.msk.f32.gmra.mrb[112].mxu0 %vm992_vm5, %v8809_v51  ;;  %v8811_v19 = vmax.f32 %v8699_v33, %v8755_v12  ;;  %v8344_v51 = vcombine.high %v19613_v25, %v19613_v25  ;;  %v21367_v33 = vld [vmem:[#allocation81_spill] sm:$0xff]  ;;  %v10669_v25 = vsel %vm10625_vm10, %v15158_v29, 0.0  ;;  %v8568_v12 = vpop.permute.xlu1 %8567 }
 0x92f   :  { %12652 = vmatprep.mubr.msk.f32.mxu0 %vm992_vm5, %v8810_v58  ;;  %12879 = vmatmul.mubr.msk.f32.vlgmr.msra.gmra.mrb[110].mxu1 %vm992_vm5, %v8843_v32  ;;  %v8402_v14 = vpop.permute.xlu0 %8401  ;;  %v21365_v32 = vld [vmem:[#allocation79_spill] sm:$0xff]  ;;  %v15162_v42 = vpop.eup %15161 }
 0x930   :  { %v8645_v61 = vadd.f32 %v19904_v60, %v8402_v14  ;;  %12880 = vmatprep.mubr.msk.f32.mxu1 %vm992_vm5, %v8844_v26  ;;  %14922 = vmatpush3.bf16.xpose.msk.msra.mxu1 %vm15760_vm6, %v21364_v62  ;;  %v8756_v43 = vmul.f32 0.33, %v8700_v21  ;;  %v8792_v14 = vmul.f32 0.33, %v8736_v53 }
 0x931   :  { %10334 = vadd.xlane.f32.xlu0 %v10333_v52  ;;  %10444 = vadd.xlane.f32.xlu1 %v10443_v22  ;;  %v10675_v22 = vsel %vm10625_vm10, %v15160_v10, 0.0  ;;  %v21370_v52 = vld [vmem:[#allocation80_spill] sm:$0xff] }
 0x932   :  { %v8701_v45 = vadd.f32 %v8645_v61, %v21351_v44  ;;  %14685 = vmatprep.subr.msk.bf16.mxu0 %vm15760_vm6, %v21365_v32  ;;  %12653 = vmatmul.mubr.msk.f32.gmra.mrb[114].mxu0 %vm992_vm5, %v8810_v58  ;;  %v8812_v15 = vmax.f32 %v8700_v21, %v8756_v43  ;;  %v8791_v58 = vmul.f32 0.33, %v8735_v63  ;;  %v20051_v21 = vrot.slane %v8344_v51, %v15984_v24  ;;  %v21378_v10 = vld [vmem:[#allocation84_spill] sm:$0xff] }
 0x933   :  { %12881 = vmatmul.mubr.msk.f32.gmra.mrb[112].mxu1 %vm992_vm5, %v8844_v26  ;;  %v8406_v0 = vpop.permute.xlu0 %8405  ;;  %14688 = vmatpush3.bf16.xpose.msk.msra.mxu0 %vm15760_vm6, %v21367_v33  ;;  %v8681_v26 = vadd.f32 %v19909_v50, %v8561_v28  ;;  %v10336_v50 = vsel %vm115_vm1, %v10323_v49, 0.0  ;;  %v8848_v43 = vmax.f32 %v8736_v53, %v8792_v14  ;;  %v21376_v33 = vld [vmem:[#allocation10_spill] sm:$0xff]  ;;  %v21377_v53 = vld [vmem:[#allocation121_spill] sm:$0xff] }
 0x934   :  { %12654 = vmatprep.mubr.msk.f32.mxu0 %vm992_vm5, %v8811_v19  ;;  %v8646_v16 = vadd.f32 %v19904_v60, %v8406_v0  ;;  %12882 = vmatprep.mubr.msk.f32.mxu1 %vm992_vm5, %v8845_v54  ;;  %v8757_v57 = vmul.f32 0.33, %v8701_v45  ;;  %v21368_v60 = vld [vmem:[#allocation118_spill] sm:$0xff]  ;;  %v8682_v24 = vadd.f32 %v20051_v21, %v8568_v12  ;;  %v8847_v31 = vmax.f32 %v8735_v63, %v8791_v58  ;;  %v21374_v63 = vld [vmem:[#allocation43_spill] sm:$0xff]  ;;  %v21385_v14 = vld [vmem:[#allocation113_spill] sm:$0xff] }
 0x935   :  { %10076 = vadd.xlane.f32.xlu0 %v10075_v20  ;;  %10670 = vadd.xlane.f32.xlu1 %v10669_v25  ;;  %v8737_v28 = vadd.f32 %v8681_v26, %v18797_v30  ;;  %v10681_v30 = vsel %vm10625_vm10, %v15162_v42, 0.0  ;;  %v21375_v0 = vld [vmem:[#allocation23_spill] sm:$0xff]  ;;  %v21382_v26 = vld [vmem:[#allocation24_spill] sm:$0xff] }
 0x936   :  { %v8702_v6 = vadd.f32 %v8646_v16, %v21351_v44  ;;  %14925 = vmatprep.subr.msk.bf16.mxu1 %vm15760_vm6, %v21368_v60  ;;  %12655 = vmatmul.mubr.msk.f32.gmra.mrb[116].mxu0 %vm992_vm5, %v8811_v19  ;;  %v8813_v7 = vmax.f32 %v8701_v45, %v8757_v57  ;;  %v10078_v19 = vsel %vm115_vm1, %v10063_v56, 0.0  ;;  %v8738_v45 = vadd.f32 %v8682_v24, %v19094_v3  ;;  %v21380_v57 = vld [vmem:[#allocation41_spill] sm:$0xff] }
 0x937   :  { %12883 = vmatmul.mubr.msk.f32.gmra.mrb[114].mxu1 %vm992_vm5, %v8845_v54  ;;  %v8413_v4 = vpop.permute.xlu0 %8412  ;;  %12656 = vmatprep.mubr.msk.f32.mxu0 %vm992_vm5, %v8812_v15  ;;  %v20084_v49 = vsub.f32 %v21375_v0, %v21374_v63  ;;  %v8793_v51 = vmul.f32 0.33, %v8737_v28  ;;  %v10064_v16 = vmul.f32 %v21376_v33, %v21376_v33  ;;  %v10325_v12 = vmul.f32 %v21382_v26, %v21382_v26  ;;  %v21394_v63 = vld [vmem:[#allocation88_spill] sm:$0xff] }
 0x938   :  { %v8647_v44 = vadd.f32 %v20036_v40, %v8413_v4  ;;  %12884 = vmatprep.mubr.msk.f32.mxu1 %vm992_vm5, %v8846_v23  ;;  %14928 = vmatpush3.bf16.xpose.msk.msra.mxu1 %vm15760_vm6, %v19060_v2  ;;  %v8758_v61 = vmul.f32 0.33, %v8702_v6  ;;  %v21372_v2 = vld [vmem:[#allocation21_spill] sm:$0xff] }
 0x939   :  { %10337 = vadd.xlane.f32.xlu0 %v10336_v50  ;;  %10676 = vadd.xlane.f32.xlu1 %v10675_v22  ;;  %v10324_v62 = vmul.f32 %v21372_v2, %v21372_v2  ;;  %v8849_v58 = vmax.f32 %v8737_v28, %v8793_v51  ;;  %v21383_v4 = vld [vmem:[#allocation85_spill] sm:$0xff]  ;;  %v10081_v56 = vsel %vm115_vm1, %v10064_v16, 0.0  ;;  %v21384_v50 = vld [vmem:[#allocation86_spill] sm:$0xff]  ;;  %v21386_v22 = vld [vmem:[#allocation67_spill] sm:$0xff] }
 0x93a   :  { %v8703_v29 = vadd.f32 %v8647_v44, %v21370_v52  ;;  %14691 = vmatprep.subr.msk.bf16.mxu0 %vm15760_vm6, %v21371_v18  ;;  %12657 = vmatmul.mubr.msk.f32.gmra.mrb[118].mxu0 %vm992_vm5, %v8812_v15  ;;  %v8814_v32 = vmax.f32 %v8702_v6, %v8758_v61  ;;  %v10652_v15 = vmul.f32 1.442695, %v20084_v49  ;;  %v21381_v6 = vld [vmem:[#allocation26_spill] sm:$0xff]  ;;  %v20127_v42 = vsub.f32 %v21386_v22, %v21385_v14  ;;  %v21388_v18 = vld [vmem:[#allocation123_spill] sm:$0xff]  ;;  %v8572_v22 = vpop.permute.xlu1 %8571 }
 0x93b   :  { %12885 = vmatmul.mubr.msk.f32.gmra.mrb[116].mxu1 %vm992_vm5, %v8846_v23  ;;  %14694 = vmatpush3.bf16.xpose.msk.msra.mxu0 %vm15760_vm6, %v21373_v35  ;;  %v10339_v20 = vsel %vm115_vm1, %v10324_v62, 0.0  ;;  %v21379_v23 = vld [vmem:[#allocation122_spill] sm:$0xff]  ;;  %v20107_v60 = vsub.f32 %v21381_v6, %v21380_v57  ;;  %v21390_v62 = vld [vmem:[#allocation116_spill] sm:$0xff] }
 0x93c   :  { %12658 = vmatprep.mubr.msk.f32.mxu0 %vm992_vm5, %v8813_v7  ;;  %12886 = vmatprep.mubr.msk.f32.mxu1 %vm992_vm5, %v8847_v31  ;;  %v8759_v54 = vmul.f32 0.33, %v8703_v29  ;;  %15163 = vpow2.f32 %v10652_v15  ;;  %v10660_v28 = vmul.f32 1.442695, %v20127_v42  ;;  %v21391_v35 = vld [vmem:[#allocation32_spill] sm:$0xff]  ;;  %v21397_v15 = vld [vmem:[#allocation89_spill] sm:$0xff] }
 0x93d   :  { %10079 = vadd.xlane.f32.xlu0 %v10078_v19  ;;  %10682 = vadd.xlane.f32.xlu1 %v10681_v30  ;;  %v10656_v24 = vmul.f32 1.442695, %v20107_v60  ;;  %v20145_v19 = vsub.f32 %v21391_v35, %v21390_v62  ;;  %v21392_v30 = vld [vmem:[#allocation25_spill] sm:$0xff]  ;;  %v10575_v6 = vld [vmem:[%s20973_s20 + $0x18] sm:$0xff] }
 0x93e   :  { %14931 = vmatprep.subr.msk.bf16.mxu1 %vm15760_vm6, %v19066_v59  ;;  %12659 = vmatmul.mubr.msk.f32.gmra.mrb[120].mxu0 %vm992_vm5, %v8813_v7  ;;  %v8794_v59 = vmul.f32 0.33, %v8738_v45  ;;  %v20096_v25 = vmax.f32 %v8703_v29, %v8759_v54  ;;  %v21387_v7 = vld [vmem:[#allocation11_spill] sm:$0xff]  ;;  %v10342_v29 = vsel %vm115_vm1, %v10325_v12, 0.0  ;;  %v10572_v54 = vld [vmem:[%s20973_s20] sm:$0xff]  ;;  %v21398_v12 = vld [vmem:[#allocation90_spill] sm:$0xff] }
 0x93f   :  { %12887 = vmatmul.mubr.msk.f32.gmra.mrb[118].mxu1 %vm992_vm5, %v8847_v31  ;;  %12660 = vmatprep.mubr.msk.f32.mxu0 %vm992_vm5, %v8814_v32  ;;  %v10065_v61 = vmul.f32 %v21387_v7, %v21387_v7  ;;  %v21389_v31 = vld [vmem:[#allocation124_spill] sm:$0xff]  ;;  %15165 = vpow2.f32 %v10656_v24  ;;  %v10664_v51 = vmul.f32 1.442695, %v20145_v19  ;;  %v21399_v24 = vld [vmem:[#allocation127_spill] sm:$0xff] }
 0x940   :  { %12888 = vmatprep.mubr.msk.f32.mxu1 %vm992_vm5, %v8848_v43  ;;  %14934 = vmatpush3.bf16.xpose.msk.msra.mxu1 %vm15760_vm6, %v21377_v53  ;;  %v20120_v44 = vmax.f32 %v8738_v45, %v8794_v59  ;;  %v21393_v45 = vld [vmem:[#allocation87_spill] sm:$0xff]  ;;  %15167 = vpow2.f32 %v10660_v28  ;;  %v8417_v59 = vpop.permute.xlu0 %8416  ;;  %v21402_v62 = vld [vmem:[#allocation92_spill] sm:$0xff] }
 0x941   :  { %10340 = vadd.xlane.f32.xlu0 %v10339_v20  ;;  %14697 = vmatprep.subr.msk.bf16.mxu0 %vm15760_vm6, %v21378_v10  ;;  %v10574_v20 = vld [vmem:[%s20973_s20 + $0x10] sm:$0xff]  ;;  %v21395_v10 = vld [vmem:[#allocation125_spill] sm:$0xff]  ;;  %15169 = vpow2.f32 %v10664_v51  ;;  %v8648_v35 = vadd.f32 %v20036_v40, %v8417_v59 }
 0x942   :  { %14937 = vmatprep.subr.msk.bf16.mxu1 %vm15760_vm6, %v21379_v23  ;;  %12661 = vmatmul.mubr.msk.f32.gmra.mrb[124].mxu0 %vm992_vm5, %v8814_v32  ;;  %v10085_v32 = vsel %vm10084_vm13, %v10065_v61, 0.0  ;;  %v21396_v23 = vld [vmem:[#allocation126_spill] sm:$0xff]  ;;  %v21400_v61 = vld [vmem:[#allocation128_spill] sm:$0xff]  ;;  %15171 = vrsqrt.f32 %v19819_v1 }
 0x943   :  { %12889 = vmatmul.mubr.msk.f32.gmra.mrb[120].mxu1 %vm992_vm5, %v8848_v43  ;;  %14700 = vmatpush3.bf16.xpose.msk.msra.mxu0 %vm15760_vm6, %v21383_v4  ;;  %v10326_v43 = vmul.f32 %v21392_v30, %v21392_v30  ;;  %v21404_v51 = vld [vmem:[#allocation130_spill] sm:$0xff]  ;;  %15173 = vrsqrt.f32 %v19632_v39 }
 0x944   :  { %12694 = vmatprep.mubr.msk.f32.mxu0 %vm992_vm5, %v20096_v25  ;;  %12890 = vmatprep.mubr.msk.f32.mxu1 %vm992_vm5, %v8849_v58  ;;  %v8421_v4 = vpop.permute.xlu0 %8420 }
 0x945   :  { %10082 = vadd.xlane.f32.xlu0 %v10081_v56  ;;  %14703 = vmatprep.subr.msk.bf16.mxu0 %vm15760_vm6, %v21384_v50  ;;  %v10345_v16 = vsel %vm10084_vm13, %v10326_v43, 0.0  ;;  %v10577_v50 = vld [vmem:[%s20973_s20 + $0x28] sm:$0xff]  ;;  %v8576_v43 = vpop.permute.xlu1 %8575 }
 0x946   :  { %v15164_v53 = vpop.eup %15163 }
 0x947   :  { %12891 = vmatmul.mubr.msk.f32.gmra.mrb[128].mxu1 %vm992_vm5, %v8849_v58  ;;  %v10666_v57 = vsel %vm10621_vm11, %v15164_v53, 0.0  ;;  %v21405_v53 = vld [vmem:[#allocation93_spill] sm:$0xff]  ;;  %vm10099_vm11 = vcmp.eq.f32.partialorder %v19709_v36, 0.0 }
 0x948   :  { %12924 = vmatprep.mubr.msk.f32.mxu1 %vm992_vm5, %v20120_v44  ;;  %14940 = vmatpush3.bf16.xpose.msk.msra.mxu1 %vm15760_vm6, %v21388_v18  ;;  %v8425_v28 = vpop.permute.xlu0 %8424 }
 0x949   :  { %10343 = vadd.xlane.f32.xlu0 %v10342_v29  ;;  %14943 = vmatprep.subr.msk.bf16.mxu1 %vm15760_vm6, %v21389_v31  ;;  %v15166_v58 = vpop.eup %15165  ;;  %v21401_v29 = vld [vmem:[#allocation91_spill] sm:$0xff]  ;;  %v8580_v59 = vpop.permute.xlu1 %8579 }
 0x94a   :  { %v10672_v56 = vsel %vm10625_vm10, %v15166_v58, 0.0  ;;  %v15168_v14 = vpop.eup %15167 }
 0x94b   :  { %14706 = vmatpush3.bf16.xpose.msk.msra.mxu0 %vm15760_vm6, %v21393_v45  ;;  %v10678_v18 = vsel %vm10625_vm10, %v15168_v14, 0.0  ;;  %v15170_v31 = vpop.eup %15169 }
 0x94c   :  { %14709 = vmatprep.subr.msk.bf16.mxu0 %vm15760_vm6, %v21394_v63  ;;  %v10684_v45 = vsel %vm10641_vm12, %v15170_v31, 0.0  ;;  %v8649_v63 = vadd.f32 %v20036_v40, %v8421_v4  ;;  %v21406_v4 = vld [vmem:[#allocation131_spill] sm:$0xff] }
 0x94d   :  { %10086 = vadd.xlane.f32.xlu0 %v10085_v32  ;;  %v21403_v32 = vld [vmem:[#allocation129_spill] sm:$0xff] }
 0x94e   :  { %10580 = vperm.xlu1 %15154, %v10572_v54   ;;  %v8704_v54 = vadd.f32 %v8648_v35, %v21370_v52 }
 0x950   :  { %14946 = vmatpush3.bf16.xpose.msk.msra.mxu1 %vm15760_vm6, %v21395_v10  ;;  %v8650_v10 = vadd.f32 %v20036_v40, %v8425_v28 }
 0x951   :  { %10346 = vadd.xlane.f32.xlu0 %v10345_v16  ;;  %14949 = vmatprep.subr.msk.bf16.mxu1 %vm15760_vm6, %v21396_v23  ;;  %v8683_v16 = vadd.f32 %v20051_v21, %v8572_v22  ;;  %v8760_v23 = vmul.f32 0.33, %v8704_v54 }
 0x952   :  { %10586 = vperm.xlu1 %15154, %v10574_v20   ;;  %v8429_v20 = vpop.permute.xlu0 %8428  ;;  %v8706_v58 = vadd.f32 %v8650_v10, %v21370_v52 }
 0x953   :  { %14712 = vmatpush3.bf16.xpose.msk.msra.mxu0 %vm15760_vm6, %v21397_v15  ;;  %v8705_v15 = vadd.f32 %v8649_v63, %v21370_v52  ;;  %v8651_v14 = vadd.f32 %v20036_v40, %v8429_v20 }
 0x954   :  { %14715 = vmatprep.subr.msk.bf16.mxu0 %vm15760_vm6, %v21398_v12 }
 0x955   :  { %10667 = vadd.xlane.f32.xlu0 %v10666_v57  ;;  %v8739_v57 = vadd.f32 %v8683_v16, %v19094_v3  ;;  %v8707_v31 = vadd.f32 %v8651_v14, %v21370_v52 }
 0x956   :  { %10589 = vperm.xlu1 %15154, %v10575_v6   ;;  %v8684_v6 = vadd.f32 %v20051_v21, %v8576_v43  ;;  %v8433_v12 = vpop.permute.xlu0 %8432 }
 0x957   :  { %v8795_v22 = vmul.f32 0.33, %v8739_v57  ;;  %v8652_v28 = vadd.f32 %v20036_v40, %v8433_v12  ;;  %v8763_v63 = vmul.f32 0.33, %v8707_v31 }
 0x958   :  { %14952 = vmatpush3.bf16.xpose.msk.msra.mxu1 %vm15760_vm6, %v21399_v24  ;;  %v8740_v24 = vadd.f32 %v8684_v6, %v19094_v3  ;;  %v15172_v6 = vpop.eup %15171 }
 0x959   :  { %10673 = vadd.xlane.f32.xlu0 %v10672_v56  ;;  %14955 = vmatprep.subr.msk.bf16.mxu1 %vm15760_vm6, %v21400_v61  ;;  %v8816_v56 = vmax.f32 %v8704_v54, %v8760_v23  ;;  %v8685_v61 = vadd.f32 %v20051_v21, %v8580_v59  ;;  %v15174_v12 = vpop.eup %15173 }
 0x95a   :  { %10595 = vperm.xlu1 %15154, %v10577_v50   ;;  %v8761_v50 = vmul.f32 0.33, %v8705_v15  ;;  %v8796_v35 = vmul.f32 0.33, %v8740_v24 }
 0x95b   :  { %14718 = vmatpush3.bf16.xpose.msk.msra.mxu0 %vm15760_vm6, %v21401_v29  ;;  %v8584_v29 = vpop.permute.xlu1 %8583  ;;  %v8741_v43 = vadd.f32 %v8685_v61, %v19094_v3 }
 0x95c   :  { %14721 = vmatprep.subr.msk.bf16.mxu0 %vm15760_vm6, %v21402_v62  ;;  %v8817_v38 = vmax.f32 %v8705_v15, %v8761_v50  ;;  %v8851_v62 = vmax.f32 %v8739_v57, %v8795_v22  ;;  %v8852_v20 = vmax.f32 %v8740_v24, %v8796_v35  ;;  %v10089_v22 = vmul.f32 %v15174_v12, %v19632_v39  ;;  %v10578_v24 = vld [vmem:[%s20973_s20 + $0x30] sm:$0x3] }
 0x95d   :  { %10679 = vadd.xlane.f32.xlu0 %v10678_v18  ;;  %v8762_v18 = vmul.f32 0.33, %v8706_v58 }
 0x95f   :  { %v20230_v54 = vpop.xlane.xlu1 %10169 }
 0x960   :  { %14958 = vmatpush3.bf16.xpose.msk.msra.mxu1 %vm15760_vm6, %v21403_v32  ;;  %v8437_v32 = vpop.permute.xlu0 %8436  ;;  %15175 = vrsqrt.f32 %v20230_v54  ;;  %vm10195_vm3 = vcmp.eq.f32.partialorder %v20230_v54, inf  ;;  %vm10197_vm8 = vcmp.eq.f32.partialorder %v20230_v54, 0.0 }
 0x961   :  { %10685 = vadd.xlane.f32.xlu0 %v10684_v45  ;;  %14961 = vmatprep.subr.msk.bf16.mxu1 %vm15760_vm6, %v21404_v51  ;;  %v8686_v45 = vadd.f32 %v20051_v21, %v8584_v29  ;;  %v8708_v51 = vadd.f32 %v8652_v28, %v21370_v52  ;;  %v8653_v16 = vadd.f32 %v20036_v40, %v8437_v32  ;;  %15177 = vrsqrt.f32 %v19709_v36 }
 0x962   :  { %v8819_v40 = vmax.f32 %v8707_v31, %v8763_v63 }
 0x963   :  { %14724 = vmatpush3.bf16.xpose.msk.msra.mxu0 %vm15760_vm6, %v21405_v53  ;;  %v8797_v53 = vmul.f32 0.33, %v8741_v43  ;;  %v8742_v59 = vadd.f32 %v8686_v45, %v19094_v3  ;;  %v8764_v10 = vmul.f32 0.33, %v8708_v51  ;;  %v8709_v23 = vadd.f32 %v8653_v16, %v21370_v52 }
 0x964   :  { %v10187_v52 = vmul.f32 %v15172_v6, %v19819_v1  ;;  %v10191_v45 = vand.u32 2147483648, %v19819_v1  ;;  %v10093_v16 = vand.u32 2147483648, %v19632_v39 }
 0x965   :  { %v8853_v15 = vmax.f32 %v8741_v43, %v8797_v53  ;;  %v8798_v57 = vmul.f32 0.33, %v8742_v59 }
 0x967   :  { %v8854_v50 = vmax.f32 %v8742_v59, %v8798_v57  ;;  %v10100_v57 = vand.u32 2147483648, %v19709_v36 }
 0x968   :  { %14964 = vmatpush3.bf16.xpose.msk.msra.mxu1 %vm15760_vm6, %v21406_v4  ;;  %v8820_v4 = vmax.f32 %v8708_v51, %v8764_v10  ;;  %vm10092_vm6 = vcmp.eq.f32.partialorder %v19632_v39, 0.0 }
 0x96a   :  { %12695 = vmatmul.mubr.msk.f32.vlgmr.msra.gmra.mrb[110].mxu0 %vm992_vm5, %v20096_v25  ;;  %v8818_v25 = vmax.f32 %v8706_v58, %v8762_v18  ;;  %v10576_v58 = vld [vmem:[%s20973_s20 + $0x20] sm:$0xff]  ;;  %v15176_v14 = vpop.eup %15175  ;;  %v8592_v18 = vpop.permute.xlu1 %8591 }
 0x96b   :  { %12696 = vmatprep.mubr.msk.f32.mxu0 %vm992_vm5, %v8816_v56  ;;  %v15178_v61 = vpop.eup %15177  ;;  %v10194_v35 = vmul.f32 %v15176_v14, %v20230_v54  ;;  %v8688_v51 = vadd.f32 %v20051_v21, %v8592_v18  ;;  %v21410_v18 = vld [vmem:[#allocation44_spill] sm:$0xff] }
 0x96c   :  { %v10096_v63 = vmul.f32 %v15178_v61, %v19709_v36 }
 0x96d   :  { %v10196_v59 = vsel %vm10195_vm3, %v20230_v54, %v10194_v35  ;;  %v8744_v10 = vadd.f32 %v8688_v51, %v19094_v3  ;;  %v21411_v51 = vld [vmem:[#allocation46_spill] sm:$0xff] }
 0x96e   :  { %12697 = vmatmul.mubr.msk.f32.gmra.mrb[112].mxu0 %vm992_vm5, %v8816_v56  ;;  %v8765_v56 = vmul.f32 0.33, %v8709_v23 }
 0x96f   :  { %12698 = vmatprep.mubr.msk.f32.mxu0 %vm992_vm5, %v8817_v38  ;;  %12925 = vmatmul.mubr.msk.f32.vlgmr.msra.gmra.mrb[110].mxu1 %vm992_vm5, %v20120_v44  ;;  %v10573_v44 = vld [vmem:[%s20973_s20 + $0x8] sm:$0xff]  ;;  %s10914_s20 = sshll.u32 %s15377_s27, 4  ;;  %s10915_s20 = int_to_ptr.vmem [resolvable:$true] %s10914_s20 }
 0x970   :  { %12926 = vmatprep.mubr.msk.f32.mxu1 %vm992_vm5, %v8851_v62  ;;  %v8821_v29 = vmax.f32 %v8709_v23, %v8765_v56  ;;  %s15348_s9 = scalar_lea.vmem %s10915_s20, 16  ;;  %s15352_s17 = scalar_lea.vmem %s10915_s20, 32 }
 0x971   :  { %p15349_p0 = scmp.ne.s32.totalorder %s10915_s20, %s15348_s9  ;;  %p15353_p1 = scmp.lt.s32.totalorder %s10915_s20, %s10915_s20 }
 0x972   :  { %12699 = vmatmul.mubr.msk.f32.gmra.mrb[114].mxu0 %vm992_vm5, %v8817_v38  ;;  %v21407_v38 = vld [vmem:[#allocation36_spill] sm:$0xff]  ;;  %p15354_p2 = scmp.lt.s32.totalorder %s15352_s17, %s15348_s9 }
 0x973   :  { %12700 = vmatprep.mubr.msk.f32.mxu0 %vm992_vm5, %v8818_v25  ;;  %12927 = vmatmul.mubr.msk.f32.gmra.mrb[112].mxu1 %vm992_vm5, %v8851_v62  ;;  %v1012_v31 = vsel %vm1011_vm14, %v21407_v38, -inf  ;;  %v10189_v62 = vsel %vm10188_vm15, %v19819_v1, %v10187_v52 }
 0x974   :  { %12928 = vmatprep.mubr.msk.f32.mxu1 %vm992_vm5, %v8852_v20  ;;  %v10192_v53 = vsel %vm10190_vm4, %v10191_v45, %v10189_v62  ;;  %p15355_p3 = por %p15354_p2, %p15353_p1 }
 0x976   :  { %12701 = vmatmul.mubr.msk.f32.gmra.mrb[116].mxu0 %vm992_vm5, %v8818_v25  ;;  %v10091_v25 = vsel %vm10090_vm0, %v19632_v39, %v10089_v22  ;;  %p15356_p4 = pnand %p15355_p3, %p15349_p0 }
 0x977   :  { %10583 = vperm.xlu0 %15153, %v10573_v44   ;;  %12702 = vmatprep.mubr.msk.f32.mxu0 %vm992_vm5, %v8819_v40  ;;  %v10094_v44 = vsel %vm10092_vm6, %v10093_v16, %v10091_v25  ;;  %v15335_v25 = vld [vmem:[%s21127_s1 + $0x8] sm:$0xff] }
 0x978   :  { %12929 = vmatmul.mubr.msk.f32.gmra.mrb[114].mxu1 %vm992_vm5, %v8852_v20  ;;  %v10198_v20 = vand.u32 2147483648, %v20230_v54  ;;  %v10137_v6 = vmax.f32 %v10094_v44, 1e-12 }
 0x979   :  { %12930 = vmatprep.mubr.msk.f32.mxu1 %vm992_vm5, %v8853_v15 }
 0x97a   :  { %12703 = vmatmul.mubr.msk.f32.gmra.mrb[118].mxu0 %vm992_vm5, %v8819_v40  ;;  %v10098_v40 = vsel %vm10097_vm9, %v19709_v36, %v10096_v63  ;;  %v10199_v39 = vsel %vm10197_vm8, %v10198_v20, %v10196_v59 }
 0x97b   :  { %10592 = vperm.xlu0 %15153, %v10576_v58   ;;  %12704 = vmatprep.mubr.msk.f32.mxu0 %vm992_vm5, %v8820_v4  ;;  %v10101_v58 = vsel %vm10099_vm11, %v10100_v57, %v10098_v40  ;;  %v10236_v12 = vmax.f32 %v10199_v39, 1e-12 }
 0x97c   :  { %12931 = vmatmul.mubr.msk.f32.gmra.mrb[116].mxu1 %vm992_vm5, %v8853_v15  ;;  %v10235_v15 = vmax.f32 %v10192_v53, 1e-12 }
 0x97d   :  { %12932 = vmatprep.mubr.msk.f32.mxu1 %vm992_vm5, %v8854_v50 }
 0x97e   :  { %v20270_v28 = vpop.f32.mrb[122].mxu1  ;;  %12705 = vmatmul.mubr.msk.f32.gmra.mrb[120].mxu0 %vm992_vm5, %v8820_v4  ;;  %1013 = vmax.xlane.f32.xlu1 %v1012_v31  ;;  %v8800_v4 = vmul.f32 0.33, %v8744_v10  ;;  %15179 = vrcp.f32 %v10235_v15 }
 0x97f   :  { %21408 = vst [vmem:[#allocation50_spill] sm:$0xff] %v20270_v28  ;;  %v20275_v43 = vpop.f32.mrb[123].mxu1  ;;  %12706 = vmatprep.mubr.msk.f32.mxu0 %vm992_vm5, %v8821_v29  ;;  %10598 = vperm.xlu0 %15153, %v10578_v24   ;;  %15181 = vrcp.f32 %v10137_v6  ;;  %v15334_v24 = vld [vmem:[%s21127_s1] sm:$0xff] }
 0x980   :  { %21409 = vst [vmem:[#allocation51_spill] sm:$0xff] %v20275_v43  ;;  %v20281_v32 = vpop.xlane.xlu0 %10328  ;;  %12933 = vmatmul.mubr.msk.f32.gmra.mrb[118].mxu1 %vm992_vm5, %v8854_v50  ;;  %v10138_v50 = vmax.f32 %v10101_v58, 1e-12  ;;  %15183 = vrcp.f32 %v10236_v12  ;;  %v8856_v14 = vmax.f32 %v8744_v10, %v8800_v4 }
 0x981   :  { %vm10350_vm4 = vcmp.eq.f32.partialorder %v20281_v32, inf  ;;  %vm10352_vm8 = vcmp.eq.f32.partialorder %v20281_v32, 0.0 }
 0x982   :  { %12707 = vmatmul.mubr.msk.f32.gmra.mrb[126].mxu0 %vm992_vm5, %v8821_v29  ;;  %15185 = vrcp.f32 %v10138_v50 }
 0x984   :  { %v8588_v1 = vpop.permute.xlu0 %8587 }
 0x985   :  { %v8687_v23 = vadd.f32 %v20051_v21, %v8588_v1 }
 0x987   :  { %v8743_v54 = vadd.f32 %v8687_v23, %v19094_v3 }
 0x988   :  { %v15180_v3 = vpop.eup %15179 }
 0x989   :  { %v8799_v56 = vmul.f32 0.33, %v8743_v54  ;;  %v15182_v21 = vpop.eup %15181  ;;  %v10243_v61 = vmul.f32 %v15334_v24, %v15180_v3 }
 0x98a   :  { %v15184_v29 = vpop.eup %15183  ;;  %v10145_v31 = vmul.f32 %v15182_v21, %v21410_v18 }
 0x98b   :  { %v8855_v52 = vmax.f32 %v8743_v54, %v8799_v56  ;;  %v10245_v63 = vmul.f32 %v15335_v25, %v15184_v29 }
 0x98c   :  { %v15186_v62 = vpop.eup %15185  ;;  %v10256_v45 = vmul.f32 %v10243_v61, %v10145_v31  ;;  %v15336_v61 = vld [vmem:[%s21129_s5 + $0x8] sm:$0xff] }
 0x98d   :  { %12934 = vmatprep.mubr.msk.f32.mxu1 %vm992_vm5, %v8855_v52  ;;  %v10147_v16 = vmul.f32 %v15186_v62, %v21411_v51 }
 0x98e   :  { %12935 = vmatmul.mubr.msk.f32.gmra.mrb[120].mxu1 %vm992_vm5, %v8855_v52  ;;  %v10263_v1 = vsel %vm115_vm1, %v10256_v45, 0.0 }
 0x98f   :  { %12936 = vmatprep.mubr.msk.f32.mxu1 %vm992_vm5, %v8856_v14  ;;  %v10257_v44 = vmul.f32 %v10245_v63, %v10147_v16 }
 0x991   :  { %v10332_v36 = vpop.xlane.xlu1 %10331  ;;  %v10266_v58 = vsel %vm115_vm1, %v10257_v44, 0.0 }
 0x992   :  { %12937 = vmatmul.mubr.msk.f32.gmra.mrb[130].mxu1 %vm992_vm5, %v8856_v14  ;;  %15187 = vrsqrt.f32 %v10332_v36  ;;  %vm10357_vm12 = vcmp.eq.f32.partialorder %v10332_v36, inf  ;;  %v10360_v40 = vand.u32 2147483648, %v10332_v36  ;;  %vm10359_vm15 = vcmp.eq.f32.partialorder %v10332_v36, 0.0 }
 0x995   :  { %v10430_v22 = vpop.xlane.xlu1 %10429 }
 0x996   :  { %15189 = vrsqrt.f32 %v10430_v22  ;;  %vm10455_vm0 = vcmp.eq.f32.partialorder %v10430_v22, inf  ;;  %v10458_v15 = vand.u32 2147483648, %v10430_v22  ;;  %vm10457_vm3 = vcmp.eq.f32.partialorder %v10430_v22, 0.0 }
 0x999   :  { %v20309_v35 = vpop.xlane.xlu1 %10172 }
 0x99a   :  { %vm10202_vm6 = vcmp.eq.f32.partialorder %v20309_v35, inf  ;;  %vm10204_vm9 = vcmp.eq.f32.partialorder %v20309_v35, 0.0 }
 0x99c   :  { %v15188_v20 = vpop.eup %15187 }
 0x99d   :  { %v20315_v53 = vpop.xlane.xlu1 %10432  ;;  %v10356_v59 = vmul.f32 %v15188_v20, %v10332_v36 }
 0x99e   :  { %10264 = vadd.xlane.f32.xlu0 %v10263_v1  ;;  %v10353_v1 = vand.u32 2147483648, %v20281_v32  ;;  %vm10462_vm11 = vcmp.eq.f32.partialorder %v20315_v53, inf }
 0x99f   :  { %v10358_v23 = vsel %vm10357_vm12, %v10332_v36, %v10356_v59 }
 0x9a0   :  { %v15190_v10 = vpop.eup %15189  ;;  %v10361_v57 = vsel %vm10359_vm15, %v10360_v40, %v10358_v23 }
 0x9a1   :  { %v10454_v39 = vmul.f32 %v15190_v10, %v10430_v22  ;;  %v20318_v54 = vpop.xlane.xlu1 %10175  ;;  %v10398_v6 = vmax.f32 %v10361_v57, 1e-12 }
 0x9a2   :  { %10267 = vadd.xlane.f32.xlu0 %v10266_v58 }
 0x9a3   :  { %v10456_v12 = vsel %vm10455_vm0, %v10430_v22, %v10454_v39  ;;  %15191 = vrcp.f32 %v10398_v6  ;;  %vm10464_vm0 = vcmp.eq.f32.partialorder %v20315_v53, 0.0 }
 0x9a4   :  { %v10459_v4 = vsel %vm10457_vm3, %v10458_v15, %v10456_v12  ;;  %v10205_v15 = vand.u32 2147483648, %v20309_v35  ;;  %v21414_v12 = vld [vmem:[#allocation12_spill] sm:$0xff]  ;;  %vm10209_vm3 = vcmp.eq.f32.partialorder %v20318_v54, inf }
 0x9a5   :  { %v10496_v56 = vmax.f32 %v10459_v4, 1e-12  ;;  %v20321_v52 = vpop.xlane.xlu1 %10435  ;;  %v10826_v4 = vmax.f32 %v21414_v12, 1e-09 }
 0x9a7   :  { %15193 = vrcp.f32 %v10496_v56 }
 0x9a8   :  { %15195 = vrsqrt.f32 %v20281_v32 }
 0x9a9   :  { %v20324_v50 = vpop.xlane.xlu1 %10178  ;;  %15197 = vrsqrt.f32 %v20309_v35 }
 0x9aa   :  { %15199 = vrsqrt.f32 %v20315_v53 }
 0x9ad   :  { %v15192_v36 = vpop.eup %15191  ;;  %v20331_v22 = vpop.xlane.xlu1 %10438 }
 0x9ae   :  { %v10407_v24 = vmul.f32 %v15192_v36, %v19792_v9 }
 0x9af   :  { %v20326_v14 = vpop.f32.mrb[124].mxu1 }
 0x9b0   :  { %21412 = vst [vmem:[#allocation52_spill] sm:$0xff] %v20326_v14  ;;  %v20329_v3 = vpop.f32.mrb[125].mxu1 }
 0x9b1   :  { %21413 = vst [vmem:[#allocation53_spill] sm:$0xff] %v20329_v3  ;;  %v15194_v21 = vpop.eup %15193  ;;  %v20339_v45 = vpop.xlane.xlu1 %10181 }
 0x9b2   :  { %v10505_v29 = vmul.f32 %v15336_v61, %v15194_v21  ;;  %v15196_v62 = vpop.eup %15195  ;;  %v21415_v21 = vld [vmem:[#allocation14_spill] sm:$0xff] }
 0x9b3   :  { %v10349_v63 = vmul.f32 %v15196_v62, %v20281_v32  ;;  %v15198_v51 = vpop.eup %15197  ;;  %v10465_v62 = vand.u32 2147483648, %v20315_v53 }
 0x9b4   :  { %v10517_v31 = vmul.f32 %v10505_v29, %v10407_v24  ;;  %v10201_v20 = vmul.f32 %v15198_v51, %v20309_v35  ;;  %v15200_v59 = vpop.eup %15199  ;;  %v10827_v24 = vmax.f32 %v21415_v21, 1e-09 }
 0x9b5   :  { %v10427_v18 = vpop.xlane.xlu0 %10426  ;;  %v10351_v16 = vsel %vm10350_vm4, %v20281_v32, %v10349_v63  ;;  %v10461_v39 = vmul.f32 %v15200_v59, %v20315_v53  ;;  %vm10469_vm4 = vcmp.eq.f32.partialorder %v20321_v52, inf }
 0x9b6   :  { %15201 = vrsqrt.f32 %v10427_v18  ;;  %v10526_v25 = vsel %vm115_vm1, %v10517_v31, 0.0  ;;  %v20352_v44 = vpop.xlane.xlu1 %10441  ;;  %v10354_v23 = vsel %vm10352_vm8, %v10353_v1, %v10351_v16  ;;  %v10203_v57 = vsel %vm10202_vm6, %v20309_v35, %v10201_v20 }
 0x9b7   :  { %15203 = vrsqrt.f32 %v20318_v54  ;;  %10527 = vadd.xlane.f32.xlu0 %v10526_v25  ;;  %vm10448_vm12 = vcmp.eq.f32.partialorder %v10427_v18, inf  ;;  %v10451_v32 = vand.u32 2147483648, %v10427_v18  ;;  %v10397_v61 = vmax.f32 %v10354_v23, 1e-12 }
 0x9b8   :  { %15205 = vrsqrt.f32 %v20321_v52  ;;  %vm10450_vm15 = vcmp.eq.f32.partialorder %v10427_v18, 0.0  ;;  %v10206_v31 = vsel %vm10204_vm9, %v10205_v15, %v10203_v57  ;;  %v10463_v51 = vsel %vm10462_vm11, %v20315_v53, %v10461_v39 }
 0x9b9   :  { %v20344_v9 = vpop.xlane.xlu0 %10073  ;;  %15207 = vrsqrt.f32 %v20324_v50  ;;  %v10237_v59 = vmax.f32 %v10206_v31, 1e-12  ;;  %v20384_v23 = vmin.f32 %v10827_v24, 1.0  ;;  %v10466_v15 = vsel %vm10464_vm0, %v10465_v62, %v10463_v51 }
 0x9ba   :  { %15209 = vrsqrt.f32 %v20331_v22  ;;  %v20371_v63 = vpop.xlane.xlu1 %10184  ;;  %v10212_v57 = vand.u32 2147483648, %v20318_v54  ;;  %vm10211_vm6 = vcmp.eq.f32.partialorder %v20318_v54, 0.0  ;;  %vm10471_vm8 = vcmp.eq.f32.partialorder %v20321_v52, 0.0 }
 0x9bb   :  { %15211 = vrsqrt.f32 %v20339_v45  ;;  %vm10216_vm9 = vcmp.eq.f32.partialorder %v20324_v50, inf  ;;  %vm10218_vm11 = vcmp.eq.f32.partialorder %v20324_v50, 0.0  ;;  %vm10223_vm0 = vcmp.eq.f32.partialorder %v20339_v45, inf }
 0x9bc   :  { %15213 = vrsqrt.f32 %v20344_v9 }
 0x9bd   :  { %15215 = vrcp.f32 %v10397_v61 }
 0x9be   :  { %v20354_v40 = vpop.xlane.xlu0 %10334  ;;  %v20395_v12 = vpop.xlane.xlu1 %10444 }
 0x9c0   :  { %v15202_v10 = vpop.eup %15201 }
 0x9c1   :  { %v10447_v6 = vmul.f32 %v15202_v10, %v10427_v18  ;;  %v15204_v58 = vpop.eup %15203  ;;  %v20382_v10 = vmin.f32 %v10826_v4, 1.0 }
 0x9c2   :  { %v20364_v56 = vpop.xlane.xlu0 %10076  ;;  %v15206_v36 = vpop.eup %15205  ;;  %v10208_v16 = vmul.f32 %v15204_v58, %v20318_v54 }
 0x9c3   :  { %v10449_v29 = vsel %vm10448_vm12, %v10427_v18, %v10447_v6  ;;  %v10468_v18 = vmul.f32 %v15206_v36, %v20321_v52  ;;  %v15208_v1 = vpop.eup %15207  ;;  %v10472_v6 = vand.u32 2147483648, %v20321_v52  ;;  %vm10476_vm12 = vcmp.eq.f32.partialorder %v20331_v22, inf }
 0x9c4   :  { %v10452_v25 = vsel %vm10450_vm15, %v10451_v32, %v10449_v29  ;;  %v10210_v39 = vsel %vm10209_vm3, %v20318_v54, %v10208_v16  ;;  %v15210_v53 = vpop.eup %15209  ;;  %v10497_v32 = vmax.f32 %v10466_v15, 1e-12  ;;  %v10215_v36 = vmul.f32 %v15208_v1, %v20324_v50  ;;  %v10671_v16 = vpop.xlane.xlu1 %10670 }
 0x9c5   :  { %v10495_v20 = vmax.f32 %v10452_v25, 1e-12  ;;  %v10470_v58 = vsel %vm10469_vm4, %v20321_v52, %v10468_v18  ;;  %v10213_v54 = vsel %vm10211_vm6, %v10212_v57, %v10210_v39  ;;  %v10219_v52 = vand.u32 2147483648, %v20324_v50  ;;  %v15212_v29 = vpop.eup %15211 }
 0x9c6   :  { %v20379_v35 = vpop.xlane.xlu0 %10337  ;;  %v10473_v21 = vsel %vm10471_vm8, %v10472_v6, %v10470_v58  ;;  %v10475_v24 = vmul.f32 %v15210_v53, %v20331_v22  ;;  %v10238_v31 = vmax.f32 %v10213_v54, 1e-12  ;;  %v10217_v62 = vsel %vm10216_vm9, %v20324_v50, %v10215_v36  ;;  %v15214_v25 = vpop.eup %15213 }
 0x9c7   :  { %15217 = vrcp.f32 %v10495_v20  ;;  %v10498_v51 = vmax.f32 %v10473_v21, 1e-12  ;;  %v15216_v20 = vpop.eup %15215  ;;  %vm10478_vm15 = vcmp.eq.f32.partialorder %v20331_v22, 0.0  ;;  %v10479_v18 = vand.u32 2147483648, %v20331_v22 }
 0x9c8   :  { %15219 = vrsqrt.f32 %v20352_v44  ;;  %v10477_v1 = vsel %vm10476_vm12, %v20331_v22, %v10475_v24  ;;  %v10222_v15 = vmul.f32 %v15212_v29, %v20339_v45  ;;  %v10103_v6 = vmul.f32 %v15214_v25, %v20344_v9 }
 0x9c9   :  { %15221 = vrcp.f32 %v10237_v59  ;;  %v10220_v59 = vsel %vm10218_vm11, %v10219_v52, %v10217_v62  ;;  %v21416_v58 = vlaneseq  ;;  %vm10225_vm3 = vcmp.eq.f32.partialorder %v20339_v45, 0.0 }
 0x9ca   :  { %v20397_v4 = vpop.xlane.xlu0 %10079  ;;  %15223 = vlog2.f32 %v20382_v10  ;;  %v10226_v50 = vand.u32 2147483648, %v20339_v45  ;;  %v10405_v36 = vmul.f32 %v15216_v20, %v19743_v48  ;;  %v10239_v21 = vmax.f32 %v10220_v59, 1e-12  ;;  %v15337_v48 = vld [vmem:[%s21129_s5] sm:$0xff] }
 0x9cb   :  { %15225 = vlog2.f32 %v20384_v23  ;;  %v20425_v53 = vand.u32 127, %v21416_v58  ;;  %v10480_v52 = vsel %vm10478_vm15, %v10479_v18, %v10477_v1  ;;  %vm10483_vm4 = vcmp.eq.f32.partialorder %v20352_v44, inf  ;;  %v15338_v58 = vld [vmem:[%s21127_s1 + $0x10] sm:$0xff] }
 0x9cc   :  { %15227 = vrsqrt.f32 %v20354_v40  ;;  %v10224_v29 = vsel %vm10223_vm0, %v20339_v45, %v10222_v15  ;;  %vm10104_vm6 = vcmp.eq.f32.partialorder %v20344_v9, inf  ;;  %vm10485_vm8 = vcmp.eq.f32.partialorder %v20352_v44, 0.0 }
 0x9cd   :  { %15229 = vrcp.f32 %v10497_v32  ;;  %v10105_v20 = vsel %vm10104_vm6, %v20344_v9, %v10103_v6  ;;  %v10499_v59 = vmax.f32 %v10480_v52, 1e-12  ;;  %v10486_v1 = vand.u32 2147483648, %v20352_v44 }
 0x9ce   :  { %v20407_v61 = vpop.xlane.xlu0 %10340  ;;  %15231 = vrsqrt.f32 %v20371_v63  ;;  %v10107_v15 = vand.u32 2147483648, %v20344_v9  ;;  %vm10106_vm9 = vcmp.eq.f32.partialorder %v20344_v9, 0.0  ;;  %vm10230_vm11 = vcmp.eq.f32.partialorder %v20371_v63, inf }
 0x9cf   :  { %15233 = vrsqrt.f32 %v20364_v56  ;;  %vm10232_vm12 = vcmp.eq.f32.partialorder %v20371_v63, 0.0  ;;  %v10233_v45 = vand.u32 2147483648, %v20371_v63  ;;  %vm10364_vm15 = vcmp.eq.f32.partialorder %v20354_v40, inf }
 0x9d0   :  { %15235 = vrsqrt.f32 %v20379_v35  ;;  %v10108_v6 = vsel %vm10106_vm9, %v10107_v15, %v10105_v20  ;;  %vm10366_vm0 = vcmp.eq.f32.partialorder %v20354_v40, 0.0  ;;  %vm10113_vm6 = vcmp.eq.f32.partialorder %v20364_v56, 0.0 }
 0x9d1   :  { %v15218_v39 = vpop.eup %15217  ;;  %15237 = vrcp.f32 %v10238_v31  ;;  %v10677_v31 = vpop.xlane.xlu1 %10676  ;;  %vm10373_vm9 = vcmp.eq.f32.partialorder %v20379_v35, 0.0 }
 0x9d2   :  { %v20420_v57 = vpop.xlane.xlu0 %10082  ;;  %v15220_v32 = vpop.eup %15219  ;;  %15239 = vrcp.f32 %v10498_v51  ;;  %v10503_v22 = vmul.f32 %v15337_v48, %v15218_v39 }
 0x9d3   :  { %v15222_v54 = vpop.eup %15221  ;;  %15241 = vrsqrt.f32 %v20395_v12  ;;  %v10482_v51 = vmul.f32 %v15220_v32, %v20352_v44  ;;  %v10227_v32 = vsel %vm10225_vm3, %v10226_v50, %v10224_v29  ;;  %vm10490_vm3 = vcmp.eq.f32.partialorder %v20395_v12, inf }
 0x9d4   :  { %v20434_v24 = vpop.eup %15223  ;;  %15243 = vrsqrt.f32 %v20397_v4  ;;  %v20454_v39 = vmul.f32 %v15338_v58, %v15222_v54  ;;  %v10516_v52 = vmul.f32 %v10503_v22, %v10405_v36  ;;  %v10240_v29 = vmax.f32 %v10227_v32, 1e-12  ;;  %v15339_v36 = vld [vmem:[%s21129_s5 + $0x10] sm:$0xff] }
 0x9d5   :  { %v20444_v25 = vpop.eup %15225  ;;  %15245 = vlog2.f32 %v10671_v16  ;;  %v10683_v20 = vpop.xlane.xlu1 %10682  ;;  %v10128_v27 = vand.u32 2147483648, %v20420_v57 }
 0x9d6   :  { %v20439_v62 = vpop.xlane.xlu0 %10343  ;;  %v15228_v18 = vpop.eup %15227  ;;  %15247 = vrcp.f32 %v10239_v21  ;;  %v10484_v21 = vsel %vm10483_vm4, %v20352_v44, %v10482_v51  ;;  %v10523_v15 = vsel %vm115_vm1, %v10516_v52, 0.0  ;;  %v10139_v51 = vmax.f32 %v10108_v6, 1e-12 }
 0x9d7   :  { %v15230_v48 = vpop.eup %15229  ;;  %15249 = vrsqrt.f32 %v20407_v61  ;;  %v10363_v9 = vmul.f32 %v15228_v18, %v20354_v40  ;;  %10524 = vadd.xlane.f32.xlu1 %v10523_v15  ;;  %v20484_v18 = vsel %vm10485_vm8, %v10486_v1, %v10484_v21  ;;  %vm10111_vm4 = vcmp.eq.f32.partialorder %v20364_v56, inf }
 0x9d8   :  { %v15232_v16 = vpop.eup %15231  ;;  %15251 = vlog2.f32 %v10677_v31  ;;  %v20473_v22 = vmul.f32 %v15339_v36, %v15230_v48  ;;  %vm10371_vm8 = vcmp.eq.f32.partialorder %v20379_v35, inf }
 0x9d9   :  { %v15234_v54 = vpop.eup %15233  ;;  %15253 = vrcp.f32 %v10499_v59  ;;  %v10229_v14 = vmul.f32 %v15232_v16, %v20371_v63  ;;  %v10367_v59 = vand.u32 2147483648, %v20354_v40  ;;  %v10365_v6 = vsel %vm10364_vm15, %v20354_v40, %v10363_v9  ;;  %v10581_v36 = vpop.permute.xlu1 %10580 }
 0x9da   :  { %v20462_v3 = vpop.xlane.xlu0 %10086  ;;  %v15236_v50 = vpop.eup %15235  ;;  %v10110_v48 = vmul.f32 %v15234_v54, %v20364_v56  ;;  %15255 = vrsqrt.f32 %v20420_v57  ;;  %vm10600_vm15 = vcmp.eq.s32.totalorder %v20425_v53, %v10581_v36 }
 0x9db   :  { %v20475_v58 = vpop.eup %15237  ;;  %v10370_v52 = vmul.f32 %v15236_v50, %v20379_v35  ;;  %15257 = vrsqrt.f32 %v20439_v62  ;;  %v10231_v9 = vsel %vm10230_vm11, %v20371_v63, %v10229_v14  ;;  %v10114_v50 = vand.u32 2147483648, %v20364_v56 }
 0x9dc   :  { %v20480_v31 = vpop.eup %15239  ;;  %15259 = vrcp.f32 %v10240_v29  ;;  %v10368_v15 = vsel %vm10366_vm0, %v10367_v59, %v10365_v6  ;;  %v10112_v29 = vsel %vm10111_vm4, %v20364_v56, %v10110_v48  ;;  %v20514_v40 = vsel %vm10232_vm12, %v10233_v45, %v10231_v9 }
 0x9dd   :  { %v15242_v16 = vpop.eup %15241  ;;  %15261 = vrcp.f32 %v10139_v51  ;;  %v10372_v51 = vsel %vm10371_vm8, %v20379_v35, %v10370_v52  ;;  %v10399_v28 = vmax.f32 %v10368_v15, 1e-12  ;;  %v10115_v52 = vsel %vm10113_vm6, %v10114_v50, %v10112_v29  ;;  %v10587_v29 = vpop.permute.xlu1 %10586 }
 0x9de   :  { %v20489_v32 = vpop.xlane.xlu0 %10346  ;;  %v15244_v44 = vpop.eup %15243  ;;  %15263 = vlog2.f32 %v10683_v20  ;;  %v10489_v59 = vmul.f32 %v15242_v16, %v20395_v12  ;;  %v10374_v20 = vand.u32 2147483648, %v20379_v35  ;;  %vm10118_vm11 = vcmp.eq.f32.partialorder %v20397_v4, inf }
 0x9df   :  { %v15246_v54 = vpop.eup %15245  ;;  %v10117_v14 = vmul.f32 %v15244_v44, %v20397_v4  ;;  %vm10120_vm12 = vcmp.eq.f32.partialorder %v20397_v4, 0.0  ;;  %v10121_v63 = vand.u32 2147483648, %v20397_v4  ;;  %v10140_v9 = vmax.f32 %v10115_v52, 1e-12 }
 0x9e0   :  { %v20507_v43 = vpop.eup %15247  ;;  %v10690_v48 = vmul.f32 0.6931472, %v15246_v54  ;;  %v20533_v54 = vsel %vm10490_vm3, %v20395_v12, %v10489_v59  ;;  %vm10378_vm0 = vcmp.eq.f32.partialorder %v20407_v61, inf  ;;  %vm10380_vm4 = vcmp.eq.f32.partialorder %v20407_v61, 0.0 }
 0x9e1   :  { %v15250_v21 = vpop.eup %15249  ;;  %v10119_v35 = vsel %vm10118_vm11, %v20397_v4, %v10117_v14  ;;  %v10381_v59 = vand.u32 2147483648, %v20407_v61  ;;  %vm10125_vm3 = vcmp.eq.f32.partialorder %v20420_v57, inf  ;;  %vm10602_vm6 = vcmp.eq.s32.totalorder %v20425_v53, %v10587_v29 }
 0x9e2   :  { %v10668_v1 = vpop.xlane.xlu0 %10667  ;;  %v15252_v6 = vpop.eup %15251  ;;  %v10377_v16 = vmul.f32 %v15250_v21, %v20407_v61  ;;  %v10702_v50 = vsub.f32 %v19923_v8, %v10690_v48  ;;  %v10122_v14 = vsel %vm10120_vm12, %v10121_v63, %v10119_v35  ;;  %vm10127_vm8 = vcmp.eq.f32.partialorder %v20420_v57, 0.0 }
 0x9e3   :  { %15265 = vlog2.f32 %v10668_v1  ;;  %v20522_v44 = vpop.eup %15253  ;;  %v10375_v1 = vsel %vm10373_vm9, %v10374_v20, %v10372_v51  ;;  %v10694_v15 = vmul.f32 0.6931472, %v15252_v6  ;;  %v10141_v47 = vmax.f32 %v10122_v14, 1e-12 }
 0x9e4   :  { %15267 = vrsqrt.f32 %v20462_v3  ;;  %v15256_v56 = vpop.eup %15255  ;;  %v10400_v20 = vmax.f32 %v10375_v1, 1e-12  ;;  %v10379_v6 = vsel %vm10378_vm0, %v20407_v61, %v10377_v16  ;;  %v10716_v4 = vrot.slane %v10702_v50, 2 }
 0x9e5   :  { %15269 = vrsqrt.f32 %v20489_v32  ;;  %v15258_v51 = vpop.eup %15257  ;;  %v10124_v52 = vmul.f32 %v15256_v56, %v20420_v57  ;;  %v10704_v63 = vsub.f32 %v19950_v11, %v10694_v15  ;;  %v10382_v16 = vsel %vm10380_vm4, %v10381_v59, %v10379_v6 }
 0x9e6   :  { %v10674_v45 = vpop.xlane.xlu0 %10673  ;;  %v20538_v21 = vpop.eup %15259  ;;  %v10384_v35 = vmul.f32 %v15258_v51, %v20439_v62  ;;  %vm10385_vm9 = vcmp.eq.f32.partialorder %v20439_v62, inf  ;;  %vm10387_vm11 = vcmp.eq.f32.partialorder %v20439_v62, 0.0  ;;  %v10388_v15 = vand.u32 2147483648, %v20439_v62 }
 0x9e7   :  { %15271 = vlog2.f32 %v10674_v45  ;;  %v21417_v45 = vmov 0.0   ;;  %v10126_v11 = vsel %vm10125_vm3, %v20420_v57, %v10124_v52  ;;  %v20566_v61 = vrot.slane %v10704_v63, 2 }
 0x9e8   :  { %15273 = vrcp.f32 %v10399_v28  ;;  %v11822_v8 = vsel %vm10600_vm15, 1.0, %v21417_v45  ;;  %v15262_v28 = vpop.eup %15261  ;;  %v20557_v56 = vsel %vm10602_vm6, 1.0, %v21417_v45  ;;  %v10386_v14 = vsel %vm10385_vm9, %v20439_v62, %v10384_v35 }
 0x9e9   :  { %v15264_v1 = vpop.eup %15263  ;;  %vm10132_vm12 = vcmp.eq.f32.partialorder %v20462_v3, inf  ;;  %vm10134_vm15 = vcmp.eq.f32.partialorder %v20462_v3, 0.0  ;;  %vm10492_vm0 = vcmp.eq.f32.partialorder %v20395_v12, 0.0  ;;  %v10135_v6 = vand.u32 2147483648, %v20462_v3 }
 0x9ea   :  { %v10680_v48 = vpop.xlane.xlu0 %10679  ;;  %vm10392_vm4 = vcmp.eq.f32.partialorder %v20489_v32, inf  ;;  %vm10394_vm3 = vcmp.eq.f32.partialorder %v20489_v32, 0.0  ;;  %v10395_v62 = vand.u32 2147483648, %v20489_v32 }
 0x9eb   :  { %15275 = vlog2.f32 %v10680_v48  ;;  %v10401_v48 = vmax.f32 %v10382_v16, 1e-12 }
 0x9ec   :  { %15277 = vrcp.f32 %v10140_v9  ;;  %v10149_v9 = vmul.f32 %v15262_v28, %v21357_v46  ;;  %v10129_v28 = vsel %vm10127_vm8, %v10128_v27, %v10126_v11 }
 0x9ed   :  { %v15266_v36 = vpop.eup %15265  ;;  %15279 = vrcp.f32 %v10400_v20  ;;  %v20568_v20 = vmul.f32 0.6931472, %v15264_v1  ;;  %v10142_v11 = vmax.f32 %v10129_v28, 1e-12 }
 0x9ee   :  { %v10688_v29 = vmul.f32 0.6931472, %v15266_v36  ;;  %v15268_v50 = vpop.eup %15267  ;;  %15281 = vrcp.f32 %v10141_v47  ;;  %v10686_v63 = vpop.xlane.xlu0 %10685  ;;  %v10258_v16 = vmul.f32 %v20454_v39, %v10149_v9 }
 0x9ef   :  { %v15270_v51 = vpop.eup %15269  ;;  %v10131_v47 = vmul.f32 %v15268_v50, %v20462_v3  ;;  %15283 = vrcp.f32 %v10401_v48 }
 0x9f0   :  { %v10701_v46 = vsub.f32 %v20084_v49, %v10688_v29  ;;  %v10389_v49 = vsel %vm10387_vm11, %v10388_v15, %v10386_v14  ;;  %v10391_v36 = vmul.f32 %v15270_v51, %v20489_v32  ;;  %15285 = vrcp.f32 %v10142_v11 }
 0x9f1   :  { %v15272_v59 = vpop.eup %15271  ;;  %v10402_v50 = vmax.f32 %v10389_v49, 1e-12 }
 0x9f2   :  { %v10715_v52 = vrot.slane %v10701_v46, 2  ;;  %v10692_v1 = vmul.f32 0.6931472, %v15272_v59  ;;  %v15274_v35 = vpop.eup %15273  ;;  %v10393_v48 = vsel %vm10392_vm4, %v20489_v32, %v10391_v36  ;;  %v10241_v32 = vmax.f32 %v20514_v40, 1e-12 }
 0x9f3   :  { %v10409_v39 = vmul.f32 %v15274_v35, %v19963_v13  ;;  %15287 = vrcp.f32 %v10402_v50  ;;  %v10396_v11 = vsel %vm10394_vm3, %v10395_v62, %v10393_v48 }
 0x9f4   :  { %v10703_v27 = vsub.f32 %v20107_v60, %v10692_v1  ;;  %v10717_v57 = vsel %vm611_vm7, %v10715_v52, %v10716_v4  ;;  %v10133_v60 = vsel %vm10132_vm12, %v20462_v3, %v10131_v47  ;;  %v10269_v47 = vsel %vm115_vm1, %v10258_v16, 0.0 }
 0x9f5   :  { %v15276_v29 = vpop.eup %15275  ;;  %v10735_v15 = vmul.f32 %v11822_v8, %v10717_v57  ;;  %15289 = vlog2.f32 %v10686_v63  ;;  %v21419_v3 = vmax.f32 %v20484_v18, 1e-12  ;;  %v21420_v63 = vand.u32 2147483648, %v20395_v12  ;;  %v15341_v18 = vld [vmem:[%s21129_s5 + $0x18] sm:$0xff] }
 0x9f6   :  { %v15278_v14 = vpop.eup %15277  ;;  %v10718_v46 = vrot.slane %v10703_v27, 2  ;;  %v10696_v51 = vmul.f32 0.6931472, %v15276_v29  ;;  %v10584_v59 = vpop.permute.xlu0 %10583 }
 0x9f7   :  { %v15280_v9 = vpop.eup %15279  ;;  %vm10601_vm6 = vcmp.eq.s32.totalorder %v20425_v53, %v10584_v59  ;;  %v10742_v8 = vsel %vm10625_vm10, %v10735_v15, 0.0  ;;  %v10151_v36 = vmul.f32 %v15278_v14, %v21362_v41  ;;  %v10590_v15 = vpop.permute.xlu1 %10589  ;;  %v21418_v14 = vld [vmem:[#allocation16_spill] sm:$0xff]  ;;  %15291 = vrcp.f32 %v21419_v3 }
 0x9f8   :  { %v10705_v28 = vsub.f32 %v20127_v42, %v10696_v51  ;;  %v11823_v52 = vsel %vm10601_vm6, 1.0, %v21417_v45  ;;  %v10719_v1 = vsel %vm611_vm7, %v10716_v4, %v10718_v46  ;;  %10743 = vadd.xlane.f32.xlu1 %v10742_v8  ;;  %v10721_v13 = vsel %vm611_vm7, %v10718_v46, %v20566_v61  ;;  %v15282_v29 = vpop.eup %15281 }
 0x9f9   :  { %v10736_v35 = vmul.f32 %v11823_v52, %v10719_v1  ;;  %v20602_v49 = vpop.f32.mrb[122].mxu0  ;;  %v10136_v42 = vsel %vm10134_vm15, %v10135_v6, %v10133_v60  ;;  %v10518_v4 = vmul.f32 %v20473_v22, %v10409_v39  ;;  %v10411_v57 = vmul.f32 %v15280_v9, %v21366_v55  ;;  %v15340_v55 = vld [vmem:[%s21127_s1 + $0x18] sm:$0xff]  ;;  %v15284_v12 = vpop.eup %15283  ;;  %v21421_v52 = vld [vmem:[#allocation18_spill] sm:$0xff] }
 0x9fa   :  { %v20608_v27 = vpop.f32.mrb[123].mxu0  ;;  %v10737_v41 = vmul.f32 %v20557_v56, %v10721_v13  ;;  %v10828_v50 = vmax.f32 %v21418_v14, 1e-09  ;;  %v10722_v6 = vrot.slane %v10705_v28, 2  ;;  %v10249_v22 = vmul.f32 %v15340_v55, %v20475_v58  ;;  %v10593_v40 = vpop.permute.xlu0 %10592  ;;  %v21422_v14 = vld [vmem:[#allocation20_spill] sm:$0xff]  ;;  %v21423_v55 = vld [vmem:[#allocation22_spill] sm:$0xff] }
 0x9fb   :  { %v10745_v16 = vsel %vm10625_vm10, %v10736_v35, 0.0  ;;  %v10494_v56 = vsel %vm10492_vm0, %v21420_v63, %v20533_v54  ;;  %v10143_v62 = vmax.f32 %v10136_v42, 1e-12  ;;  %v10509_v46 = vmul.f32 %v15341_v18, %v20480_v31  ;;  %v15286_v42 = vpop.eup %15285 }
 0x9fc   :  { %10746 = vadd.xlane.f32.xlu0 %v10745_v16  ;;  %10270 = vadd.xlane.f32.xlu1 %v10269_v47  ;;  %v10706_v51 = vsub.f32 %v19971_v37, %v20568_v20  ;;  %vm10603_vm8 = vcmp.eq.s32.totalorder %v20425_v53, %v10590_v15  ;;  %v10403_v58 = vmax.f32 %v10396_v11, 1e-12  ;;  %v10153_v39 = vmul.f32 %v15282_v29, %v21369_v5  ;;  %v15342_v20 = vld [vmem:[%s21127_s1 + $0x20] sm:$0xff] }
 0x9fd   :  { %v20636_v59 = vpop.f32.mrb[126].mxu1  ;;  %v10529_v9 = vsel %vm115_vm1, %v10518_v4, 0.0  ;;  %v10748_v60 = vsel %vm10625_vm10, %v10737_v41, 0.0  ;;  %v10259_v48 = vmul.f32 %v10249_v22, %v10151_v36  ;;  %v10519_v31 = vmul.f32 %v10509_v46, %v10411_v57  ;;  %v15288_v57 = vpop.eup %15287 }
 0x9fe   :  { %v20639_v54 = vpop.f32.mrb[127].mxu1  ;;  %v20643_v8 = vmin.f32 %v10828_v50, 1.0  ;;  %v10501_v37 = vmax.f32 %v10494_v56, 1e-12  ;;  %v10251_v5 = vmul.f32 %v15342_v20, %v20507_v43  ;;  %v10723_v28 = vsel %vm611_vm7, %v20566_v61, %v10722_v6 }
 0x9ff   :  { %v10829_v1 = vmax.f32 %v21421_v52, 1e-09  ;;  %v11825_v13 = vsel %vm10603_vm8, 1.0, %v21417_v45  ;;  %15293 = vrcp.f32 %v10143_v62  ;;  %vm10604_vm9 = vcmp.eq.s32.totalorder %v20425_v53, %v10593_v40  ;;  %v15290_v16 = vpop.eup %15289 }
 0xa00   :  { %10530 = vadd.xlane.f32.xlu0 %v10529_v9  ;;  %10749 = vadd.xlane.f32.xlu1 %v10748_v60  ;;  %v20656_v35 = vrot.slane %v10706_v51, 2  ;;  %15295 = vrcp.f32 %v10403_v58  ;;  %v10260_v47 = vmul.f32 %v10251_v5, %v10153_v39  ;;  %v10413_v36 = vmul.f32 %v15284_v12, %v21372_v2  ;;  %v15343_v2 = vld [vmem:[%s21129_s5 + $0x20] sm:$0xff]  ;;  %v15344_v58 = vld [vmem:[%s21129_s5 + $0x28] sm:$0xff] }
 0xa01   :  { %15297 = vrcp.f32 %v10241_v32  ;;  %v10272_v43 = vsel %vm115_vm1, %v10259_v48, 0.0  ;;  %v10532_v61 = vsel %vm115_vm1, %v10519_v31, 0.0  ;;  %v10738_v4 = vmul.f32 %v11825_v13, %v10723_v28  ;;  %v15292_v3 = vpop.eup %15291 }
 0xa02   :  { %15299 = vrcp.f32 %v10501_v37  ;;  %v11826_v29 = vsel %vm10604_vm9, 1.0, %v21417_v45  ;;  %v10725_v15 = vsel %vm611_vm7, %v10722_v6, %v20656_v35  ;;  %v10511_v11 = vmul.f32 %v15343_v2, %v20522_v44 }
 0xa03   :  { %15301 = vlog2.f32 %v20643_v8  ;;  %v20669_v41 = vmin.f32 %v10829_v1, 1.0  ;;  %v10830_v50 = vmax.f32 %v21422_v14, 1e-09  ;;  %v10831_v22 = vmax.f32 %v21423_v55, 1e-09 }
 0xa04   :  { %10273 = vadd.xlane.f32.xlu0 %v10272_v43  ;;  %10533 = vadd.xlane.f32.xlu1 %v10532_v61  ;;  %v10275_v6 = vsel %vm115_vm1, %v10260_v47, 0.0  ;;  %v10520_v32 = vmul.f32 %v10511_v11, %v10413_v36  ;;  %v10739_v63 = vmul.f32 %v11826_v29, %v10725_v15  ;;  %v10751_v56 = vsel %vm10625_vm10, %v10738_v4, 0.0  ;;  %v15346_v61 = vld [vmem:[%s21129_s5 + $0x30] sm:$0x3]  ;;  %v10599_v15 = vpop.permute.xlu0 %10598 }
 0xa05   :  { %v10415_v62 = vmul.f32 %v15288_v57, %v21382_v26  ;;  %v10155_v44 = vmul.f32 %v15286_v42, %v21376_v33  ;;  %v10700_v18 = vmul.f32 0.6931472, %v15290_v16  ;;  %v10848_v46 = vmul.f32 0.6931472, %v20434_v24  ;;  %v15345_v26 = vld [vmem:[%s21127_s1 + $0x28] sm:$0xff]  ;;  %v10596_v42 = vpop.permute.xlu1 %10595 }
 0xa06   :  { %15303 = vlog2.f32 %v20669_v41  ;;  %v20679_v51 = vmin.f32 %v10830_v50, 1.0  ;;  %v10513_v40 = vmul.f32 %v15344_v58, %v15292_v3  ;;  %v10253_v33 = vmul.f32 %v15345_v26, %v20538_v21  ;;  %v15347_v57 = vld [vmem:[%s21127_s1 + $0x30] sm:$0x3] }
 0xa07   :  { %v20688_v39 = vmin.f32 %v10831_v22, 1.0  ;;  %v10832_v12 = vmax.f32 %v21375_v0, 1e-09  ;;  %v10850_v24 = vmul.f32 0.6931472, %v20444_v25  ;;  %v10754_v60 = vsel %vm10625_vm10, %v10739_v63, 0.0 }
 0xa08   :  { %10276 = vadd.xlane.f32.xlu1 %v10275_v6  ;;  %10752 = vadd.xlane.f32.xlu0 %v10751_v56  ;;  %v10535_v48 = vsel %vm115_vm1, %v10520_v32, 0.0  ;;  %v10521_v31 = vmul.f32 %v10513_v40, %v10415_v62  ;;  %v10261_v37 = vmul.f32 %v10253_v33, %v10155_v44  ;;  %v10840_v5 = vsub.f32 0.0, %v20382_v10 }
 0xa09   :  { %v15294_v9 = vpop.eup %15293  ;;  %v10841_v28 = vsub.f32 0.0, %v20384_v23  ;;  %v10707_v21 = vsub.f32 %v20145_v19, %v10700_v18  ;;  %15305 = vlog2.f32 %v20679_v51  ;;  %v20699_v25 = vmin.f32 %v10832_v12, 1.0 }
 0xa0a   :  { %v15296_v20 = vpop.eup %15295  ;;  %15307 = vlog2.f32 %v20688_v39  ;;  %v10861_v13 = vmul.f32 %v10848_v46, %v10840_v5  ;;  %v10538_v36 = vsel %vm115_vm1, %v10521_v31, 0.0  ;;  %v10278_v10 = vsel %vm115_vm1, %v10261_v37, 0.0 }
 0xa0b   :  { %v15298_v52 = vpop.eup %15297  ;;  %v10862_v1 = vmul.f32 %v10850_v24, %v10841_v28  ;;  %v10417_v23 = vmul.f32 %v15296_v20, %v21392_v30  ;;  %v10157_v19 = vmul.f32 %v15294_v9, %v21387_v7  ;;  %v10726_v43 = vrot.slane %v10707_v21, 2 }
 0xa0c   :  { %10755 = vadd.xlane.f32.xlu1 %v10754_v60  ;;  %10536 = vadd.xlane.f32.xlu0 %v10535_v48  ;;  %v15300_v0 = vpop.eup %15299  ;;  %v10255_v29 = vmul.f32 %v15347_v57, %v15298_v52  ;;  %15309 = vlog2.f32 %v20699_v25  ;;  %v10868_v30 = vsel %vm10625_vm10, %v10861_v13, 0.0  ;;  %vm10605_vm1 = vcmp.eq.s32.totalorder %v20425_v53, %v10596_v42  ;;  %v21424_v13 = vld [vmem:[#allocation45_spill] sm:$0xff]  ;;  %v21426_v42 = vld [vmem:[#allocation119_spill] sm:$0xff] }
 0xa0d   :  { %v15302_v47 = vpop.eup %15301  ;;  %v10515_v4 = vmul.f32 %v15346_v61, %v15300_v0  ;;  %v10871_v11 = vsel %vm10625_vm10, %v10862_v1, 0.0  ;;  %v10842_v50 = vsub.f32 0.0, %v20643_v8  ;;  %v10727_v3 = vsel %vm611_vm7, %v20656_v35, %v10726_v43  ;;  %v21428_v61 = vld [vmem:[#allocation47_spill] sm:$0xff] }
 0xa0e   :  { %v10852_v7 = vmul.f32 0.6931472, %v15302_v47  ;;  %v10262_v14 = vmul.f32 %v10255_v29, %v10157_v19  ;;  %v10843_v55 = vsub.f32 0.0, %v20669_v41  ;;  %vm10606_vm11 = vcmp.eq.s32.totalorder %v20425_v53, %v10599_v15  ;;  %v21425_v47 = vld [vmem:[#allocation28_spill] sm:$0xff] }
 0xa0f   :  { %v10522_v16 = vmul.f32 %v10515_v4, %v10417_v23  ;;  %v11827_v22 = vsel %vm10605_vm1, 1.0, %v21417_v45  ;;  %v9965_v6 = vsel %vm97_vm2, %v20602_v49, 0.0  ;;  %v9980_v58 = vsel %vm97_vm2, %v20608_v27, 0.0  ;;  %v21429_v4 = vld [vmem:[#allocation31_spill] sm:$0xff]  ;;  %v21430_v15 = vld [vmem:[#allocation120_spill] sm:$0xff] }
 0xa10   :  { %10539 = vadd.xlane.f32.xlu1 %v10538_v36  ;;  %10279 = vadd.xlane.f32.xlu0 %v10278_v10  ;;  %v15304_v2 = vpop.eup %15303  ;;  %v10863_v63 = vmul.f32 %v10852_v7, %v10842_v50  ;;  %v10281_v35 = vsel %vm10084_vm13, %v10262_v14, 0.0  ;;  %v10740_v46 = vmul.f32 %v11827_v22, %v10727_v3  ;;  %v11828_v40 = vsel %vm10606_vm11, 1.0, %v21417_v45  ;;  %v21432_v7 = vld [vmem:[#allocation34_spill] sm:$0xff]  ;;  %v21433_v3 = vld [vmem:[#allocation35_spill] sm:$0xff] }
 0xa11   :  { %v10854_v56 = vmul.f32 0.6931472, %v15304_v2  ;;  %v10541_v18 = vsel %vm10084_vm13, %v10522_v16, 0.0  ;;  %v10741_v60 = vmul.f32 %v11828_v40, %v10726_v43  ;;  %v10844_v20 = vsub.f32 0.0, %v20679_v51  ;;  %v21427_v43 = vld [vmem:[#allocation29_spill] sm:$0xff]  ;;  %v1014_v2 = vpop.xlane.xlu1 %1013 }
 0xa12   :  { %v10874_v24 = vsel %vm10625_vm10, %v10863_v63, 0.0  ;;  %v10757_v27 = vsel %vm10625_vm10, %v10740_v46, 0.0  ;;  %v10845_v5 = vsub.f32 0.0, %v20688_v39  ;;  %vm10760_vm7 = vcmask 33792   ;;  %v21434_v46 = vld [vmem:[#allocation48_spill] sm:$0xff]  ;;  %v21435_v40 = vld [vmem:[#allocation49_spill] sm:$0xff] }
 0xa13   :  { %v15306_v62 = vpop.eup %15305  ;;  %v10864_v9 = vmul.f32 %v10854_v56, %v10843_v55  ;;  %v10761_v21 = vsel %vm10760_vm7, %v10741_v60, 0.0  ;;  %vm1018_vm13 = vcmp.eq.f32.partialorder %v21425_v47, %v21424_v13  ;;  %v10846_v36 = vsub.f32 0.0, %v20699_v25 }
 0xa14   :  { %10872 = vadd.xlane.f32.xlu1 %v10871_v11  ;;  %10869 = vadd.xlane.f32.xlu0 %v10868_v30  ;;  %v15308_v41 = vpop.eup %15307  ;;  %v10856_v45 = vmul.f32 0.6931472, %v15306_v62  ;;  %v1017_v10 = vcvt.s32.f32 %v20425_v53  ;;  %vm1019_vm12 = vcmp.eq.f32.partialorder %v21427_v43, %v21426_v42  ;;  %vm1020_vm15 = vcmp.eq.f32.partialorder %v21429_v4, %v21428_v61  ;;  %v21431_v30 = vld [vmem:[#allocation33_spill] sm:$0xff] }
 0xa15   :  { %v9108_v32 = vpop.f32.mrb[124].mxu0  ;;  %v10858_v31 = vmul.f32 0.6931472, %v15308_v41  ;;  %v10877_v28 = vsel %vm10625_vm10, %v10864_v9, 0.0  ;;  %vm1022_vm0 = vcmp.eq.f32.partialorder %v21432_v7, %v19449_v17  ;;  %vm1023_vm4 = vcmp.eq.f32.partialorder %v21433_v3, %v19486_v34 }
 0xa16   :  { %v9966_v8 = vsel %vm97_vm2, %v9108_v32, 0.0  ;;  %v9110_v44 = vpop.f32.mrb[125].mxu0  ;;  %v15310_v37 = vpop.eup %15309  ;;  %v10865_v0 = vmul.f32 %v10856_v45, %v10844_v20  ;;  %v1025_v19 = vsel %vm1018_vm13, %v1017_v10, 50.0  ;;  %v1027_v53 = vsel %vm1020_vm15, %v1017_v10, 50.0 }
 0xa17   :  { %v20729_v26 = vadd.f32 %v9966_v8, %v9965_v6  ;;  %v9981_v49 = vsel %vm97_vm2, %v9110_v44, 0.0  ;;  %v10866_v52 = vmul.f32 %v10858_v31, %v10845_v5  ;;  %v10860_v1 = vmul.f32 0.6931472, %v15310_v37 }
 0xa18   :  { %10542 = vadd.xlane.f32.xlu1 %v10541_v18  ;;  %10282 = vadd.xlane.f32.xlu0 %v10281_v35  ;;  %v20732_v33 = vadd.f32 %v9981_v49, %v9980_v58  ;;  %v10880_v39 = vsel %vm10625_vm10, %v10865_v0, 0.0  ;;  %v1032_v57 = vsel %vm992_vm5, %v1025_v19, inf  ;;  %v1026_v29 = vsel %vm1019_vm12, %v1017_v10, 50.0 }
 0xa19   :  { %v10883_v51 = vsel %vm10625_vm10, %v10866_v52, 0.0  ;;  %v10867_v23 = vmul.f32 %v10860_v1, %v10846_v36  ;;  %vm1021_vm10 = vcmp.eq.f32.partialorder %v21431_v30, %v21430_v15  ;;  %v1038_v11 = vsel %vm992_vm5, %v1027_v53, inf }
 0xa1a   :  { %v20734_v12 = vpop.f32.mrb[128].mxu1  ;;  %v1035_v16 = vsel %vm992_vm5, %v1026_v29, inf  ;;  %v1029_v14 = vsel %vm1022_vm0, %v1017_v10, 50.0  ;;  %v1028_v50 = vsel %vm1021_vm10, %v1017_v10, 50.0  ;;  %vm1024_vm3 = vcmp.eq.f32.partialorder %v21407_v38, %v1014_v2 }
 0xa1b   :  { %v20737_v48 = vpop.f32.mrb[129].mxu1  ;;  %v10886_v25 = vsel %vm10760_vm7, %v10867_v23, 0.0  ;;  %v1044_v55 = vsel %vm992_vm5, %v1029_v14, inf  ;;  %v1041_v22 = vsel %vm992_vm5, %v1028_v50, inf  ;;  %v1031_v6 = vsel %vm1024_vm3, %v1017_v10, 50.0 }
 0xa1c   :  { %10875 = vadd.xlane.f32.xlu1 %v10874_v24  ;;  %10758 = vadd.xlane.f32.xlu0 %v10757_v27  ;;  %v1030_v17 = vsel %vm1023_vm4, %v1017_v10, 50.0  ;;  %v1050_v63 = vsel %vm1011_vm14, %v1031_v6, inf  ;;  %vm1067_vm14 = vcmask 1024  }
 0xa1d   :  { %v1047_v32 = vsel %vm992_vm5, %v1030_v17, inf  ;;  %vm1060_vm5 = vcmask 7168  }
 0xa20   :  { %10878 = vadd.xlane.f32.xlu1 %v10877_v28  ;;  %10762 = vadd.xlane.f32.xlu0 %v10761_v21 }
 0xa24   :  { %10884 = vadd.xlane.f32.xlu1 %v10883_v51  ;;  %10881 = vadd.xlane.f32.xlu0 %v10880_v39 }
 0xa28   :  { %1033 = vmin.xlane.f32.xlu1 %v1032_v57  ;;  %10887 = vadd.xlane.f32.xlu0 %v10886_v25 }
 0xa2c   :  { %1039 = vmin.xlane.f32.xlu1 %v1038_v11  ;;  %1036 = vmin.xlane.f32.xlu0 %v1035_v16 }
 0xa30   :  { %1045 = vmin.xlane.f32.xlu1 %v1044_v55  ;;  %1042 = vmin.xlane.f32.xlu0 %v1041_v22 }
 0xa34   :  { %1048 = vmin.xlane.f32.xlu0 %v1047_v32  ;;  %1051 = vmin.xlane.f32.xlu1 %v1050_v63 }
 0xa3d   :  { %v9200_v56 = vpop.f32.mrb[110].mxu0 }
 0xa3e   :  { %v9202_v62 = vpop.f32.mrb[111].mxu0 }
 0xa41   :  { %v9206_v8 = vpop.f32.mrb[112].mxu0 }
 0xa42   :  { %v9208_v34 = vpop.f32.mrb[113].mxu0  ;;  %v9840_v44 = vpop.f32.mrb[110].mxu1 }
 0xa43   :  { %v14965_v38 = vadd.f32 %v9840_v44, %v9200_v56  ;;  %v9842_v18 = vpop.f32.mrb[111].mxu1 }
 0xa44   :  { %v14966_v35 = vadd.f32 %v9842_v18, %v9202_v62 }
 0xa45   :  { %v9995_v41 = vadd.f32 %v14965_v38, %v21434_v46  ;;  %v9212_v58 = vpop.f32.mrb[114].mxu0 }
 0xa46   :  { %v9996_v49 = vadd.f32 %v14966_v35, %v21435_v40  ;;  %v9214_v24 = vpop.f32.mrb[115].mxu0  ;;  %v9846_v9 = vpop.f32.mrb[112].mxu1  ;;  %v21436_v35 = vld [vmem:[#allocation50_spill] sm:$0xff] }
 0xa47   :  { %v10009_v60 = vmul.f32 0.33, %v9995_v41  ;;  %v14967_v27 = vadd.f32 %v9846_v9, %v9206_v8  ;;  %v9848_v31 = vpop.f32.mrb[113].mxu1 }
 0xa48   :  { %v10010_v45 = vmul.f32 0.33, %v9996_v49  ;;  %v14968_v37 = vadd.f32 %v9848_v31, %v9208_v34  ;;  %v21438_v31 = vld [vmem:[#allocation52_spill] sm:$0xff] }
 0xa49   :  { %v10023_v20 = vmax.f32 %v9995_v41, %v10009_v60  ;;  %v9997_v5 = vadd.f32 %v14967_v27, %v21434_v46  ;;  %v9218_v28 = vpop.f32.mrb[116].mxu0  ;;  %v9970_v41 = vsel %vm97_vm2, %v21436_v35, 0.0 }
 0xa4a   :  { %v10024_v21 = vmax.f32 %v9996_v49, %v10010_v45  ;;  %v9998_v52 = vadd.f32 %v14968_v37, %v21435_v40  ;;  %v9220_v0 = vpop.f32.mrb[117].mxu0 }
 0xa4b   :  { %v9852_v1 = vpop.f32.mrb[114].mxu1  ;;  %11808 = vst [vmem:[%s20977_s24 + $0x70] sm:$0xff] %v10023_v20  ;;  %v10011_v13 = vmul.f32 0.33, %v9997_v5  ;;  %v21439_v20 = vld [vmem:[#allocation53_spill] sm:$0xff] }
 0xa4c   :  { %v14969_v47 = vadd.f32 %v9852_v1, %v9212_v58  ;;  %v9854_v36 = vpop.f32.mrb[115].mxu1  ;;  %11809 = vst [vmem:[%s20977_s24 + $0x78] sm:$0xff] %v10024_v21  ;;  %v10012_v10 = vmul.f32 0.33, %v9998_v52 }
 0xa4d   :  { %v14970_v51 = vadd.f32 %v9854_v36, %v9214_v24  ;;  %v10025_v39 = vmax.f32 %v9997_v5, %v10011_v13  ;;  %v9224_v19 = vpop.f32.mrb[118].mxu0  ;;  %v21437_v24 = vld [vmem:[#allocation51_spill] sm:$0xff]  ;;  %v9987_v5 = vsel %vm97_vm2, %v21439_v20, 0.0  ;;  %v9976_v13 = vsel %vm97_vm2, %v20734_v12, 0.0 }
 0xa4e   :  { %v9999_v23 = vadd.f32 %v14969_v47, %v21434_v46  ;;  %v10026_v42 = vmax.f32 %v9998_v52, %v10012_v10  ;;  %v9226_v61 = vpop.f32.mrb[119].mxu0  ;;  %v9985_v9 = vsel %vm97_vm2, %v21437_v24, 0.0  ;;  %v9974_v52 = vsel %vm97_vm2, %v20636_v59, 0.0 }
 0xa4f   :  { %v10000_v43 = vadd.f32 %v14970_v51, %v21435_v40  ;;  %v9858_v4 = vpop.f32.mrb[116].mxu1  ;;  %11810 = vst [vmem:[%s20977_s24 + $0x80] sm:$0xff] %v10025_v39  ;;  %v9991_v59 = vsel %vm97_vm2, %v20737_v48, 0.0 }
 0xa50   :  { %v10013_v57 = vmul.f32 0.33, %v9999_v23  ;;  %v14971_v25 = vadd.f32 %v9858_v4, %v9218_v28  ;;  %v9860_v53 = vpop.f32.mrb[117].mxu1  ;;  %11811 = vst [vmem:[%s20977_s24 + $0x88] sm:$0xff] %v10026_v42 }
 0xa51   :  { %v10014_v29 = vmul.f32 0.33, %v10000_v43  ;;  %v14972_v15 = vadd.f32 %v9860_v53, %v9220_v0  ;;  %v9230_v2 = vpop.f32.mrb[120].mxu0  ;;  %v9989_v0 = vsel %vm97_vm2, %v20639_v54, 0.0 }
 0xa52   :  { %v10027_v30 = vmax.f32 %v9999_v23, %v10013_v57  ;;  %v10001_v7 = vadd.f32 %v14971_v25, %v21434_v46  ;;  %v9232_v14 = vpop.f32.mrb[121].mxu0 }
 0xa53   :  { %v10028_v11 = vmax.f32 %v10000_v43, %v10014_v29  ;;  %v10002_v16 = vadd.f32 %v14972_v15, %v21435_v40  ;;  %v9864_v3 = vpop.f32.mrb[118].mxu1 }
 0xa54   :  { %11812 = vst [vmem:[%s20977_s24 + $0x90] sm:$0xff] %v10027_v30  ;;  %v10015_v50 = vmul.f32 0.33, %v10001_v7  ;;  %v14973_v22 = vadd.f32 %v9864_v3, %v9224_v19  ;;  %v9866_v6 = vpop.f32.mrb[119].mxu1 }
 0xa55   :  { %11813 = vst [vmem:[%s20977_s24 + $0x98] sm:$0xff] %v10028_v11  ;;  %v10016_v55 = vmul.f32 0.33, %v10002_v16  ;;  %v14974_v32 = vadd.f32 %v9866_v6, %v9226_v61  ;;  %v9236_v63 = vpop.f32.mrb[126].mxu0  ;;  %v20864_v6 = vld [vmem:[%s20974_s21 + $0x10] sm:$0xff] }
 0xa56   :  { %v10029_v17 = vmax.f32 %v10001_v7, %v10015_v50  ;;  %v10003_v62 = vadd.f32 %v14973_v22, %v21434_v46  ;;  %v9968_v8 = vsel %vm97_vm2, %v9236_v63, 0.0  ;;  %v9238_v34 = vpop.f32.mrb[127].mxu0  ;;  %v10265_v50 = vpop.xlane.xlu0 %10264 }
 0xa57   :  { %v10030_v56 = vmax.f32 %v10002_v16, %v10016_v55  ;;  %v10004_v44 = vadd.f32 %v14974_v32, %v21435_v40  ;;  %v9969_v38 = vadd.f32 %v9968_v8, %v20729_v26  ;;  %v9983_v18 = vsel %vm97_vm2, %v9238_v34, 0.0 }
 0xa58   :  { %11814 = vst [vmem:[%s20977_s24 + $0xa0] sm:$0xff] %v10029_v17  ;;  %v10017_v58 = vmul.f32 0.33, %v10003_v62  ;;  %v9984_v49 = vadd.f32 %v9983_v18, %v20732_v33  ;;  %v9972_v26 = vsel %vm97_vm2, %v21438_v31, 0.0  ;;  %v10807_v17 = vsel %vm1060_vm5, %v20864_v6, 0.0  ;;  %v20878_v18 = vld [vmem:[%s20974_s21 + $0x20] sm:$0xff] }
 0xa59   :  { %11815 = vst [vmem:[%s20977_s24 + $0xa8] sm:$0xff] %v10030_v56  ;;  %v10018_v60 = vmul.f32 0.33, %v10004_v44  ;;  %v9971_v27 = vadd.f32 %v9970_v41, %v9969_v38  ;;  %v10811_v35 = vsel %vm1060_vm5, %v20878_v18, 0.0  ;;  %v20885_v41 = vld [vmem:[%s20974_s21 + $0x28] sm:$0xff] }
 0xa5a   :  { %v10031_v45 = vmax.f32 %v10003_v62, %v10017_v58  ;;  %v9986_v37 = vadd.f32 %v9985_v9, %v9984_v49  ;;  %v10268_v32 = vpop.xlane.xlu0 %10267  ;;  %v20871_v62 = vld [vmem:[%s20974_s21 + $0x18] sm:$0xff]  ;;  %v10813_v9 = vsel %vm1060_vm5, %v20885_v41, 0.0 }
 0xa5b   :  { %v10032_v28 = vmax.f32 %v10004_v44, %v10018_v60  ;;  %v9973_v21 = vadd.f32 %v9972_v26, %v9971_v27  ;;  %v10809_v8 = vsel %vm1060_vm5, %v20871_v62, 0.0  ;;  %v20892_v60 = vld [vmem:[%s20974_s21 + $0x30] sm:$0x3] }
 0xa5c   :  { %11816 = vst [vmem:[%s20977_s24 + $0xb0] sm:$0xff] %v10031_v45  ;;  %v9988_v33 = vadd.f32 %v9987_v5, %v9986_v37  ;;  %v10815_v45 = vsel %vm1067_vm14, %v20892_v60, 0.0 }
 0xa5d   :  { %11817 = vst [vmem:[%s20977_s24 + $0xb8] sm:$0xff] %v10032_v28  ;;  %v9975_v1 = vadd.f32 %v9974_v52, %v9973_v21 }
 0xa5e   :  { %v9990_v47 = vadd.f32 %v9989_v0, %v9988_v33  ;;  %v10528_v34 = vpop.xlane.xlu0 %10527  ;;  %v10285_v33 = vsub.f32 1.0, %v10268_v32 }
 0xa5f   :  { %v9977_v36 = vadd.f32 %v9976_v13, %v9975_v1  ;;  %v10284_v1 = vsub.f32 1.0, %v10265_v50 }
 0xa60   :  { %v9992_v51 = vadd.f32 %v9991_v59, %v9990_v47  ;;  %v10545_v59 = vsub.f32 1.0, %v10528_v34 }
 0xa61   :  { %v9870_v10 = vpop.f32.mrb[120].mxu1 }
 0xa62   :  { %v14975_v39 = vadd.f32 %v9870_v10, %v9230_v2  ;;  %v9872_v23 = vpop.f32.mrb[121].mxu1 }
 0xa63   :  { %v14976_v19 = vadd.f32 %v9872_v23, %v9232_v14 }
 0xa64   :  { %v10005_v54 = vadd.f32 %v14975_v39, %v21434_v46  ;;  %v10525_v63 = vpop.xlane.xlu1 %10524  ;;  %v10292_v39 = vmul.f32 %v10285_v33, %v10285_v33 }
 0xa65   :  { %v10006_v42 = vadd.f32 %v14976_v19, %v21435_v40  ;;  %v9876_v43 = vpop.f32.mrb[130].mxu1  ;;  %v10544_v0 = vsub.f32 1.0, %v10525_v63  ;;  %v10291_v19 = vmul.f32 %v10284_v1, %v10284_v1 }
 0xa66   :  { %v10019_v61 = vmul.f32 0.33, %v10005_v54  ;;  %v9978_v4 = vsel %vm97_vm2, %v9876_v43, 0.0  ;;  %v9878_v57 = vpop.f32.mrb[131].mxu1 }
 0xa67   :  { %v10020_v12 = vmul.f32 0.33, %v10006_v42  ;;  %v9979_v25 = vadd.f32 %v9978_v4, %v9977_v36  ;;  %v9993_v53 = vsel %vm97_vm2, %v9878_v57, 0.0  ;;  %v10551_v23 = vmul.f32 %v10544_v0, %v10544_v0 }
 0xa68   :  { %v10033_v48 = vmax.f32 %v10005_v54, %v10019_v61  ;;  %v9994_v29 = vadd.f32 %v9993_v53, %v9992_v51  ;;  %v10552_v4 = vmul.f32 %v10545_v59, %v10545_v59 }
 0xa69   :  { %v10034_v15 = vmax.f32 %v10006_v42, %v10020_v12  ;;  %v10007_v30 = vadd.f32 %v9979_v25, %v21434_v46  ;;  %v20850_v46 = vld [vmem:[%s20974_s21] sm:$0xff] }
 0xa6a   :  { %11818 = vst [vmem:[%s20977_s24 + $0xc0] sm:$0xff] %v10033_v48  ;;  %v10008_v7 = vadd.f32 %v9994_v29, %v21435_v40  ;;  %v20855_v40 = vld [vmem:[%s20974_s21 + $0x8] sm:$0xff]  ;;  %v10804_v3 = vsel %vm1060_vm5, %v20850_v46, 0.0 }
 0xa6b   :  { %11819 = vst [vmem:[%s20977_s24 + $0xc8] sm:$0xff] %v10034_v15  ;;  %v10021_v2 = vmul.f32 0.33, %v10007_v30  ;;  %v10805_v55 = vsel %vm1060_vm5, %v20855_v40, 0.0 }
 0xa6c   :  { %v10022_v11 = vmul.f32 0.33, %v10008_v7  ;;  %v10806_v22 = vadd.f32 %v10805_v55, %v10804_v3 }
 0xa6d   :  { %v10035_v16 = vmax.f32 %v10007_v30, %v10021_v2  ;;  %v10298_v30 = vadd.f32 %v10292_v39, %v10291_v19 }
 0xa6e   :  { %v10036_v14 = vmax.f32 %v10008_v7, %v10022_v11  ;;  %v10808_v56 = vadd.f32 %v10807_v17, %v10806_v22  ;;  %v10558_v7 = vadd.f32 %v10552_v4, %v10551_v23 }
 0xa6f   :  { %11820 = vst [vmem:[%s20977_s24 + $0xd0] sm:$0x3] %v10035_v16 }
 0xa70   :  { %11821 = vst [vmem:[%s20977_s24 + $0xd8] sm:$0x3] %v10036_v14  ;;  %v10810_v38 = vadd.f32 %v10809_v8, %v10808_v56 }
 0xa72   :  { %v10812_v24 = vadd.f32 %v10811_v35, %v10810_v38 }
 0xa74   :  { %v10814_v26 = vadd.f32 %v10813_v9, %v10812_v24 }
 0xa76   :  { %v10816_v5 = vadd.f32 %v10815_v45, %v10814_v26 }
 0xa78   :  { %v10817_v52 = vrot.slane %v10816_v5, 4 }
 0xa7a   :  { %v10818_v36 = vadd.f32 %v10817_v52, %v10816_v5 }
 0xa7c   :  { %v10819_v25 = vrot.slane %v10818_v36, 2 }
 0xa7e   :  { %v10820_v63 = vadd.f32 %v10819_v25, %v10818_v36 }
 0xa85   :  { %v10744_v44 = vpop.xlane.xlu1 %10743 }
 0xa86   :  { %v10764_v57 = vsub.f32 0.0, %v10744_v44 }
 0xa88   :  { %v10778_v22 = vmul.f32 %v20850_v46, %v10764_v57 }
 0xa89   :  { %v10747_v58 = vpop.xlane.xlu0 %10746  ;;  %v10271_v49 = vpop.xlane.xlu1 %10270 }
 0xa8a   :  { %v10286_v10 = vsub.f32 1.0, %v10271_v49  ;;  %v10765_v12 = vsub.f32 0.0, %v10747_v58 }
 0xa8c   :  { %v10293_v53 = vmul.f32 %v10286_v10, %v10286_v10  ;;  %v10779_v17 = vmul.f32 %v20855_v40, %v10765_v12 }
 0xa8d   :  { %v10531_v27 = vpop.xlane.xlu0 %10530  ;;  %v10750_v31 = vpop.xlane.xlu1 %10749 }
 0xa8e   :  { %v10546_v51 = vsub.f32 1.0, %v10531_v27  ;;  %v10766_v2 = vsub.f32 0.0, %v10750_v31  ;;  %v10299_v56 = vadd.f32 %v10298_v30, %v10293_v53  ;;  %v10786_v26 = vsel %vm1060_vm5, %v10779_v17, 0.0 }
 0xa90   :  { %v10553_v48 = vmul.f32 %v10546_v51, %v10546_v51  ;;  %v10780_v38 = vmul.f32 %v20864_v6, %v10766_v2 }
 0xa91   :  { %v10274_v37 = vpop.xlane.xlu0 %10273  ;;  %v10534_v20 = vpop.xlane.xlu1 %10533 }
 0xa92   :  { %v10287_v54 = vsub.f32 1.0, %v10274_v37  ;;  %v10547_v42 = vsub.f32 1.0, %v10534_v20  ;;  %v10559_v8 = vadd.f32 %v10558_v7, %v10553_v48  ;;  %v10785_v37 = vsel %vm1060_vm5, %v10778_v22, 0.0 }
 0xa93   :  { %v10788_v6 = vsel %vm1060_vm5, %v10780_v38, 0.0  ;;  %v10787_v0 = vadd.f32 %v10786_v26, %v10785_v37 }
 0xa94   :  { %v10294_v11 = vmul.f32 %v10287_v54, %v10287_v54  ;;  %v10554_v16 = vmul.f32 %v10547_v42, %v10547_v42 }
 0xa95   :  { %v10753_v28 = vpop.xlane.xlu0 %10752  ;;  %v10277_v21 = vpop.xlane.xlu1 %10276  ;;  %v10789_v39 = vadd.f32 %v10788_v6, %v10787_v0 }
 0xa96   :  { %v10288_v29 = vsub.f32 1.0, %v10277_v21  ;;  %v10767_v32 = vsub.f32 0.0, %v10753_v28  ;;  %v10300_v58 = vadd.f32 %v10299_v56, %v10294_v11  ;;  %v10560_v49 = vadd.f32 %v10559_v8, %v10554_v16 }
 0xa97   :  { %v10821_v28 = vrot.slane %v10820_v63, 1 }
 0xa98   :  { %v10295_v34 = vmul.f32 %v10288_v29, %v10288_v29  ;;  %v10781_v46 = vmul.f32 %v20871_v62, %v10767_v32 }
 0xa99   :  { %v10537_v13 = vpop.xlane.xlu0 %10536  ;;  %v10756_v47 = vpop.xlane.xlu1 %10755 }
 0xa9a   :  { %v10548_v15 = vsub.f32 1.0, %v10537_v13  ;;  %v10768_v35 = vsub.f32 0.0, %v10756_v47  ;;  %v10301_v20 = vadd.f32 %v10300_v58, %v10295_v34  ;;  %v10790_v62 = vsel %vm1060_vm5, %v10781_v46, 0.0 }
 0xa9c   :  { %v10555_v44 = vmul.f32 %v10548_v15, %v10548_v15  ;;  %v10782_v21 = vmul.f32 %v20878_v18, %v10768_v35 }
 0xa9d   :  { %v10280_v43 = vpop.xlane.xlu0 %10279  ;;  %v10540_v61 = vpop.xlane.xlu1 %10539 }
 0xa9e   :  { %v10289_v14 = vsub.f32 1.0, %v10280_v43  ;;  %v10549_v50 = vsub.f32 1.0, %v10540_v61  ;;  %v10561_v5 = vadd.f32 %v10560_v49, %v10555_v44  ;;  %v10792_v54 = vsel %vm1060_vm5, %v10782_v21, 0.0 }
 0xa9f   :  { %v10822_v43 = vadd.f32 %v10821_v28, %v10820_v63  ;;  %v10791_v61 = vadd.f32 %v10790_v62, %v10789_v39 }
 0xaa0   :  { %v10296_v24 = vmul.f32 %v10289_v14, %v10289_v14  ;;  %v10556_v9 = vmul.f32 %v10549_v50, %v10549_v50 }
 0xaa1   :  { %v10870_v3 = vpop.xlane.xlu0 %10869  ;;  %v10873_v55 = vpop.xlane.xlu1 %10872  ;;  %v10793_v15 = vadd.f32 %v10792_v54, %v10791_v61  ;;  %v10823_v2 = vmax.f32 %v10822_v43, 1.0 }
 0xaa2   :  { %v10302_v1 = vadd.f32 %v10301_v20, %v10296_v24  ;;  %v10562_v13 = vadd.f32 %v10561_v5, %v10556_v9  ;;  %v10889_v18 = vadd.f32 %v10873_v55, %v10870_v3 }
 0xaa3   :  { %15311 = vrcp.f32 %v10823_v2 }
 0xaa5   :  { %v10283_v27 = vpop.xlane.xlu0 %10282  ;;  %v10543_v31 = vpop.xlane.xlu1 %10542 }
 0xaa6   :  { %v10290_v40 = vsub.f32 1.0, %v10283_v27  ;;  %v10550_v45 = vsub.f32 1.0, %v10543_v31 }
 0xaa8   :  { %v10297_v52 = vmul.f32 %v10290_v40, %v10290_v40  ;;  %v10557_v33 = vmul.f32 %v10550_v45, %v10550_v45 }
 0xaa9   :  { %v10759_v47 = vpop.xlane.xlu0 %10758  ;;  %v10876_v59 = vpop.xlane.xlu1 %10875 }
 0xaaa   :  { %v10303_v36 = vsel %vm97_vm2, %v10297_v52, 0.0  ;;  %v10563_v10 = vsel %vm97_vm2, %v10557_v33, 0.0  ;;  %v10769_v51 = vsub.f32 0.0, %v10759_v47  ;;  %v10890_v48 = vadd.f32 %v10889_v18, %v10876_v59 }
 0xaab   :  { %v10304_v23 = vadd.f32 %v10303_v36, %v10302_v1  ;;  %v10564_v19 = vadd.f32 %v10563_v10, %v10562_v13 }
 0xaac   :  { %v10783_v42 = vmul.f32 %v20885_v41, %v10769_v51 }
 0xaad   :  { %v10305_v4 = vrot.slane %v10304_v23, 4  ;;  %v10565_v57 = vrot.slane %v10564_v19, 4  ;;  %v10763_v12 = vpop.xlane.xlu0 %10762  ;;  %v10879_v25 = vpop.xlane.xlu1 %10878 }
 0xaae   :  { %v10794_v53 = vsel %vm1060_vm5, %v10783_v42, 0.0  ;;  %v10770_v29 = vsub.f32 0.0, %v10763_v12  ;;  %v10891_v16 = vadd.f32 %v10890_v48, %v10879_v25  ;;  %v15312_v47 = vpop.eup %15311 }
 0xaaf   :  { %v10306_v30 = vadd.f32 %v10305_v4, %v10304_v23  ;;  %v10566_v7 = vadd.f32 %v10565_v57, %v10564_v19  ;;  %v10795_v41 = vadd.f32 %v10794_v53, %v10793_v15 }
 0xab0   :  { %v10784_v11 = vmul.f32 %v20892_v60, %v10770_v29 }
 0xab1   :  { %v10307_v14 = vrot.slane %v10306_v30, 2  ;;  %v10567_v50 = vrot.slane %v10566_v7, 2  ;;  %v10882_v3 = vpop.xlane.xlu0 %10881  ;;  %v10885_v55 = vpop.xlane.xlu1 %10884 }
 0xab2   :  { %v10796_v22 = vsel %vm1067_vm14, %v10784_v11, 0.0  ;;  %v10892_v17 = vadd.f32 %v10891_v16, %v10882_v3 }
 0xab3   :  { %v10308_v32 = vadd.f32 %v10307_v14, %v10306_v30  ;;  %v10568_v63 = vadd.f32 %v10567_v50, %v10566_v7  ;;  %v10797_v56 = vadd.f32 %v10796_v22, %v10795_v41 }
 0xab4   :  { %v10893_v8 = vadd.f32 %v10892_v17, %v10885_v55 }
 0xab5   :  { %v10798_v34 = vrot.slane %v10797_v56, 4  ;;  %v10888_v44 = vpop.xlane.xlu0 %10887  ;;  %v1034_v38 = vpop.xlane.xlu1 %1033  ;;  %v10309_v58 = vrot.slane %v10308_v32, 1  ;;  %v10569_v49 = vrot.slane %v10568_v63, 1 }
 0xab6   :  { %v10894_v35 = vsel %vm97_vm2, %v10888_v44, 0.0  ;;  %v15133_v60 = vtrunc.f32 %v1034_v38  ;;  %vm10906_vm2 = vcmask 0  }
 0xab7   :  { %v10799_v24 = vadd.f32 %v10798_v34, %v10797_v56  ;;  %v10895_v9 = vadd.f32 %v10894_v35, %v10893_v8  ;;  %v10310_v20 = vadd.f32 %v10309_v58, %v10308_v32  ;;  %v10570_v5 = vadd.f32 %v10569_v49, %v10568_v63 }
 0xab8   :  { %v15134_v27 = vcvt.f32.s32 %v15133_v60 }
 0xab9   :  { %v10800_v31 = vrot.slane %v10799_v24, 2  ;;  %v10896_v26 = vrot.slane %v10895_v9, 4  ;;  %v1037_v46 = vpop.xlane.xlu0 %1036  ;;  %v1040_v40 = vpop.xlane.xlu1 %1039  ;;  %v10312_v10 = vmul.f32 0.02, %v10310_v20  ;;  %v10571_v51 = vmul.f32 0.02, %v10570_v5 }
 0xaba   :  { %1061 = vst.msk [vmem:[%s20978_s25] sm:$0xff] %vm1060_vm5, %v15134_v27  ;;  %v15135_v45 = vtrunc.f32 %v1037_v46  ;;  %v15137_v37 = vtrunc.f32 %v1040_v40 }
 0xabb   :  { %v10801_v28 = vadd.f32 %v10800_v31, %v10799_v24  ;;  %v10897_v6 = vadd.f32 %v10896_v26, %v10895_v9  ;;  %v10903_v12 = vadd.f32 %v10571_v51, %v10312_v10 }
 0xabc   :  { %v15136_v21 = vcvt.f32.s32 %v15135_v45  ;;  %v15138_v52 = vcvt.f32.s32 %v15137_v37 }
 0xabd   :  { %v10802_v33 = vrot.slane %v10801_v28, 1  ;;  %v10898_v0 = vrot.slane %v10897_v6, 2  ;;  %v1043_v1 = vpop.xlane.xlu0 %1042  ;;  %v1046_v13 = vpop.xlane.xlu1 %1045 }
 0xabe   :  { %1062 = vst.msk [vmem:[%s20978_s25 + $0x8] sm:$0xff] %vm1060_vm5, %v15136_v21  ;;  %1063 = vst.msk [vmem:[%s20978_s25 + $0x10] sm:$0xff] %vm1060_vm5, %v15138_v52  ;;  %v15139_v59 = vtrunc.f32 %v1043_v1  ;;  %v15141_v62 = vtrunc.f32 %v1046_v13 }
 0xabf   :  { %v10899_v36 = vadd.f32 %v10898_v0, %v10897_v6  ;;  %v10803_v39 = vadd.f32 %v10802_v33, %v10801_v28 }
 0xac0   :  { %v15140_v23 = vcvt.f32.s32 %v15139_v59  ;;  %v15142_v19 = vcvt.f32.s32 %v15141_v62 }
 0xac1   :  { %v10900_v54 = vrot.slane %v10899_v36, 1  ;;  %v1049_v18 = vpop.xlane.xlu0 %1048  ;;  %v1052_v42 = vpop.xlane.xlu1 %1051  ;;  %v10825_v43 = vmul.f32 %v15312_v47, %v10803_v39 }
 0xac2   :  { %1064 = vst.msk [vmem:[%s20978_s25 + $0x18] sm:$0xff] %vm1060_vm5, %v15140_v23  ;;  %1065 = vst.msk [vmem:[%s20978_s25 + $0x20] sm:$0xff] %vm1060_vm5, %v15142_v19  ;;  %v15143_v61 = vtrunc.f32 %v1049_v18  ;;  %v15145_v4 = vtrunc.f32 %v1052_v42 }
 0xac3   :  { %v10901_v57 = vadd.f32 %v10900_v54, %v10899_v36  ;;  %v10904_v29 = vadd.f32 %v10903_v12, %v10825_v43 }
 0xac4   :  { %v15144_v25 = vcvt.f32.s32 %v15143_v61  ;;  %v15146_v53 = vcvt.f32.s32 %v15145_v4 }
 0xac5   :  { %v10902_v48 = vmul.f32 0.02, %v10901_v57 }
 0xac6   :  { %1066 = vst.msk [vmem:[%s20978_s25 + $0x28] sm:$0xff] %vm1060_vm5, %v15144_v25 }
 0xac7   :  { %1068 = vst.msk [vmem:[%s20978_s25 + $0x30] sm:$0x3] %vm1067_vm14, %v15146_v53  ;;  %v10905_v15 = vadd.f32 %v10904_v29, %v10902_v48 }
 0xac9   :  { %10907 = vst.msk [vmem:[#allocation2] sm:$0x1] %vm10906_vm2, %v10905_v15 }
 0xaca   :  { %15359 = shalt.err (!%p15356_p4)
}
 0xacb   :  { %s15360_s10 = scalar_lea.hbm %s20975_s22, 16 }
 0xacc   :  { %p15361_p5 = scmp.ne.s32.totalorder %s20975_s22, %s15360_s10  ;;  %p15364_p6 = scmp.lt.u32.totalorder %s15360_s10, %s20975_s22 }
 0xace   :  { %p15366_p7 = pnand %p15364_p6, %p15361_p5 }
 0xad0   :  { %15369 = shalt.err (!%p15366_p7)
}
 0xad1   :  { %10917 = dma.vmem_to_hbm [thread:$0]  %s10915_s20, 16, %s20975_s22, [#allocation3]  }
 0xad2   :  { %15370 = dma.done.wait [#allocation3], 16  }
 0xad3   :  { %15371 = vsyncadd [#allocation3], 4294967280 }
 0xad4   :  { %10933 = vsyncpa [#allocation3], 1 }

</bundles_post_ra>
